<compile_context>
chip_gen: v6e
topology: v6e:2x2x1
jax: 0.10.0
libtpu: 0.0.40
codegen_flags: <defaults>
</compile_context>

<pallas_src>
import functools

import jax
import jax.numpy as jnp
from jax import lax
from jax.experimental import pallas as pl
from jax.experimental.pallas import tpu as pltpu


def _s3conv1_kernel(wsp_ref, wdp_ref, mask_ref, *refs,
                    block_d, C_in, C_out, H, W, K, p, neg_slope):
    """Computes block_d output depth slices for one batch element.

    wsp_ref : (C_out, K*K*C_in) f32  spatial-conv weights, tap-major / channel-minor
    wdp_ref : (C_out, K*C_in)   f32  depth-conv weights,  kd-major  / channel-minor
    mask_ref: (K, H*W)          f32  per-kw column-validity masks (W zero padding)
    refs    : block_d + 2p input refs, each (C_in, L) with L = H*W + 2*p*(W+1),
              followed by the output ref (block_d, C_out, H*W).
    """
    x_refs = refs[:-1]
    o_ref = refs[-1]
    HW = H * W
    n_slices = block_d + 2 * p
    interior = p * (W + 1)                      # offset of the un-shifted (0,0) window

    w_sp = wsp_ref[...]                         # (C_out, K*K*C_in)
    w_dp = wdp_ref[...]                         # (C_out, K*C_in)
    masks = mask_ref[...]                       # (K, HW)

    # Hoist all loads: every streamed depth slice is read from VMEM once and reused
    # across all output depths / taps below (no per-C_out re-reads).
    x_vals = [x_refs[j][...].astype(jnp.float32) for j in range(n_slices)]   # (C_in, L)
    x_int = [v[:, interior:interior + HW] for v in x_vals]                   # (C_in, HW)

    for od in range(block_d):                   # small static loop (<= 4)
        xc = x_vals[od + p]                     # centre depth slice (guard-padded flat)

        # ---- spatial (1,K,K) branch: one MXU matmul per tap, f32 accumulate ----
        y_sp = jnp.zeros((C_out, HW), jnp.float32)
        for kh in range(K):
            for kw in range(K):
                t = kh * K + kw
                tap = xc[:, kh * W + kw: kh * W + kw + HW]        # (C_in, HW) lane slice
                if kw != p:                                       # zero cols that crossed a row edge
                    tap = tap * masks[kw:kw + 1, :]
                y_sp = y_sp + jnp.dot(
                    w_sp[:, t * C_in:(t + 1) * C_in], tap,
                    precision=lax.Precision.HIGHEST,
                    preferred_element_type=jnp.float32)
        # LeakyReLU (negative_slope=0.01, PyTorch default) on the spatial branch only.
        y = jnp.where(y_sp > 0, y_sp, neg_slope * y_sp)

        # ---- depth (K,1,1) branch: one MXU matmul per depth neighbour ----
        for kd in range(K):
            y = y + jnp.dot(
                w_dp[:, kd * C_in:(kd + 1) * C_in], x_int[od + kd],
                precision=lax.Precision.HIGHEST,
                preferred_element_type=jnp.float32)

        o_ref[od] = y.astype(o_ref.dtype)       # lane-dense (C_out, HW) store


def s3conv1(x, w_sp, w_dp, *, p=1, neg_slope=0.01, block_d=None):
    """x: (N, C_in, D, H, W) float32 (PyTorch NCDHW).
       w_sp: (C_out, C_in, K, K)  -- Conv3d weight for kernel (1, K, K), squeezed
       w_dp: (C_out, C_in, K)     -- Conv3d weight for kernel (K, 1, 1), squeezed
    """
    N, C_in, D, H, W = x.shape
    C_out, _, K, _ = w_sp.shape
    # TODO(synk): general stride / k != 2p+1 variants of the module are not implemented.
    assert K == 2 * p + 1, "stride-1 'same' separable conv assumed (k = 2p+1, s = 1)"
    if block_d is None:
        # Block several output depth slices per grid step to amortise per-step overhead.
        block_d = next(bd for bd in (4, 2, 1) if D % bd == 0)
    assert D % block_d == 0
    HW = H * W
    n_slices = block_d + 2 * p
    guard = p * (W + 1)                         # H zero-pad rows + slice guard, flattened
    L = HW + 2 * guard

    # Single padded copy of the input (glue): channel-major per depth slice, spatial
    # dims flattened, depth padded by p and the flat axis padded by `guard` zeros.
    x_flat = jnp.transpose(x, (0, 2, 1, 3, 4)).reshape(N, D, C_in, HW)
    x_op = jnp.pad(x_flat, ((0, 0), (p, p), (0, 0), (guard, guard)))   # (N, D+2p, C_in, L)

    # Dense 2-D weight matrices for the MXU; column order = tap-major, channel-minor,
    # matching the per-tap weight slices used in the kernel.
    w_sp_mat = jnp.transpose(w_sp, (0, 2, 3, 1)).reshape(C_out, K * K * C_in).astype(jnp.float32)
    w_dp_mat = jnp.transpose(w_dp, (0, 2, 1)).reshape(C_out, K * C_in).astype(jnp.float32)

    # Column-validity masks for the W zero padding (taps with kw != p wrap a row edge).
    col = jnp.arange(HW, dtype=jnp.int32) % W
    masks = jnp.stack(
        [((col + (kw - p) >= 0) & (col + (kw - p) < W)).astype(jnp.float32)
         for kw in range(K)], axis=0)                                   # (K, HW)

    kernel = functools.partial(
        _s3conv1_kernel, block_d=block_d, C_in=C_in, C_out=C_out,
        H=H, W=W, K=K, p=p, neg_slope=neg_slope)

    # Stream exactly the block_d + 2p depth slices each grid step needs.
    x_specs = [
        pl.BlockSpec((None, None, C_in, L),
                     lambda n, d, j=j: (n, d * block_d + j, 0, 0))
        for j in range(n_slices)
    ]

    out = pl.pallas_call(
        kernel,
        out_shape=jax.ShapeDtypeStruct((N, D, C_out, HW), x.dtype),
        grid=(N, D // block_d),
        in_specs=[
            pl.BlockSpec((C_out, K * K * C_in), lambda n, d: (0, 0)),   # weights stay resident in VMEM
            pl.BlockSpec((C_out, K * C_in), lambda n, d: (0, 0)),
            pl.BlockSpec((K, HW), lambda n, d: (0, 0)),
            *x_specs,
        ],
        out_specs=pl.BlockSpec((None, block_d, C_out, HW), lambda n, d: (n, d, 0, 0)),
        compiler_params=pltpu.CompilerParams(
            # Both axes are independent -> shard across v7x's two TensorCores.
            dimension_semantics=("parallel", "parallel"),
            # Tiny blocks at these sizes; re-derive against 64 MiB when scaling H*W / C on v7x.
            vmem_limit_bytes=32 * 1024 * 1024),
    )(w_sp_mat, w_dp_mat, masks, *([x_op] * n_slices))

    # (N, D, C_out, H*W) -> PyTorch NCDHW
    return jnp.transpose(out.reshape(N, D, C_out, H, W), (0, 2, 1, 3, 4))


def s3conv1_reference(x, w_sp, w_dp, *, p=1, neg_slope=0.01):
    """Pure-JAX reference using lax 3D convs (mirrors the PyTorch module)."""
    C_out, C_in, K, _ = w_sp.shape
    dn = lax.conv_dimension_numbers(x.shape, (C_out, C_in, 1, K, K),
                                    ('NCDHW', 'OIDHW', 'NCDHW'))
    y_sp = lax.conv_general_dilated(
        x, w_sp.reshape(C_out, C_in, 1, K, K), window_strides=(1, 1, 1),
        padding=((0, 0), (p, p), (p, p)), dimension_numbers=dn)
    y_dp = lax.conv_general_dilated(
        x, w_dp.reshape(C_out, C_in, K, 1, 1), window_strides=(1, 1, 1),
        padding=((p, p), (0, 0), (0, 0)), dimension_numbers=dn)
    x1 = jnp.where(y_sp > 0, y_sp, neg_slope * y_sp)   # LeakyReLU(0.01)
    return x1 + y_dp


if __name__ == "__main__":
    N, C_in, C_out, D, H, W, K, P = 2, 4, 4, 8, 16, 16, 3, 1

    key = jax.random.PRNGKey(0)
    kx, kw1, kw2 = jax.random.split(key, 3)
    x = jax.random.normal(kx, (N, C_in, D, H, W), dtype=jnp.float32)
    # Deterministic synthetic weights (module uses bias=False).
    w_sp = 0.1 * jax.random.normal(kw1, (C_out, C_in, K, K), dtype=jnp.float32)
    w_dp = 0.1 * jax.random.normal(kw2, (C_out, C_in, K), dtype=jnp.float32)

    out = jax.block_until_ready(s3conv1(x, w_sp, w_dp, p=P))
    ref = jax.block_until_ready(s3conv1_reference(x, w_sp, w_dp, p=P))

    assert out.shape == (N, C_out, D, H, W), out.shape
    max_err = float(jnp.max(jnp.abs(out - ref)))
    assert jnp.allclose(out, ref, atol=1e-4, rtol=1e-4), max_err
    print("KERNEL_OK")
</pallas_src>

<mosaic_0001>
module attributes {stable_mosaic.version = 11 : i64} {
  func.func @_s3conv1_kernel(%arg0: i32, %arg1: i32, %arg2: memref<4x36xf32, #tpu.memory_space<vmem>>, %arg3: memref<4x12xf32, #tpu.memory_space<vmem>>, %arg4: memref<3x256xf32, #tpu.memory_space<vmem>>, %arg5: memref<1x1x4x290xf32, #tpu.memory_space<vmem>>, %arg6: memref<1x1x4x290xf32, #tpu.memory_space<vmem>>, %arg7: memref<1x1x4x290xf32, #tpu.memory_space<vmem>>, %arg8: memref<1x1x4x290xf32, #tpu.memory_space<vmem>>, %arg9: memref<1x1x4x290xf32, #tpu.memory_space<vmem>>, %arg10: memref<1x1x4x290xf32, #tpu.memory_space<vmem>>, %arg11: memref<1x4x4x256xf32, #tpu.memory_space<vmem>>) attributes {dimension_semantics = [#tpu.dimension_semantics<parallel>, #tpu.dimension_semantics<parallel>], iteration_bounds = array<i64: 2, 2>, scalar_prefetch = 0 : i64, scratch_operands = 0 : i64, tpu.core_type = #tpu.core_type<tc>, window_params = [{pipeline_mode = #tpu.pipeline_mode<synchronous>, transform_indices = @transform_0, window_bounds = array<i64: 4, 36>}, {pipeline_mode = #tpu.pipeline_mode<synchronous>, transform_indices = @transform_1, window_bounds = array<i64: 4, 12>}, {pipeline_mode = #tpu.pipeline_mode<synchronous>, transform_indices = @transform_2, window_bounds = array<i64: 3, 256>}, {transform_indices = @transform_3, window_bounds = array<i64: 1, 1, 4, 290>}, {transform_indices = @transform_4, window_bounds = array<i64: 1, 1, 4, 290>}, {transform_indices = @transform_5, window_bounds = array<i64: 1, 1, 4, 290>}, {transform_indices = @transform_6, window_bounds = array<i64: 1, 1, 4, 290>}, {transform_indices = @transform_7, window_bounds = array<i64: 1, 1, 4, 290>}, {transform_indices = @transform_8, window_bounds = array<i64: 1, 1, 4, 290>}, {transform_indices = @transform_9, window_bounds = array<i64: 1, 4, 4, 256>}]} {
    %c0 = arith.constant 0 : index
    %c0_0 = arith.constant 0 : index
    %0 = vector.load %arg2[%c0, %c0_0] : memref<4x36xf32, #tpu.memory_space<vmem>>, vector<4x36xf32>
    %c0_1 = arith.constant 0 : index
    %c0_2 = arith.constant 0 : index
    %1 = vector.load %arg3[%c0_1, %c0_2] : memref<4x12xf32, #tpu.memory_space<vmem>>, vector<4x12xf32>
    %c0_3 = arith.constant 0 : index
    %c0_4 = arith.constant 0 : index
    %2 = vector.load %arg4[%c0_3, %c0_4] : memref<3x256xf32, #tpu.memory_space<vmem>>, vector<3x256xf32>
    %c0_5 = arith.constant 0 : index
    %c0_6 = arith.constant 0 : index
    %c0_7 = arith.constant 0 : index
    %c0_8 = arith.constant 0 : index
    %3 = vector.load %arg5[%c0_5, %c0_6, %c0_7, %c0_8] : memref<1x1x4x290xf32, #tpu.memory_space<vmem>>, vector<1x1x4x290xf32>
    %4 = vector.shape_cast %3 : vector<1x1x4x290xf32> to vector<4x290xf32>
    %c0_9 = arith.constant 0 : index
    %c0_10 = arith.constant 0 : index
    %c0_11 = arith.constant 0 : index
    %c0_12 = arith.constant 0 : index
    %5 = vector.load %arg6[%c0_9, %c0_10, %c0_11, %c0_12] : memref<1x1x4x290xf32, #tpu.memory_space<vmem>>, vector<1x1x4x290xf32>
    %6 = vector.shape_cast %5 : vector<1x1x4x290xf32> to vector<4x290xf32>
    %c0_13 = arith.constant 0 : index
    %c0_14 = arith.constant 0 : index
    %c0_15 = arith.constant 0 : index
    %c0_16 = arith.constant 0 : index
    %7 = vector.load %arg7[%c0_13, %c0_14, %c0_15, %c0_16] : memref<1x1x4x290xf32, #tpu.memory_space<vmem>>, vector<1x1x4x290xf32>
    %8 = vector.shape_cast %7 : vector<1x1x4x290xf32> to vector<4x290xf32>
    %c0_17 = arith.constant 0 : index
    %c0_18 = arith.constant 0 : index
    %c0_19 = arith.constant 0 : index
    %c0_20 = arith.constant 0 : index
    %9 = vector.load %arg8[%c0_17, %c0_18, %c0_19, %c0_20] : memref<1x1x4x290xf32, #tpu.memory_space<vmem>>, vector<1x1x4x290xf32>
    %10 = vector.shape_cast %9 : vector<1x1x4x290xf32> to vector<4x290xf32>
    %c0_21 = arith.constant 0 : index
    %c0_22 = arith.constant 0 : index
    %c0_23 = arith.constant 0 : index
    %c0_24 = arith.constant 0 : index
    %11 = vector.load %arg9[%c0_21, %c0_22, %c0_23, %c0_24] : memref<1x1x4x290xf32, #tpu.memory_space<vmem>>, vector<1x1x4x290xf32>
    %12 = vector.shape_cast %11 : vector<1x1x4x290xf32> to vector<4x290xf32>
    %c0_25 = arith.constant 0 : index
    %c0_26 = arith.constant 0 : index
    %c0_27 = arith.constant 0 : index
    %c0_28 = arith.constant 0 : index
    %13 = vector.load %arg10[%c0_25, %c0_26, %c0_27, %c0_28] : memref<1x1x4x290xf32, #tpu.memory_space<vmem>>, vector<1x1x4x290xf32>
    %14 = vector.shape_cast %13 : vector<1x1x4x290xf32> to vector<4x290xf32>
    %15 = vector.extract_strided_slice %4 {offsets = [0, 17], sizes = [4, 256], strides = [1, 1]} : vector<4x290xf32> to vector<4x256xf32>
    %16 = vector.extract_strided_slice %6 {offsets = [0, 17], sizes = [4, 256], strides = [1, 1]} : vector<4x290xf32> to vector<4x256xf32>
    %17 = vector.extract_strided_slice %8 {offsets = [0, 17], sizes = [4, 256], strides = [1, 1]} : vector<4x290xf32> to vector<4x256xf32>
    %18 = vector.extract_strided_slice %10 {offsets = [0, 17], sizes = [4, 256], strides = [1, 1]} : vector<4x290xf32> to vector<4x256xf32>
    %19 = vector.extract_strided_slice %12 {offsets = [0, 17], sizes = [4, 256], strides = [1, 1]} : vector<4x290xf32> to vector<4x256xf32>
    %20 = vector.extract_strided_slice %14 {offsets = [0, 17], sizes = [4, 256], strides = [1, 1]} : vector<4x290xf32> to vector<4x256xf32>
    %cst = arith.constant 0.000000e+00 : f32
    %21 = vector.broadcast %cst : f32 to vector<4x256xf32>
    %22 = vector.extract_strided_slice %6 {offsets = [0, 0], sizes = [4, 256], strides = [1, 1]} : vector<4x290xf32> to vector<4x256xf32>
    %23 = vector.extract_strided_slice %2 {offsets = [0, 0], sizes = [1, 256], strides = [1, 1]} : vector<3x256xf32> to vector<1x256xf32>
    %24 = vector.broadcast %23 : vector<1x256xf32> to vector<4x256xf32>
    %25 = arith.mulf %22, %24 : vector<4x256xf32>
    %26 = vector.extract_strided_slice %0 {offsets = [0, 0], sizes = [4, 4], strides = [1, 1]} : vector<4x36xf32> to vector<4x4xf32>
    %cst_29 = arith.constant dense<0.000000e+00> : vector<4x256xf32>
    %27 = tpu.matmul %26, %25, %cst_29 {dimension_numbers = #tpu.dot_dimension_numbers<[1], [0], [0], [1], [0, 0, 1, 1], [], []>, precision = #tpu.contract_precision<fp32>} : vector<4x4xf32>, vector<4x256xf32>, vector<4x256xf32> -> vector<4x256xf32>
    %28 = arith.addf %21, %27 : vector<4x256xf32>
    %29 = vector.extract_strided_slice %6 {offsets = [0, 1], sizes = [4, 256], strides = [1, 1]} : vector<4x290xf32> to vector<4x256xf32>
    %30 = vector.extract_strided_slice %0 {offsets = [0, 4], sizes = [4, 4], strides = [1, 1]} : vector<4x36xf32> to vector<4x4xf32>
    %cst_30 = arith.constant dense<0.000000e+00> : vector<4x256xf32>
    %31 = tpu.matmul %30, %29, %cst_30 {dimension_numbers = #tpu.dot_dimension_numbers<[1], [0], [0], [1], [0, 0, 1, 1], [], []>, precision = #tpu.contract_precision<fp32>} : vector<4x4xf32>, vector<4x256xf32>, vector<4x256xf32> -> vector<4x256xf32>
    %32 = arith.addf %28, %31 : vector<4x256xf32>
    %33 = vector.extract_strided_slice %6 {offsets = [0, 2], sizes = [4, 256], strides = [1, 1]} : vector<4x290xf32> to vector<4x256xf32>
    %34 = vector.extract_strided_slice %2 {offsets = [2, 0], sizes = [1, 256], strides = [1, 1]} : vector<3x256xf32> to vector<1x256xf32>
    %35 = vector.broadcast %34 : vector<1x256xf32> to vector<4x256xf32>
    %36 = arith.mulf %33, %35 : vector<4x256xf32>
    %37 = vector.extract_strided_slice %0 {offsets = [0, 8], sizes = [4, 4], strides = [1, 1]} : vector<4x36xf32> to vector<4x4xf32>
    %cst_31 = arith.constant dense<0.000000e+00> : vector<4x256xf32>
    %38 = tpu.matmul %37, %36, %cst_31 {dimension_numbers = #tpu.dot_dimension_numbers<[1], [0], [0], [1], [0, 0, 1, 1], [], []>, precision = #tpu.contract_precision<fp32>} : vector<4x4xf32>, vector<4x256xf32>, vector<4x256xf32> -> vector<4x256xf32>
    %39 = arith.addf %32, %38 : vector<4x256xf32>
    %40 = vector.extract_strided_slice %6 {offsets = [0, 16], sizes = [4, 256], strides = [1, 1]} : vector<4x290xf32> to vector<4x256xf32>
    %41 = vector.extract_strided_slice %2 {offsets = [0, 0], sizes = [1, 256], strides = [1, 1]} : vector<3x256xf32> to vector<1x256xf32>
    %42 = vector.broadcast %41 : vector<1x256xf32> to vector<4x256xf32>
    %43 = arith.mulf %40, %42 : vector<4x256xf32>
    %44 = vector.extract_strided_slice %0 {offsets = [0, 12], sizes = [4, 4], strides = [1, 1]} : vector<4x36xf32> to vector<4x4xf32>
    %cst_32 = arith.constant dense<0.000000e+00> : vector<4x256xf32>
    %45 = tpu.matmul %44, %43, %cst_32 {dimension_numbers = #tpu.dot_dimension_numbers<[1], [0], [0], [1], [0, 0, 1, 1], [], []>, precision = #tpu.contract_precision<fp32>} : vector<4x4xf32>, vector<4x256xf32>, vector<4x256xf32> -> vector<4x256xf32>
    %46 = arith.addf %39, %45 : vector<4x256xf32>
    %47 = vector.extract_strided_slice %6 {offsets = [0, 17], sizes = [4, 256], strides = [1, 1]} : vector<4x290xf32> to vector<4x256xf32>
    %48 = vector.extract_strided_slice %0 {offsets = [0, 16], sizes = [4, 4], strides = [1, 1]} : vector<4x36xf32> to vector<4x4xf32>
    %cst_33 = arith.constant dense<0.000000e+00> : vector<4x256xf32>
    %49 = tpu.matmul %48, %47, %cst_33 {dimension_numbers = #tpu.dot_dimension_numbers<[1], [0], [0], [1], [0, 0, 1, 1], [], []>, precision = #tpu.contract_precision<fp32>} : vector<4x4xf32>, vector<4x256xf32>, vector<4x256xf32> -> vector<4x256xf32>
    %50 = arith.addf %46, %49 : vector<4x256xf32>
    %51 = vector.extract_strided_slice %6 {offsets = [0, 18], sizes = [4, 256], strides = [1, 1]} : vector<4x290xf32> to vector<4x256xf32>
    %52 = vector.extract_strided_slice %2 {offsets = [2, 0], sizes = [1, 256], strides = [1, 1]} : vector<3x256xf32> to vector<1x256xf32>
    %53 = vector.broadcast %52 : vector<1x256xf32> to vector<4x256xf32>
    %54 = arith.mulf %51, %53 : vector<4x256xf32>
    %55 = vector.extract_strided_slice %0 {offsets = [0, 20], sizes = [4, 4], strides = [1, 1]} : vector<4x36xf32> to vector<4x4xf32>
    %cst_34 = arith.constant dense<0.000000e+00> : vector<4x256xf32>
    %56 = tpu.matmul %55, %54, %cst_34 {dimension_numbers = #tpu.dot_dimension_numbers<[1], [0], [0], [1], [0, 0, 1, 1], [], []>, precision = #tpu.contract_precision<fp32>} : vector<4x4xf32>, vector<4x256xf32>, vector<4x256xf32> -> vector<4x256xf32>
    %57 = arith.addf %50, %56 : vector<4x256xf32>
    %58 = vector.extract_strided_slice %6 {offsets = [0, 32], sizes = [4, 256], strides = [1, 1]} : vector<4x290xf32> to vector<4x256xf32>
    %59 = vector.extract_strided_slice %2 {offsets = [0, 0], sizes = [1, 256], strides = [1, 1]} : vector<3x256xf32> to vector<1x256xf32>
    %60 = vector.broadcast %59 : vector<1x256xf32> to vector<4x256xf32>
    %61 = arith.mulf %58, %60 : vector<4x256xf32>
    %62 = vector.extract_strided_slice %0 {offsets = [0, 24], sizes = [4, 4], strides = [1, 1]} : vector<4x36xf32> to vector<4x4xf32>
    %cst_35 = arith.constant dense<0.000000e+00> : vector<4x256xf32>
    %63 = tpu.matmul %62, %61, %cst_35 {dimension_numbers = #tpu.dot_dimension_numbers<[1], [0], [0], [1], [0, 0, 1, 1], [], []>, precision = #tpu.contract_precision<fp32>} : vector<4x4xf32>, vector<4x256xf32>, vector<4x256xf32> -> vector<4x256xf32>
    %64 = arith.addf %57, %63 : vector<4x256xf32>
    %65 = vector.extract_strided_slice %6 {offsets = [0, 33], sizes = [4, 256], strides = [1, 1]} : vector<4x290xf32> to vector<4x256xf32>
    %66 = vector.extract_strided_slice %0 {offsets = [0, 28], sizes = [4, 4], strides = [1, 1]} : vector<4x36xf32> to vector<4x4xf32>
    %cst_36 = arith.constant dense<0.000000e+00> : vector<4x256xf32>
    %67 = tpu.matmul %66, %65, %cst_36 {dimension_numbers = #tpu.dot_dimension_numbers<[1], [0], [0], [1], [0, 0, 1, 1], [], []>, precision = #tpu.contract_precision<fp32>} : vector<4x4xf32>, vector<4x256xf32>, vector<4x256xf32> -> vector<4x256xf32>
    %68 = arith.addf %64, %67 : vector<4x256xf32>
    %69 = vector.extract_strided_slice %6 {offsets = [0, 34], sizes = [4, 256], strides = [1, 1]} : vector<4x290xf32> to vector<4x256xf32>
    %70 = vector.extract_strided_slice %2 {offsets = [2, 0], sizes = [1, 256], strides = [1, 1]} : vector<3x256xf32> to vector<1x256xf32>
    %71 = vector.broadcast %70 : vector<1x256xf32> to vector<4x256xf32>
    %72 = arith.mulf %69, %71 : vector<4x256xf32>
    %73 = vector.extract_strided_slice %0 {offsets = [0, 32], sizes = [4, 4], strides = [1, 1]} : vector<4x36xf32> to vector<4x4xf32>
    %cst_37 = arith.constant dense<0.000000e+00> : vector<4x256xf32>
    %74 = tpu.matmul %73, %72, %cst_37 {dimension_numbers = #tpu.dot_dimension_numbers<[1], [0], [0], [1], [0, 0, 1, 1], [], []>, precision = #tpu.contract_precision<fp32>} : vector<4x4xf32>, vector<4x256xf32>, vector<4x256xf32> -> vector<4x256xf32>
    %75 = arith.addf %68, %74 : vector<4x256xf32>
    %cst_38 = arith.constant 0.000000e+00 : f32
    %76 = vector.broadcast %cst_38 : f32 to vector<4x256xf32>
    %77 = arith.cmpf ogt, %75, %76 : vector<4x256xf32>
    %cst_39 = arith.constant 0.00999999977 : f32
    %78 = vector.broadcast %cst_39 : f32 to vector<4x256xf32>
    %79 = arith.mulf %78, %75 : vector<4x256xf32>
    %80 = arith.select %77, %75, %79 : vector<4x256xi1>, vector<4x256xf32>
    %81 = vector.extract_strided_slice %1 {offsets = [0, 0], sizes = [4, 4], strides = [1, 1]} : vector<4x12xf32> to vector<4x4xf32>
    %cst_40 = arith.constant dense<0.000000e+00> : vector<4x256xf32>
    %82 = tpu.matmul %81, %15, %cst_40 {dimension_numbers = #tpu.dot_dimension_numbers<[1], [0], [0], [1], [0, 0, 1, 1], [], []>, precision = #tpu.contract_precision<fp32>} : vector<4x4xf32>, vector<4x256xf32>, vector<4x256xf32> -> vector<4x256xf32>
    %83 = arith.addf %80, %82 : vector<4x256xf32>
    %84 = vector.extract_strided_slice %1 {offsets = [0, 4], sizes = [4, 4], strides = [1, 1]} : vector<4x12xf32> to vector<4x4xf32>
    %cst_41 = arith.constant dense<0.000000e+00> : vector<4x256xf32>
    %85 = tpu.matmul %84, %16, %cst_41 {dimension_numbers = #tpu.dot_dimension_numbers<[1], [0], [0], [1], [0, 0, 1, 1], [], []>, precision = #tpu.contract_precision<fp32>} : vector<4x4xf32>, vector<4x256xf32>, vector<4x256xf32> -> vector<4x256xf32>
    %86 = arith.addf %83, %85 : vector<4x256xf32>
    %87 = vector.extract_strided_slice %1 {offsets = [0, 8], sizes = [4, 4], strides = [1, 1]} : vector<4x12xf32> to vector<4x4xf32>
    %cst_42 = arith.constant dense<0.000000e+00> : vector<4x256xf32>
    %88 = tpu.matmul %87, %17, %cst_42 {dimension_numbers = #tpu.dot_dimension_numbers<[1], [0], [0], [1], [0, 0, 1, 1], [], []>, precision = #tpu.contract_precision<fp32>} : vector<4x4xf32>, vector<4x256xf32>, vector<4x256xf32> -> vector<4x256xf32>
    %89 = arith.addf %86, %88 : vector<4x256xf32>
    %c0_43 = arith.constant 0 : index
    %c0_44 = arith.constant 0 : index
    %c0_45 = arith.constant 0 : index
    %c0_46 = arith.constant 0 : index
    %90 = vector.load %arg11[%c0_43, %c0_44, %c0_45, %c0_46] : memref<1x4x4x256xf32, #tpu.memory_space<vmem>>, vector<1x1x4x256xf32>
    %91 = vector.shape_cast %90 : vector<1x1x4x256xf32> to vector<4x256xf32>
    %92 = vector.shape_cast %89 : vector<4x256xf32> to vector<1x1x4x256xf32>
    tpu.vector_store %arg11[%c0_43, %c0_44, %c0_45, %c0_46], %92 {strides = array<i32>} : memref<1x4x4x256xf32, #tpu.memory_space<vmem>>, vector<1x1x4x256xf32>,
    %cst_47 = arith.constant 0.000000e+00 : f32
    %93 = vector.broadcast %cst_47 : f32 to vector<4x256xf32>
    %94 = vector.extract_strided_slice %8 {offsets = [0, 0], sizes = [4, 256], strides = [1, 1]} : vector<4x290xf32> to vector<4x256xf32>
    %95 = vector.extract_strided_slice %2 {offsets = [0, 0], sizes = [1, 256], strides = [1, 1]} : vector<3x256xf32> to vector<1x256xf32>
    %96 = vector.broadcast %95 : vector<1x256xf32> to vector<4x256xf32>
    %97 = arith.mulf %94, %96 : vector<4x256xf32>
    %98 = vector.extract_strided_slice %0 {offsets = [0, 0], sizes = [4, 4], strides = [1, 1]} : vector<4x36xf32> to vector<4x4xf32>
    %cst_48 = arith.constant dense<0.000000e+00> : vector<4x256xf32>
    %99 = tpu.matmul %98, %97, %cst_48 {dimension_numbers = #tpu.dot_dimension_numbers<[1], [0], [0], [1], [0, 0, 1, 1], [], []>, precision = #tpu.contract_precision<fp32>} : vector<4x4xf32>, vector<4x256xf32>, vector<4x256xf32> -> vector<4x256xf32>
    %100 = arith.addf %93, %99 : vector<4x256xf32>
    %101 = vector.extract_strided_slice %8 {offsets = [0, 1], sizes = [4, 256], strides = [1, 1]} : vector<4x290xf32> to vector<4x256xf32>
    %102 = vector.extract_strided_slice %0 {offsets = [0, 4], sizes = [4, 4], strides = [1, 1]} : vector<4x36xf32> to vector<4x4xf32>
    %cst_49 = arith.constant dense<0.000000e+00> : vector<4x256xf32>
    %103 = tpu.matmul %102, %101, %cst_49 {dimension_numbers = #tpu.dot_dimension_numbers<[1], [0], [0], [1], [0, 0, 1, 1], [], []>, precision = #tpu.contract_precision<fp32>} : vector<4x4xf32>, vector<4x256xf32>, vector<4x256xf32> -> vector<4x256xf32>
    %104 = arith.addf %100, %103 : vector<4x256xf32>
    %105 = vector.extract_strided_slice %8 {offsets = [0, 2], sizes = [4, 256], strides = [1, 1]} : vector<4x290xf32> to vector<4x256xf32>
    %106 = vector.extract_strided_slice %2 {offsets = [2, 0], sizes = [1, 256], strides = [1, 1]} : vector<3x256xf32> to vector<1x256xf32>
    %107 = vector.broadcast %106 : vector<1x256xf32> to vector<4x256xf32>
    %108 = arith.mulf %105, %107 : vector<4x256xf32>
    %109 = vector.extract_strided_slice %0 {offsets = [0, 8], sizes = [4, 4], strides = [1, 1]} : vector<4x36xf32> to vector<4x4xf32>
    %cst_50 = arith.constant dense<0.000000e+00> : vector<4x256xf32>
    %110 = tpu.matmul %109, %108, %cst_50 {dimension_numbers = #tpu.dot_dimension_numbers<[1], [0], [0], [1], [0, 0, 1, 1], [], []>, precision = #tpu.contract_precision<fp32>} : vector<4x4xf32>, vector<4x256xf32>, vector<4x256xf32> -> vector<4x256xf32>
    %111 = arith.addf %104, %110 : vector<4x256xf32>
    %112 = vector.extract_strided_slice %8 {offsets = [0, 16], sizes = [4, 256], strides = [1, 1]} : vector<4x290xf32> to vector<4x256xf32>
    %113 = vector.extract_strided_slice %2 {offsets = [0, 0], sizes = [1, 256], strides = [1, 1]} : vector<3x256xf32> to vector<1x256xf32>
    %114 = vector.broadcast %113 : vector<1x256xf32> to vector<4x256xf32>
    %115 = arith.mulf %112, %114 : vector<4x256xf32>
    %116 = vector.extract_strided_slice %0 {offsets = [0, 12], sizes = [4, 4], strides = [1, 1]} : vector<4x36xf32> to vector<4x4xf32>
    %cst_51 = arith.constant dense<0.000000e+00> : vector<4x256xf32>
    %117 = tpu.matmul %116, %115, %cst_51 {dimension_numbers = #tpu.dot_dimension_numbers<[1], [0], [0], [1], [0, 0, 1, 1], [], []>, precision = #tpu.contract_precision<fp32>} : vector<4x4xf32>, vector<4x256xf32>, vector<4x256xf32> -> vector<4x256xf32>
    %118 = arith.addf %111, %117 : vector<4x256xf32>
    %119 = vector.extract_strided_slice %8 {offsets = [0, 17], sizes = [4, 256], strides = [1, 1]} : vector<4x290xf32> to vector<4x256xf32>
    %120 = vector.extract_strided_slice %0 {offsets = [0, 16], sizes = [4, 4], strides = [1, 1]} : vector<4x36xf32> to vector<4x4xf32>
    %cst_52 = arith.constant dense<0.000000e+00> : vector<4x256xf32>
    %121 = tpu.matmul %120, %119, %cst_52 {dimension_numbers = #tpu.dot_dimension_numbers<[1], [0], [0], [1], [0, 0, 1, 1], [], []>, precision = #tpu.contract_precision<fp32>} : vector<4x4xf32>, vector<4x256xf32>, vector<4x256xf32> -> vector<4x256xf32>
    %122 = arith.addf %118, %121 : vector<4x256xf32>
    %123 = vector.extract_strided_slice %8 {offsets = [0, 18], sizes = [4, 256], strides = [1, 1]} : vector<4x290xf32> to vector<4x256xf32>
    %124 = vector.extract_strided_slice %2 {offsets = [2, 0], sizes = [1, 256], strides = [1, 1]} : vector<3x256xf32> to vector<1x256xf32>
    %125 = vector.broadcast %124 : vector<1x256xf32> to vector<4x256xf32>
    %126 = arith.mulf %123, %125 : vector<4x256xf32>
    %127 = vector.extract_strided_slice %0 {offsets = [0, 20], sizes = [4, 4], strides = [1, 1]} : vector<4x36xf32> to vector<4x4xf32>
    %cst_53 = arith.constant dense<0.000000e+00> : vector<4x256xf32>
    %128 = tpu.matmul %127, %126, %cst_53 {dimension_numbers = #tpu.dot_dimension_numbers<[1], [0], [0], [1], [0, 0, 1, 1], [], []>, precision = #tpu.contract_precision<fp32>} : vector<4x4xf32>, vector<4x256xf32>, vector<4x256xf32> -> vector<4x256xf32>
    %129 = arith.addf %122, %128 : vector<4x256xf32>
    %130 = vector.extract_strided_slice %8 {offsets = [0, 32], sizes = [4, 256], strides = [1, 1]} : vector<4x290xf32> to vector<4x256xf32>
    %131 = vector.extract_strided_slice %2 {offsets = [0, 0], sizes = [1, 256], strides = [1, 1]} : vector<3x256xf32> to vector<1x256xf32>
    %132 = vector.broadcast %131 : vector<1x256xf32> to vector<4x256xf32>
    %133 = arith.mulf %130, %132 : vector<4x256xf32>
    %134 = vector.extract_strided_slice %0 {offsets = [0, 24], sizes = [4, 4], strides = [1, 1]} : vector<4x36xf32> to vector<4x4xf32>
    %cst_54 = arith.constant dense<0.000000e+00> : vector<4x256xf32>
    %135 = tpu.matmul %134, %133, %cst_54 {dimension_numbers = #tpu.dot_dimension_numbers<[1], [0], [0], [1], [0, 0, 1, 1], [], []>, precision = #tpu.contract_precision<fp32>} : vector<4x4xf32>, vector<4x256xf32>, vector<4x256xf32> -> vector<4x256xf32>
    %136 = arith.addf %129, %135 : vector<4x256xf32>
    %137 = vector.extract_strided_slice %8 {offsets = [0, 33], sizes = [4, 256], strides = [1, 1]} : vector<4x290xf32> to vector<4x256xf32>
    %138 = vector.extract_strided_slice %0 {offsets = [0, 28], sizes = [4, 4], strides = [1, 1]} : vector<4x36xf32> to vector<4x4xf32>
    %cst_55 = arith.constant dense<0.000000e+00> : vector<4x256xf32>
    %139 = tpu.matmul %138, %137, %cst_55 {dimension_numbers = #tpu.dot_dimension_numbers<[1], [0], [0], [1], [0, 0, 1, 1], [], []>, precision = #tpu.contract_precision<fp32>} : vector<4x4xf32>, vector<4x256xf32>, vector<4x256xf32> -> vector<4x256xf32>
    %140 = arith.addf %136, %139 : vector<4x256xf32>
    %141 = vector.extract_strided_slice %8 {offsets = [0, 34], sizes = [4, 256], strides = [1, 1]} : vector<4x290xf32> to vector<4x256xf32>
    %142 = vector.extract_strided_slice %2 {offsets = [2, 0], sizes = [1, 256], strides = [1, 1]} : vector<3x256xf32> to vector<1x256xf32>
    %143 = vector.broadcast %142 : vector<1x256xf32> to vector<4x256xf32>
    %144 = arith.mulf %141, %143 : vector<4x256xf32>
    %145 = vector.extract_strided_slice %0 {offsets = [0, 32], sizes = [4, 4], strides = [1, 1]} : vector<4x36xf32> to vector<4x4xf32>
    %cst_56 = arith.constant dense<0.000000e+00> : vector<4x256xf32>
    %146 = tpu.matmul %145, %144, %cst_56 {dimension_numbers = #tpu.dot_dimension_numbers<[1], [0], [0], [1], [0, 0, 1, 1], [], []>, precision = #tpu.contract_precision<fp32>} : vector<4x4xf32>, vector<4x256xf32>, vector<4x256xf32> -> vector<4x256xf32>
    %147 = arith.addf %140, %146 : vector<4x256xf32>
    %cst_57 = arith.constant 0.000000e+00 : f32
    %148 = vector.broadcast %cst_57 : f32 to vector<4x256xf32>
    %149 = arith.cmpf ogt, %147, %148 : vector<4x256xf32>
    %cst_58 = arith.constant 0.00999999977 : f32
    %150 = vector.broadcast %cst_58 : f32 to vector<4x256xf32>
    %151 = arith.mulf %150, %147 : vector<4x256xf32>
    %152 = arith.select %149, %147, %151 : vector<4x256xi1>, vector<4x256xf32>
    %153 = vector.extract_strided_slice %1 {offsets = [0, 0], sizes = [4, 4], strides = [1, 1]} : vector<4x12xf32> to vector<4x4xf32>
    %cst_59 = arith.constant dense<0.000000e+00> : vector<4x256xf32>
    %154 = tpu.matmul %153, %16, %cst_59 {dimension_numbers = #tpu.dot_dimension_numbers<[1], [0], [0], [1], [0, 0, 1, 1], [], []>, precision = #tpu.contract_precision<fp32>} : vector<4x4xf32>, vector<4x256xf32>, vector<4x256xf32> -> vector<4x256xf32>
    %155 = arith.addf %152, %154 : vector<4x256xf32>
    %156 = vector.extract_strided_slice %1 {offsets = [0, 4], sizes = [4, 4], strides = [1, 1]} : vector<4x12xf32> to vector<4x4xf32>
    %cst_60 = arith.constant dense<0.000000e+00> : vector<4x256xf32>
    %157 = tpu.matmul %156, %17, %cst_60 {dimension_numbers = #tpu.dot_dimension_numbers<[1], [0], [0], [1], [0, 0, 1, 1], [], []>, precision = #tpu.contract_precision<fp32>} : vector<4x4xf32>, vector<4x256xf32>, vector<4x256xf32> -> vector<4x256xf32>
    %158 = arith.addf %155, %157 : vector<4x256xf32>
    %159 = vector.extract_strided_slice %1 {offsets = [0, 8], sizes = [4, 4], strides = [1, 1]} : vector<4x12xf32> to vector<4x4xf32>
    %cst_61 = arith.constant dense<0.000000e+00> : vector<4x256xf32>
    %160 = tpu.matmul %159, %18, %cst_61 {dimension_numbers = #tpu.dot_dimension_numbers<[1], [0], [0], [1], [0, 0, 1, 1], [], []>, precision = #tpu.contract_precision<fp32>} : vector<4x4xf32>, vector<4x256xf32>, vector<4x256xf32> -> vector<4x256xf32>
    %161 = arith.addf %158, %160 : vector<4x256xf32>
    %c0_62 = arith.constant 0 : index
    %c1 = arith.constant 1 : index
    %c0_63 = arith.constant 0 : index
    %c0_64 = arith.constant 0 : index
    %162 = vector.load %arg11[%c0_62, %c1, %c0_63, %c0_64] : memref<1x4x4x256xf32, #tpu.memory_space<vmem>>, vector<1x1x4x256xf32>
    %163 = vector.shape_cast %162 : vector<1x1x4x256xf32> to vector<4x256xf32>
    %164 = vector.shape_cast %161 : vector<4x256xf32> to vector<1x1x4x256xf32>
    tpu.vector_store %arg11[%c0_62, %c1, %c0_63, %c0_64], %164 {strides = array<i32>} : memref<1x4x4x256xf32, #tpu.memory_space<vmem>>, vector<1x1x4x256xf32>,
    %cst_65 = arith.constant 0.000000e+00 : f32
    %165 = vector.broadcast %cst_65 : f32 to vector<4x256xf32>
    %166 = vector.extract_strided_slice %10 {offsets = [0, 0], sizes = [4, 256], strides = [1, 1]} : vector<4x290xf32> to vector<4x256xf32>
    %167 = vector.extract_strided_slice %2 {offsets = [0, 0], sizes = [1, 256], strides = [1, 1]} : vector<3x256xf32> to vector<1x256xf32>
    %168 = vector.broadcast %167 : vector<1x256xf32> to vector<4x256xf32>
    %169 = arith.mulf %166, %168 : vector<4x256xf32>
    %170 = vector.extract_strided_slice %0 {offsets = [0, 0], sizes = [4, 4], strides = [1, 1]} : vector<4x36xf32> to vector<4x4xf32>
    %cst_66 = arith.constant dense<0.000000e+00> : vector<4x256xf32>
    %171 = tpu.matmul %170, %169, %cst_66 {dimension_numbers = #tpu.dot_dimension_numbers<[1], [0], [0], [1], [0, 0, 1, 1], [], []>, precision = #tpu.contract_precision<fp32>} : vector<4x4xf32>, vector<4x256xf32>, vector<4x256xf32> -> vector<4x256xf32>
    %172 = arith.addf %165, %171 : vector<4x256xf32>
    %173 = vector.extract_strided_slice %10 {offsets = [0, 1], sizes = [4, 256], strides = [1, 1]} : vector<4x290xf32> to vector<4x256xf32>
    %174 = vector.extract_strided_slice %0 {offsets = [0, 4], sizes = [4, 4], strides = [1, 1]} : vector<4x36xf32> to vector<4x4xf32>
    %cst_67 = arith.constant dense<0.000000e+00> : vector<4x256xf32>
    %175 = tpu.matmul %174, %173, %cst_67 {dimension_numbers = #tpu.dot_dimension_numbers<[1], [0], [0], [1], [0, 0, 1, 1], [], []>, precision = #tpu.contract_precision<fp32>} : vector<4x4xf32>, vector<4x256xf32>, vector<4x256xf32> -> vector<4x256xf32>
    %176 = arith.addf %172, %175 : vector<4x256xf32>
    %177 = vector.extract_strided_slice %10 {offsets = [0, 2], sizes = [4, 256], strides = [1, 1]} : vector<4x290xf32> to vector<4x256xf32>
    %178 = vector.extract_strided_slice %2 {offsets = [2, 0], sizes = [1, 256], strides = [1, 1]} : vector<3x256xf32> to vector<1x256xf32>
    %179 = vector.broadcast %178 : vector<1x256xf32> to vector<4x256xf32>
    %180 = arith.mulf %177, %179 : vector<4x256xf32>
    %181 = vector.extract_strided_slice %0 {offsets = [0, 8], sizes = [4, 4], strides = [1, 1]} : vector<4x36xf32> to vector<4x4xf32>
    %cst_68 = arith.constant dense<0.000000e+00> : vector<4x256xf32>
    %182 = tpu.matmul %181, %180, %cst_68 {dimension_numbers = #tpu.dot_dimension_numbers<[1], [0], [0], [1], [0, 0, 1, 1], [], []>, precision = #tpu.contract_precision<fp32>} : vector<4x4xf32>, vector<4x256xf32>, vector<4x256xf32> -> vector<4x256xf32>
    %183 = arith.addf %176, %182 : vector<4x256xf32>
    %184 = vector.extract_strided_slice %10 {offsets = [0, 16], sizes = [4, 256], strides = [1, 1]} : vector<4x290xf32> to vector<4x256xf32>
    %185 = vector.extract_strided_slice %2 {offsets = [0, 0], sizes = [1, 256], strides = [1, 1]} : vector<3x256xf32> to vector<1x256xf32>
    %186 = vector.broadcast %185 : vector<1x256xf32> to vector<4x256xf32>
    %187 = arith.mulf %184, %186 : vector<4x256xf32>
    %188 = vector.extract_strided_slice %0 {offsets = [0, 12], sizes = [4, 4], strides = [1, 1]} : vector<4x36xf32> to vector<4x4xf32>
    %cst_69 = arith.constant dense<0.000000e+00> : vector<4x256xf32>
    %189 = tpu.matmul %188, %187, %cst_69 {dimension_numbers = #tpu.dot_dimension_numbers<[1], [0], [0], [1], [0, 0, 1, 1], [], []>, precision = #tpu.contract_precision<fp32>} : vector<4x4xf32>, vector<4x256xf32>, vector<4x256xf32> -> vector<4x256xf32>
    %190 = arith.addf %183, %189 : vector<4x256xf32>
    %191 = vector.extract_strided_slice %10 {offsets = [0, 17], sizes = [4, 256], strides = [1, 1]} : vector<4x290xf32> to vector<4x256xf32>
    %192 = vector.extract_strided_slice %0 {offsets = [0, 16], sizes = [4, 4], strides = [1, 1]} : vector<4x36xf32> to vector<4x4xf32>
    %cst_70 = arith.constant dense<0.000000e+00> : vector<4x256xf32>
    %193 = tpu.matmul %192, %191, %cst_70 {dimension_numbers = #tpu.dot_dimension_numbers<[1], [0], [0], [1], [0, 0, 1, 1], [], []>, precision = #tpu.contract_precision<fp32>} : vector<4x4xf32>, vector<4x256xf32>, vector<4x256xf32> -> vector<4x256xf32>
    %194 = arith.addf %190, %193 : vector<4x256xf32>
    %195 = vector.extract_strided_slice %10 {offsets = [0, 18], sizes = [4, 256], strides = [1, 1]} : vector<4x290xf32> to vector<4x256xf32>
    %196 = vector.extract_strided_slice %2 {offsets = [2, 0], sizes = [1, 256], strides = [1, 1]} : vector<3x256xf32> to vector<1x256xf32>
    %197 = vector.broadcast %196 : vector<1x256xf32> to vector<4x256xf32>
    %198 = arith.mulf %195, %197 : vector<4x256xf32>
    %199 = vector.extract_strided_slice %0 {offsets = [0, 20], sizes = [4, 4], strides = [1, 1]} : vector<4x36xf32> to vector<4x4xf32>
    %cst_71 = arith.constant dense<0.000000e+00> : vector<4x256xf32>
    %200 = tpu.matmul %199, %198, %cst_71 {dimension_numbers = #tpu.dot_dimension_numbers<[1], [0], [0], [1], [0, 0, 1, 1], [], []>, precision = #tpu.contract_precision<fp32>} : vector<4x4xf32>, vector<4x256xf32>, vector<4x256xf32> -> vector<4x256xf32>
    %201 = arith.addf %194, %200 : vector<4x256xf32>
    %202 = vector.extract_strided_slice %10 {offsets = [0, 32], sizes = [4, 256], strides = [1, 1]} : vector<4x290xf32> to vector<4x256xf32>
    %203 = vector.extract_strided_slice %2 {offsets = [0, 0], sizes = [1, 256], strides = [1, 1]} : vector<3x256xf32> to vector<1x256xf32>
    %204 = vector.broadcast %203 : vector<1x256xf32> to vector<4x256xf32>
    %205 = arith.mulf %202, %204 : vector<4x256xf32>
    %206 = vector.extract_strided_slice %0 {offsets = [0, 24], sizes = [4, 4], strides = [1, 1]} : vector<4x36xf32> to vector<4x4xf32>
    %cst_72 = arith.constant dense<0.000000e+00> : vector<4x256xf32>
    %207 = tpu.matmul %206, %205, %cst_72 {dimension_numbers = #tpu.dot_dimension_numbers<[1], [0], [0], [1], [0, 0, 1, 1], [], []>, precision = #tpu.contract_precision<fp32>} : vector<4x4xf32>, vector<4x256xf32>, vector<4x256xf32> -> vector<4x256xf32>
    %208 = arith.addf %201, %207 : vector<4x256xf32>
    %209 = vector.extract_strided_slice %10 {offsets = [0, 33], sizes = [4, 256], strides = [1, 1]} : vector<4x290xf32> to vector<4x256xf32>
    %210 = vector.extract_strided_slice %0 {offsets = [0, 28], sizes = [4, 4], strides = [1, 1]} : vector<4x36xf32> to vector<4x4xf32>
    %cst_73 = arith.constant dense<0.000000e+00> : vector<4x256xf32>
    %211 = tpu.matmul %210, %209, %cst_73 {dimension_numbers = #tpu.dot_dimension_numbers<[1], [0], [0], [1], [0, 0, 1, 1], [], []>, precision = #tpu.contract_precision<fp32>} : vector<4x4xf32>, vector<4x256xf32>, vector<4x256xf32> -> vector<4x256xf32>
    %212 = arith.addf %208, %211 : vector<4x256xf32>
    %213 = vector.extract_strided_slice %10 {offsets = [0, 34], sizes = [4, 256], strides = [1, 1]} : vector<4x290xf32> to vector<4x256xf32>
    %214 = vector.extract_strided_slice %2 {offsets = [2, 0], sizes = [1, 256], strides = [1, 1]} : vector<3x256xf32> to vector<1x256xf32>
    %215 = vector.broadcast %214 : vector<1x256xf32> to vector<4x256xf32>
    %216 = arith.mulf %213, %215 : vector<4x256xf32>
    %217 = vector.extract_strided_slice %0 {offsets = [0, 32], sizes = [4, 4], strides = [1, 1]} : vector<4x36xf32> to vector<4x4xf32>
    %cst_74 = arith.constant dense<0.000000e+00> : vector<4x256xf32>
    %218 = tpu.matmul %217, %216, %cst_74 {dimension_numbers = #tpu.dot_dimension_numbers<[1], [0], [0], [1], [0, 0, 1, 1], [], []>, precision = #tpu.contract_precision<fp32>} : vector<4x4xf32>, vector<4x256xf32>, vector<4x256xf32> -> vector<4x256xf32>
    %219 = arith.addf %212, %218 : vector<4x256xf32>
    %cst_75 = arith.constant 0.000000e+00 : f32
    %220 = vector.broadcast %cst_75 : f32 to vector<4x256xf32>
    %221 = arith.cmpf ogt, %219, %220 : vector<4x256xf32>
    %cst_76 = arith.constant 0.00999999977 : f32
    %222 = vector.broadcast %cst_76 : f32 to vector<4x256xf32>
    %223 = arith.mulf %222, %219 : vector<4x256xf32>
    %224 = arith.select %221, %219, %223 : vector<4x256xi1>, vector<4x256xf32>
    %225 = vector.extract_strided_slice %1 {offsets = [0, 0], sizes = [4, 4], strides = [1, 1]} : vector<4x12xf32> to vector<4x4xf32>
    %cst_77 = arith.constant dense<0.000000e+00> : vector<4x256xf32>
    %226 = tpu.matmul %225, %17, %cst_77 {dimension_numbers = #tpu.dot_dimension_numbers<[1], [0], [0], [1], [0, 0, 1, 1], [], []>, precision = #tpu.contract_precision<fp32>} : vector<4x4xf32>, vector<4x256xf32>, vector<4x256xf32> -> vector<4x256xf32>
    %227 = arith.addf %224, %226 : vector<4x256xf32>
    %228 = vector.extract_strided_slice %1 {offsets = [0, 4], sizes = [4, 4], strides = [1, 1]} : vector<4x12xf32> to vector<4x4xf32>
    %cst_78 = arith.constant dense<0.000000e+00> : vector<4x256xf32>
    %229 = tpu.matmul %228, %18, %cst_78 {dimension_numbers = #tpu.dot_dimension_numbers<[1], [0], [0], [1], [0, 0, 1, 1], [], []>, precision = #tpu.contract_precision<fp32>} : vector<4x4xf32>, vector<4x256xf32>, vector<4x256xf32> -> vector<4x256xf32>
    %230 = arith.addf %227, %229 : vector<4x256xf32>
    %231 = vector.extract_strided_slice %1 {offsets = [0, 8], sizes = [4, 4], strides = [1, 1]} : vector<4x12xf32> to vector<4x4xf32>
    %cst_79 = arith.constant dense<0.000000e+00> : vector<4x256xf32>
    %232 = tpu.matmul %231, %19, %cst_79 {dimension_numbers = #tpu.dot_dimension_numbers<[1], [0], [0], [1], [0, 0, 1, 1], [], []>, precision = #tpu.contract_precision<fp32>} : vector<4x4xf32>, vector<4x256xf32>, vector<4x256xf32> -> vector<4x256xf32>
    %233 = arith.addf %230, %232 : vector<4x256xf32>
    %c0_80 = arith.constant 0 : index
    %c2 = arith.constant 2 : index
    %c0_81 = arith.constant 0 : index
    %c0_82 = arith.constant 0 : index
    %234 = vector.load %arg11[%c0_80, %c2, %c0_81, %c0_82] : memref<1x4x4x256xf32, #tpu.memory_space<vmem>>, vector<1x1x4x256xf32>
    %235 = vector.shape_cast %234 : vector<1x1x4x256xf32> to vector<4x256xf32>
    %236 = vector.shape_cast %233 : vector<4x256xf32> to vector<1x1x4x256xf32>
    tpu.vector_store %arg11[%c0_80, %c2, %c0_81, %c0_82], %236 {strides = array<i32>} : memref<1x4x4x256xf32, #tpu.memory_space<vmem>>, vector<1x1x4x256xf32>,
    %cst_83 = arith.constant 0.000000e+00 : f32
    %237 = vector.broadcast %cst_83 : f32 to vector<4x256xf32>
    %238 = vector.extract_strided_slice %12 {offsets = [0, 0], sizes = [4, 256], strides = [1, 1]} : vector<4x290xf32> to vector<4x256xf32>
    %239 = vector.extract_strided_slice %2 {offsets = [0, 0], sizes = [1, 256], strides = [1, 1]} : vector<3x256xf32> to vector<1x256xf32>
    %240 = vector.broadcast %239 : vector<1x256xf32> to vector<4x256xf32>
    %241 = arith.mulf %238, %240 : vector<4x256xf32>
    %242 = vector.extract_strided_slice %0 {offsets = [0, 0], sizes = [4, 4], strides = [1, 1]} : vector<4x36xf32> to vector<4x4xf32>
    %cst_84 = arith.constant dense<0.000000e+00> : vector<4x256xf32>
    %243 = tpu.matmul %242, %241, %cst_84 {dimension_numbers = #tpu.dot_dimension_numbers<[1], [0], [0], [1], [0, 0, 1, 1], [], []>, precision = #tpu.contract_precision<fp32>} : vector<4x4xf32>, vector<4x256xf32>, vector<4x256xf32> -> vector<4x256xf32>
    %244 = arith.addf %237, %243 : vector<4x256xf32>
    %245 = vector.extract_strided_slice %12 {offsets = [0, 1], sizes = [4, 256], strides = [1, 1]} : vector<4x290xf32> to vector<4x256xf32>
    %246 = vector.extract_strided_slice %0 {offsets = [0, 4], sizes = [4, 4], strides = [1, 1]} : vector<4x36xf32> to vector<4x4xf32>
    %cst_85 = arith.constant dense<0.000000e+00> : vector<4x256xf32>
    %247 = tpu.matmul %246, %245, %cst_85 {dimension_numbers = #tpu.dot_dimension_numbers<[1], [0], [0], [1], [0, 0, 1, 1], [], []>, precision = #tpu.contract_precision<fp32>} : vector<4x4xf32>, vector<4x256xf32>, vector<4x256xf32> -> vector<4x256xf32>
    %248 = arith.addf %244, %247 : vector<4x256xf32>
    %249 = vector.extract_strided_slice %12 {offsets = [0, 2], sizes = [4, 256], strides = [1, 1]} : vector<4x290xf32> to vector<4x256xf32>
    %250 = vector.extract_strided_slice %2 {offsets = [2, 0], sizes = [1, 256], strides = [1, 1]} : vector<3x256xf32> to vector<1x256xf32>
    %251 = vector.broadcast %250 : vector<1x256xf32> to vector<4x256xf32>
    %252 = arith.mulf %249, %251 : vector<4x256xf32>
    %253 = vector.extract_strided_slice %0 {offsets = [0, 8], sizes = [4, 4], strides = [1, 1]} : vector<4x36xf32> to vector<4x4xf32>
    %cst_86 = arith.constant dense<0.000000e+00> : vector<4x256xf32>
    %254 = tpu.matmul %253, %252, %cst_86 {dimension_numbers = #tpu.dot_dimension_numbers<[1], [0], [0], [1], [0, 0, 1, 1], [], []>, precision = #tpu.contract_precision<fp32>} : vector<4x4xf32>, vector<4x256xf32>, vector<4x256xf32> -> vector<4x256xf32>
    %255 = arith.addf %248, %254 : vector<4x256xf32>
    %256 = vector.extract_strided_slice %12 {offsets = [0, 16], sizes = [4, 256], strides = [1, 1]} : vector<4x290xf32> to vector<4x256xf32>
    %257 = vector.extract_strided_slice %2 {offsets = [0, 0], sizes = [1, 256], strides = [1, 1]} : vector<3x256xf32> to vector<1x256xf32>
    %258 = vector.broadcast %257 : vector<1x256xf32> to vector<4x256xf32>
    %259 = arith.mulf %256, %258 : vector<4x256xf32>
    %260 = vector.extract_strided_slice %0 {offsets = [0, 12], sizes = [4, 4], strides = [1, 1]} : vector<4x36xf32> to vector<4x4xf32>
    %cst_87 = arith.constant dense<0.000000e+00> : vector<4x256xf32>
    %261 = tpu.matmul %260, %259, %cst_87 {dimension_numbers = #tpu.dot_dimension_numbers<[1], [0], [0], [1], [0, 0, 1, 1], [], []>, precision = #tpu.contract_precision<fp32>} : vector<4x4xf32>, vector<4x256xf32>, vector<4x256xf32> -> vector<4x256xf32>
    %262 = arith.addf %255, %261 : vector<4x256xf32>
    %263 = vector.extract_strided_slice %12 {offsets = [0, 17], sizes = [4, 256], strides = [1, 1]} : vector<4x290xf32> to vector<4x256xf32>
    %264 = vector.extract_strided_slice %0 {offsets = [0, 16], sizes = [4, 4], strides = [1, 1]} : vector<4x36xf32> to vector<4x4xf32>
    %cst_88 = arith.constant dense<0.000000e+00> : vector<4x256xf32>
    %265 = tpu.matmul %264, %263, %cst_88 {dimension_numbers = #tpu.dot_dimension_numbers<[1], [0], [0], [1], [0, 0, 1, 1], [], []>, precision = #tpu.contract_precision<fp32>} : vector<4x4xf32>, vector<4x256xf32>, vector<4x256xf32> -> vector<4x256xf32>
    %266 = arith.addf %262, %265 : vector<4x256xf32>
    %267 = vector.extract_strided_slice %12 {offsets = [0, 18], sizes = [4, 256], strides = [1, 1]} : vector<4x290xf32> to vector<4x256xf32>
    %268 = vector.extract_strided_slice %2 {offsets = [2, 0], sizes = [1, 256], strides = [1, 1]} : vector<3x256xf32> to vector<1x256xf32>
    %269 = vector.broadcast %268 : vector<1x256xf32> to vector<4x256xf32>
    %270 = arith.mulf %267, %269 : vector<4x256xf32>
    %271 = vector.extract_strided_slice %0 {offsets = [0, 20], sizes = [4, 4], strides = [1, 1]} : vector<4x36xf32> to vector<4x4xf32>
    %cst_89 = arith.constant dense<0.000000e+00> : vector<4x256xf32>
    %272 = tpu.matmul %271, %270, %cst_89 {dimension_numbers = #tpu.dot_dimension_numbers<[1], [0], [0], [1], [0, 0, 1, 1], [], []>, precision = #tpu.contract_precision<fp32>} : vector<4x4xf32>, vector<4x256xf32>, vector<4x256xf32> -> vector<4x256xf32>
    %273 = arith.addf %266, %272 : vector<4x256xf32>
    %274 = vector.extract_strided_slice %12 {offsets = [0, 32], sizes = [4, 256], strides = [1, 1]} : vector<4x290xf32> to vector<4x256xf32>
    %275 = vector.extract_strided_slice %2 {offsets = [0, 0], sizes = [1, 256], strides = [1, 1]} : vector<3x256xf32> to vector<1x256xf32>
    %276 = vector.broadcast %275 : vector<1x256xf32> to vector<4x256xf32>
    %277 = arith.mulf %274, %276 : vector<4x256xf32>
    %278 = vector.extract_strided_slice %0 {offsets = [0, 24], sizes = [4, 4], strides = [1, 1]} : vector<4x36xf32> to vector<4x4xf32>
    %cst_90 = arith.constant dense<0.000000e+00> : vector<4x256xf32>
    %279 = tpu.matmul %278, %277, %cst_90 {dimension_numbers = #tpu.dot_dimension_numbers<[1], [0], [0], [1], [0, 0, 1, 1], [], []>, precision = #tpu.contract_precision<fp32>} : vector<4x4xf32>, vector<4x256xf32>, vector<4x256xf32> -> vector<4x256xf32>
    %280 = arith.addf %273, %279 : vector<4x256xf32>
    %281 = vector.extract_strided_slice %12 {offsets = [0, 33], sizes = [4, 256], strides = [1, 1]} : vector<4x290xf32> to vector<4x256xf32>
    %282 = vector.extract_strided_slice %0 {offsets = [0, 28], sizes = [4, 4], strides = [1, 1]} : vector<4x36xf32> to vector<4x4xf32>
    %cst_91 = arith.constant dense<0.000000e+00> : vector<4x256xf32>
    %283 = tpu.matmul %282, %281, %cst_91 {dimension_numbers = #tpu.dot_dimension_numbers<[1], [0], [0], [1], [0, 0, 1, 1], [], []>, precision = #tpu.contract_precision<fp32>} : vector<4x4xf32>, vector<4x256xf32>, vector<4x256xf32> -> vector<4x256xf32>
    %284 = arith.addf %280, %283 : vector<4x256xf32>
    %285 = vector.extract_strided_slice %12 {offsets = [0, 34], sizes = [4, 256], strides = [1, 1]} : vector<4x290xf32> to vector<4x256xf32>
    %286 = vector.extract_strided_slice %2 {offsets = [2, 0], sizes = [1, 256], strides = [1, 1]} : vector<3x256xf32> to vector<1x256xf32>
    %287 = vector.broadcast %286 : vector<1x256xf32> to vector<4x256xf32>
    %288 = arith.mulf %285, %287 : vector<4x256xf32>
    %289 = vector.extract_strided_slice %0 {offsets = [0, 32], sizes = [4, 4], strides = [1, 1]} : vector<4x36xf32> to vector<4x4xf32>
    %cst_92 = arith.constant dense<0.000000e+00> : vector<4x256xf32>
    %290 = tpu.matmul %289, %288, %cst_92 {dimension_numbers = #tpu.dot_dimension_numbers<[1], [0], [0], [1], [0, 0, 1, 1], [], []>, precision = #tpu.contract_precision<fp32>} : vector<4x4xf32>, vector<4x256xf32>, vector<4x256xf32> -> vector<4x256xf32>
    %291 = arith.addf %284, %290 : vector<4x256xf32>
    %cst_93 = arith.constant 0.000000e+00 : f32
    %292 = vector.broadcast %cst_93 : f32 to vector<4x256xf32>
    %293 = arith.cmpf ogt, %291, %292 : vector<4x256xf32>
    %cst_94 = arith.constant 0.00999999977 : f32
    %294 = vector.broadcast %cst_94 : f32 to vector<4x256xf32>
    %295 = arith.mulf %294, %291 : vector<4x256xf32>
    %296 = arith.select %293, %291, %295 : vector<4x256xi1>, vector<4x256xf32>
    %297 = vector.extract_strided_slice %1 {offsets = [0, 0], sizes = [4, 4], strides = [1, 1]} : vector<4x12xf32> to vector<4x4xf32>
    %cst_95 = arith.constant dense<0.000000e+00> : vector<4x256xf32>
    %298 = tpu.matmul %297, %18, %cst_95 {dimension_numbers = #tpu.dot_dimension_numbers<[1], [0], [0], [1], [0, 0, 1, 1], [], []>, precision = #tpu.contract_precision<fp32>} : vector<4x4xf32>, vector<4x256xf32>, vector<4x256xf32> -> vector<4x256xf32>
    %299 = arith.addf %296, %298 : vector<4x256xf32>
    %300 = vector.extract_strided_slice %1 {offsets = [0, 4], sizes = [4, 4], strides = [1, 1]} : vector<4x12xf32> to vector<4x4xf32>
    %cst_96 = arith.constant dense<0.000000e+00> : vector<4x256xf32>
    %301 = tpu.matmul %300, %19, %cst_96 {dimension_numbers = #tpu.dot_dimension_numbers<[1], [0], [0], [1], [0, 0, 1, 1], [], []>, precision = #tpu.contract_precision<fp32>} : vector<4x4xf32>, vector<4x256xf32>, vector<4x256xf32> -> vector<4x256xf32>
    %302 = arith.addf %299, %301 : vector<4x256xf32>
    %303 = vector.extract_strided_slice %1 {offsets = [0, 8], sizes = [4, 4], strides = [1, 1]} : vector<4x12xf32> to vector<4x4xf32>
    %cst_97 = arith.constant dense<0.000000e+00> : vector<4x256xf32>
    %304 = tpu.matmul %303, %20, %cst_97 {dimension_numbers = #tpu.dot_dimension_numbers<[1], [0], [0], [1], [0, 0, 1, 1], [], []>, precision = #tpu.contract_precision<fp32>} : vector<4x4xf32>, vector<4x256xf32>, vector<4x256xf32> -> vector<4x256xf32>
    %305 = arith.addf %302, %304 : vector<4x256xf32>
    %c0_98 = arith.constant 0 : index
    %c3 = arith.constant 3 : index
    %c0_99 = arith.constant 0 : index
    %c0_100 = arith.constant 0 : index
    %306 = vector.load %arg11[%c0_98, %c3, %c0_99, %c0_100] : memref<1x4x4x256xf32, #tpu.memory_space<vmem>>, vector<1x1x4x256xf32>
    %307 = vector.shape_cast %306 : vector<1x1x4x256xf32> to vector<4x256xf32>
    %308 = vector.shape_cast %305 : vector<4x256xf32> to vector<1x1x4x256xf32>
    tpu.vector_store %arg11[%c0_98, %c3, %c0_99, %c0_100], %308 {strides = array<i32>} : memref<1x4x4x256xf32, #tpu.memory_space<vmem>>, vector<1x1x4x256xf32>,
    return
  }
  func.func @transform_0(%arg0: i32, %arg1: i32) -> (i32, i32) {
    %c0_i32 = arith.constant 0 : i32
    %c0_i32_0 = arith.constant 0 : i32
    %c0_i32_1 = arith.constant 0 : i32
    return %c0_i32, %c0_i32_0 : i32, i32
  }
  func.func @transform_1(%arg0: i32, %arg1: i32) -> (i32, i32) {
    %c0_i32 = arith.constant 0 : i32
    %c0_i32_0 = arith.constant 0 : i32
    %c0_i32_1 = arith.constant 0 : i32
    return %c0_i32, %c0_i32_0 : i32, i32
  }
  func.func @transform_2(%arg0: i32, %arg1: i32) -> (i32, i32) {
    %c0_i32 = arith.constant 0 : i32
    %c0_i32_0 = arith.constant 0 : i32
    %c0_i32_1 = arith.constant 0 : i32
    return %c0_i32, %c0_i32_0 : i32, i32
  }
  func.func @transform_3(%arg0: i32, %arg1: i32) -> (i32, i32, i32, i32) {
    %c4_i32 = arith.constant 4 : i32
    %0 = arith.muli %arg1, %c4_i32 : i32
    %c0_i32 = arith.constant 0 : i32
    %1 = arith.addi %0, %c0_i32 : i32
    %c0_i32_0 = arith.constant 0 : i32
    %c0_i32_1 = arith.constant 0 : i32
    %c0_i32_2 = arith.constant 0 : i32
    return %arg0, %1, %c0_i32_0, %c0_i32_1 : i32, i32, i32, i32
  }
  func.func @transform_4(%arg0: i32, %arg1: i32) -> (i32, i32, i32, i32) {
    %c4_i32 = arith.constant 4 : i32
    %0 = arith.muli %arg1, %c4_i32 : i32
    %c1_i32 = arith.constant 1 : i32
    %1 = arith.addi %0, %c1_i32 : i32
    %c0_i32 = arith.constant 0 : i32
    %c0_i32_0 = arith.constant 0 : i32
    %c0_i32_1 = arith.constant 0 : i32
    return %arg0, %1, %c0_i32, %c0_i32_0 : i32, i32, i32, i32
  }
  func.func @transform_5(%arg0: i32, %arg1: i32) -> (i32, i32, i32, i32) {
    %c4_i32 = arith.constant 4 : i32
    %0 = arith.muli %arg1, %c4_i32 : i32
    %c2_i32 = arith.constant 2 : i32
    %1 = arith.addi %0, %c2_i32 : i32
    %c0_i32 = arith.constant 0 : i32
    %c0_i32_0 = arith.constant 0 : i32
    %c0_i32_1 = arith.constant 0 : i32
    return %arg0, %1, %c0_i32, %c0_i32_0 : i32, i32, i32, i32
  }
  func.func @transform_6(%arg0: i32, %arg1: i32) -> (i32, i32, i32, i32) {
    %c4_i32 = arith.constant 4 : i32
    %0 = arith.muli %arg1, %c4_i32 : i32
    %c3_i32 = arith.constant 3 : i32
    %1 = arith.addi %0, %c3_i32 : i32
    %c0_i32 = arith.constant 0 : i32
    %c0_i32_0 = arith.constant 0 : i32
    %c0_i32_1 = arith.constant 0 : i32
    return %arg0, %1, %c0_i32, %c0_i32_0 : i32, i32, i32, i32
  }
  func.func @transform_7(%arg0: i32, %arg1: i32) -> (i32, i32, i32, i32) {
    %c4_i32 = arith.constant 4 : i32
    %0 = arith.muli %arg1, %c4_i32 : i32
    %c4_i32_0 = arith.constant 4 : i32
    %1 = arith.addi %0, %c4_i32_0 : i32
    %c0_i32 = arith.constant 0 : i32
    %c0_i32_1 = arith.constant 0 : i32
    %c0_i32_2 = arith.constant 0 : i32
    return %arg0, %1, %c0_i32, %c0_i32_1 : i32, i32, i32, i32
  }
  func.func @transform_8(%arg0: i32, %arg1: i32) -> (i32, i32, i32, i32) {
    %c4_i32 = arith.constant 4 : i32
    %0 = arith.muli %arg1, %c4_i32 : i32
    %c5_i32 = arith.constant 5 : i32
    %1 = arith.addi %0, %c5_i32 : i32
    %c0_i32 = arith.constant 0 : i32
    %c0_i32_0 = arith.constant 0 : i32
    %c0_i32_1 = arith.constant 0 : i32
    return %arg0, %1, %c0_i32, %c0_i32_0 : i32, i32, i32, i32
  }
  func.func @transform_9(%arg0: i32, %arg1: i32) -> (i32, i32, i32, i32) {
    %c0_i32 = arith.constant 0 : i32
    %c0_i32_0 = arith.constant 0 : i32
    %c0_i32_1 = arith.constant 0 : i32
    return %arg0, %arg1, %c0_i32, %c0_i32_0 : i32, i32, i32, i32
  }
}

</mosaic_0001>

<bundles_post_ra>
// kernel: tpu_custom_call.1
= control target key start
LH: loop header
LB: loop body
LE: loop exit
PB: predicated region body
PF: predicated region fallthrough
CT: control target
= control target key end

     0   :  { %s28765_s0 = inlined_call_operand.hbm [shape: f32[4,36], index: 0, kind: input, shape index: {}]   ;;  %s28766_s1 = inlined_call_operand.hbm [shape: f32[4,12], index: 1, kind: input, shape index: {}]   ;;  %s28767_s2 = inlined_call_operand.hbm [shape: f32[3,256], index: 2, kind: input, shape index: {}]   ;;  %s28768_s3 = inlined_call_operand.hbm [shape: f32[2,10,4,290], index: 3, kind: input, shape index: {}]   ;;  %s28769_s4 = inlined_call_operand.hbm [shape: f32[2,10,4,290], index: 4, kind: input, shape index: {}]   ;;  %s28770_s5 = inlined_call_operand.hbm [shape: f32[2,10,4,290], index: 5, kind: input, shape index: {}]   ;;  %s28771_s6 = inlined_call_operand.hbm [shape: f32[2,10,4,290], index: 6, kind: input, shape index: {}]   ;;  %s28772_s7 = inlined_call_operand.hbm [shape: f32[2,10,4,290], index: 7, kind: input, shape index: {}]   ;;  %s28773_s8 = inlined_call_operand.hbm [shape: f32[2,10,4,290], index: 8, kind: input, shape index: {}]   ;;  %s28774_s9 = inlined_call_operand.hbm [shape: f32[2,8,4,256], index: 9, kind: output, shape index: {}]  }
   0x1   :  { %28983 = sst [smem:[#allocation153_spill]] %s28765_s0 }
   0x2   :  { %28984 = sst [smem:[#allocation154_spill]] %s28766_s1 }
   0x3   :  { %28985 = sst [smem:[#allocation155_spill]] %s28767_s2 }
   0x4   :  { %28986 = sst [smem:[#allocation156_spill]] %s28768_s3 }
   0x5   :  { %28987 = sst [smem:[#allocation157_spill]] %s28769_s4 }
   0x6   :  { %28988 = sst [smem:[#allocation158_spill]] %s28770_s5 }
   0x7   :  { %28989 = sst [smem:[#allocation159_spill]] %s28771_s6 }
   0x8   :  { %28990 = sst [smem:[#allocation160_spill]] %s28772_s7 }
   0x9   :  { %28991 = sst [smem:[#allocation161_spill]] %s28773_s8 }
   0xa   :  { %28992 = sst [smem:[#allocation162_spill]] %s28774_s9 }
   0xb   :  { %14 = vsyncpa [#allocation3], 0 }
   0xc   :  { %15 = vsyncpa [#allocation6], 0 }
   0xd   :  { %16 = vsyncpa [#allocation9], 0 }
   0xe   :  { %18 = vsyncpa [#allocation9 + $0x1], 0 }
   0xf   :  { %19 = vsyncpa [#allocation12], 0 }
  0x10   :  { %21 = vsyncpa [#allocation12 + $0x1], 0 }
  0x11   :  { %22 = vsyncpa [#allocation15], 0 }
  0x12   :  { %24 = vsyncpa [#allocation15 + $0x1], 0 }
  0x13   :  { %25 = vsyncpa [#allocation4], 0 }
  0x14   :  { %27 = vsyncpa [#allocation4 + $0x1], 0  ;;  %s25049_s30 = smov 0   ;;  %s25051_s10 = smov 0  }
  0x15   :  { %s25053_s11 = smov 0   ;;  %s25055_s12 = smov 0  }
  0x16   :  { %s25057_s13 = smov 0   ;;  %s25059_s14 = smov 0  }
  0x17   :  { %s25061_s15 = smov 0   ;;  %s25063_s16 = smov 0  }
  0x18   :  { %s25065_s17 = smov 0   ;;  %s25067_s18 = smov 0  }
  0x19   :  { %s25069_s19 = smov 0   ;;  %s25071_s20 = smov 0  }
  0x1a   :  { %s25073_s21 = smov 0   ;;  %s25075_s22 = smov 0  }
  0x1b   :  { %s25077_s23 = smov 0   ;;  %s25079_s24 = smov 0  }
  0x1c   :  { %s25081_s25 = smov 0   ;;  %s25083_s26 = smov 0  }
  0x1d   :  { %s25085_s27 = smov 0   ;;  %s25087_s28 = smov 0  }
  0x1e   :  { %s25089_s29 = smov 0   ;;  %s25091_s9 = smov 0  }
  0x1f   :  { %s25093_s8 = smov 0   ;;  %s25095_s6 = smov 0  }
  0x20   :  { %s25097_s4 = smov 0   ;;  %s25099_s2 = smov 0  }
  0x21 LB: > { %28993 = sst [smem:[#allocation27_spill]] %s24865_s30  ;;  %p24085_p0 = scmp.ge.s32.totalorder %s24965_s2, 1  ;;  %s24965_s2 = sphi %s25099_s2, %s33_s2   ;;  %s24961_s4 = sphi %s25097_s4, %s29516_s4   ;;  %s24957_s6 = sphi %s25095_s6, %s29515_s6   ;;  %s24953_s8 = sphi %s25093_s8, %s29500_s8   ;;  %s24949_s9 = sphi %s25091_s9, %s29514_s9   ;;  %s24945_s29 = sphi %s25089_s29, %s29513_s29   ;;  %s24941_s28 = sphi %s25087_s28, %s29512_s28   ;;  %s24937_s27 = sphi %s25085_s27, %s29494_s27   ;;  %s24933_s26 = sphi %s25083_s26, %s29511_s26   ;;  %s24929_s25 = sphi %s25081_s25, %s29510_s25   ;;  %s24925_s24 = sphi %s25079_s24, %s29489_s24   ;;  %s24921_s23 = sphi %s25077_s23, %s29509_s23   ;;  %s24917_s22 = sphi %s25075_s22, %s29508_s22   ;;  %s24913_s21 = sphi %s25073_s21, %s29507_s21   ;;  %s24909_s20 = sphi %s25071_s20, %s29506_s20   ;;  %s24905_s19 = sphi %s25069_s19, %s29485_s19   ;;  %s24901_s18 = sphi %s25067_s18, %s29484_s18   ;;  %s24897_s17 = sphi %s25065_s17, %s29503_s17   ;;  %s24893_s16 = sphi %s25063_s16, %s29501_s16   ;;  %s24889_s15 = sphi %s25061_s15, %s29499_s15   ;;  %s24885_s14 = sphi %s25059_s14, %s29497_s14   ;;  %s24881_s13 = sphi %s25057_s13, %s29482_s13   ;;  %s24877_s12 = sphi %s25055_s12, %s29481_s12   ;;  %s24873_s11 = sphi %s25053_s11, %s29480_s11   ;;  %s24869_s10 = sphi %s25051_s10, %s29492_s10   ;;  %s24865_s30 = sphi %s25049_s30, %s29490_s30  }
  0x22   : > { %28994 = sst [smem:[#allocation28_spill]] %s24873_s11  ;;  %p331_p3 = scmp.lt.s32.totalorder %s24965_s2, 5 }
  0x23   : > { %28995 = sst [smem:[#allocation29_spill]] %s24877_s12  ;;  %s24967_s12 = smov [#allocation5]  }
  0x24   : > { %28996 = sst [smem:[#allocation30_spill]] %s24881_s13  ;;  %s355_s13 = sshll.u32 %s24967_s12, 4  ;;  %s356_s13 = int_to_ptr.vmem [resolvable:$true] %s355_s13 }
  0x25   : > { %28997 = sst [smem:[#allocation31_spill]] %s24885_s14  ;;  %s25180_s14 = sadd.s32 4294967295, %s24965_s2  }
  0x26   : > { %28998 = sst [smem:[#allocation32_spill]] %s24889_s15  ;;  %p28788_p1 = scmp.eq.s32.totalorder %s25180_s14, 0 }
  0x27   : > { %28999 = sst [smem:[#allocation33_spill]] %s24901_s18  ;;  %p318_p2 = scmp.eq.s32.totalorder %s25180_s14, 3 }
  0x28   : > { %29000 = sst [smem:[#allocation34_spill]] %s24905_s19  ;;  %p25186_p4 = pnand %p24085_p0, %p331_p3 }
  0x29   : > { %29001 = sst [smem:[#allocation35_spill]] %s24909_s20  ;;  %p24465_p11 = scmp.lt.s32.totalorder %s356_s13, %s356_s13 }
  0x2a   : > { %29002 = sst [smem:[#allocation36_spill]] %s24921_s23  ;;  %p24164_p5 = pneg %p25186_p4 }
  0x2b   : > { %29003 = sst [smem:[#allocation37_spill]] %s24925_s24 }
  0x2c   : > { %29004 = sst [smem:[#allocation38_spill]] %s24929_s25  ;;  %p25194_p6 = pnand %p24164_p5, %p28788_p1 }
  0x2d   : > { %29005 = sst [smem:[#allocation39_spill]] %s24933_s26 }
  0x2e   : > { %29006 = sst [smem:[#allocation40_spill]] %s24941_s28  ;;  %p28787_p7 = pneg %p25194_p6 }
  0x2f   : > { %29007 = sst [smem:[#allocation41_spill]] %s24945_s29 }
  0x30   : > { %29008 = sst [smem:[#allocation42_spill]] %s24949_s9  ;;  %s24457_s9 = scalar_lea.vmem %s356_s13, 64 }
  0x31   : > { %29009 = sst [smem:[#allocation43_spill]] %s24953_s8  ;;  %p24458_p8 = scmp.ne.s32.totalorder %s356_s13, %s24457_s9 }
  0x32   : > { %29010 = sst [smem:[#allocation44_spill]] %s24957_s6  ;;  %p24466_p12 = scmp.lt.s32.totalorder %s24457_s9, %s24457_s9 }
  0x33   : > { %29011 = sst [smem:[#allocation45_spill]] %s24961_s4  ;;  %p24460_p9 = pnand %p24458_p8, %p28787_p7 }
  0x34   : > { %s29012_s8 = scalar_select %p25186_p4, 1, 0 }
  0x35   : > { %s29014_s12 = scalar_select %p25194_p6, 1, 0 }
  0x36   : > { %29013 = sst [smem:[#allocation46_spill]] %s29012_s8  ;;  %p24461_p10 = pneg %p24460_p9 }
  0x37   : > { %29015 = sst [smem:[#allocation47_spill]] %s29014_s12  ;;  %p24467_p13 = por %p24466_p12, %p24465_p11 }
  0x39   : > { %p24468_p0 = pnand %p24467_p13, %p24461_p10 }
  0x3b   : > { %24471 = shalt.err (!%p24468_p0)
}
  0x3c   : > { %s29016_s1 = sld [smem:[#allocation154_spill]]  ;;  %s42_s19 = sadd.s32 1, %s24957_s6 }
  0x3d   : > { %p43_p3 = scmp.ge.s32.totalorder %s42_s19, 2  ;;  %s45_s8 = sadd.s32 1, %s24961_s4 }
  0x3e   : > { %s25212_s18 = sshll.u32 %s24957_s6, 2  ;;  %s119_s20 = sadd.s32 1, %s24945_s29 }
  0x3f   : > { %s29518_s19 = smov (%p43_p3, %s42_s19), 0  ;;  %s29520_s8 = smov (!%p43_p3, %s45_s8), %s24961_s4 }
  0x40   : > { %29017 = sst [smem:[#allocation48_spill]] %s29518_s19  ;;  %s25219_s24 = sshll.u32 %s29518_s19, 2 }
  0x41   : > { %p126_p5 = scmp.ne.s32.totalorder %s24945_s29, %s24941_s28  ;;  %p47_p8 = scmp.ge.s32.totalorder %s29520_s8, 2 }
  0x42   : > { %24170 = dma.hbm_to_vmem [thread:$0]  (!%p25194_p6), %s29016_s1, 64, %s356_s13, [#allocation6]  }
  0x43   : > { %s115_s13 = ssub.s32 %s25212_s18, %s25219_s24  ;;  %p28797_p9 = scmp.eq.s32.totalorder %s24965_s2, 0 }
  0x44   : > { %p132_p10 = scmp.ne.s32.totalorder %s24941_s28, %s24937_s27  ;;  %s29522_s8 = smov (%p47_p8, %s29520_s8), 0 }
  0x45   : > { %29018 = sst [smem:[#allocation49_spill]] %s29522_s8  ;;  %p25232_p11 = por %p28797_p9, %p126_p5 }
  0x46   : > { %p25238_p12 = por %p28788_p1, %p132_p10  ;;  %s25244_s25 = ssub.s32 %s24961_s4, %s29522_s8 }
  0x47   : > { %s303_s27 = ssub.s32 %s24957_s6, %s29518_s19  ;;  %s116_s28 = sor.u32 %s115_s13, %s25244_s25 }
  0x48   : > { %s29020_s1 = scalar_select %p25238_p12, 1, 0 }
  0x49   : > { %s304_s26 = sor.u32 %s303_s27, %s25244_s25  ;;  %p117_p13 = scmp.eq.s32.totalorder %s116_s28, 0 }
  0x4a   : > { %p305_p0 = scmp.eq.s32.totalorder %s304_s26, 0  ;;  %s307_s0 = sadd.s32 1, %s24873_s11 }
  0x4b   : > { %p317_p3 = scmp.ne.s32.totalorder %s24873_s11, %s24869_s10  ;;  %p323_p8 = scmp.ne.s32.totalorder %s24869_s10, %s24865_s30 }
  0x4c   : > { %s25254_s12 = scalar_select %p117_p13, %s24945_s29, %s119_s20  }
  0x4d   : > { %s25257_s15 = scalar_select %p305_p0, %s24873_s11, %s307_s0  }
  0x4e   : > { %29021 = sst [smem:[#allocation50_spill]] %s25254_s12  ;;  %p25261_p5 = por %p318_p2, %p317_p3 }
  0x4f   : > { %29022 = sst [smem:[#allocation51_spill]] %s25257_s15  ;;  %s29024_s13 = sadd.s32 4294967294, %s24965_s2  }
  0x50   : > { %s29023_s8 = scalar_select %p25261_p5, 1, 0 }
  0x51   : > { %p324_p10 = scmp.eq.s32.totalorder %s29024_s13, 3  ;;  %p28796_p7 = scmp.lt.s32.totalorder %s24965_s2, 4 }
  0x52   : > { %s25271_s27 = sand.u32 1, %s24965_s2   ;;  %s379_s28 = sand.u32 1, %s24945_s29  }
  0x53   : > { %p25274_p1 = por %p324_p10, %p323_p8  ;;  %s24124_s20 = smul.u32 12, %s379_s28 }
  0x54   : > { %p25282_p13 = pnand %p28796_p7, %p25232_p11  ;;  %s24125_s12 = smul.u32 12, %s24957_s6 }
  0x55   : > { %s29025_s26 = scalar_select %p25274_p1, 1, 0 }
  0x56   : > { %s24126_s19 = smul.u32 30, %s24961_s4  ;;  %s381_s13 = scalar_lea.vmem [#allocation8], %s24124_s20 }
  0x57   : > { %29026 = sst [smem:[#allocation52_spill]] %s29025_s26  ;;  %s392_s7 = sshll.u32 %s381_s13, 4  ;;  %s393_s7 = int_to_ptr.vmem [resolvable:$true] %s392_s7 }
  0x58   : > { %s388_s15 = sadd.s32 %s24126_s19, %s24125_s12  ;;  %s29028_s3 = sld [smem:[#allocation156_spill]] }
  0x59   : > { %s25288_s11 = sshll.u32 %s388_s15, 6  ;;  %s28799_s9 = scalar_lea.sflag [#allocation9], %s25271_s27 }
  0x5a   : > { %p24474_p2 = pneg %p25282_p13  ;;  %s24485_s26 = scalar_lea.vmem %s393_s7, 192 }
  0x5b   : > { %p24486_p11 = scmp.ne.s32.totalorder %s393_s7, %s24485_s26  ;;  %s24968_s6 = smov [#allocation8]  }
  0x5c   : > { %s24490_s4 = sshll.u32 %s24968_s6, 4  ;;  %s24491_s4 = int_to_ptr.vmem [resolvable:$false] %s24490_s4 }
  0x5d   : > { %p24488_p0 = pnand %p24486_p11, %p24474_p2  ;;  %s24492_s20 = scalar_lea.vmem %s24491_s4, 384 }
  0x5e   : > { %s390_s28 = scalar_lea.hbm %s29028_s3, %s25288_s11  ;;  %p24493_p8 = scmp.lt.s32.totalorder %s393_s7, %s24491_s4 }
  0x5f   : > { %p24489_p3 = pneg %p24488_p0  ;;  %p24494_p10 = scmp.lt.s32.totalorder %s24492_s20, %s24485_s26 }
  0x61   : > { %p24495_p7 = por %p24494_p10, %p24493_p8 }
  0x63   : > { %p24496_p9 = pnand %p24495_p7, %p24489_p3 }
  0x65   : > { %24499 = shalt.err (!%p24496_p9)
}
  0x66   : > { %24177 = dma.hbm_to_vmem [thread:$0]  (!%p25282_p13), %s390_s28, 192, %s393_s7, %s28799_s9  }
  0x67   : > { %s175_s4 = sadd.s32 2, %s25212_s18  ;;  %s177_s6 = sadd.s32 2, %s25219_s24 }
  0x68   : > { %s183_s30 = sadd.s32 1, %s24921_s23  ;;  %s179_s15 = ssub.s32 %s175_s4, %s177_s6 }
  0x69   : > { %p190_p7 = scmp.ne.s32.totalorder %s24921_s23, %s24917_s22  ;;  %s180_s19 = sor.u32 %s179_s15, %s25244_s25 }
  0x6a   : > { %p196_p9 = scmp.ne.s32.totalorder %s24917_s22, %s24913_s21  ;;  %p181_p2 = scmp.eq.s32.totalorder %s180_s19, 0 }
  0x6b   : > { %p29029_p11 = scmp.eq.s32.totalorder %s24965_s2, 0  ;;  %p29030_p3 = scmp.eq.s32.totalorder %s25180_s14, 0 }
  0x6c   : > { %s25318_s26 = scalar_select %p181_p2, %s24921_s23, %s183_s30  }
  0x6d   : > { %p192_p0 = por %p190_p7, %p29029_p11  ;;  %p25313_p8 = por %p196_p9, %p29030_p3 }
  0x6e   : > { %29032 = sst [smem:[#allocation53_spill]] %s25318_s26  ;;  %s424_s7 = sand.u32 1, %s24921_s23  }
  0x6f   : > { %s29031_s29 = scalar_select %p25313_p8, 1, 0 }
  0x70   : > { %s29033_s5 = sld [smem:[#allocation158_spill]]  ;;  %s24128_s28 = smul.u32 12, %s424_s7 }
  0x71   : > { %p29034_p13 = scmp.lt.s32.totalorder %s24965_s2, 4  ;;  %s28798_s15 = scalar_lea.sflag [#allocation12], %s25271_s27 }
  0x72   : > { %s426_s4 = scalar_lea.vmem [#allocation11], %s24128_s28  ;;  %s24969_s19 = smov [#allocation11]  }
  0x73   : > { %p25327_p10 = pnand %p29034_p13, %p192_p0  ;;  %s438_s6 = sshll.u32 %s426_s4, 4  ;;  %s439_s6 = int_to_ptr.vmem [resolvable:$true] %s438_s6 }
  0x74   : > { %s24513_s30 = scalar_lea.vmem %s439_s6, 192  ;;  %s24518_s0 = sshll.u32 %s24969_s19, 4  ;;  %s24519_s0 = int_to_ptr.vmem [resolvable:$false] %s24518_s0 }
  0x75   : > { %p24502_p7 = pneg %p25327_p10  ;;  %p24514_p9 = scmp.ne.s32.totalorder %s439_s6, %s24513_s30 }
  0x76   : > { %s23882_s13 = scalar_lea.hbm %s29033_s5, %s25288_s11  ;;  %s24520_s7 = scalar_lea.vmem %s24519_s0, 384 }
  0x77   : > { %s23883_s20 = scalar_lea.hbm %s23882_s13, 384  ;;  %p24516_p2 = pnand %p24514_p9, %p24502_p7 }
  0x78   : > { %p24521_p3 = scmp.lt.s32.totalorder %s439_s6, %s24519_s0  ;;  %p24522_p0 = scmp.lt.s32.totalorder %s24520_s7, %s24513_s30 }
  0x79   : > { %p24517_p11 = pneg %p24516_p2 }
  0x7a   : > { %p24523_p13 = por %p24522_p0, %p24521_p3 }
  0x7c   : > { %p24524_p1 = pnand %p24523_p13, %p24517_p11 }
  0x7e   : > { %24527 = shalt.err (!%p24524_p1)
}
  0x7f   : > { %s29036_s12 = sld [smem:[#allocation32_spill]]  ;;  %s239_s13 = sadd.s32 4, %s25212_s18 }
  0x80   : > { %24183 = dma.hbm_to_vmem [thread:$0]  (!%p25327_p10), %s23883_s20, 192, %s439_s6, %s28798_s15  }
  0x81   : > { %s241_s28 = sadd.s32 4, %s25219_s24  ;;  %s247_s21 = sadd.s32 1, %s24897_s17 }
  0x82   : > { %s243_s4 = ssub.s32 %s239_s13, %s241_s28  ;;  %p254_p1 = scmp.ne.s32.totalorder %s24897_s17, %s24893_s16 }
  0x83   : > { %s244_s30 = sor.u32 %s243_s4, %s25244_s25  ;;  %p29037_p2 = scmp.eq.s32.totalorder %s24965_s2, 0 }
  0x84   : > { %p245_p9 = scmp.eq.s32.totalorder %s244_s30, 0  ;;  %p29038_p3 = scmp.eq.s32.totalorder %s25180_s14, 0 }
  0x85   : > { %p260_p7 = scmp.ne.s32.totalorder %s24893_s16, %s29036_s12  ;;  %p256_p11 = por %p254_p1, %p29037_p2 }
  0x86   : > { %s25355_s0 = scalar_select %p245_p9, %s24897_s17, %s247_s21  }
  0x87   : > { %p25350_p0 = por %p260_p7, %p29038_p3  ;;  %s470_s20 = sand.u32 1, %s24897_s17  }
  0x88   : > { %29040 = sst [smem:[#allocation54_spill]] %s25355_s0  ;;  %s24130_s13 = smul.u32 12, %s470_s20 }
  0x89   : > { %s29039_s19 = scalar_select %p25350_p0, 1, 0 }
  0x8a   : > { %s29041_s15 = sld [smem:[#allocation160_spill]]  ;;  %p29042_p10 = scmp.lt.s32.totalorder %s24965_s2, 4 }
  0x8b   : > { %s472_s4 = scalar_lea.vmem [#allocation14], %s24130_s13  ;;  %s28804_s3 = scalar_lea.sflag [#allocation15], %s25271_s27 }
  0x8c   : > { %p25364_p13 = pnand %p29042_p10, %p256_p11  ;;  %s484_s30 = sshll.u32 %s472_s4, 4  ;;  %s485_s30 = int_to_ptr.vmem [resolvable:$true] %s484_s30 }
  0x8d   : > { %s24542_s21 = scalar_lea.vmem %s485_s30, 192  ;;  %s24970_s6 = smov [#allocation14]  }
  0x8e   : > { %p24531_p1 = pneg %p25364_p13  ;;  %p24543_p7 = scmp.ne.s32.totalorder %s485_s30, %s24542_s21 }
  0x90   : > { %s23902_s9 = scalar_lea.hbm %s29041_s15, %s25288_s11  ;;  %p24545_p9 = pnand %p24543_p7, %p24531_p1 }
  0x91   : > { %s23903_s28 = scalar_lea.hbm %s23902_s9, 768  ;;  %s24547_s15 = sshll.u32 %s24970_s6, 4  ;;  %s24548_s15 = int_to_ptr.vmem [resolvable:$false] %s24547_s15 }
  0x92   : > { %p24546_p2 = pneg %p24545_p9  ;;  %s24549_s9 = scalar_lea.vmem %s24548_s15, 384 }
  0x93   : > { %p24550_p3 = scmp.lt.s32.totalorder %s485_s30, %s24548_s15  ;;  %p24551_p11 = scmp.lt.s32.totalorder %s24549_s9, %s24542_s21 }
  0x95   : > { %p24552_p10 = por %p24551_p11, %p24550_p3 }
  0x97   : > { %p24553_p5 = pnand %p24552_p10, %p24546_p2 }
  0x99   : > { %24556 = shalt.err (!%p24553_p5)
}
  0x9a   : > { %24189 = dma.hbm_to_vmem [thread:$0]  (!%p25364_p13), %s23903_s28, 192, %s485_s30, %s28804_s3  }
  0x9b   : > { %s24971_s7 = smov [#allocation2]   ;;  %s24972_s4 = smov [#allocation7]  }
  0x9c   : > { %s344_s13 = sshll.u32 %s24971_s7, 4  ;;  %s366_s5 = sshll.u32 %s24972_s4, 4  ;;  %s345_s13 = int_to_ptr.vmem [resolvable:$true] %s344_s13  ;;  %s367_s5 = int_to_ptr.vmem [resolvable:$true] %s366_s5 }
  0x9d   : > { %s24569_s26 = scalar_lea.vmem %s345_s13, 64  ;;  %p29045_p7 = pneg %p25194_p6 }
  0x9e   : > { %p24570_p1 = scmp.ne.s32.totalorder %s345_s13, %s24569_s26  ;;  %p24577_p3 = scmp.lt.s32.totalorder %s345_s13, %s345_s13 }
  0x9f   : > { %p24578_p2 = scmp.lt.s32.totalorder %s24569_s26, %s24569_s26 }
  0xa0   : > { %p24572_p9 = pnand %p24570_p1, %p29045_p7 }
  0xa1   : > { %p24579_p5 = por %p24578_p2, %p24577_p3 }
  0xa2   : > { %p24573_p0 = pneg %p24572_p9 }
  0xa4   : > { %p24580_p11 = pnand %p24579_p5, %p24573_p0 }
  0xa6   : > { %24583 = shalt.err (!%p24580_p11)
}
  0xa7   : > { %s29046_s30 = sld [smem:[#allocation153_spill]]  ;;  %s24595_s21 = scalar_lea.vmem %s367_s5, 128 }
  0xa8   : > { %p24596_p13 = scmp.ne.s32.totalorder %s367_s5, %s24595_s21  ;;  %p29047_p10 = pmov %p29045_p7 }
  0xa9   : > { %p24603_p7 = scmp.lt.s32.totalorder %s367_s5, %s367_s5  ;;  %p24604_p9 = scmp.lt.s32.totalorder %s24595_s21, %s24595_s21 }
  0xaa   : > { %p24598_p8 = pnand %p24596_p13, %p29047_p10 }
  0xab   : > { %p24605_p12 = por %p24604_p9, %p24603_p7 }
  0xac   : > { %p24599_p1 = pneg %p24598_p8 }
  0xad   : > { %24167 = dma.hbm_to_vmem [thread:$0]  (!%p25194_p6), %s29046_s30, 64, %s345_s13, [#allocation3]  }
  0xae   : > { %p24606_p3 = pnand %p24605_p12, %p24599_p1 }
  0xb0   : > { %24609 = shalt.err (!%p24606_p3)
}
  0xb1   : > { %s29048_s15 = sld [smem:[#allocation155_spill]]  ;;  %s143_s4 = sadd.s32 1, %s25212_s18 }
  0xb2   : > { %s29049_s9 = sld [smem:[#allocation39_spill]]  ;;  %s145_s20 = sadd.s32 1, %s25219_s24 }
  0xb3   : > { %s29050_s7 = sld [smem:[#allocation38_spill]]  ;;  %s147_s28 = ssub.s32 %s143_s4, %s145_s20 }
  0xb4   : > { %s29051_s13 = sld [smem:[#allocation37_spill]]  ;;  %s148_s30 = sor.u32 %s147_s28, %s25244_s25 }
  0xb5   : > { %p149_p0 = scmp.eq.s32.totalorder %s148_s30, 0  ;;  %p29052_p2 = scmp.eq.s32.totalorder %s24965_s2, 0 }
  0xb6   : > { %p29053_p11 = scmp.eq.s32.totalorder %s25180_s14, 0  ;;  %s29056_s3 = sld [smem:[#allocation157_spill]] }
  0xb7   : > { %24173 = dma.hbm_to_vmem [thread:$0]  (!%p25194_p6), %s29048_s15, 128, %s367_s5, [#allocation6]  }
  0xb8   : > { %s151_s12 = sadd.s32 1, %s29049_s9  ;;  %s401_s26 = sand.u32 1, %s29049_s9  }
  0xb9   : > { %p158_p12 = scmp.ne.s32.totalorder %s29049_s9, %s29050_s7  ;;  %s29524_s9 = smov (!%p149_p0, %s29049_s9), %s151_s12 }
  0xba   : > { %p164_p8 = scmp.ne.s32.totalorder %s29050_s7, %s29051_s13  ;;  %29055 = sst [smem:[#allocation55_spill]] %s29524_s9 }
  0xbb   : > { %p160_p5 = por %p158_p12, %p29052_p2  ;;  %s24127_s5 = smul.u32 12, %s401_s26 }
  0xbc   : > { %p25403_p13 = por %p164_p8, %p29053_p11  ;;  %s23872_s23 = scalar_lea.hbm %s29056_s3, %s25288_s11 }
  0xbd   : > { %s23873_s4 = scalar_lea.hbm %s23872_s23, 192  ;;  %p29057_p6 = scmp.lt.s32.totalorder %s24965_s2, 4 }
  0xbe   : > { %s403_s13 = scalar_lea.vmem [#allocation10], %s24127_s5  ;;  %s24973_s12 = smov [#allocation10]  }
  0xbf   : > { %p25417_p10 = pnand %p29057_p6, %p160_p5  ;;  %s415_s20 = sshll.u32 %s403_s13, 4  ;;  %s416_s20 = int_to_ptr.vmem [resolvable:$true] %s415_s20 }
  0xc0   : > { %s24623_s28 = scalar_lea.vmem %s416_s20, 192  ;;  %s24628_s30 = sshll.u32 %s24973_s12, 4  ;;  %s24629_s30 = int_to_ptr.vmem [resolvable:$false] %s24628_s30 }
  0xc1   : > { %p24612_p1 = pneg %p25417_p10  ;;  %p24624_p7 = scmp.ne.s32.totalorder %s416_s20, %s24623_s28 }
  0xc2   : > { %s24630_s3 = scalar_lea.vmem %s24629_s30, 384  ;;  %p24631_p12 = scmp.lt.s32.totalorder %s416_s20, %s24629_s30 }
  0xc3   : > { %p24626_p9 = pnand %p24624_p7, %p24612_p1  ;;  %p24632_p8 = scmp.lt.s32.totalorder %s24630_s3, %s24623_s28 }
  0xc5   : > { %p24627_p3 = pneg %p24626_p9  ;;  %p24633_p0 = por %p24632_p8, %p24631_p12 }
  0xc7   : > { %p24634_p2 = pnand %p24633_p0, %p24627_p3 }
  0xc9   : > { %24637 = shalt.err (!%p24634_p2)
}
  0xca   : > { %s29059_s23 = scalar_lea.sflag [#allocation9], %s25271_s27  ;;  %s29060_s26 = sld [smem:[#allocation35_spill]] }
  0xcb   : > { %s29061_s5 = sld [smem:[#allocation34_spill]]  ;;  %s207_s15 = sadd.s32 3, %s25212_s18 }
  0xcc   : > { %s29062_s6 = sld [smem:[#allocation33_spill]]  ;;  %s209_s13 = sadd.s32 3, %s25219_s24 }
  0xcd   : > { %24180 = dma.hbm_to_vmem [thread:$0]  (!%p25417_p10), %s23873_s4, 192, %s416_s20, %s29059_s23  }
  0xce   : > { %s211_s7 = ssub.s32 %s207_s15, %s209_s13  ;;  %p29063_p1 = scmp.eq.s32.totalorder %s24965_s2, 0 }
  0xcf   : > { %s212_s12 = sor.u32 %s211_s7, %s25244_s25  ;;  %p29065_p9 = scmp.eq.s32.totalorder %s25180_s14, 0 }
  0xd0   : > { %s215_s28 = sadd.s32 1, %s29060_s26  ;;  %p213_p11 = scmp.eq.s32.totalorder %s212_s12, 0 }
  0xd1   : > { %p222_p5 = scmp.ne.s32.totalorder %s29060_s26, %s29061_s5  ;;  %s447_s30 = sand.u32 1, %s29060_s26  }
  0xd2   : > { %p228_p6 = scmp.ne.s32.totalorder %s29061_s5, %s29062_s6  ;;  %s29526_s26 = smov (!%p213_p11, %s29060_s26), %s215_s28 }
  0xd3   : > { %p224_p7 = por %p222_p5, %p29063_p1  ;;  %29064 = sst [smem:[#allocation56_spill]] %s29526_s26 }
  0xd4   : > { %p25443_p3 = por %p228_p6, %p29065_p9  ;;  %s24129_s9 = smul.u32 12, %s447_s30 }
  0xd5   : > { %s29067_s23 = sld [smem:[#allocation159_spill]]  ;;  %p29068_p10 = scmp.lt.s32.totalorder %s24965_s2, 4 }
  0xd6   : > { %s449_s6 = scalar_lea.vmem [#allocation13], %s24129_s9  ;;  %s24974_s12 = smov [#allocation13]  }
  0xd7   : > { %p25453_p12 = pnand %p29068_p10, %p224_p7  ;;  %s461_s7 = sshll.u32 %s449_s6, 4  ;;  %s462_s7 = int_to_ptr.vmem [resolvable:$true] %s461_s7 }
  0xd8   : > { %s24652_s28 = scalar_lea.vmem %s462_s7, 192  ;;  %s24657_s30 = sshll.u32 %s24974_s12, 4  ;;  %s24658_s30 = int_to_ptr.vmem [resolvable:$false] %s24657_s30 }
  0xd9   : > { %p24641_p8 = pneg %p25453_p12  ;;  %p24653_p0 = scmp.ne.s32.totalorder %s462_s7, %s24652_s28 }
  0xda   : > { %s24659_s4 = scalar_lea.vmem %s24658_s30, 384  ;;  %p24660_p11 = scmp.lt.s32.totalorder %s462_s7, %s24658_s30 }
  0xdb   : > { %s23892_s15 = scalar_lea.hbm %s29067_s23, %s25288_s11  ;;  %p24655_p2 = pnand %p24653_p0, %p24641_p8 }
  0xdc   : > { %s23893_s5 = scalar_lea.hbm %s23892_s15, 576  ;;  %p24661_p6 = scmp.lt.s32.totalorder %s24659_s4, %s24652_s28 }
  0xdd   : > { %p24656_p5 = pneg %p24655_p2 }
  0xde   : > { %p24662_p1 = por %p24661_p6, %p24660_p11 }
  0xe0   : > { %p24663_p7 = pnand %p24662_p1, %p24656_p5 }
  0xe2   : > { %24666 = shalt.err (!%p24663_p7)
}
  0xe3   : > { %s29070_s9 = scalar_lea.sflag [#allocation12], %s25271_s27  ;;  %s29071_s20 = sld [smem:[#allocation31_spill]] }
  0xe4   : > { %s29072_s23 = sld [smem:[#allocation30_spill]]  ;;  %s271_s6 = sadd.s32 5, %s25212_s18 }
  0xe5   : > { %s29073_s15 = sld [smem:[#allocation29_spill]]  ;;  %s273_s28 = sadd.s32 5, %s25219_s24 }
  0xe6   : > { %24186 = dma.hbm_to_vmem [thread:$0]  (!%p25453_p12), %s23893_s5, 192, %s462_s7, %s29070_s9  }
  0xe7   : > { %s275_s12 = ssub.s32 %s271_s6, %s273_s28  ;;  %p29074_p0 = scmp.eq.s32.totalorder %s24965_s2, 0 }
  0xe8   : > { %s276_s30 = sor.u32 %s275_s12, %s25244_s25  ;;  %p29075_p5 = scmp.eq.s32.totalorder %s25180_s14, 0 }
  0xe9   : > { %s279_s13 = sadd.s32 1, %s29071_s20  ;;  %p277_p8 = scmp.eq.s32.totalorder %s276_s30, 0 }
  0xea   : > { %p286_p9 = scmp.ne.s32.totalorder %s29071_s20, %s29072_s23  ;;  %s493_s26 = sand.u32 1, %s29071_s20  }
  0xeb   : > { %p292_p10 = scmp.ne.s32.totalorder %s29072_s23, %s29073_s15  ;;  %s29528_s20 = smov (!%p277_p8, %s29071_s20), %s279_s13 }
  0xec   : > { %p288_p2 = por %p286_p9, %p29074_p0  ;;  %s24131_s0 = smul.u32 12, %s493_s26 }
  0xed   : > { %p25475_p11 = por %p292_p10, %p29075_p5  ;;  %s29077_s24 = sld [smem:[#allocation161_spill]] }
  0xee   : > { %p29078_p12 = scmp.lt.s32.totalorder %s24965_s2, 4  ;;  %s495_s23 = scalar_lea.vmem [#allocation16], %s24131_s0 }
  0xef   : > { %s507_s15 = sshll.u32 %s495_s23, 4  ;;  %s24975_s26 = smov [#allocation16]   ;;  %s508_s15 = int_to_ptr.vmem [resolvable:$true] %s507_s15 }
  0xf0   : > { %p25489_p6 = pnand %p29078_p12, %p288_p2  ;;  %s24681_s6 = scalar_lea.vmem %s508_s15, 192 }
  0xf1   : > { %p24682_p7 = scmp.ne.s32.totalorder %s508_s15, %s24681_s6  ;;  %s24686_s28 = sshll.u32 %s24975_s26, 4  ;;  %s24687_s28 = int_to_ptr.vmem [resolvable:$false] %s24686_s28 }
  0xf2   : > { %p24670_p1 = pneg %p25489_p6  ;;  %p24689_p8 = scmp.lt.s32.totalorder %s508_s15, %s24687_s28 }
  0xf3   : > { %s23912_s7 = scalar_lea.hbm %s29077_s24, %s25288_s11  ;;  %s24688_s11 = scalar_lea.vmem %s24687_s28, 384 }
  0xf4   : > { %s23913_s9 = scalar_lea.hbm %s23912_s7, 960  ;;  %p24684_p9 = pnand %p24682_p7, %p24670_p1 }
  0xf5   : > { %p24690_p0 = scmp.lt.s32.totalorder %s24688_s11, %s24681_s6 }
  0xf6   : > { %p24685_p10 = pneg %p24684_p9 }
  0xf7   : > { %p24691_p2 = por %p24690_p0, %p24689_p8 }
  0xf9   : > { %p24692_p5 = pnand %p24691_p2, %p24685_p10 }
  0xfb   : > { %24695 = shalt.err (!%p24692_p5)
}
  0xfc   : > { %s29080_s0 = scalar_lea.sflag [#allocation15], %s25271_s27  ;;  %516 = sbr.rel (%p25186_p4) target bundleno = 1418 (0x58a), region = 56 }
  0xfd   : > { %24192 = dma.hbm_to_vmem [thread:$0]  (!%p25489_p6), %s23913_s9, 192, %s508_s15, %s29080_s0  }
 0x101   : > { %p29082_p12 = scmp.eq.s32.totalorder %s25180_s14, 0 }
 0x103   : > { %24828 = dma.done.wait (%p29082_p12), [#allocation3], 64   ;;  %p29083_p1 = pmov %p29082_p12 }
 0x105   : > { %24830 = vsyncadd (%p29083_p1), [#allocation3], 4294967232  ;;  %p29084_p7 = pmov %p29083_p1 }
 0x106   : > { %p29085_p9 = pmov %p29083_p1 }
 0x107   : > { %24832 = dma.done.wait (%p29084_p7), [#allocation6], 192  }
 0x108   : > { %24834 = vsyncadd (%p29085_p9), [#allocation6], 4294967104  ;;  %s29086_s12 = sld [smem:[#allocation40_spill]]  ;;  %s530_s27 = sand.u32 1, %s25180_s14  }
 0x109   : > { %s531_s18 = scalar_lea.sflag [#allocation9], %s530_s27  ;;  %p29087_p4 = scmp.ne.s32.totalorder %s29020_s1, 0 }
 0x10e   : > { %s532_s30 = sand.u32 1, %s29086_s12  }
 0x10f   : > { %s25511_s5 = smul.u32 12, %s532_s30 }
 0x111   : > { %s534_s24 = scalar_lea.vmem [#allocation8], %s25511_s5 }
 0x112   : > { %24836 = dma.done.wait (%p29087_p4), %s531_s18, 192  }
 0x113   : > { %24838 = vsyncadd (%p29087_p4), %s531_s18, 4294967104  ;;  %s29088_s7 = sld [smem:[#allocation38_spill]] }
 0x119   : > { %s541_s25 = sand.u32 1, %s29088_s7  }
 0x11a   : > { %s25519_s9 = smul.u32 12, %s541_s25 }
 0x11c   : > { %s543_s23 = scalar_lea.vmem [#allocation10], %s25519_s9 }
 0x11d   : > { %24840 = dma.done.wait (%p25403_p13), %s531_s18, 192  }
 0x11e   : > { %24842 = vsyncadd (%p25403_p13), %s531_s18, 4294967104  ;;  %s550_s14 = sand.u32 1, %s24917_s22   ;;  %s549_s1 = scalar_lea.sflag [#allocation12], %s530_s27 }
 0x11f   : > { %s25527_s15 = smul.u32 12, %s550_s14  ;;  %p29089_p6 = scmp.ne.s32.totalorder %s29031_s29, 0 }
 0x121   : > { %s552_s6 = scalar_lea.vmem [#allocation11], %s25527_s15 }
 0x122   : > { %24844 = dma.done.wait (%p29089_p6), %s549_s1, 192  }
 0x123   : > { %24846 = vsyncadd (%p29089_p6), %s549_s1, 4294967104  ;;  %s29090_s26 = sld [smem:[#allocation34_spill]] }
 0x129   : > { %s559_s28 = sand.u32 1, %s29090_s26  }
 0x12a   : > { %s24135_s11 = smul.u32 12, %s559_s28 }
 0x12c   : > { %s25535_s0 = scalar_lea.vmem [#allocation13], %s24135_s11 }
 0x12d   : > { %24848 = dma.done.wait (%p25443_p3), %s549_s1, 192  }
 0x12e   : > { %24850 = vsyncadd (%p25443_p3), %s549_s1, 4294967104  ;;  %s568_s21 = sand.u32 1, %s24893_s16   ;;  %s567_s12 = scalar_lea.sflag [#allocation15], %s530_s27 }
 0x12f   : > { %s24136_s13 = smul.u32 12, %s568_s21  ;;  %p29091_p13 = scmp.ne.s32.totalorder %s29039_s19, 0 }
 0x131   : > { %s25542_s30 = scalar_lea.vmem [#allocation14], %s24136_s13 }
 0x132   : > { %24852 = dma.done.wait (%p29091_p13), %s567_s12, 192  }
 0x133   : > { %24854 = vsyncadd (%p29091_p13), %s567_s12, 4294967104  ;;  %s29092_s29 = sld [smem:[#allocation30_spill]] }
 0x139   : > { %s577_s18 = sand.u32 1, %s29092_s29  }
 0x13a   : > { %s25549_s7 = smul.u32 12, %s577_s18 }
 0x13c   : > { %s579_s3 = scalar_lea.vmem [#allocation16], %s25549_s7 }
 0x13d   : > { %24856 = dma.done.wait (%p25475_p11), %s567_s12, 192  }
 0x13e   : > { %24858 = vsyncadd (%p25475_p11), %s567_s12, 4294967104  ;;  %v667_v0 = vlaneseq  ;;  %v653_v6 = vld [vmem:[#allocation7] sm:$0x77]  ;;  %s24976_s19 = smov 2   ;;  %s24977_s4 = smov 18   ;;  %v28807_v21 = vmov 0.0  }
 0x13f   : > { %v25558_v15 = vld [vmem:[%s543_s23] sm:$0xff]  ;;  %s24978_s27 = smov 16   ;;  %s24979_s25 = smov 127   ;;  %v25573_v19 = vld [vmem:[#allocation2] sm:$0xf]  ;;  %779 = vmatprep.mubr.f32.mxu0 %v28807_v21  ;;  %865 = vmatprep.mubr.f32.mxu1 %v28807_v21  ;;  %vm1675_vm0 = vcmask 15360  }
 0x140   : > { %v668_v1 = vshrl.u32 %v667_v0, 7  ;;  %v25568_v18 = vcombine.high %v25558_v15, %v25558_v15  ;;  %v25577_v20 = vld [vmem:[%s543_s23 + $0x8] sm:$0xf]  ;;  %s24980_s14 = smov 124   ;;  %s24981_s1 = smov 32   ;;  %vm2171_vm1 = vcmask 130048  }
 0x141   : > { %s24983_s9 = smov 126   ;;  %vm705_vm2 = vcmask 31744   ;;  %vm702_vm3 = vcmask 1039360   ;;  %vm708_vm4 = vcmask 1043456   ;;  %s24984_s23 = smov 120   ;;  %vm3151_vm5 = vcmask 146432  }
 0x142   : > { %v669_v2 = vsub.s32 0, %v668_v1  ;;  %v673_v3 = vsub.s32 4, %v668_v1  ;;  %v1653_v4 = vsub.s32 2, %v668_v1  ;;  %v1657_v5 = vsub.s32 6, %v668_v1  ;;  %s24985_s26 = smov 112   ;;  %s24986_s28 = smov 34  }
 0x143   : > { %v1180_v49 = vsel %vm705_vm2, %v25573_v19, 0  ;;  %s24987_s11 = smov 116   ;;  %s24988_s21 = smov 111   ;;  %vm3647_vm6 = vcmask 261120   ;;  %vm1692_vm7 = vcmask 1031168   ;;  %vm4627_vm8 = vcmask 277504  }
 0x144   : > { %v1654_v7 = vrot.slane %v653_v6, %v1653_v4  ;;  %v1658_v8 = vrot.slane %v653_v6, %v1657_v5  ;;  %v670_v9 = vrot.slane %v653_v6, %v669_v2  ;;  %v674_v10 = vrot.slane %v653_v6, %v673_v3  ;;  %s24989_s13 = smov 110   ;;  %s24990_s12 = smov 108  }
 0x145   : > { %v25648_v59 = vand.u32 4294901760, %v1180_v49  ;;  %s24991_s29 = smov 96   ;;  %s24992_s18 = smov 104   ;;  %vm2188_vm9 = vcmask 916480   ;;  %vm2672_vm10 = vcmask 908288   ;;  %vm3168_vm11 = vcmask 900096  }
 0x146   : > { %v1664_v11 = vrot.slane %v1654_v7, %v1653_v4  ;;  %v1668_v12 = vrot.slane %v1658_v8, %v1653_v4  ;;  %v680_v13 = vrot.slane %v670_v9, %v669_v2  ;;  %v684_v14 = vrot.slane %v674_v10, %v669_v2  ;;  %s636_s5 = sand.u32 1, %s24869_s10   ;;  %p29474_p11 = scmp.ne.s32.totalorder %s29023_s8, 0 }
 0x147   : > { %v25666_v5 = vsub.f32 %v1180_v49, %v25648_v59  ;;  %vm3664_vm12 = vcmask 785408   ;;  %vm4148_vm13 = vcmask 777216   ;;  %vm4644_vm14 = vcmask 769024  }
 0x148   : > { %v25560_v16 = vcombine.low %v1664_v11, %v1668_v12  ;;  %v25563_v17 = vcombine.low %v680_v13, %v684_v14 }
 0x149   : > { %29097 = vst [vmem:[#allocation61_spill] sm:$0xff] %v25666_v5  ;;  %v25683_v12 = vand.u32 4294901760, %v25666_v5 }
 0x14a   : > { %1672 = vrot.lane.b32.xlu0 %v25560_v16, %s24976_s19  ;;  %29093 = vst [vmem:[#allocation57_spill] sm:$0xff] %v25563_v17  ;;  %3148 = vrot.lane.b32.xlu1 %v25560_v16, %s24977_s4  ;;  %v689_v30 = vmul.f32 %v25563_v17, %v25558_v15  ;;  %s24993_s19 = smov 95   ;;  %s24994_s4 = smov 100  }
 0x14b   : > { %29098 = vst [vmem:[#allocation62_spill] sm:$0xff] %v25683_v12 }
 0x14c   : > { %v1179_v37 = vcombine.high %v689_v30, %v689_v30  ;;  %v1182_v53 = vsel %vm708_vm4, %v689_v30, 0 }
 0x14d   : > { %v25653_v62 = vand.u32 4294901760, %v1182_v53 }
 0x14e   : > { %2168 = vrot.lane.b32.xlu0 %v25563_v17, %s24978_s27  ;;  %698 = vrot.lane.b32.xlu1 %v25568_v18, %s24979_s25  ;;  %v1184_v46 = vsel %vm708_vm4, %v1179_v37, 0  ;;  %s24995_s27 = smov 94  }
 0x14f   : > { %v25641_v56 = vand.u32 4294901760, %v1184_v46  ;;  %v25673_v8 = vsub.f32 %v1182_v53, %v25653_v62 }
 0x151   : > { %v25661_v4 = vsub.f32 %v1184_v46, %v25641_v56  ;;  %v1302_v14 = vand.u32 4294901760, %v25673_v8 }
 0x152   : > { %691 = vrot.lane.b32.xlu1 %v25573_v19, %s24980_s14  ;;  %700 = vrot.lane.b32.xlu0 %v25577_v20, %s24979_s25 }
 0x153   : > { %v1296_v11 = vand.u32 4294901760, %v25661_v4 }
 0x156   : > { %3644 = vrot.lane.b32.xlu1 %v25563_v17, %s24981_s1  ;;  %696 = vrot.lane.b32.xlu0 %v25558_v15, %s24979_s25 }
 0x1bc   : > { %v1673_v22 = vpop.permute.xlu0 %1672  ;;  %v3149_v23 = vpop.permute.xlu1 %3148 }
 0x1bd   : > { %v25588_v24 = vrot.slane %v1673_v22, 4  ;;  %v25632_v50 = vrot.slane %v3149_v23, 4 }
 0x1bf   : > { %v25591_v25 = vsel %vm1675_vm0, %v25588_v24, %v1673_v22  ;;  %v1680_v26 = vmul.f32 %v25588_v24, %v25577_v20  ;;  %v25656_v63 = vsel %vm3151_vm5, %v25632_v50, %v3149_v23  ;;  %v1297_v22 = vsub.f32 %v25661_v4, %v1296_v11 }
 0x1c0   : > { %v1679_v27 = vmul.f32 %v25591_v25, %v25558_v15  ;;  %v2169_v28 = vpop.permute.xlu0 %2168  ;;  %v699_v29 = vpop.permute.xlu1 %698  ;;  %v3155_v6 = vmul.f32 %v25656_v63, %v25558_v15  ;;  %v1256_v23 = vsub.f32 %v25666_v5, %v25683_v12 }
 0x1c1   : > { %1690 = vrot.lane.b32.xlu1 %v1680_v26, %s24983_s9  ;;  %v25600_v31 = vrot.slane %v2169_v28, 4 }
 0x1c2   : > { %v1685_v32 = vcombine.high %v1679_v27, %v1679_v27  ;;  %v3161_v13 = vcombine.high %v3155_v6, %v3155_v6  ;;  %v25714_v30 = vand.u32 4294901760, %v1256_v23 }
 0x1c3   : > { %v25603_v33 = vsel %vm2171_vm1, %v25600_v31, %v2169_v28  ;;  %v2176_v57 = vmul.f32 %v25600_v31, %v25577_v20  ;;  %v1298_v28 = vand.u32 4294901760, %v1297_v22 }
 0x1c4   : > { %1688 = vrot.lane.b32.xlu0 %v1685_v32, %s24983_s9  ;;  %v25608_v34 = vmul.f32 %v25603_v33, %v25558_v15  ;;  %v692_v35 = vpop.permute.xlu1 %691  ;;  %v701_v36 = vpop.permute.xlu0 %700  ;;  %29099 = vst [vmem:[#allocation63_spill] sm:$0xff] %v25714_v30 }
 0x1c5   : > { %1686 = vrot.lane.b32.xlu1 %v1679_v27, %s24983_s9  ;;  %v706_v38 = vsel %vm705_vm2, %v692_v35, 0  ;;  %v704_v39 = vsel %vm702_vm3, %v699_v29, %v701_v36  ;;  %v1303_v27 = vsub.f32 %v25673_v8, %v1302_v14 }
 0x1c6   : > { %v2181_v40 = vcombine.high %v25608_v34, %v25608_v34  ;;  %v25615_v41 = vand.u32 4294901760, %v706_v38  ;;  %v711_v42 = vsel %vm708_vm4, %v704_v39, 0 }
 0x1c7   : > { %v25618_v43 = vand.u32 4294901760, %v711_v42 }
 0x1c8   : > { %1681 = vrot.lane.b32.xlu0 %v25573_v19, %s24984_s23  ;;  %v25623_v44 = vsub.f32 %v706_v38, %v25615_v41  ;;  %v697_v45 = vpop.permute.xlu0 %696  ;;  %v3645_v1 = vpop.permute.xlu1 %3644 }
 0x1c9   : > { %2184 = vrot.lane.b32.xlu1 %v2181_v40, %s24985_s26  ;;  %v822_v47 = vsub.f32 %v711_v42, %v25618_v43  ;;  %v703_v48 = vsel %vm702_vm3, %v697_v45, %v699_v29  ;;  %744 = vmatprep.subr.mxu0 %v25618_v43  ;;  %v25675_v9 = vrot.slane %v3645_v1, 4  ;;  %v3156_v29 = vmul.f32 %v25632_v50, %v25577_v20 }
 0x1ca   : > { %29094 = vst [vmem:[#allocation58_spill] sm:$0xff] %v25623_v44  ;;  %v709_v51 = vsel %vm708_vm4, %v703_v48, 0  ;;  %v25636_v52 = vand.u32 4294901760, %v25623_v44 }
 0x1cb   : > { %v25639_v54 = vand.u32 4294901760, %v709_v51  ;;  %v823_v55 = vand.u32 4294901760, %v822_v47  ;;  %v3652_v35 = vmul.f32 %v25675_v9, %v25577_v20 }
 0x1cc   : > { %29095 = vst [vmem:[#allocation59_spill] sm:$0xff] %v25636_v52  ;;  %4624 = vrot.lane.b32.xlu0 %v25560_v16, %s24986_s28  ;;  %v783_v58 = vsub.f32 %v25623_v44, %v25636_v52  ;;  %v25689_v16 = vsel %vm3647_vm6, %v25675_v9, %v3645_v1  ;;  %s28654_s28 = scalar_lea.sflag [#allocation4], %s636_s5 }
 0x1cd   : > { %2177 = vrot.lane.b32.xlu1 %v25573_v19, %s24987_s11  ;;  %v828_v60 = vsub.f32 %v709_v51, %v25639_v54  ;;  %746 = vmatpush1.msra.mxu0 %v25639_v54  ;;  %v824_v61 = vsub.f32 %v822_v47, %v823_v55  ;;  %v3651_v26 = vmul.f32 %v25689_v16, %v25558_v15 }
 0x1ce   : > { %v25658_v0 = vand.u32 4294901760, %v783_v58  ;;  %905 = vmatprep.subr.mxu0 %v822_v47 }
 0x1cf   : > { %v825_v2 = vand.u32 4294901760, %v824_v61  ;;  %v829_v3 = vand.u32 4294901760, %v828_v60  ;;  %v3657_v32 = vcombine.high %v3651_v26, %v3651_v26 }
 0x1d0   : > { %29096 = vst [vmem:[#allocation60_spill] sm:$0xff] %v25658_v0  ;;  %2186 = vrot.lane.b32.xlu0 %v2176_v57, %s24985_s26  ;;  %785 = vmatmul.mubr.f32.vlgmr.msra.gmra.mxu0 %v25658_v0 }
 0x1d1   : > { %2668 = vrot.lane.b32.xlu1 %v25568_v18, %s24988_s21  ;;  %826 = vmatprep.subr.mxu1 %v825_v2  ;;  %v830_v7 = vsub.f32 %v828_v60, %v829_v3 }
 0x1d2   : > { %908 = vmatpush1.msra.mxu0 %v828_v60  ;;  %941 = vmatprep.mubr.f32.mxu0 %v28807_v21 }
 0x1d3   : > { %v831_v10 = vand.u32 4294901760, %v830_v7  ;;  %1059 = vmatprep.subr.mxu0 %v823_v55 }
 0x1d4   : > { %2182 = vrot.lane.b32.xlu0 %v25608_v34, %s24985_s26  ;;  %944 = vmatmul.mubr.f32.vlgmr.msra.gmra.mxu0 %v25623_v44  ;;  %v1304_v34 = vand.u32 4294901760, %v1303_v27 }
 0x1d5   : > { %2664 = vrot.lane.b32.xlu1 %v25573_v19, %s24985_s26  ;;  %832 = vmatpush1.msra.mxu1 %v831_v10 }
 0x1d6   : > { %867 = vmatmul.mubr.f32.vlgmr.msra.gmra.mxu1 %v25615_v41  ;;  %981 = vmatprep.subr.mxu1 %v25618_v43 }
 0x1d7   : > { %983 = vmatpush1.msra.mxu1 %v25639_v54  ;;  %1016 = vmatprep.mubr.f32.mxu1 %v28807_v21 }
 0x1d8   : > { %2670 = vrot.lane.b32.xlu0 %v25577_v20, %s24988_s21  ;;  %1063 = vmatpush1.msra.mxu0 %v829_v3 }
 0x1d9   : > { %3164 = vrot.lane.b32.xlu1 %v3161_v13, %s24989_s13  ;;  %1096 = vmatprep.mubr.f32.mxu0 %v28807_v21 }
 0x1da   : > { %1020 = vmatmul.mubr.f32.vlgmr.msra.gmra.mxu1 %v25636_v52  ;;  %1098 = vmatmul.mubr.f32.vlgmr.msra.gmra.mxu0 %v25615_v41 }
 0x1db   : > { %1135 = vmatprep.subr.mxu1 %v25618_v43  ;;  %1170 = vmatprep.mubr.f32.mxu1 %v28807_v21 }
 0x1dc   : > { %2666 = vrot.lane.b32.xlu0 %v25558_v15, %s24988_s21  ;;  %1137 = vmatpush1.msra.mxu1 %v25639_v54 }
 0x1dd   : > { %3157 = vrot.lane.b32.xlu1 %v25573_v19, %s24990_s12  ;;  %1217 = vmatprep.subr.mxu0 %v25641_v56 }
 0x1de   : > { %1172 = vmatmul.mubr.f32.vlgmr.msra.gmra.mxu1 %v25615_v41  ;;  %1219 = vmatpush1.msra.mxu0 %v25653_v62 }
 0x1df   : > { %1252 = vmatprep.mubr.f32.mxu0 %v28807_v21  ;;  %1299 = vmatprep.subr.mxu1 %v1298_v28 }
 0x1e0   : > { %3166 = vrot.lane.b32.xlu0 %v3156_v29, %s24989_s13  ;;  %1258 = vmatmul.mubr.f32.vlgmr.msra.gmra.mxu0 %v25714_v30 }
 0x1e1   : > { %3660 = vrot.lane.b32.xlu1 %v3657_v32, %s24991_s29  ;;  %1305 = vmatpush1.msra.mxu1 %v1304_v34 }
 0x1e2   : > { %1338 = vmatprep.mubr.f32.mxu1 %v28807_v21  ;;  %1378 = vmatprep.subr.mxu0 %v25661_v4 }
 0x1e3   : > { %1340 = vmatmul.mubr.f32.vlgmr.msra.gmra.mxu1 %v25648_v59  ;;  %1381 = vmatpush1.msra.mxu0 %v25673_v8 }
 0x1e4   : > { %3162 = vrot.lane.b32.xlu0 %v3155_v6, %s24989_s13  ;;  %1414 = vmatprep.mubr.f32.mxu0 %v28807_v21 }
 0x1e5   : > { %3653 = vrot.lane.b32.xlu1 %v25573_v19, %s24992_s18  ;;  %1417 = vmatmul.mubr.f32.vlgmr.msra.gmra.mxu0 %v25666_v5 }
 0x1e6   : > { %1454 = vmatprep.subr.mxu1 %v25641_v56  ;;  %1489 = vmatprep.mubr.f32.mxu1 %v28807_v21 }
 0x1e7   : > { %1456 = vmatpush1.msra.mxu1 %v25653_v62  ;;  %1532 = vmatprep.subr.mxu0 %v1296_v11 }
 0x1e8   : > { %3662 = vrot.lane.b32.xlu0 %v3652_v35, %s24991_s29  ;;  %1493 = vmatmul.mubr.f32.vlgmr.msra.gmra.mxu1 %v25683_v12 }
 0x1e9   : > { %4144 = vrot.lane.b32.xlu1 %v25568_v18, %s24993_s19  ;;  %1536 = vmatpush1.msra.mxu0 %v1302_v14 }
 0x1ea   : > { %1569 = vmatprep.mubr.f32.mxu0 %v28807_v21  ;;  %1608 = vmatprep.subr.mxu1 %v25641_v56 }
 0x1eb   : > { %1571 = vmatmul.mubr.f32.vlgmr.msra.gmra.mxu0 %v25648_v59  ;;  %1610 = vmatpush1.msra.mxu1 %v25653_v62 }
 0x1ec   : > { %3658 = vrot.lane.b32.xlu0 %v3651_v26, %s24991_s29  ;;  %1643 = vmatprep.mubr.f32.mxu1 %v28807_v21 }
 0x1ed   : > { %4140 = vrot.lane.b32.xlu1 %v25573_v19, %s24994_s4  ;;  %1645 = vmatmul.mubr.f32.vlgmr.msra.gmra.mxu1 %v25648_v59 }
 0x1ee   : > { %1853 = vmatprep.mubr.f32.mxu1 %v28807_v21  ;;  %1767 = vmatprep.mubr.f32.mxu0 %v28807_v21 }
 0x1f0   : > { %4146 = vrot.lane.b32.xlu0 %v25577_v20, %s24993_s19 }
 0x1f4   : > { %4142 = vrot.lane.b32.xlu0 %v25558_v15, %s24993_s19 }
 0x233   : > { %v1691_v18 = vpop.permute.xlu1 %1690 }
 0x236   : > { %v1689_v36 = vpop.permute.xlu0 %1688 }
 0x237   : > { %v1694_v37 = vsel %vm1692_vm7, %v1689_v36, %v1691_v18  ;;  %v1687_v38 = vpop.permute.xlu1 %1686  ;;  %v654_v18 = vld [vmem:[%s534_s24] sm:$0xff] }
 0x238   : > { %v1699_v39 = vsel %vm708_vm4, %v1694_v37, 0  ;;  %v1693_v40 = vsel %vm1692_vm7, %v1687_v38, %v1689_v36  ;;  %v655_v38 = vld [vmem:[%s534_s24 + $0x8] sm:$0xf]  ;;  %s27494_s24 = sshll.u32 %s636_s5, 5 }
 0x239   : > { %v1731_v42 = vand.u32 4294901760, %v1699_v39  ;;  %v1697_v43 = vsel %vm708_vm4, %v1693_v40, 0  ;;  %s27521_s15 = scalar_lea.vmem [#allocation17], %s27494_s24 }
 0x23a   : > { %v25759_v45 = vand.u32 4294901760, %v1697_v43  ;;  %v1682_v46 = vpop.permute.xlu0 %1681 }
 0x23b   : > { %v1695_v47 = vsel %vm705_vm2, %v1682_v46, 0  ;;  %1732 = vmatprep.subr.mxu0 %v1731_v42  ;;  %v1810_v48 = vsub.f32 %v1699_v39, %v1731_v42  ;;  %v2185_v49 = vpop.permute.xlu1 %2184 }
 0x23c   : > { %v25763_v51 = vsub.f32 %v1697_v43, %v25759_v45  ;;  %v25765_v53 = vand.u32 4294901760, %v1695_v47  ;;  %1734 = vmatpush1.msra.mxu0 %v25759_v45 }
 0x23d   : > { %1893 = vmatprep.subr.mxu0 %v1810_v48  ;;  %v1811_v54 = vand.u32 4294901760, %v1810_v48 }
 0x23e   : > { %29100 = vst [vmem:[#allocation64_spill] sm:$0xff] %v25765_v53  ;;  %v1817_v55 = vand.u32 4294901760, %v25763_v51  ;;  %v25770_v56 = vsub.f32 %v1695_v47, %v25765_v53  ;;  %v4625_v57 = vpop.permute.xlu0 %4624 }
 0x23f   : > { %v25772_v58 = vrot.slane %v4625_v57, 4  ;;  %v1812_v60 = vsub.f32 %v1810_v48, %v1811_v54  ;;  %v2178_v61 = vpop.permute.xlu1 %2177 }
 0x240   : > { %29101 = vst [vmem:[#allocation65_spill] sm:$0xff] %v25770_v56  ;;  %v1818_v62 = vsub.f32 %v25763_v51, %v1817_v55  ;;  %v2191_v1 = vsel %vm705_vm2, %v2178_v61, 0  ;;  %v25779_v2 = vand.u32 4294901760, %v25770_v56 }
 0x241   : > { %v25782_v3 = vsel %vm4627_vm8, %v25772_v58, %v4625_v57  ;;  %v4632_v4 = vmul.f32 %v25772_v58, %v25577_v20  ;;  %v1813_v6 = vand.u32 4294901760, %v1812_v60  ;;  %v25786_v7 = vand.u32 4294901760, %v2191_v1 }
 0x242   : > { %29102 = vst [vmem:[#allocation66_spill] sm:$0xff] %v25779_v2  ;;  %v2187_v8 = vpop.permute.xlu0 %2186  ;;  %v1819_v10 = vand.u32 4294901760, %v1818_v62  ;;  %v4631_v11 = vmul.f32 %v25782_v3, %v25558_v15  ;;  %v1771_v13 = vsub.f32 %v25770_v56, %v25779_v2 }
 0x243   : > { %29103 = vst [vmem:[#allocation67_spill] sm:$0xff] %v25786_v7  ;;  %v2190_v14 = vsel %vm2188_vm9, %v2185_v49, %v2187_v8  ;;  %4642 = vrot.lane.b32.xlu0 %v4632_v4, %s24995_s27  ;;  %1814 = vmatprep.subr.mxu1 %v1813_v6  ;;  %v2669_v22 = vpop.permute.xlu1 %2668  ;;  %v25796_v26 = vsub.f32 %v2191_v1, %v25786_v7 }
 0x244   : > { %v2195_v20 = vsel %vm708_vm4, %v2190_v14, 0  ;;  %1820 = vmatpush1.msra.mxu1 %v1819_v10  ;;  %v4637_v23 = vcombine.high %v4631_v11, %v4631_v11  ;;  %v25798_v27 = vand.u32 4294901760, %v1771_v13  ;;  %v25877_v14 = vld [vmem:[%s552_s6] sm:$0xff] }
 0x245   : > { %29104 = vst [vmem:[#allocation68_spill] sm:$0xff] %v25796_v26  ;;  %v25800_v15 = vand.u32 4294901760, %v2195_v20  ;;  %1855 = vmatmul.mubr.f32.vlgmr.msra.gmra.mxu1 %v25765_v53  ;;  %1969 = vmatprep.subr.mxu1 %v1731_v42  ;;  %v25816_v36 = vand.u32 4294901760, %v25796_v26 }
 0x246   : > { %29105 = vst [vmem:[#allocation69_spill] sm:$0xff] %v25798_v27  ;;  %v2183_v28 = vpop.permute.xlu0 %2182  ;;  %4640 = vrot.lane.b32.xlu1 %v4637_v23, %s24995_s27  ;;  %1773 = vmatmul.mubr.f32.vlgmr.msra.gmra.mxu0 %v25798_v27  ;;  %v25885_v23 = vld [vmem:[%s552_s6 + $0x8] sm:$0xf]  ;;  %s29470_s6 = sld [smem:[#allocation42_spill]] }
 0x247   : > { %v25806_v29 = vsub.f32 %v2195_v20, %v25800_v15  ;;  %v2189_v32 = vsel %vm2188_vm9, %v2183_v28, %v2185_v49  ;;  %1896 = vmatpush1.msra.mxu0 %v25763_v51  ;;  %1971 = vmatpush1.msra.mxu1 %v25759_v45  ;;  %v2665_v34 = vpop.permute.xlu1 %2664  ;;  %29106 = vst [vmem:[#allocation70_spill] sm:$0xff] %v25816_v36 }
 0x248   : > { %v2193_v35 = vsel %vm708_vm4, %v2189_v32, 0  ;;  %4638 = vrot.lane.b32.xlu0 %v4631_v11, %s24995_s27  ;;  %2047 = vmatprep.subr.mxu0 %v1811_v54  ;;  %v2675_v43 = vsel %vm705_vm2, %v2665_v34, 0  ;;  %v2267_v49 = vsub.f32 %v25796_v26, %v25816_v36  ;;  %v25889_v28 = vcombine.high %v25877_v14, %v25877_v14 }
 0x249   : > { %v25818_v37 = vand.u32 4294901760, %v2193_v35  ;;  %2123 = vmatprep.subr.mxu1 %v1731_v42  ;;  %2004 = vmatprep.mubr.f32.mxu1 %v28807_v21  ;;  %v2307_v39 = vand.u32 4294901760, %v25806_v29  ;;  %v5128_v42 = vcombine.high %v654_v18, %v654_v18  ;;  %v25848_v57 = vand.u32 4294901760, %v2675_v43 }
 0x24a   : > { %1929 = vmatprep.mubr.f32.mxu0 %v28807_v21  ;;  %2008 = vmatmul.mubr.f32.vlgmr.msra.gmra.mxu1 %v25779_v2  ;;  %v2671_v40 = vpop.permute.xlu0 %2670  ;;  %v25862_v4 = vand.u32 4294901760, %v2267_v49 }
 0x24b   : > { %v25828_v46 = vsub.f32 %v2193_v35, %v25818_v37  ;;  %2125 = vmatpush1.msra.mxu1 %v25759_v45  ;;  %4633 = vrot.lane.b32.xlu1 %v25573_v19, %s24991_s29  ;;  %v2674_v47 = vsel %vm2672_vm10, %v2669_v22, %v2671_v40  ;;  %v2308_v54 = vsub.f32 %v25806_v29, %v2307_v39  ;;  %v25846_v19 = vld [vmem:[#allocation5] sm:$0xf]  ;;  %v3165_v6 = vpop.permute.xlu1 %3164 }
 0x24c   : > { %1932 = vmatmul.mubr.f32.vlgmr.msra.gmra.mxu0 %v25770_v56  ;;  %5133 = vrot.lane.b32.xlu0 %v655_v38, %s24988_s21  ;;  %v2679_v48 = vsel %vm708_vm4, %v2674_v47, 0  ;;  %29107 = vst [vmem:[#allocation71_spill] sm:$0xff] %v25848_v57  ;;  %29108 = vst [vmem:[#allocation72_spill] sm:$0xff] %v25862_v4  ;;  %v25869_v10 = vsub.f32 %v2675_v43, %v25848_v57 }
 0x24d   : > { %v2313_v45 = vand.u32 4294901760, %v25828_v46  ;;  %2051 = vmatpush1.msra.mxu0 %v1817_v55  ;;  %2158 = vmatprep.mubr.f32.mxu1 %v28807_v21  ;;  %v25852_v60 = vand.u32 4294901760, %v2679_v48  ;;  %v2309_v62 = vand.u32 4294901760, %v2308_v54 }
 0x24e   : > { %2084 = vmatprep.mubr.f32.mxu0 %v28807_v21  ;;  %2160 = vmatmul.mubr.f32.vlgmr.msra.gmra.mxu1 %v25765_v53  ;;  %v2667_v61 = vpop.permute.xlu0 %2666  ;;  %29109 = vst [vmem:[#allocation73_spill] sm:$0xff] %v25869_v10  ;;  %v25895_v32 = vand.u32 4294901760, %v25869_v10 }
 0x24f   : > { %5131 = vrot.lane.b32.xlu1 %v5128_v42, %s24988_s21  ;;  %2228 = vmatprep.subr.mxu0 %v25800_v15  ;;  %v2673_v51 = vsel %vm2672_vm10, %v2667_v61, %v2669_v22  ;;  %v2314_v55 = vsub.f32 %v25828_v46, %v2313_v45  ;;  %v25872_v13 = vsub.f32 %v2679_v48, %v25852_v60  ;;  %v3158_v35 = vpop.permute.xlu1 %3157 }
 0x250   : > { %2086 = vmatmul.mubr.f32.vlgmr.msra.gmra.mxu0 %v25765_v53  ;;  %5611 = vrot.lane.b32.xlu0 %v25846_v19, %s24980_s14  ;;  %v2677_v1 = vsel %vm708_vm4, %v2673_v51, 0  ;;  %29110 = vst [vmem:[#allocation74_spill] sm:$0xff] %v25895_v32  ;;  %v2751_v42 = vsub.f32 %v25869_v10, %v25895_v32  ;;  %s23819_s14 = sshll.u32 %s27521_s15, 4  ;;  %s28649_s14 = int_to_ptr.vmem [resolvable:$true] %s23819_s14 }
 0x251   : > { %2230 = vmatpush1.msra.mxu0 %v25818_v37  ;;  %2263 = vmatprep.mubr.f32.mxu0 %v28807_v21  ;;  %v25866_v8 = vand.u32 4294901760, %v2677_v1  ;;  %v2315_v11 = vand.u32 4294901760, %v2314_v55  ;;  %s24697_s11 = scalar_lea.vmem %s28649_s14, 512 }
 0x252   : > { %2310 = vmatprep.subr.mxu1 %v2309_v62  ;;  %2349 = vmatprep.mubr.f32.mxu1 %v28807_v21  ;;  %v3167_v22 = vpop.permute.xlu0 %3166  ;;  %p24698_p3 = scmp.ne.s32.totalorder %s28649_s14, %s24697_s11 }
 0x253   : > { %v25880_v20 = vsub.f32 %v2677_v1, %v25866_v8  ;;  %5129 = vrot.lane.b32.xlu1 %v654_v18, %s24988_s21  ;;  %2316 = vmatpush1.msra.mxu1 %v2315_v11  ;;  %v25902_v18 = vand.u32 4294901760, %v25872_v13  ;;  %v3170_v38 = vsel %vm3168_vm11, %v3165_v6, %v3167_v22 }
 0x254   : > { %2269 = vmatmul.mubr.f32.vlgmr.msra.gmra.mxu0 %v25862_v4  ;;  %6091 = vrot.lane.b32.xlu0 %v25885_v23, %s24988_s21  ;;  %v3175_v47 = vsel %vm708_vm4, %v3170_v38, 0  ;;  %p24699_p10 = pnand %p24698_p3, %p29474_p11 }
 0x255   : > { %2351 = vmatmul.mubr.f32.vlgmr.msra.gmra.mxu1 %v25786_v7  ;;  %2389 = vmatprep.subr.mxu0 %v25806_v29  ;;  %v25909_v40 = vand.u32 4294901760, %v25880_v20  ;;  %v2792_v48 = vsub.f32 %v25872_v13, %v25902_v18  ;;  %v25937_v61 = vand.u32 4294901760, %v3175_v47 }
 0x256   : > { %2392 = vmatpush1.msra.mxu0 %v25828_v46  ;;  %2425 = vmatprep.mubr.f32.mxu0 %v28807_v21  ;;  %v3163_v34 = vpop.permute.xlu0 %3162  ;;  %v3171_v46 = vsel %vm705_vm2, %v3158_v35, 0  ;;  %p24700_p8 = pneg %p24699_p10 }
 0x257   : > { %6089 = vrot.lane.b32.xlu1 %v25889_v28, %s24988_s21  ;;  %2465 = vmatprep.subr.mxu1 %v25800_v15  ;;  %v3169_v43 = vsel %vm3168_vm11, %v3163_v34, %v3165_v6  ;;  %v2798_v54 = vsub.f32 %v25880_v20, %v25909_v40  ;;  %v25933_v29 = vand.u32 4294901760, %v3171_v46  ;;  %v25948_v51 = vand.u32 4294901760, %v2792_v48 }
 0x258   : > { %2428 = vmatmul.mubr.f32.vlgmr.msra.gmra.mxu0 %v25796_v26  ;;  %6087 = vrot.lane.b32.xlu0 %v25877_v14, %s24988_s21  ;;  %v3173_v49 = vsel %vm708_vm4, %v3169_v43, 0  ;;  %v25960_v11 = vsub.f32 %v3175_v47, %v25937_v61 }
 0x259   : > { %2467 = vmatpush1.msra.mxu1 %v25818_v37  ;;  %2500 = vmatprep.mubr.f32.mxu1 %v28807_v21  ;;  %29111 = vst [vmem:[#allocation75_spill] sm:$0xff] %v25933_v29  ;;  %v25946_v62 = vand.u32 4294901760, %v3173_v49  ;;  %v25952_v1 = vand.u32 4294901760, %v2798_v54  ;;  %v7523_v54 = vmul.f32 %v25588_v24, %v25885_v23 }
 0x25a   : > { %2504 = vmatmul.mubr.f32.vlgmr.msra.gmra.mxu1 %v25816_v36  ;;  %2543 = vmatprep.subr.mxu0 %v2307_v39  ;;  %v7522_v39 = vmul.f32 %v25591_v25, %v25877_v14  ;;  %v3663_v55 = vpop.permute.xlu0 %3662  ;;  %v28806_v43 = vand.u32 4294901760, %v25960_v11 }
 0x25b   : > { %2547 = vmatpush1.msra.mxu0 %v2313_v45  ;;  %2580 = vmatprep.mubr.f32.mxu0 %v28807_v21  ;;  %v25942_v45 = vand.u32 4294901760, %v2751_v42  ;;  %v25966_v22 = vsub.f32 %v3173_v49, %v25946_v62 }
 0x25c   : > { %6082 = vrot.lane.b32.xlu1 %v25846_v19, %s24984_s23  ;;  %2582 = vmatmul.mubr.f32.vlgmr.msra.gmra.mxu0 %v25786_v7  ;;  %v7526_v6 = vcombine.high %v7522_v39, %v7522_v39  ;;  %s29472_s23 = sld [smem:[#allocation162_spill]] }
 0x25d   : > { %2619 = vmatprep.subr.mxu1 %v25800_v15  ;;  %6578 = vrot.lane.b32.xlu0 %v25885_v23, %s24979_s25  ;;  %29112 = vst [vmem:[#allocation76_spill] sm:$0xff] %v25942_v45  ;;  %v3661_v15 = vpop.permute.xlu1 %3660 }
 0x25e   : > { %2621 = vmatpush1.msra.mxu1 %v25818_v37  ;;  %2654 = vmatprep.mubr.f32.mxu1 %v28807_v21  ;;  %v25957_v37 = vsub.f32 %v3171_v46, %v25933_v29  ;;  %v3659_v35 = vpop.permute.xlu0 %3658  ;;  %v28809_v46 = vand.u32 4294901760, %v25966_v22  ;;  %v3666_v42 = vsel %vm3664_vm12, %v3661_v15, %v3663_v55  ;;  %v3288_v55 = vsub.f32 %v25960_v11, %v28806_v43 }
 0x25f   : > { %2656 = vmatmul.mubr.f32.vlgmr.msra.gmra.mxu1 %v25786_v7  ;;  %2712 = vmatprep.subr.mxu0 %v25852_v60  ;;  %v3665_v47 = vsel %vm3664_vm12, %v3659_v35, %v3661_v15  ;;  %v8007_v15 = vmul.f32 %v25600_v31, %v25885_v23  ;;  %v8006_v35 = vmul.f32 %v25603_v33, %v25877_v14 }
 0x260   : > { %2714 = vmatpush1.msra.mxu0 %v25866_v8  ;;  %2747 = vmatprep.mubr.f32.mxu0 %v28807_v21  ;;  %29113 = vst [vmem:[#allocation77_spill] sm:$0xff] %v25957_v37  ;;  %v25973_v34 = vand.u32 4294901760, %v25957_v37  ;;  %v8957_v43 = vmul.f32 %v25656_v63, %v25877_v14 }
 0x261   : > { %6576 = vrot.lane.b32.xlu1 %v25889_v28, %s24979_s25  ;;  %2753 = vmatmul.mubr.f32.vlgmr.msra.gmra.mxu0 %v25942_v45  ;;  %v3654_v38 = vpop.permute.xlu1 %3653  ;;  %v8010_v45 = vcombine.high %v8006_v35, %v8006_v35 }
 0x262   : > { %2794 = vmatprep.subr.mxu1 %v25948_v51  ;;  %7529 = vrot.lane.b32.xlu0 %v7526_v6, %s24983_s9  ;;  %29114 = vst [vmem:[#allocation78_spill] sm:$0xff] %v25973_v34  ;;  %v3667_v48 = vsel %vm705_vm2, %v3654_v38, 0  ;;  %v3247_v49 = vsub.f32 %v25957_v37, %v25973_v34  ;;  %v3669_v6 = vsel %vm708_vm4, %v3665_v47, 0  ;;  %v3294_v38 = vsub.f32 %v25966_v22, %v28809_v46 }
 0x263   : > { %2800 = vmatpush1.msra.mxu1 %v25952_v1  ;;  %2833 = vmatprep.mubr.f32.mxu1 %v28807_v21  ;;  %v29117_v46 = vmov 0.0  }
 0x264   : > { %2835 = vmatmul.mubr.f32.vlgmr.msra.gmra.mxu1 %v25848_v57  ;;  %2873 = vmatprep.subr.mxu0 %v25872_v13  ;;  %v26021_v47 = vand.u32 4294901760, %v3247_v49  ;;  %v3295_v26 = vand.u32 4294901760, %v3294_v38 }
 0x265   : > { %2876 = vmatpush1.msra.mxu0 %v25880_v20  ;;  %2909 = vmatprep.mubr.f32.mxu0 %v28807_v21  ;;  %v4145_v36 = vpop.permute.xlu1 %4144 }
 0x266   : > { %6574 = vrot.lane.b32.xlu1 %v25877_v14, %s24979_s25  ;;  %2912 = vmatmul.mubr.f32.vlgmr.msra.gmra.mxu0 %v25869_v10  ;;  %29116 = vst [vmem:[#allocation80_spill] sm:$0xff] %v26021_v47  ;;  %v3289_v10 = vand.u32 4294901760, %v3288_v55 }
 0x267   : > { %2949 = vmatprep.subr.mxu1 %v25852_v60  ;;  %7527 = vrot.lane.b32.xlu0 %v7522_v39, %s24983_s9  ;;  %v3671_v39 = vsel %vm708_vm4, %v3666_v42, 0  ;;  %v26013_v42 = vand.u32 4294901760, %v3667_v48 }
 0x268   : > { %2951 = vmatpush1.msra.mxu1 %v25866_v8  ;;  %2984 = vmatprep.mubr.f32.mxu1 %v28807_v21 }
 0x269   : > { %2988 = vmatmul.mubr.f32.vlgmr.msra.gmra.mxu1 %v25895_v32  ;;  %3027 = vmatprep.subr.mxu0 %v25902_v18  ;;  %29115 = vst [vmem:[#allocation79_spill] sm:$0xff] %v26013_v42  ;;  %v4147_v32 = vpop.permute.xlu0 %4146  ;;  %v26032_v49 = vsub.f32 %v3667_v48, %v26013_v42 }
 0x26a   : > { %3031 = vmatpush1.msra.mxu0 %v25909_v40  ;;  %3064 = vmatprep.mubr.f32.mxu0 %v28807_v21  ;;  %v26017_v21 = vand.u32 4294901760, %v3671_v39 }
 0x26b   : > { %7531 = vrot.lane.b32.xlu1 %v7523_v54, %s24983_s9  ;;  %3066 = vmatmul.mubr.f32.vlgmr.msra.gmra.mxu0 %v25848_v57  ;;  %v26025_v54 = vand.u32 4294901760, %v3669_v6  ;;  %29118 = vst [vmem:[#allocation81_spill] sm:$0xff] %v26032_v49  ;;  %v26045_v48 = vand.u32 4294901760, %v26032_v49 }
 0x26c   : > { %3103 = vmatprep.subr.mxu1 %v25852_v60  ;;  %8015 = vrot.lane.b32.xlu0 %v8007_v15, %s24985_s26  ;;  %v8961_v15 = vcombine.high %v8957_v43, %v8957_v43  ;;  %v26035_v4 = vsub.f32 %v3671_v39, %v26017_v21  ;;  %v4141_v39 = vpop.permute.xlu1 %4140 }
 0x26d   : > { %3105 = vmatpush1.msra.mxu1 %v25866_v8  ;;  %3138 = vmatprep.mubr.f32.mxu1 %v29117_v46  ;;  %v26040_v55 = vsub.f32 %v3669_v6, %v26025_v54  ;;  %29119 = vst [vmem:[#allocation82_spill] sm:$0xff] %v26045_v48  ;;  %v4150_v6 = vsel %vm4148_vm13, %v4145_v36, %v4147_v32 }
 0x26e   : > { %3140 = vmatmul.mubr.f32.vlgmr.msra.gmra.mxu1 %v25848_v57  ;;  %3208 = vmatprep.subr.mxu0 %v25937_v61  ;;  %v8958_v32 = vmul.f32 %v25632_v50, %v25885_v23 }
 0x26f   : > { %3210 = vmatpush1.msra.mxu0 %v25946_v62  ;;  %3243 = vmatprep.mubr.f32.mxu0 %v29117_v46 }
 0x270   : > { %8013 = vrot.lane.b32.xlu1 %v8010_v45, %s24985_s26  ;;  %3249 = vmatmul.mubr.f32.vlgmr.msra.gmra.mxu0 %v26021_v47  ;;  %v4143_v45 = vpop.permute.xlu0 %4142 }
 0x271   : > { %3290 = vmatprep.subr.mxu1 %v3289_v10  ;;  %8964 = vrot.lane.b32.xlu0 %v8961_v15, %s24989_s13  ;;  %v28824_v10 = vand.u32 4294901760, %v26035_v4  ;;  %v4149_v38 = vsel %vm4148_vm13, %v4143_v45, %v4145_v36  ;;  %v4151_v15 = vsel %vm705_vm2, %v4141_v39, 0  ;;  %v29121_v45 = vand.u32 4294901760, %v25966_v22 }
 0x272   : > { %3296 = vmatpush1.msra.mxu1 %v3295_v26  ;;  %3329 = vmatprep.mubr.f32.mxu1 %v29117_v46  ;;  %v3743_v26 = vsub.f32 %v26032_v49, %v26045_v48  ;;  %v9442_v39 = vmul.f32 %v25675_v9, %v25885_v23 }
 0x273   : > { %3331 = vmatmul.mubr.f32.vlgmr.msra.gmra.mxu1 %v25933_v29  ;;  %3369 = vmatprep.subr.mxu0 %v25960_v11  ;;  %v3784_v36 = vsub.f32 %v26035_v4, %v28824_v10 }
 0x274   : > { %3372 = vmatpush1.msra.mxu0 %v25966_v22  ;;  %3405 = vmatprep.mubr.f32.mxu0 %v29117_v46  ;;  %v26086_v22 = vand.u32 4294901760, %v4151_v15 }
 0x275   : > { %8011 = vrot.lane.b32.xlu1 %v8006_v35, %s24985_s26  ;;  %3408 = vmatmul.mubr.f32.vlgmr.msra.gmra.mxu0 %v25957_v37  ;;  %v29120_v35 = vand.u32 4294901760, %v25960_v11  ;;  %v4153_v11 = vsel %vm708_vm4, %v4149_v38, 0  ;;  %v29122_v37 = vand.u32 4294901760, %v26040_v55  ;;  %v26092_v38 = vand.u32 4294901760, %v3743_v26 }
 0x276   : > { %3445 = vmatprep.subr.mxu1 %v25937_v61  ;;  %8962 = vrot.lane.b32.xlu0 %v8957_v43, %s24989_s13  ;;  %v4155_v43 = vsel %vm708_vm4, %v4150_v6, 0  ;;  %29123 = vst [vmem:[#allocation83_spill] sm:$0xff] %v26086_v22  ;;  %v26096_v10 = vand.u32 4294901760, %v4153_v11 }
 0x277   : > { %3447 = vmatpush1.msra.mxu1 %v25946_v62  ;;  %3480 = vmatprep.mubr.f32.mxu1 %v29117_v46  ;;  %v3790_v6 = vsub.f32 %v26040_v55, %v29122_v37  ;;  %29124 = vst [vmem:[#allocation84_spill] sm:$0xff] %v26092_v38  ;;  %v3785_v37 = vand.u32 4294901760, %v3784_v36 }
 0x278   : > { %3484 = vmatmul.mubr.f32.vlgmr.msra.gmra.mxu1 %v25973_v34  ;;  %3523 = vmatprep.subr.mxu0 %v29120_v35  ;;  %v9441_v35 = vmul.f32 %v25689_v16, %v25877_v14  ;;  %v26111_v26 = vsub.f32 %v4153_v11, %v26096_v10  ;;  %v29128_v11 = vand.u32 4294901760, %v26040_v55 }
 0x279   : > { %3527 = vmatpush1.msra.mxu0 %v29121_v45  ;;  %3560 = vmatprep.mubr.f32.mxu0 %v29117_v46  ;;  %v26088_v45 = vand.u32 4294901760, %v4155_v43  ;;  %v3791_v34 = vand.u32 4294901760, %v3790_v6  ;;  %v10404_v6 = vmul.f32 %v25782_v3, %v25877_v14 }
 0x27a   : > { %8966 = vrot.lane.b32.xlu1 %v8958_v32, %s24989_s13  ;;  %3562 = vmatmul.mubr.f32.vlgmr.msra.gmra.mxu0 %v25933_v29  ;;  %v9445_v32 = vcombine.high %v9441_v35, %v9441_v35  ;;  %v4273_v36 = vand.u32 4294901760, %v26111_v26 }
 0x27b   : > { %3599 = vmatprep.subr.mxu1 %v25937_v61  ;;  %9450 = vrot.lane.b32.xlu0 %v9442_v39, %s24991_s29  ;;  %v26103_v61 = vsub.f32 %v4151_v15, %v26086_v22 }
 0x27c   : > { %3601 = vmatpush1.msra.mxu1 %v25946_v62  ;;  %3634 = vmatprep.mubr.f32.mxu1 %v29117_v46  ;;  %v26106_v62 = vsub.f32 %v4155_v43, %v26088_v45 }
 0x27d   : > { %3636 = vmatmul.mubr.f32.vlgmr.msra.gmra.mxu1 %v25933_v29  ;;  %3704 = vmatprep.subr.mxu0 %v26017_v21  ;;  %29125 = vst [vmem:[#allocation85_spill] sm:$0xff] %v26103_v61  ;;  %v26117_v15 = vand.u32 4294901760, %v26103_v61 }
 0x27e   : > { %3706 = vmatpush1.msra.mxu0 %v26025_v54  ;;  %3739 = vmatprep.mubr.f32.mxu0 %v29117_v46  ;;  %v4267_v43 = vand.u32 4294901760, %v26106_v62 }
 0x27f   : > { %9448 = vrot.lane.b32.xlu1 %v9445_v32, %s24991_s29  ;;  %3745 = vmatmul.mubr.f32.vlgmr.msra.gmra.mxu0 %v26092_v38  ;;  %29126 = vst [vmem:[#allocation86_spill] sm:$0xff] %v26117_v15 }
 0x280   : > { %3786 = vmatprep.subr.mxu1 %v3785_v37  ;;  %9927 = vrot.lane.b32.xlu0 %v25889_v28, %s24993_s19  ;;  %v4227_v28 = vsub.f32 %v26103_v61, %v26117_v15  ;;  %v4268_v39 = vsub.f32 %v26106_v62, %v4267_v43  ;;  %v4274_v37 = vsub.f32 %v26111_v26, %v4273_v36 }
 0x281   : > { %3792 = vmatpush1.msra.mxu1 %v3791_v34  ;;  %3825 = vmatprep.mubr.f32.mxu1 %v29117_v46  ;;  %v29127_v34 = vand.u32 4294901760, %v26035_v4 }
 0x282   : > { %3827 = vmatmul.mubr.f32.vlgmr.msra.gmra.mxu1 %v26013_v42  ;;  %3865 = vmatprep.subr.mxu0 %v26035_v4  ;;  %v26151_v4 = vand.u32 4294901760, %v4227_v28  ;;  %v4269_v32 = vand.u32 4294901760, %v4268_v39 }
 0x283   : > { %3868 = vmatpush1.msra.mxu0 %v26040_v55  ;;  %3901 = vmatprep.mubr.f32.mxu0 %v29117_v46  ;;  %v26154_v55 = vld [vmem:[%s25535_s0] sm:$0xff] }
 0x284   : > { %9446 = vrot.lane.b32.xlu1 %v9441_v35, %s24991_s29  ;;  %3904 = vmatmul.mubr.f32.vlgmr.msra.gmra.mxu0 %v26032_v49  ;;  %v10405_v35 = vmul.f32 %v25772_v58, %v25885_v23  ;;  %29129 = vst [vmem:[#allocation87_spill] sm:$0xff] %v26151_v4 }
 0x285   : > { %3941 = vmatprep.subr.mxu1 %v26017_v21  ;;  %9925 = vrot.lane.b32.xlu0 %v25877_v14, %s24993_s19 }
 0x286   : > { %3943 = vmatpush1.msra.mxu1 %v26025_v54  ;;  %3976 = vmatprep.mubr.f32.mxu1 %v29117_v46 }
 0x287   : > { %3980 = vmatmul.mubr.f32.vlgmr.msra.gmra.mxu1 %v26045_v48  ;;  %4019 = vmatprep.subr.mxu0 %v29127_v34  ;;  %v26160_v34 = vcombine.high %v26154_v55, %v26154_v55 }
 0x288   : > { %4023 = vmatpush1.msra.mxu0 %v29128_v11  ;;  %4056 = vmatprep.mubr.f32.mxu0 %v29117_v46  ;;  %v26189_v11 = vld [vmem:[%s25535_s0 + $0x8] sm:$0xf] }
 0x289   : > { %9929 = vrot.lane.b32.xlu1 %v25885_v23, %s24993_s19  ;;  %4058 = vmatmul.mubr.f32.vlgmr.msra.gmra.mxu0 %v26013_v42  ;;  %v4275_v23 = vand.u32 4294901760, %v4274_v37 }
 0x28a   : > { %4095 = vmatprep.subr.mxu1 %v26017_v21  ;;  %10413 = vrot.lane.b32.xlu0 %v10405_v35, %s24995_s27  ;;  %v10408_v21 = vcombine.high %v10404_v6, %v10404_v6  ;;  %v13265_v35 = vmul.f32 %v25591_v25, %v26154_v55 }
 0x28b   : > { %4097 = vmatpush1.msra.mxu1 %v26025_v54  ;;  %4130 = vmatprep.mubr.f32.mxu1 %v29117_v46 }
 0x28c   : > { %4132 = vmatmul.mubr.f32.vlgmr.msra.gmra.mxu1 %v26013_v42  ;;  %4188 = vmatprep.subr.mxu0 %v26088_v45 }
 0x28d   : > { %4190 = vmatpush1.msra.mxu0 %v26096_v10  ;;  %4223 = vmatprep.mubr.f32.mxu0 %v29117_v46 }
 0x28e   : > { %10411 = vrot.lane.b32.xlu1 %v10408_v21, %s24995_s27  ;;  %4229 = vmatmul.mubr.f32.vlgmr.msra.gmra.mxu0 %v26151_v4  ;;  %v13269_v21 = vcombine.high %v13265_v35, %v13265_v35 }
 0x28f   : > { %4270 = vmatprep.subr.mxu1 %v4269_v32  ;;  %11833 = vrot.lane.b32.xlu0 %v26160_v34, %s24988_s21 }
 0x290   : > { %4276 = vmatpush1.msra.mxu1 %v4275_v23  ;;  %4309 = vmatprep.mubr.f32.mxu1 %v29117_v46  ;;  %v786_v54 = vpop.f32.mrf.mxu0 }
 0x291   : > { %4311 = vmatmul.mubr.f32.vlgmr.msra.gmra.mxu1 %v26086_v22  ;;  %4349 = vmatprep.subr.mxu0 %v26106_v62 }
 0x292   : > { %4352 = vmatpush1.msra.mxu0 %v26111_v26  ;;  %4385 = vmatprep.mubr.f32.mxu0 %v29117_v46  ;;  %v26175_v28 = vpop.f32.mrf.mxu0 }
 0x293   : > { %29130 = vst [vmem:[#allocation88_spill] sm:$0xff] %v26175_v28  ;;  %10409 = vrot.lane.b32.xlu1 %v10404_v6, %s24995_s27  ;;  %4388 = vmatmul.mubr.f32.vlgmr.msra.gmra.mxu0 %v26103_v61 }
 0x294   : > { %4425 = vmatprep.subr.mxu1 %v26088_v45  ;;  %11831 = vrot.lane.b32.xlu0 %v26154_v55, %s24988_s21  ;;  %v945_v39 = vpop.f32.mrf.mxu0 }
 0x295   : > { %4427 = vmatpush1.msra.mxu1 %v26096_v10  ;;  %4460 = vmatprep.mubr.f32.mxu1 %v29117_v46 }
 0x296   : > { %4464 = vmatmul.mubr.f32.vlgmr.msra.gmra.mxu1 %v26117_v15  ;;  %4503 = vmatprep.subr.mxu0 %v4267_v43  ;;  %v868_v62 = vpop.f32.mrf.mxu1  ;;  %v26185_v26 = vpop.f32.mrf.mxu0 }
 0x297   : > { %29131 = vst [vmem:[#allocation89_spill] sm:$0xff] %v26185_v26  ;;  %4507 = vmatpush1.msra.mxu0 %v4273_v36  ;;  %4540 = vmatprep.mubr.f32.mxu0 %v29117_v46  ;;  %v869_v6 = vadd.f32 %v868_v62, %v786_v54  ;;  %v13266_v26 = vmul.f32 %v25588_v24, %v26189_v11 }
 0x298   : > { %11835 = vrot.lane.b32.xlu1 %v26189_v11, %s24988_s21  ;;  %4542 = vmatmul.mubr.f32.vlgmr.msra.gmra.mxu0 %v26086_v22  ;;  %v26196_v37 = vpop.f32.mrf.mxu1 }
 0x299   : > { %29132 = vst [vmem:[#allocation90_spill] sm:$0xff] %v26196_v37  ;;  %4579 = vmatprep.subr.mxu1 %v26088_v45  ;;  %12321 = vrot.lane.b32.xlu0 %v26189_v11, %s24979_s25  ;;  %v946_v43 = vadd.f32 %v945_v39, %v869_v6 }
 0x29a   : > { %4581 = vmatpush1.msra.mxu1 %v26096_v10  ;;  %4614 = vmatprep.mubr.f32.mxu1 %v29117_v46  ;;  %v1021_v36 = vpop.f32.mrf.mxu1  ;;  %v1099_v32 = vpop.f32.mrf.mxu0 }
 0x29b   : > { %4616 = vmatmul.mubr.f32.vlgmr.msra.gmra.mxu1 %v26086_v22  ;;  %4719 = vmatprep.mubr.f32.mxu0 %v29117_v46  ;;  %v1022_v23 = vadd.f32 %v1021_v36, %v946_v43 }
 0x29c   : > { %12319 = vrot.lane.b32.xlu1 %v26160_v34, %s24979_s25  ;;  %4805 = vmatprep.mubr.f32.mxu1 %v29117_v46  ;;  %v26208_v45 = vpop.f32.mrf.mxu1  ;;  %v26210_v54 = vpop.f32.mrf.mxu0 }
 0x29d   : > { %29133 = vst [vmem:[#allocation91_spill] sm:$0xff] %v26208_v45  ;;  %29134 = vst [vmem:[#allocation92_spill] sm:$0xff] %v26210_v54  ;;  %13272 = vrot.lane.b32.xlu0 %v13269_v21, %s24983_s9  ;;  %v1100_v10 = vadd.f32 %v1099_v32, %v1022_v23  ;;  %v13749_v54 = vmul.f32 %v25603_v33, %v26154_v55  ;;  %v13750_v32 = vmul.f32 %v25600_v31, %v26189_v11 }
 0x29e   : > { %v1173_v39 = vpop.f32.mrf.mxu1  ;;  %v14700_v21 = vmul.f32 %v25656_v63, %v26154_v55 }
 0x29f   : > { %v1174_v62 = vadd.f32 %v1173_v39, %v1100_v10 }
 0x2a0   : > { %12317 = vrot.lane.b32.xlu1 %v26154_v55, %s24979_s25  ;;  %v26215_v6 = vpop.f32.mrf.mxu1  ;;  %v1259_v43 = vpop.f32.mrf.mxu0 }
 0x2a1   : > { %29135 = vst [vmem:[#allocation93_spill] sm:$0xff] %v26215_v6  ;;  %13270 = vrot.lane.b32.xlu0 %v13265_v35, %s24983_s9  ;;  %v1260_v36 = vadd.f32 %v1259_v43, %v1174_v62  ;;  %v13753_v62 = vcombine.high %v13749_v54, %v13749_v54  ;;  %v14704_v6 = vcombine.high %v14700_v21, %v14700_v21 }
 0x2a2   : > { %v26222_v45 = vpop.f32.mrf.mxu0 }
 0x2a3   : > { %29136 = vst [vmem:[#allocation94_spill] sm:$0xff] %v26222_v45  ;;  %v1341_v23 = vpop.f32.mrf.mxu1 }
 0x2a4   : > { %13274 = vrot.lane.b32.xlu1 %v13266_v26, %s24983_s9  ;;  %v1342_v10 = vadd.f32 %v1341_v23, %v1260_v36  ;;  %v14701_v23 = vmul.f32 %v25632_v50, %v26189_v11 }
 0x2a5   : > { %13758 = vrot.lane.b32.xlu0 %v13750_v32, %s24985_s26  ;;  %v26230_v35 = vpop.f32.mrf.mxu1  ;;  %v1418_v39 = vpop.f32.mrf.mxu0 }
 0x2a6   : > { %29137 = vst [vmem:[#allocation95_spill] sm:$0xff] %v26230_v35  ;;  %v1419_v43 = vadd.f32 %v1418_v39, %v1342_v10  ;;  %v15184_v10 = vmul.f32 %v25689_v16, %v26154_v55  ;;  %v5138_v35 = vsel %vm705_vm2, %v25846_v19, 0 }
 0x2a7   : > { %v26232_v37 = vpop.f32.mrf.mxu0  ;;  %v26301_v19 = vand.u32 4294901760, %v5138_v35 }
 0x2a8   : > { %29138 = vst [vmem:[#allocation96_spill] sm:$0xff] %v26232_v37  ;;  %13756 = vrot.lane.b32.xlu1 %v13753_v62, %s24985_s26  ;;  %v1494_v45 = vpop.f32.mrf.mxu1  ;;  %v16147_v62 = vmul.f32 %v25782_v3, %v26154_v55 }
 0x2a9   : > { %14707 = vrot.lane.b32.xlu0 %v14704_v6, %s24989_s13  ;;  %v1495_v28 = vadd.f32 %v1494_v45, %v1419_v43  ;;  %v15185_v45 = vmul.f32 %v25675_v9, %v26189_v11  ;;  %29143 = vst [vmem:[#allocation101_spill] sm:$0xff] %v26301_v19 }
 0x2aa   : > { %v26236_v61 = vpop.f32.mrf.mxu1 }
 0x2ab   : > { %29139 = vst [vmem:[#allocation97_spill] sm:$0xff] %v26236_v61  ;;  %v1572_v26 = vpop.f32.mrf.mxu0 }
 0x2ac   : > { %13754 = vrot.lane.b32.xlu1 %v13749_v54, %s24985_s26  ;;  %v1573_v36 = vadd.f32 %v1572_v26, %v1495_v28  ;;  %v15188_v28 = vcombine.high %v15184_v10, %v15184_v10 }
 0x2ad   : > { %14705 = vrot.lane.b32.xlu0 %v14700_v21, %s24989_s13  ;;  %v1646_v32 = vpop.f32.mrf.mxu1 }
 0x2ae   : > { %v26244_v39 = vadd.f32 %v1646_v32, %v1573_v36  ;;  %v16148_v36 = vmul.f32 %v25772_v58, %v26189_v11 }
 0x2b0   : > { %14709 = vrot.lane.b32.xlu1 %v14701_v23, %s24989_s13  ;;  %v26264_v23 = vld [vmem:[%s25542_s30] sm:$0xff] }
 0x2b1   : > { %15193 = vrot.lane.b32.xlu0 %v15185_v45, %s24991_s29  ;;  %v19008_v48 = vmul.f32 %v25591_v25, %v26264_v23 }
 0x2b4   : > { %15191 = vrot.lane.b32.xlu1 %v15188_v28, %s24991_s29 }
 0x2b5   : > { %15670 = vrot.lane.b32.xlu0 %v26160_v34, %s24993_s19  ;;  %v4643_v54 = vpop.permute.xlu0 %4642 }
 0x2b8   : > { %15189 = vrot.lane.b32.xlu1 %v15184_v10, %s24991_s29  ;;  %v4641_v6 = vpop.permute.xlu1 %4640 }
 0x2b9   : > { %15668 = vrot.lane.b32.xlu0 %v26154_v55, %s24993_s19  ;;  %v4646_v21 = vsel %vm4644_vm14, %v4641_v6, %v4643_v54  ;;  %v26272_v55 = vcombine.high %v26264_v23, %v26264_v23 }
 0x2ba   : > { %v4651_v43 = vsel %vm708_vm4, %v4646_v21, 0  ;;  %v4639_v26 = vpop.permute.xlu0 %4638  ;;  %v16151_v21 = vcombine.high %v16147_v62, %v16147_v62 }
 0x2bb   : > { %v4683_v34 = vand.u32 4294901760, %v4651_v43  ;;  %v4645_v32 = vsel %vm4644_vm14, %v4639_v26, %v4641_v6 }
 0x2bc   : > { %15672 = vrot.lane.b32.xlu1 %v26189_v11, %s24993_s19  ;;  %v4649_v10 = vsel %vm708_vm4, %v4645_v32, 0 }
 0x2bd   : > { %16156 = vrot.lane.b32.xlu0 %v16148_v36, %s24995_s27  ;;  %v4762_v45 = vsub.f32 %v4651_v43, %v4683_v34  ;;  %v26274_v28 = vand.u32 4294901760, %v4649_v10  ;;  %v4634_v54 = vpop.permute.xlu1 %4633  ;;  %4684 = vmatprep.subr.mxu0 %v4683_v34 }
 0x2be   : > { %v4647_v6 = vsel %vm705_vm2, %v4634_v54, 0  ;;  %v5134_v32 = vpop.permute.xlu0 %5133 }
 0x2bf   : > { %v4768_v26 = vsub.f32 %v4649_v10, %v26274_v28  ;;  %v26278_v61 = vand.u32 4294901760, %v4647_v6  ;;  %4686 = vmatpush1.msra.mxu0 %v26274_v28  ;;  %v4763_v11 = vand.u32 4294901760, %v4762_v45 }
 0x2c0   : > { %16154 = vrot.lane.b32.xlu1 %v16151_v21, %s24995_s27  ;;  %4845 = vmatprep.subr.mxu0 %v4762_v45 }
 0x2c1   : > { %29140 = vst [vmem:[#allocation98_spill] sm:$0xff] %v26278_v61  ;;  %17576 = vrot.lane.b32.xlu0 %v26272_v55, %s24988_s21  ;;  %v4769_v43 = vand.u32 4294901760, %v4768_v26  ;;  %v26285_v36 = vsub.f32 %v4647_v6, %v26278_v61  ;;  %v5132_v37 = vpop.permute.xlu1 %5131  ;;  %v4764_v54 = vsub.f32 %v4762_v45, %v4763_v11 }
 0x2c2   : > { %v5136_v10 = vsel %vm2672_vm10, %v5132_v37, %v5134_v32 }
 0x2c3   : > { %29141 = vst [vmem:[#allocation99_spill] sm:$0xff] %v26285_v36  ;;  %v26291_v15 = vand.u32 4294901760, %v26285_v36  ;;  %v5142_v21 = vsel %vm708_vm4, %v5136_v10, 0  ;;  %v4765_v4 = vand.u32 4294901760, %v4764_v54  ;;  %v4770_v6 = vsub.f32 %v4768_v26, %v4769_v43 }
 0x2c4   : > { %16152 = vrot.lane.b32.xlu1 %v16147_v62, %s24995_s27  ;;  %v26295_v22 = vand.u32 4294901760, %v5142_v21  ;;  %v26308_v62 = vld [vmem:[%s25542_s30 + $0x8] sm:$0xf] }
 0x2c5   : > { %29142 = vst [vmem:[#allocation100_spill] sm:$0xff] %v26291_v15  ;;  %17574 = vrot.lane.b32.xlu0 %v26264_v23, %s24988_s21  ;;  %v5130_v45 = vpop.permute.xlu1 %5129  ;;  %4766 = vmatprep.subr.mxu1 %v4765_v4  ;;  %v4723_v32 = vsub.f32 %v26285_v36, %v26291_v15  ;;  %v4771_v10 = vand.u32 4294901760, %v4770_v6 }
 0x2c6   : > { %v26304_v49 = vsub.f32 %v5142_v21, %v26295_v22  ;;  %v5135_v54 = vsel %vm2672_vm10, %v5130_v45, %v5132_v37  ;;  %v26324_v37 = vsub.f32 %v5138_v35, %v26301_v19  ;;  %v19012_v45 = vcombine.high %v19008_v48, %v19008_v48 }
 0x2c7   : > { %v5140_v38 = vsel %vm708_vm4, %v5135_v54, 0  ;;  %v26313_v42 = vand.u32 4294901760, %v4723_v32  ;;  %4772 = vmatpush1.msra.mxu1 %v4771_v10  ;;  %v5612_v54 = vpop.permute.xlu0 %5611 }
 0x2c8   : > { %17578 = vrot.lane.b32.xlu1 %v26308_v62, %s24988_s21  ;;  %v26317_v4 = vand.u32 4294901760, %v5140_v38  ;;  %v5254_v21 = vand.u32 4294901760, %v26304_v49  ;;  %4807 = vmatmul.mubr.f32.vlgmr.msra.gmra.mxu1 %v26278_v61  ;;  %29145 = vst [vmem:[#allocation103_spill] sm:$0xff] %v26324_v37  ;;  %v26344_v32 = vand.u32 4294901760, %v26324_v37 }
 0x2c9   : > { %29144 = vst [vmem:[#allocation102_spill] sm:$0xff] %v26313_v42  ;;  %18064 = vrot.lane.b32.xlu0 %v26308_v62, %s24979_s25  ;;  %4921 = vmatprep.subr.mxu1 %v4683_v34 }
 0x2ca   : > { %v26327_v25 = vsub.f32 %v5140_v38, %v26317_v4  ;;  %4725 = vmatmul.mubr.f32.vlgmr.msra.gmra.mxu0 %v26313_v42  ;;  %v5255_v6 = vsub.f32 %v26304_v49, %v5254_v21  ;;  %4923 = vmatpush1.msra.mxu1 %v26274_v28  ;;  %29146 = vst [vmem:[#allocation104_spill] sm:$0xff] %v26344_v32 }
 0x2cb   : > { %4848 = vmatpush1.msra.mxu0 %v4768_v26  ;;  %5075 = vmatprep.subr.mxu1 %v4683_v34  ;;  %v19492_v34 = vmul.f32 %v25603_v33, %v26264_v23  ;;  %v6092_v33 = vpop.permute.xlu0 %6091 }
 0x2cc   : > { %18062 = vrot.lane.b32.xlu1 %v26272_v55, %s24979_s25  ;;  %v5260_v35 = vand.u32 4294901760, %v26327_v25  ;;  %4999 = vmatprep.subr.mxu0 %v4763_v11  ;;  %v5256_v38 = vand.u32 4294901760, %v5255_v6  ;;  %v19009_v11 = vmul.f32 %v25588_v24, %v26308_v62  ;;  %v5214_v6 = vsub.f32 %v26324_v37, %v26344_v32 }
 0x2cd   : > { %19015 = vrot.lane.b32.xlu0 %v19012_v45, %s24983_s9  ;;  %4956 = vmatprep.mubr.f32.mxu1 %v29117_v46  ;;  %v20443_v45 = vmul.f32 %v25656_v63, %v26264_v23  ;;  %v5613_v24 = vsel %vm705_vm2, %v5612_v54, 0  ;;  %v19496_v63 = vcombine.high %v19492_v34, %v19492_v34 }
 0x2ce   : > { %4881 = vmatprep.mubr.f32.mxu0 %v29117_v46  ;;  %v5261_v26 = vsub.f32 %v26327_v25, %v5260_v35  ;;  %4960 = vmatmul.mubr.f32.vlgmr.msra.gmra.mxu1 %v26291_v15 }
 0x2cf   : > { %4884 = vmatmul.mubr.f32.vlgmr.msra.gmra.mxu0 %v26285_v36  ;;  %5077 = vmatpush1.msra.mxu1 %v26274_v28  ;;  %v6090_v28 = vpop.permute.xlu1 %6089 }
 0x2d0   : > { %18060 = vrot.lane.b32.xlu1 %v26264_v23, %s24979_s25  ;;  %5003 = vmatpush1.msra.mxu0 %v4769_v43  ;;  %v5262_v10 = vand.u32 4294901760, %v5261_v26  ;;  %v6094_v43 = vsel %vm2672_vm10, %v6090_v28, %v6092_v33  ;;  %v26376_v26 = vand.u32 4294901760, %v5613_v24 }
 0x2d1   : > { %19013 = vrot.lane.b32.xlu0 %v19008_v48, %s24983_s9  ;;  %5175 = vmatprep.subr.mxu0 %v26295_v22  ;;  %v19493_v48 = vmul.f32 %v25600_v31, %v26308_v62  ;;  %v26371_v31 = vand.u32 4294901760, %v5214_v6  ;;  %v6099_v54 = vsel %vm708_vm4, %v6094_v43, 0 }
 0x2d2   : > { %5257 = vmatprep.subr.mxu1 %v5256_v38  ;;  %5110 = vmatprep.mubr.f32.mxu1 %v29117_v46  ;;  %v20447_v38 = vcombine.high %v20443_v45, %v20443_v45  ;;  %29148 = vst [vmem:[#allocation106_spill] sm:$0xff] %v26376_v26  ;;  %v26393_v33 = vand.u32 4294901760, %v6099_v54 }
 0x2d3   : > { %5036 = vmatprep.mubr.f32.mxu0 %v29117_v46  ;;  %5112 = vmatmul.mubr.f32.vlgmr.msra.gmra.mxu1 %v26278_v61  ;;  %29147 = vst [vmem:[#allocation105_spill] sm:$0xff] %v26371_v31 }
 0x2d4   : > { %19017 = vrot.lane.b32.xlu1 %v19009_v11, %s24983_s9  ;;  %5038 = vmatmul.mubr.f32.vlgmr.msra.gmra.mxu0 %v26278_v61  ;;  %v6088_v11 = vpop.permute.xlu0 %6087  ;;  %29150 = vst [vmem:[#allocation108_spill] sm:$0xff] %v26393_v33 }
 0x2d5   : > { %19501 = vrot.lane.b32.xlu0 %v19493_v48, %s24985_s26  ;;  %5177 = vmatpush1.msra.mxu0 %v26317_v4  ;;  %v6093_v6 = vsel %vm2672_vm10, %v6088_v11, %v6090_v28  ;;  %v6083_v48 = vpop.permute.xlu1 %6082 }
 0x2d6   : > { %5263 = vmatpush1.msra.mxu1 %v5262_v10  ;;  %5336 = vmatprep.subr.mxu0 %v26304_v49  ;;  %v26388_v10 = vsub.f32 %v5613_v24, %v26376_v26  ;;  %v20444_v24 = vmul.f32 %v25632_v50, %v26308_v62  ;;  %v26415_v50 = vsub.f32 %v6099_v54, %v26393_v33 }
 0x2d7   : > { %5296 = vmatprep.mubr.f32.mxu1 %v29117_v46  ;;  %5412 = vmatprep.subr.mxu1 %v26295_v22 }
 0x2d8   : > { %19499 = vrot.lane.b32.xlu1 %v19496_v63, %s24985_s26  ;;  %5210 = vmatprep.mubr.f32.mxu0 %v29117_v46  ;;  %29149 = vst [vmem:[#allocation107_spill] sm:$0xff] %v26388_v10  ;;  %v20927_v63 = vmul.f32 %v25689_v16, %v26264_v23  ;;  %v26410_v49 = vand.u32 4294901760, %v26388_v10  ;;  %29152 = vst [vmem:[#allocation110_spill] sm:$0xff] %v26415_v50 }
 0x2d9   : > { %20450 = vrot.lane.b32.xlu0 %v20447_v38, %s24989_s13  ;;  %5298 = vmatmul.mubr.f32.vlgmr.msra.gmra.mxu1 %v26301_v19  ;;  %v6577_v16 = vpop.permute.xlu1 %6576 }
 0x2da   : > { %5216 = vmatmul.mubr.f32.vlgmr.msra.gmra.mxu0 %v26371_v31  ;;  %5414 = vmatpush1.msra.mxu1 %v26317_v4  ;;  %29151 = vst [vmem:[#allocation109_spill] sm:$0xff] %v26410_v49 }
 0x2db   : > { %5339 = vmatpush1.msra.mxu0 %v26327_v25  ;;  %5566 = vmatprep.subr.mxu1 %v26295_v22  ;;  %v20928_v22 = vmul.f32 %v25675_v9, %v26308_v62  ;;  %v5685_v25 = vsub.f32 %v26388_v10, %v26410_v49 }
 0x2dc   : > { %19497 = vrot.lane.b32.xlu1 %v19492_v34, %s24985_s26  ;;  %5490 = vmatprep.subr.mxu0 %v5254_v21  ;;  %v6097_v34 = vsel %vm708_vm4, %v6093_v6, 0  ;;  %v20931_v21 = vcombine.high %v20927_v63, %v20927_v63 }
 0x2dd   : > { %20448 = vrot.lane.b32.xlu0 %v20443_v45, %s24989_s13  ;;  %5447 = vmatprep.mubr.f32.mxu1 %v29117_v46  ;;  %v26420_v9 = vand.u32 4294901760, %v6097_v34  ;;  %v6579_v45 = vpop.permute.xlu0 %6578  ;;  %v26450_v11 = vand.u32 4294901760, %v5685_v25 }
 0x2de   : > { %5372 = vmatprep.mubr.f32.mxu0 %v29117_v46  ;;  %5451 = vmatmul.mubr.f32.vlgmr.msra.gmra.mxu1 %v26344_v32  ;;  %v6581_v28 = vsel %vm702_vm3, %v6577_v16, %v6579_v45 }
 0x2df   : > { %5375 = vmatmul.mubr.f32.vlgmr.msra.gmra.mxu0 %v26324_v37  ;;  %5568 = vmatpush1.msra.mxu1 %v26317_v4  ;;  %29153 = vst [vmem:[#allocation111_spill] sm:$0xff] %v26420_v9  ;;  %v6095_v4 = vsel %vm705_vm2, %v6083_v48, 0  ;;  %v26439_v43 = vsub.f32 %v6097_v34, %v26420_v9  ;;  %v6584_v54 = vsel %vm708_vm4, %v6581_v28, 0  ;;  %29157 = vst [vmem:[#allocation115_spill] sm:$0xff] %v26450_v11 }
 0x2e0   : > { %20452 = vrot.lane.b32.xlu1 %v20444_v24, %s24989_s13  ;;  %5494 = vmatpush1.msra.mxu0 %v5260_v35  ;;  %v26436_v35 = vand.u32 4294901760, %v26415_v50  ;;  %v26443_v38 = vand.u32 4294901760, %v6095_v4  ;;  %v21890_v24 = vmul.f32 %v25782_v3, %v26264_v23  ;;  %v26460_v34 = vand.u32 4294901760, %v6584_v54 }
 0x2e1   : > { %20936 = vrot.lane.b32.xlu0 %v20928_v22, %s24991_s29  ;;  %5728 = vmatprep.subr.mxu1 %v25948_v51  ;;  %29155 = vst [vmem:[#allocation113_spill] sm:$0xff] %v26439_v43 }
 0x2e2   : > { %5646 = vmatprep.subr.mxu0 %v25852_v60  ;;  %5601 = vmatprep.mubr.f32.mxu1 %v29117_v46  ;;  %29154 = vst [vmem:[#allocation112_spill] sm:$0xff] %v26436_v35  ;;  %29156 = vst [vmem:[#allocation114_spill] sm:$0xff] %v26443_v38  ;;  %v6212_v48 = vsub.f32 %v26415_v50, %v26436_v35  ;;  %v26468_v22 = vsub.f32 %v6095_v4, %v26443_v38 }
 0x2e3   : > { %5527 = vmatprep.mubr.f32.mxu0 %v29117_v46  ;;  %5603 = vmatmul.mubr.f32.vlgmr.msra.gmra.mxu1 %v26301_v19  ;;  %v21894_v45 = vcombine.high %v21890_v24, %v21890_v24 }
 0x2e4   : > { %20934 = vrot.lane.b32.xlu1 %v20931_v21, %s24991_s29  ;;  %5734 = vmatpush1.msra.mxu1 %v25952_v1  ;;  %29159 = vst [vmem:[#allocation117_spill] sm:$0xff] %v26468_v22  ;;  %v26485_v21 = vsub.f32 %v6584_v54, %v26460_v34  ;;  %v26492_v4 = vand.u32 4294901760, %v26468_v22 }
 0x2e5   : > { %21413 = vrot.lane.b32.xlu0 %v26272_v55, %s24993_s19  ;;  %5529 = vmatmul.mubr.f32.vlgmr.msra.gmra.mxu0 %v26301_v19  ;;  %v6575_v55 = vpop.permute.xlu1 %6574 }
 0x2e6   : > { %5883 = vmatprep.subr.mxu1 %v25852_v60  ;;  %5648 = vmatpush1.msra.mxu0 %v25866_v8  ;;  %v6580_v6 = vsel %vm702_vm3, %v6575_v55, %v6577_v16  ;;  %v21891_v16 = vmul.f32 %v25772_v58, %v26308_v62  ;;  %v6573_v58 = vmul.f32 %v25563_v17, %v25877_v14  ;;  %v28843_v54 = vand.u32 4294901760, %v26485_v21 }
 0x2e7   : > { %5767 = vmatprep.mubr.f32.mxu1 %v29117_v46  ;;  %5807 = vmatprep.subr.mxu0 %v25872_v13  ;;  %v6582_v3 = vsel %vm708_vm4, %v6580_v6, 0  ;;  %29161 = vst [vmem:[#allocation119_spill] sm:$0xff] %v26492_v4  ;;  %v6171_v6 = vsub.f32 %v26468_v22, %v26492_v4 }
 0x2e8   : > { %20932 = vrot.lane.b32.xlu1 %v20927_v63, %s24991_s29  ;;  %5681 = vmatprep.mubr.f32.mxu0 %v29117_v46  ;;  %v26465_v63 = vand.u32 4294901760, %v26439_v43  ;;  %v26494_v28 = vand.u32 4294901760, %v6582_v3  ;;  %v7052_v14 = vcombine.high %v6573_v58, %v6573_v58 }
 0x2e9   : > { %21411 = vrot.lane.b32.xlu0 %v26264_v23, %s24993_s19  ;;  %5769 = vmatmul.mubr.f32.vlgmr.msra.gmra.mxu1 %v26376_v26  ;;  %v26480_v23 = vand.u32 4294901760, %v6212_v48 }
 0x2ea   : > { %5687 = vmatmul.mubr.f32.vlgmr.msra.gmra.mxu0 %v26450_v11  ;;  %29158 = vst [vmem:[#allocation116_spill] sm:$0xff] %v26465_v63  ;;  %5885 = vmatpush1.msra.mxu1 %v25866_v8  ;;  %v26508_v55 = vsub.f32 %v6582_v3, %v26494_v28  ;;  %v7055_v48 = vsel %vm708_vm4, %v7052_v14, 0  ;;  %v7053_v3 = vsel %vm708_vm4, %v6573_v58, 0 }
 0x2eb   : > { %5810 = vmatpush1.msra.mxu0 %v25880_v20  ;;  %6037 = vmatprep.subr.mxu1 %v25852_v60  ;;  %29160 = vst [vmem:[#allocation118_spill] sm:$0xff] %v26480_v23  ;;  %v26531_v14 = vand.u32 4294901760, %v7055_v48 }
 0x2ec   : > { %21415 = vrot.lane.b32.xlu1 %v26308_v62, %s24993_s19  ;;  %5961 = vmatprep.subr.mxu0 %v25902_v18  ;;  %v6218_v62 = vsub.f32 %v26439_v43, %v26465_v63 }
 0x2ed   : > { %21899 = vrot.lane.b32.xlu0 %v21891_v16, %s24995_s27  ;;  %5918 = vmatprep.mubr.f32.mxu1 %v29117_v46  ;;  %v6697_v16 = vsub.f32 %v26485_v21, %v28843_v54  ;;  %v26535_v54 = vand.u32 4294901760, %v7053_v3 }
 0x2ee   : > { %5843 = vmatprep.mubr.f32.mxu0 %v29117_v46  ;;  %5922 = vmatmul.mubr.f32.vlgmr.msra.gmra.mxu1 %v26410_v49  ;;  %v26504_v25 = vand.u32 4294901760, %v6218_v62  ;;  %v7530_v62 = vpop.permute.xlu0 %7529 }
 0x2ef   : > { %5846 = vmatmul.mubr.f32.vlgmr.msra.gmra.mxu0 %v26388_v10  ;;  %6039 = vmatpush1.msra.mxu1 %v25866_v8  ;;  %v6698_v58 = vand.u32 4294901760, %v6697_v16  ;;  %v26552_v16 = vsub.f32 %v7053_v3, %v26535_v54 }
 0x2f0   : > { %21897 = vrot.lane.b32.xlu1 %v21894_v45, %s24995_s27  ;;  %5965 = vmatpush1.msra.mxu0 %v25909_v40  ;;  %29162 = vst [vmem:[#allocation120_spill] sm:$0xff] %v26504_v25  ;;  %v26528_v45 = vand.u32 4294901760, %v6171_v6  ;;  %v29164_v6 = vand.u32 4294901760, %v26508_v55 }
 0x2f1   : > { %6214 = vmatprep.subr.mxu1 %v26480_v23  ;;  %6132 = vmatprep.subr.mxu0 %v26393_v33 }
 0x2f2   : > { %6072 = vmatprep.mubr.f32.mxu1 %v29117_v46  ;;  %5998 = vmatprep.mubr.f32.mxu0 %v29117_v46  ;;  %29163 = vst [vmem:[#allocation121_spill] sm:$0xff] %v26528_v45  ;;  %v6703_v10 = vsub.f32 %v26508_v55, %v29164_v6  ;;  %v7528_v49 = vpop.permute.xlu0 %7527 }
 0x2f3   : > { %6074 = vmatmul.mubr.f32.vlgmr.msra.gmra.mxu1 %v26376_v26  ;;  %6000 = vmatmul.mubr.f32.vlgmr.msra.gmra.mxu0 %v26376_v26  ;;  %v7533_v3 = vsel %vm1692_vm7, %v7528_v49, %v7530_v62 }
 0x2f4   : > { %21895 = vrot.lane.b32.xlu1 %v21890_v24, %s24995_s27  ;;  %6220 = vmatpush1.msra.mxu1 %v26504_v25  ;;  %v7532_v24 = vpop.permute.xlu1 %7531  ;;  %v6704_v6 = vand.u32 4294901760, %v6703_v10  ;;  %v26567_v10 = vpop.f32.mrf.mxu1 }
 0x2f5   : > { %6369 = vmatprep.subr.mxu1 %v26393_v33  ;;  %6134 = vmatpush1.msra.mxu0 %v26420_v9  ;;  %v7534_v17 = vsel %vm1692_vm7, %v7530_v62, %v7532_v24  ;;  %v28863_v24 = vand.u32 4294901760, %v26552_v16  ;;  %29165 = vst [vmem:[#allocation122_spill] sm:$0xff] %v26567_v10  ;;  %v26574_v62 = vpop.f32.mrf.mxu0 }
 0x2f6   : > { %6253 = vmatprep.mubr.f32.mxu1 %v29117_v46  ;;  %6293 = vmatprep.subr.mxu0 %v26415_v50  ;;  %29166 = vst [vmem:[#allocation123_spill] sm:$0xff] %v26574_v62  ;;  %v8016_v26 = vpop.permute.xlu0 %8015 }
 0x2f7   : > { %6167 = vmatprep.mubr.f32.mxu0 %v29117_v46  ;;  %6255 = vmatmul.mubr.f32.vlgmr.msra.gmra.mxu1 %v26443_v38 }
 0x2f8   : > { %6371 = vmatpush1.msra.mxu1 %v26420_v9  ;;  %6173 = vmatmul.mubr.f32.vlgmr.msra.gmra.mxu0 %v26528_v45  ;;  %v26547_v45 = vsub.f32 %v7055_v48, %v26531_v14 }
 0x2f9   : > { %6296 = vmatpush1.msra.mxu0 %v26439_v43  ;;  %6523 = vmatprep.subr.mxu1 %v26393_v33 }
 0x2fa   : > { %6447 = vmatprep.subr.mxu0 %v26436_v35  ;;  %6404 = vmatprep.mubr.f32.mxu1 %v29117_v46  ;;  %v28858_v48 = vand.u32 4294901760, %v26547_v45 }
 0x2fb   : > { %6329 = vmatprep.mubr.f32.mxu0 %v29117_v46  ;;  %6408 = vmatmul.mubr.f32.vlgmr.msra.gmra.mxu1 %v26492_v4 }
 0x2fc   : > { %6525 = vmatpush1.msra.mxu1 %v26420_v9  ;;  %6332 = vmatmul.mubr.f32.vlgmr.msra.gmra.mxu0 %v26468_v22  ;;  %v7537_v22 = vsel %vm708_vm4, %v7534_v17, 0  ;;  %v8014_v17 = vpop.permute.xlu1 %8013 }
 0x2fd   : > { %6451 = vmatpush1.msra.mxu0 %v26465_v63  ;;  %6699 = vmatprep.subr.mxu1 %v6698_v58  ;;  %v7535_v58 = vsel %vm708_vm4, %v7533_v3, 0  ;;  %v26572_v49 = vand.u32 4294901760, %v7537_v22  ;;  %v7174_v3 = vsub.f32 %v26552_v16, %v28863_v24 }
 0x2fe   : > { %6617 = vmatprep.subr.mxu0 %v26460_v34  ;;  %6558 = vmatprep.mubr.f32.mxu1 %v29117_v46  ;;  %v26588_v4 = vand.u32 4294901760, %v7535_v58 }
 0x2ff   : > { %6484 = vmatprep.mubr.f32.mxu0 %v29117_v46  ;;  %6560 = vmatmul.mubr.f32.vlgmr.msra.gmra.mxu1 %v26443_v38 }
 0x300   : > { %6705 = vmatpush1.msra.mxu1 %v6704_v6  ;;  %6486 = vmatmul.mubr.f32.vlgmr.msra.gmra.mxu0 %v26443_v38  ;;  %v7168_v6 = vsub.f32 %v26547_v45, %v28858_v48  ;;  %v29167_v38 = vand.u32 4294901760, %v26485_v21 }
 0x301   : > { %6619 = vmatpush1.msra.mxu0 %v26494_v28  ;;  %6854 = vmatprep.subr.mxu1 %v26460_v34 }
 0x302   : > { %6778 = vmatprep.subr.mxu0 %v26485_v21  ;;  %6738 = vmatprep.mubr.f32.mxu1 %v29117_v46  ;;  %v7169_v24 = vand.u32 4294901760, %v7168_v6  ;;  %v8018_v21 = vsel %vm2188_vm9, %v8014_v17, %v8016_v26 }
 0x303   : > { %6652 = vmatprep.mubr.f32.mxu0 %v29117_v46  ;;  %6740 = vmatmul.mubr.f32.vlgmr.msra.gmra.mxu1 %v25615_v41 }
 0x304   : > { %6856 = vmatpush1.msra.mxu1 %v26494_v28  ;;  %6658 = vmatmul.mubr.f32.vlgmr.msra.gmra.mxu0 %v25658_v0  ;;  %v26596_v0 = vsub.f32 %v7537_v22, %v26572_v49 }
 0x305   : > { %v1856_v10 = vpop.f32.mrf.mxu1  ;;  %6781 = vmatpush1.msra.mxu0 %v26508_v55  ;;  %7008 = vmatprep.subr.mxu1 %v26460_v34 }
 0x306   : > { %v1774_v62 = vpop.f32.mrf.mxu0  ;;  %6932 = vmatprep.subr.mxu0 %v29167_v38  ;;  %6889 = vmatprep.mubr.f32.mxu1 %v29117_v46  ;;  %v7175_v38 = vand.u32 4294901760, %v7174_v3 }
 0x307   : > { %v1857_v48 = vadd.f32 %v1856_v10, %v1774_v62  ;;  %v26593_v11 = vpop.f32.mrf.mxu1  ;;  %6814 = vmatprep.mubr.f32.mxu0 %v29117_v46  ;;  %6893 = vmatmul.mubr.f32.vlgmr.msra.gmra.mxu1 %v25636_v52  ;;  %v8012_v10 = vpop.permute.xlu1 %8011  ;;  %v29168_v62 = vand.u32 4294901760, %v26508_v55  ;;  %v26609_v52 = vsub.f32 %v7535_v58, %v26588_v4  ;;  %v8021_v55 = vsel %vm708_vm4, %v8018_v21, 0 }
 0x308   : > { %v26600_v34 = vpop.f32.mrf.mxu0  ;;  %7010 = vmatpush1.msra.mxu1 %v26494_v28  ;;  %6817 = vmatmul.mubr.f32.vlgmr.msra.gmra.mxu0 %v25623_v44  ;;  %v8017_v3 = vsel %vm2188_vm9, %v8012_v10, %v8014_v17  ;;  %v26627_v21 = vand.u32 4294901760, %v8021_v55 }
 0x309   : > { %6936 = vmatpush1.msra.mxu0 %v29168_v62  ;;  %7043 = vmatprep.mubr.f32.mxu1 %v29117_v46  ;;  %v8019_v17 = vsel %vm708_vm4, %v8017_v3, 0 }
 0x30a   : > { %v2009_v22 = vpop.f32.mrf.mxu1  ;;  %6969 = vmatprep.mubr.f32.mxu0 %v29117_v46  ;;  %7088 = vmatprep.subr.mxu0 %v26531_v14  ;;  %v26641_v44 = vand.u32 4294901760, %v8019_v17 }
 0x30b   : > { %7045 = vmatmul.mubr.f32.vlgmr.msra.gmra.mxu1 %v25615_v41  ;;  %7170 = vmatprep.subr.mxu1 %v7169_v24 }
 0x30c   : > { %v1933_v26 = vpop.f32.mrf.mxu0  ;;  %v26615_v6 = vpop.f32.mrf.mxu1  ;;  %6971 = vmatmul.mubr.f32.vlgmr.msra.gmra.mxu0 %v25615_v41  ;;  %7176 = vmatpush1.msra.mxu1 %v7175_v38 }
 0x30d   : > { %29169 = vst [vmem:[#allocation124_spill] sm:$0xff] %v26615_v6  ;;  %v1934_v58 = vadd.f32 %v1933_v26, %v1857_v48  ;;  %7090 = vmatpush1.msra.mxu0 %v26535_v54  ;;  %7209 = vmatprep.mubr.f32.mxu1 %v29117_v46  ;;  %v29170_v48 = vand.u32 4294901760, %v26596_v0 }
 0x30e   : > { %v26622_v62 = vpop.f32.mrf.mxu0  ;;  %7123 = vmatprep.mubr.f32.mxu0 %v29117_v46  ;;  %7249 = vmatprep.subr.mxu0 %v26547_v45  ;;  %v2161_v28 = vpop.f32.mrf.mxu1 }
 0x30f   : > { %7211 = vmatmul.mubr.f32.vlgmr.msra.gmra.mxu1 %v25648_v59  ;;  %7325 = vmatprep.subr.mxu1 %v26531_v14  ;;  %v7650_v38 = vsub.f32 %v26596_v0, %v29170_v48  ;;  %v2010_v10 = vadd.f32 %v2009_v22, %v1934_v58  ;;  %v29172_v22 = vand.u32 4294901760, %v26609_v52 }
 0x310   : > { %v2087_v26 = vpop.f32.mrf.mxu0  ;;  %7129 = vmatmul.mubr.f32.vlgmr.msra.gmra.mxu0 %v25714_v30  ;;  %7327 = vmatpush1.msra.mxu1 %v26535_v54  ;;  %v26648_v48 = vpop.f32.mrf.mxu1  ;;  %v26651_v30 = vsub.f32 %v8021_v55, %v26627_v21 }
 0x311   : > { %7252 = vmatpush1.msra.mxu0 %v26552_v16  ;;  %7360 = vmatprep.mubr.f32.mxu1 %v29117_v46  ;;  %v2088_v24 = vadd.f32 %v2087_v26, %v2010_v10  ;;  %v7656_v58 = vsub.f32 %v26609_v52, %v29172_v22  ;;  %29173 = vst [vmem:[#allocation126_spill] sm:$0xff] %v26648_v48  ;;  %v29174_v10 = vand.u32 4294901760, %v26547_v45  ;;  %v7651_v26 = vand.u32 4294901760, %v7650_v38 }
 0x312   : > { %v26639_v3 = vpop.f32.mrf.mxu0  ;;  %7479 = vmatprep.subr.mxu1 %v26531_v14  ;;  %7285 = vmatprep.mubr.f32.mxu0 %v29117_v46  ;;  %v29175_v22 = vand.u32 4294901760, %v26552_v16  ;;  %v26664_v45 = vsub.f32 %v8019_v17, %v26641_v44  ;;  %v28874_v16 = vand.u32 4294901760, %v26651_v30 }
 0x313   : > { %29171 = vst [vmem:[#allocation125_spill] sm:$0xff] %v26639_v3  ;;  %7364 = vmatmul.mubr.f32.vlgmr.msra.gmra.mxu1 %v25683_v12  ;;  %7403 = vmatprep.subr.mxu0 %v29174_v10  ;;  %v2162_v3 = vadd.f32 %v2161_v28, %v2088_v24 }
 0x314   : > { %v2270_v6 = vpop.f32.mrf.mxu0  ;;  %7481 = vmatpush1.msra.mxu1 %v26535_v54  ;;  %7288 = vmatmul.mubr.f32.vlgmr.msra.gmra.mxu0 %v25666_v5  ;;  %v7657_v54 = vand.u32 4294901760, %v7656_v58  ;;  %v28877_v17 = vand.u32 4294901760, %v26664_v45  ;;  %v8134_v58 = vsub.f32 %v26651_v30, %v28874_v16 }
 0x315   : > { %v2352_v14 = vpop.f32.mrf.mxu1  ;;  %7407 = vmatpush1.msra.mxu0 %v29175_v22  ;;  %7652 = vmatprep.subr.mxu1 %v7651_v26  ;;  %v2166_v12 = vadd.f32 %v2162_v3, %v26244_v39  ;;  %v8965_v3 = vpop.permute.xlu0 %8964 }
 0x316   : > { %v26660_v48 = vpop.f32.mrf.mxu0  ;;  %v2353_v55 = vadd.f32 %v2352_v14, %v2270_v6  ;;  %7570 = vmatprep.subr.mxu0 %v26572_v49  ;;  %7514 = vmatprep.mubr.f32.mxu1 %v29117_v46  ;;  %v8135_v16 = vand.u32 4294901760, %v8134_v58 }
 0x317   : > { %v26668_v28 = vpop.f32.mrf.mxu1  ;;  %7440 = vmatprep.mubr.f32.mxu0 %v29117_v46  ;;  %7516 = vmatmul.mubr.f32.vlgmr.msra.gmra.mxu1 %v25648_v59 }
 0x318   : > { %v2429_v24 = vpop.f32.mrf.mxu0  ;;  %7658 = vmatpush1.msra.mxu1 %v7657_v54  ;;  %7442 = vmatmul.mubr.f32.vlgmr.msra.gmra.mxu0 %v25648_v59  ;;  %v8967_v54 = vpop.permute.xlu1 %8966 }
 0x319   : > { %v2430_v39 = vadd.f32 %v2429_v24, %v2353_v55  ;;  %7572 = vmatpush1.msra.mxu0 %v26588_v4  ;;  %7807 = vmatprep.subr.mxu1 %v26572_v49  ;;  %v29177_v24 = vand.u32 4294901760, %v26596_v0 }
 0x31a   : > { %v26676_v6 = vpop.f32.mrf.mxu0  ;;  %7731 = vmatprep.subr.mxu0 %v26596_v0  ;;  %7691 = vmatprep.mubr.f32.mxu1 %v29117_v46  ;;  %v2505_v38 = vpop.f32.mrf.mxu1 }
 0x31b   : > { %7605 = vmatprep.mubr.f32.mxu0 %v29117_v46  ;;  %7693 = vmatmul.mubr.f32.vlgmr.msra.gmra.mxu1 %v25765_v53  ;;  %v2506_v10 = vadd.f32 %v2505_v38, %v2430_v39  ;;  %v8140_v39 = vsub.f32 %v26664_v45, %v28877_v17 }
 0x31c   : > { %v2583_v26 = vpop.f32.mrf.mxu0  ;;  %7809 = vmatpush1.msra.mxu1 %v26588_v4  ;;  %7611 = vmatmul.mubr.f32.vlgmr.msra.gmra.mxu0 %v25798_v27  ;;  %v26688_v14 = vpop.f32.mrf.mxu1  ;;  %v29179_v27 = vand.u32 4294901760, %v26609_v52 }
 0x31d   : > { %7734 = vmatpush1.msra.mxu0 %v26609_v52  ;;  %7961 = vmatprep.subr.mxu1 %v26572_v49  ;;  %v2584_v22 = vadd.f32 %v2583_v26, %v2506_v10  ;;  %v8963_v26 = vpop.permute.xlu0 %8962  ;;  %v8141_v58 = vand.u32 4294901760, %v8140_v39  ;;  %v9449_v39 = vpop.permute.xlu1 %9448 }
 0x31e   : > { %v26692_v55 = vpop.f32.mrf.mxu0  ;;  %7885 = vmatprep.subr.mxu0 %v29177_v24  ;;  %7842 = vmatprep.mubr.f32.mxu1 %v29117_v46  ;;  %v8969_v24 = vsel %vm3168_vm11, %v8965_v3, %v8967_v54 }
 0x31f   : > { %29176 = vst [vmem:[#allocation127_spill] sm:$0xff] %v26692_v55  ;;  %v2657_v38 = vpop.f32.mrf.mxu1  ;;  %7767 = vmatprep.mubr.f32.mxu0 %v29117_v46  ;;  %7846 = vmatmul.mubr.f32.vlgmr.msra.gmra.mxu1 %v25779_v2  ;;  %v8972_v54 = vsel %vm708_vm4, %v8969_v24, 0 }
 0x320   : > { %v2658_v49 = vadd.f32 %v2657_v38, %v2584_v22  ;;  %7963 = vmatpush1.msra.mxu1 %v26588_v4  ;;  %7770 = vmatmul.mubr.f32.vlgmr.msra.gmra.mxu0 %v25770_v56  ;;  %v8968_v38 = vsel %vm3168_vm11, %v8963_v26, %v8965_v3  ;;  %v26725_v3 = vand.u32 4294901760, %v8972_v54 }
 0x321   : > { %v26704_v10 = vpop.f32.mrf.mxu1  ;;  %v2754_v0 = vpop.f32.mrf.mxu0  ;;  %7889 = vmatpush1.msra.mxu0 %v29179_v27  ;;  %8136 = vmatprep.subr.mxu1 %v8135_v16  ;;  %v8970_v16 = vsel %vm708_vm4, %v8968_v38, 0  ;;  %v29181_v38 = vand.u32 4294901760, %v26651_v30 }
 0x322   : > { %29178 = vst [vmem:[#allocation128_spill] sm:$0xff] %v26704_v10  ;;  %v2662_v17 = vadd.f32 %v2658_v49, %v2166_v12  ;;  %8054 = vmatprep.subr.mxu0 %v26627_v21  ;;  %7996 = vmatprep.mubr.f32.mxu1 %v29117_v46  ;;  %v9451_v2 = vpop.permute.xlu0 %9450 }
 0x323   : > { %v26711_v22 = vpop.f32.mrf.mxu0  ;;  %7922 = vmatprep.mubr.f32.mxu0 %v29117_v46  ;;  %7998 = vmatmul.mubr.f32.vlgmr.msra.gmra.mxu1 %v25765_v53 }
 0x324   : > { %v2836_v4 = vpop.f32.mrf.mxu1  ;;  %8142 = vmatpush1.msra.mxu1 %v8141_v58  ;;  %7924 = vmatmul.mubr.f32.vlgmr.msra.gmra.mxu0 %v25765_v53 }
 0x325   : > { %v2837_v52 = vadd.f32 %v2836_v4, %v2754_v0  ;;  %8056 = vmatpush1.msra.mxu0 %v26641_v44  ;;  %8291 = vmatprep.subr.mxu1 %v26627_v21  ;;  %v29180_v0 = vld [vmem:[#allocation72_spill] sm:$0xff]  ;;  %v26735_v4 = vand.u32 4294901760, %v8970_v16 }
 0x326   : > { %v26720_v12 = vpop.f32.mrf.mxu1  ;;  %8215 = vmatprep.subr.mxu0 %v26651_v30  ;;  %8175 = vmatprep.mubr.f32.mxu1 %v29117_v46  ;;  %v2913_v27 = vpop.f32.mrf.mxu0  ;;  %v9453_v30 = vsel %vm3664_vm12, %v9449_v39, %v9451_v2 }
 0x327   : > { %8089 = vmatprep.mubr.f32.mxu0 %v29117_v46  ;;  %8177 = vmatmul.mubr.f32.vlgmr.msra.gmra.mxu1 %v25786_v7  ;;  %v2914_v49 = vadd.f32 %v2913_v27, %v2837_v52  ;;  %v26743_v27 = vsub.f32 %v8972_v54, %v26725_v3  ;;  %v26754_v54 = vsub.f32 %v8970_v16, %v26735_v4  ;;  %v9456_v2 = vsel %vm708_vm4, %v9453_v30, 0  ;;  %v9928_v30 = vpop.permute.xlu0 %9927 }
 0x328   : > { %8293 = vmatpush1.msra.mxu1 %v26641_v44  ;;  %8095 = vmatmul.mubr.f32.vlgmr.msra.gmra.mxu0 %v29180_v0  ;;  %v26731_v26 = vpop.f32.mrf.mxu0  ;;  %v29183_v0 = vld [vmem:[#allocation70_spill] sm:$0xff] }
 0x329   : > { %v2989_v24 = vpop.f32.mrf.mxu1  ;;  %8218 = vmatpush1.msra.mxu0 %v26664_v45  ;;  %8445 = vmatprep.subr.mxu1 %v26627_v21  ;;  %v29184_v21 = vld [vmem:[#allocation68_spill] sm:$0xff] }
 0x32a   : > { %v2990_v58 = vadd.f32 %v2989_v24, %v2914_v49  ;;  %8369 = vmatprep.subr.mxu0 %v29181_v38  ;;  %8326 = vmatprep.mubr.f32.mxu1 %v29117_v46  ;;  %v9447_v24 = vpop.permute.xlu1 %9446  ;;  %v29185_v38 = vand.u32 4294901760, %v26664_v45 }
 0x32b   : > { %v26740_v52 = vpop.f32.mrf.mxu1  ;;  %8251 = vmatprep.mubr.f32.mxu0 %v29117_v46  ;;  %8330 = vmatmul.mubr.f32.vlgmr.msra.gmra.mxu1 %v29183_v0  ;;  %v3067_v56 = vpop.f32.mrf.mxu0  ;;  %v9452_v45 = vsel %vm3664_vm12, %v9447_v24, %v9449_v39 }
 0x32c   : > { %29182 = vst [vmem:[#allocation129_spill] sm:$0xff] %v26740_v52  ;;  %8447 = vmatpush1.msra.mxu1 %v26641_v44  ;;  %8254 = vmatmul.mubr.f32.vlgmr.msra.gmra.mxu0 %v29184_v21  ;;  %v3068_v49 = vadd.f32 %v3067_v56, %v2990_v58  ;;  %v28882_v56 = vand.u32 4294901760, %v26743_v27  ;;  %v28885_v58 = vand.u32 4294901760, %v26754_v54  ;;  %v9454_v39 = vsel %vm708_vm4, %v9452_v45, 0 }
 0x32d   : > { %8373 = vmatpush1.msra.mxu0 %v29185_v38  ;;  %8603 = vmatprep.subr.mxu1 %v26480_v23  ;;  %v26784_v24 = vand.u32 4294901760, %v9454_v39 }
 0x32e   : > { %8521 = vmatprep.subr.mxu0 %v26393_v33  ;;  %8480 = vmatprep.mubr.f32.mxu1 %v29117_v46  ;;  %v3141_v0 = vpop.f32.mrf.mxu1  ;;  %v9091_v38 = vsub.f32 %v26754_v54, %v28885_v58  ;;  %v9930_v45 = vpop.permute.xlu1 %9929 }
 0x32f   : > { %8406 = vmatprep.mubr.f32.mxu0 %v29117_v46  ;;  %8482 = vmatmul.mubr.f32.vlgmr.msra.gmra.mxu1 %v25786_v7  ;;  %v3142_v44 = vadd.f32 %v3141_v0, %v3068_v49  ;;  %v26772_v0 = vand.u32 4294901760, %v9456_v2  ;;  %v9085_v49 = vsub.f32 %v26743_v27, %v28882_v56  ;;  %v29188_v56 = vld [vmem:[#allocation74_spill] sm:$0xff]  ;;  %v9932_v21 = vsel %vm4148_vm13, %v9928_v30, %v9930_v45  ;;  %v9926_v45 = vpop.permute.xlu0 %9925 }
 0x330   : > { %8609 = vmatpush1.msra.mxu1 %v26504_v25  ;;  %8408 = vmatmul.mubr.f32.vlgmr.msra.gmra.mxu0 %v25786_v7  ;;  %v29189_v7 = vld [vmem:[#allocation73_spill] sm:$0xff]  ;;  %v26801_v58 = vsub.f32 %v9454_v39, %v26784_v24  ;;  %v9931_v39 = vsel %vm4148_vm13, %v9926_v45, %v9928_v30 }
 0x331   : > { %8523 = vmatpush1.msra.mxu0 %v26420_v9  ;;  %8758 = vmatprep.subr.mxu1 %v26393_v33  ;;  %v26767_v16 = vadd.f32 %v3142_v44, %v2662_v17  ;;  %v29187_v17 = vld [vmem:[#allocation76_spill] sm:$0xff]  ;;  %v26792_v44 = vsub.f32 %v9456_v2, %v26772_v0  ;;  %v9092_v2 = vand.u32 4294901760, %v9091_v38  ;;  %v9933_v45 = vsel %vm708_vm4, %v9931_v39, 0 }
 0x332   : > { %8682 = vmatprep.subr.mxu0 %v26415_v50  ;;  %8642 = vmatprep.mubr.f32.mxu1 %v29117_v46  ;;  %v29194_v39 = vand.u32 4294901760, %v26801_v58  ;;  %v26843_v53 = vand.u32 4294901760, %v9933_v45 }
 0x333   : > { %29186 = vst [vmem:[#allocation130_spill] sm:$0xff] %v26767_v16  ;;  %8556 = vmatprep.mubr.f32.mxu0 %v29117_v46  ;;  %8644 = vmatmul.mubr.f32.vlgmr.msra.gmra.mxu1 %v25848_v57  ;;  %v29192_v30 = vand.u32 4294901760, %v26792_v44  ;;  %v29193_v16 = vand.u32 4294901760, %v26743_v27 }
 0x334   : > { %8760 = vmatpush1.msra.mxu1 %v26420_v9  ;;  %8562 = vmatmul.mubr.f32.vlgmr.msra.gmra.mxu0 %v29187_v17  ;;  %v9086_v17 = vand.u32 4294901760, %v9085_v49  ;;  %v26820_v49 = vpop.f32.mrf.mxu0 }
 0x335   : > { %8685 = vmatpush1.msra.mxu0 %v26439_v43  ;;  %8912 = vmatprep.subr.mxu1 %v26393_v33  ;;  %29191 = vst [vmem:[#allocation132_spill] sm:$0xff] %v26820_v49 }
 0x336   : > { %8836 = vmatprep.subr.mxu0 %v26436_v35  ;;  %8793 = vmatprep.mubr.f32.mxu1 %v29117_v46 }
 0x337   : > { %8718 = vmatprep.mubr.f32.mxu0 %v29117_v46  ;;  %8797 = vmatmul.mubr.f32.vlgmr.msra.gmra.mxu1 %v29188_v56  ;;  %v9935_v56 = vsel %vm708_vm4, %v9932_v21, 0  ;;  %v26816_v21 = vpop.f32.mrf.mxu1 }
 0x338   : > { %8914 = vmatpush1.msra.mxu1 %v26420_v9  ;;  %8721 = vmatmul.mubr.f32.vlgmr.msra.gmra.mxu0 %v29189_v7  ;;  %v26814_v38 = vand.u32 4294901760, %v9935_v56  ;;  %29190 = vst [vmem:[#allocation131_spill] sm:$0xff] %v26816_v21  ;;  %v29196_v21 = vld [vmem:[#allocation77_spill] sm:$0xff] }
 0x339   : > { %8840 = vmatpush1.msra.mxu0 %v26465_v63  ;;  %9087 = vmatprep.subr.mxu1 %v9086_v17  ;;  %v10412_v17 = vpop.permute.xlu1 %10411 }
 0x33a   : > { %9005 = vmatprep.subr.mxu0 %v26725_v3  ;;  %8947 = vmatprep.mubr.f32.mxu1 %v29117_v46  ;;  %v26833_v7 = vsub.f32 %v9935_v56, %v26814_v38 }
 0x33b   : > { %8873 = vmatprep.mubr.f32.mxu0 %v29117_v46  ;;  %8949 = vmatmul.mubr.f32.vlgmr.msra.gmra.mxu1 %v25848_v57 }
 0x33c   : > { %9093 = vmatpush1.msra.mxu1 %v9092_v2  ;;  %8875 = vmatmul.mubr.f32.vlgmr.msra.gmra.mxu0 %v25848_v57  ;;  %v9569_v2 = vsub.f32 %v26792_v44, %v29192_v30  ;;  %v26835_v57 = vpop.f32.mrf.mxu1  ;;  %v9575_v30 = vsub.f32 %v26801_v58, %v29194_v39 }
 0x33d   : > { %9007 = vmatpush1.msra.mxu0 %v26735_v4  ;;  %9242 = vmatprep.subr.mxu1 %v26725_v3  ;;  %v10410_v10 = vpop.permute.xlu1 %10409 }
 0x33e   : > { %9166 = vmatprep.subr.mxu0 %v26743_v27  ;;  %9126 = vmatprep.mubr.f32.mxu1 %v29117_v46  ;;  %v9570_v56 = vand.u32 4294901760, %v9569_v2  ;;  %v10414_v27 = vpop.permute.xlu0 %10413  ;;  %v26854_v49 = vpop.f32.mrf.mxu1  ;;  %v28892_v2 = vand.u32 4294901760, %v26833_v7 }
 0x33f   : > { %9040 = vmatprep.mubr.f32.mxu0 %v29117_v46  ;;  %9128 = vmatmul.mubr.f32.vlgmr.msra.gmra.mxu1 %v25933_v29  ;;  %v10416_v39 = vsel %vm4644_vm14, %v10412_v17, %v10414_v27 }
 0x340   : > { %9244 = vmatpush1.msra.mxu1 %v26735_v4  ;;  %9046 = vmatmul.mubr.f32.vlgmr.msra.gmra.mxu0 %v26021_v47  ;;  %v26845_v47 = vpop.f32.mrf.mxu0 }
 0x341   : > { %9169 = vmatpush1.msra.mxu0 %v26754_v54  ;;  %9396 = vmatprep.subr.mxu1 %v26725_v3  ;;  %v29195_v3 = vld [vmem:[#allocation78_spill] sm:$0xff] }
 0x342   : > { %9320 = vmatprep.subr.mxu0 %v29193_v16  ;;  %9277 = vmatprep.mubr.f32.mxu1 %v29117_v46  ;;  %v29197_v16 = vand.u32 4294901760, %v26754_v54  ;;  %v10419_v54 = vsel %vm708_vm4, %v10416_v39, 0  ;;  %v29200_v39 = vld [vmem:[#allocation84_spill] sm:$0xff] }
 0x343   : > { %9202 = vmatprep.mubr.f32.mxu0 %v29117_v46  ;;  %9281 = vmatmul.mubr.f32.vlgmr.msra.gmra.mxu1 %v29195_v3  ;;  %v9576_v3 = vand.u32 4294901760, %v9575_v30  ;;  %v26871_v30 = vpop.f32.mrf.mxu1 }
 0x344   : > { %9398 = vmatpush1.msra.mxu1 %v26735_v4  ;;  %9205 = vmatmul.mubr.f32.vlgmr.msra.gmra.mxu0 %v29196_v21  ;;  %v26860_v4 = vsub.f32 %v9933_v45, %v26843_v53  ;;  %v26862_v21 = vpop.f32.mrf.mxu0  ;;  %29198 = vst [vmem:[#allocation133_spill] sm:$0xff] %v26871_v30  ;;  %v10048_v45 = vsub.f32 %v26833_v7, %v28892_v2 }
 0x345   : > { %9324 = vmatpush1.msra.mxu0 %v29197_v16  ;;  %9571 = vmatprep.subr.mxu1 %v9570_v56  ;;  %v10415_v56 = vsel %vm4644_vm14, %v10410_v10, %v10412_v17  ;;  %v29199_v10 = vld [vmem:[#allocation79_spill] sm:$0xff]  ;;  %v26883_v17 = vand.u32 4294901760, %v10419_v54  ;;  %v26890_v2 = vpop.f32.mrf.mxu1 }
 0x346   : > { %9489 = vmatprep.subr.mxu0 %v26772_v0  ;;  %9431 = vmatprep.mubr.f32.mxu1 %v29117_v46  ;;  %v26879_v27 = vpop.f32.mrf.mxu0  ;;  %v10417_v16 = vsel %vm708_vm4, %v10415_v56, 0  ;;  %29201 = vst [vmem:[#allocation134_spill] sm:$0xff] %v26890_v2  ;;  %v10049_v5 = vand.u32 4294901760, %v10048_v45  ;;  %v29204_v2 = vld [vmem:[#allocation81_spill] sm:$0xff] }
 0x347   : > { %9357 = vmatprep.mubr.f32.mxu0 %v29117_v46  ;;  %9433 = vmatmul.mubr.f32.vlgmr.msra.gmra.mxu1 %v25933_v29  ;;  %v26894_v30 = vand.u32 4294901760, %v10417_v16 }
 0x348   : > { %9577 = vmatpush1.msra.mxu1 %v9576_v3  ;;  %9359 = vmatmul.mubr.f32.vlgmr.msra.gmra.mxu0 %v25933_v29  ;;  %v10053_v3 = vand.u32 4294901760, %v26860_v4  ;;  %v29202_v29 = vand.u32 4294901760, %v26792_v44  ;;  %v26896_v55 = vpop.f32.mrf.mxu0 }
 0x349   : > { %9491 = vmatpush1.msra.mxu0 %v26784_v24  ;;  %9726 = vmatprep.subr.mxu1 %v26772_v0  ;;  %v26913_v45 = vsub.f32 %v10417_v16, %v26894_v30 }
 0x34a   : > { %9650 = vmatprep.subr.mxu0 %v26792_v44  ;;  %9610 = vmatprep.mubr.f32.mxu1 %v29117_v46  ;;  %v10054_v56 = vsub.f32 %v26860_v4, %v10053_v3  ;;  %v26909_v44 = vpop.f32.mrf.mxu1  ;;  %v26915_v52 = vpop.f32.mrf.mxu0 }
 0x34b   : > { %9524 = vmatprep.mubr.f32.mxu0 %v29117_v46  ;;  %9612 = vmatmul.mubr.f32.vlgmr.msra.gmra.mxu1 %v29199_v10  ;;  %29206 = vst [vmem:[#allocation135_spill] sm:$0xff] %v26909_v44  ;;  %v29212_v44 = vld [vmem:[#allocation85_spill] sm:$0xff] }
 0x34c   : > { %9728 = vmatpush1.msra.mxu1 %v26784_v24  ;;  %9530 = vmatmul.mubr.f32.vlgmr.msra.gmra.mxu0 %v29200_v39  ;;  %v26902_v39 = vsub.f32 %v10419_v54, %v26883_v17  ;;  %v10055_v54 = vand.u32 4294901760, %v10054_v56  ;;  %v26928_v16 = vpop.f32.mrf.mxu0  ;;  %v29208_v56 = vld [vmem:[#allocation83_spill] sm:$0xff] }
 0x34d   : > { %9653 = vmatpush1.msra.mxu0 %v26801_v58  ;;  %9880 = vmatprep.subr.mxu1 %v26772_v0  ;;  %v29203_v0 = vld [vmem:[#allocation82_spill] sm:$0xff] }
 0x34e   : > { %9804 = vmatprep.subr.mxu0 %v29202_v29  ;;  %9761 = vmatprep.mubr.f32.mxu1 %v29117_v46  ;;  %v29205_v29 = vand.u32 4294901760, %v26801_v58  ;;  %v10531_v58 = vand.u32 4294901760, %v26902_v39 }
 0x34f   : > { %9686 = vmatprep.mubr.f32.mxu0 %v29117_v46  ;;  %9765 = vmatmul.mubr.f32.vlgmr.msra.gmra.mxu1 %v29203_v0  ;;  %v29210_v0 = vand.u32 4294901760, %v26833_v7 }
 0x350   : > { %9689 = vmatmul.mubr.f32.vlgmr.msra.gmra.mxu0 %v29204_v2  ;;  %9882 = vmatpush1.msra.mxu1 %v26784_v24  ;;  %v10537_v24 = vand.u32 4294901760, %v26913_v45 }
 0x351   : > { %9808 = vmatpush1.msra.mxu0 %v29205_v29  ;;  %10050 = vmatprep.subr.mxu1 %v10049_v5  ;;  %v26923_v5 = vpop.f32.mrf.mxu1  ;;  %v29209_v29 = vld [vmem:[#allocation87_spill] sm:$0xff] }
 0x352   : > { %9968 = vmatprep.subr.mxu0 %v26814_v38  ;;  %9915 = vmatprep.mubr.f32.mxu1 %v29117_v46  ;;  %29207 = vst [vmem:[#allocation136_spill] sm:$0xff] %v26923_v5  ;;  %v29211_v5 = vld [vmem:[#allocation86_spill] sm:$0xff] }
 0x353   : > { %9841 = vmatprep.mubr.f32.mxu0 %v29117_v46  ;;  %9917 = vmatmul.mubr.f32.vlgmr.msra.gmra.mxu1 %v29199_v10  ;;  %v26937_v2 = vpop.f32.mrf.mxu1 }
 0x354   : > { %9843 = vmatmul.mubr.f32.vlgmr.msra.gmra.mxu0 %v29199_v10  ;;  %10056 = vmatpush1.msra.mxu1 %v10055_v54  ;;  %v10532_v54 = vsub.f32 %v26902_v39, %v10531_v58  ;;  %v26942_v10 = vpop.f32.mrf.mxu0 }
 0x355   : > { %9970 = vmatpush1.msra.mxu0 %v26843_v53  ;;  %10205 = vmatprep.subr.mxu1 %v26814_v38 }
 0x356   : > { %10129 = vmatprep.subr.mxu0 %v26833_v7  ;;  %10089 = vmatprep.mubr.f32.mxu1 %v29117_v46  ;;  %v26953_v7 = vpop.f32.mrf.mxu0 }
 0x357   : > { %10003 = vmatprep.mubr.f32.mxu0 %v29117_v46  ;;  %10091 = vmatmul.mubr.f32.vlgmr.msra.gmra.mxu1 %v29208_v56 }
 0x358   : > { %10009 = vmatmul.mubr.f32.vlgmr.msra.gmra.mxu0 %v29209_v29  ;;  %10207 = vmatpush1.msra.mxu1 %v26843_v53  ;;  %v10538_v29 = vsub.f32 %v26913_v45, %v10537_v24 }
 0x359   : > { %10132 = vmatpush1.msra.mxu0 %v26860_v4  ;;  %10359 = vmatprep.subr.mxu1 %v26814_v38  ;;  %v10533_v4 = vand.u32 4294901760, %v10532_v54  ;;  %v26950_v38 = vpop.f32.mrf.mxu1 }
 0x35a   : > { %10283 = vmatprep.subr.mxu0 %v29210_v0  ;;  %10240 = vmatprep.mubr.f32.mxu1 %v29117_v46  ;;  %v10539_v0 = vand.u32 4294901760, %v10538_v29  ;;  %v11834_v29 = vpop.permute.xlu0 %11833 }
 0x35b   : > { %10165 = vmatprep.mubr.f32.mxu0 %v29117_v46  ;;  %10244 = vmatmul.mubr.f32.vlgmr.msra.gmra.mxu1 %v29211_v5 }
 0x35c   : > { %10168 = vmatmul.mubr.f32.vlgmr.msra.gmra.mxu0 %v29212_v44  ;;  %10361 = vmatpush1.msra.mxu1 %v26843_v53  ;;  %v26960_v53 = vpop.f32.mrf.mxu1  ;;  %v29229_v44 = vld [vmem:[#allocation89_spill] sm:$0xff] }
 0x35d   : > { %10287 = vmatpush1.msra.mxu0 %v10053_v3  ;;  %10534 = vmatprep.subr.mxu1 %v10533_v4  ;;  %v26964_v3 = vpop.f32.mrf.mxu0 }
 0x35e   : > { %10452 = vmatprep.subr.mxu0 %v26883_v17  ;;  %10394 = vmatprep.mubr.f32.mxu1 %v29117_v46  ;;  %v26972_v54 = vpop.f32.mrf.mxu1 }
 0x35f   : > { %10320 = vmatprep.mubr.f32.mxu0 %v29117_v46  ;;  %10396 = vmatmul.mubr.f32.vlgmr.msra.gmra.mxu1 %v29208_v56  ;;  %v26975_v4 = vpop.f32.mrf.mxu0 }
 0x360   : > { %10322 = vmatmul.mubr.f32.vlgmr.msra.gmra.mxu0 %v29208_v56  ;;  %10540 = vmatpush1.msra.mxu1 %v10539_v0 }
 0x361   : > { %10454 = vmatpush1.msra.mxu0 %v26894_v30  ;;  %10689 = vmatprep.subr.mxu1 %v26883_v17 }
 0x362   : > { %10613 = vmatprep.subr.mxu0 %v26902_v39  ;;  %10573 = vmatprep.mubr.f32.mxu1 %v29117_v46  ;;  %v11836_v39 = vpop.permute.xlu1 %11835 }
 0x363   : > { %10487 = vmatprep.mubr.f32.mxu0 %v29117_v46  ;;  %10575 = vmatmul.mubr.f32.vlgmr.msra.gmra.mxu1 %v26278_v61  ;;  %v11838_v0 = vsel %vm2672_vm10, %v11834_v29, %v11836_v39  ;;  %v11832_v39 = vpop.permute.xlu0 %11831 }
 0x364   : > { %10493 = vmatmul.mubr.f32.vlgmr.msra.gmra.mxu0 %v26313_v42  ;;  %10691 = vmatpush1.msra.mxu1 %v26894_v30 }
 0x365   : > { %10616 = vmatpush1.msra.mxu0 %v26913_v45  ;;  %10843 = vmatprep.subr.mxu1 %v26883_v17  ;;  %v26983_v45 = vpop.f32.mrf.mxu1  ;;  %v11841_v17 = vsel %vm708_vm4, %v11838_v0, 0 }
 0x366   : > { %10767 = vmatprep.subr.mxu0 %v10531_v58  ;;  %10724 = vmatprep.mubr.f32.mxu1 %v29117_v46  ;;  %29213 = vst [vmem:[#allocation137_spill] sm:$0xff] %v26983_v45  ;;  %v26988_v58 = vpop.f32.mrf.mxu0 }
 0x367   : > { %10649 = vmatprep.mubr.f32.mxu0 %v29117_v46  ;;  %10728 = vmatmul.mubr.f32.vlgmr.msra.gmra.mxu1 %v26291_v15  ;;  %29214 = vst [vmem:[#allocation138_spill] sm:$0xff] %v26988_v58 }
 0x368   : > { %10652 = vmatmul.mubr.f32.vlgmr.msra.gmra.mxu0 %v26285_v36  ;;  %10845 = vmatpush1.msra.mxu1 %v26894_v30  ;;  %v11837_v30 = vsel %vm2672_vm10, %v11832_v39, %v11834_v29  ;;  %v27003_v0 = vpop.f32.mrf.mxu0 }
 0x369   : > { %10771 = vmatpush1.msra.mxu0 %v10537_v24  ;;  %11007 = vmatprep.subr.mxu1 %v25948_v51  ;;  %v26997_v51 = vand.u32 4294901760, %v11841_v17  ;;  %v26999_v24 = vpop.f32.mrf.mxu1  ;;  %29217 = vst [vmem:[#allocation141_spill] sm:$0xff] %v27003_v0  ;;  %v11839_v29 = vsel %vm708_vm4, %v11837_v30, 0  ;;  %v12322_v30 = vpop.permute.xlu0 %12321 }
 0x36a   : > { %10925 = vmatprep.subr.mxu0 %v25852_v60  ;;  %10878 = vmatprep.mubr.f32.mxu1 %v29117_v46  ;;  %29216 = vst [vmem:[#allocation140_spill] sm:$0xff] %v26999_v24  ;;  %v27019_v36 = vand.u32 4294901760, %v11839_v29  ;;  %v27021_v15 = vpop.f32.mrf.mxu0 }
 0x36b   : > { %10804 = vmatprep.mubr.f32.mxu0 %v29117_v46  ;;  %10880 = vmatmul.mubr.f32.vlgmr.msra.gmra.mxu1 %v26278_v61  ;;  %29215 = vst [vmem:[#allocation139_spill] sm:$0xff] %v26997_v51  ;;  %v27015_v39 = vpop.f32.mrf.mxu1 }
 0x36c   : > { %10806 = vmatmul.mubr.f32.vlgmr.msra.gmra.mxu0 %v26278_v61  ;;  %11013 = vmatpush1.msra.mxu1 %v25952_v1  ;;  %v27013_v1 = vsub.f32 %v11841_v17, %v26997_v51  ;;  %29219 = vst [vmem:[#allocation143_spill] sm:$0xff] %v27019_v36  ;;  %v27038_v17 = vsub.f32 %v11839_v29, %v27019_v36 }
 0x36d   : > { %10927 = vmatpush1.msra.mxu0 %v25866_v8  ;;  %11162 = vmatprep.subr.mxu1 %v25852_v60 }
 0x36e   : > { %11086 = vmatprep.subr.mxu0 %v25872_v13  ;;  %11046 = vmatprep.mubr.f32.mxu1 %v29117_v46  ;;  %29218 = vst [vmem:[#allocation142_spill] sm:$0xff] %v27013_v1  ;;  %v12320_v13 = vpop.permute.xlu1 %12319  ;;  %29221 = vst [vmem:[#allocation145_spill] sm:$0xff] %v27038_v17 }
 0x36f   : > { %10960 = vmatprep.mubr.f32.mxu0 %v29117_v46  ;;  %11048 = vmatmul.mubr.f32.vlgmr.msra.gmra.mxu1 %v26301_v19 }
 0x370   : > { %10966 = vmatmul.mubr.f32.vlgmr.msra.gmra.mxu0 %v26371_v31  ;;  %11164 = vmatpush1.msra.mxu1 %v25866_v8 }
 0x371   : > { %11089 = vmatpush1.msra.mxu0 %v25880_v20  ;;  %11316 = vmatprep.subr.mxu1 %v25852_v60  ;;  %v12324_v20 = vsel %vm702_vm3, %v12320_v13, %v12322_v30  ;;  %v27030_v60 = vpop.f32.mrf.mxu1 }
 0x372   : > { %11240 = vmatprep.subr.mxu0 %v25902_v18  ;;  %11197 = vmatprep.mubr.f32.mxu1 %v29117_v46  ;;  %v27035_v18 = vand.u32 4294901760, %v27013_v1  ;;  %v12327_v30 = vsel %vm708_vm4, %v12324_v20, 0 }
 0x373   : > { %11122 = vmatprep.mubr.f32.mxu0 %v29117_v46  ;;  %11201 = vmatmul.mubr.f32.vlgmr.msra.gmra.mxu1 %v26344_v32  ;;  %v27041_v32 = vpop.f32.mrf.mxu0  ;;  %v27052_v20 = vand.u32 4294901760, %v12327_v30 }
 0x374   : > { %11125 = vmatmul.mubr.f32.vlgmr.msra.gmra.mxu0 %v26324_v37  ;;  %11318 = vmatpush1.msra.mxu1 %v25866_v8  ;;  %29220 = vst [vmem:[#allocation144_spill] sm:$0xff] %v27035_v18  ;;  %v12318_v8 = vpop.permute.xlu1 %12317  ;;  %v29223_v37 = vld [vmem:[#allocation90_spill] sm:$0xff] }
 0x375   : > { %11244 = vmatpush1.msra.mxu0 %v25909_v40  ;;  %11474 = vmatprep.subr.mxu1 %v26480_v23  ;;  %v29222_v40 = vld [vmem:[#allocation88_spill] sm:$0xff]  ;;  %v12323_v29 = vsel %vm702_vm3, %v12318_v8, %v12320_v13  ;;  %v27054_v23 = vpop.f32.mrf.mxu1  ;;  %v27060_v42 = vpop.f32.mrf.mxu0  ;;  %v29226_v8 = vld [vmem:[#allocation106_spill] sm:$0xff]  ;;  %v27076_v56 = vsub.f32 %v12327_v30, %v27052_v20  ;;  %v29233_v30 = vld [vmem:[#allocation107_spill] sm:$0xff] }
 0x376   : > { %11392 = vmatprep.subr.mxu0 %v26393_v33  ;;  %11351 = vmatprep.mubr.f32.mxu1 %v29117_v46  ;;  %v871_v31 = vadd.f32 %v29223_v37, %v29222_v40  ;;  %29224 = vst [vmem:[#allocation88_spill] sm:$0xff] %v27054_v23  ;;  %v27065_v37 = vand.u32 4294901760, %v27038_v17  ;;  %v12325_v13 = vsel %vm708_vm4, %v12323_v29, 0  ;;  %v29227_v40 = vld [vmem:[#allocation115_spill] sm:$0xff] }
 0x377   : > { %11277 = vmatprep.mubr.f32.mxu0 %v29117_v46  ;;  %11353 = vmatmul.mubr.f32.vlgmr.msra.gmra.mxu1 %v26301_v19  ;;  %v27078_v24 = vpop.f32.mrf.mxu1 }
 0x378   : > { %11279 = vmatmul.mubr.f32.vlgmr.msra.gmra.mxu0 %v26301_v19  ;;  %11480 = vmatpush1.msra.mxu1 %v26504_v25  ;;  %v11954_v19 = vsub.f32 %v27013_v1, %v27035_v18  ;;  %29225 = vst [vmem:[#allocation90_spill] sm:$0xff] %v27065_v37  ;;  %v24444_v25 = vld [vmem:[%s25535_s0] sm:$0xff]  ;;  %v948_v5 = vadd.f32 %v29229_v44, %v871_v31  ;;  %29230 = vst [vmem:[#allocation89_spill] sm:$0xff] %v27078_v24  ;;  %s29471_s0 = sld [smem:[#allocation43_spill]] }
 0x379   : > { %11394 = vmatpush1.msra.mxu0 %v26420_v9  ;;  %11629 = vmatprep.subr.mxu1 %v26393_v33  ;;  %v11960_v31 = vsub.f32 %v27038_v17, %v27065_v37  ;;  %v29232_v44 = vld [vmem:[#allocation109_spill] sm:$0xff] }
 0x37a   : > { %11553 = vmatprep.subr.mxu0 %v26415_v50  ;;  %11513 = vmatprep.mubr.f32.mxu1 %v29117_v46  ;;  %v29228_v50 = vld [vmem:[#allocation57_spill] sm:$0xff]  ;;  %v27082_v29 = vand.u32 4294901760, %v11954_v19  ;;  %v27097_v19 = vpop.f32.mrf.mxu1 }
 0x37b   : > { %11427 = vmatprep.mubr.f32.mxu0 %v29117_v46  ;;  %11515 = vmatmul.mubr.f32.vlgmr.msra.gmra.mxu1 %v29226_v8  ;;  %v12316_v61 = vmul.f32 %v24444_v25, %v29228_v50  ;;  %v27086_v25 = vpop.f32.mrf.mxu0 }
 0x37c   : > { %11433 = vmatmul.mubr.f32.vlgmr.msra.gmra.mxu0 %v29227_v40  ;;  %11631 = vmatpush1.msra.mxu1 %v26420_v9  ;;  %29231 = vst [vmem:[#allocation146_spill] sm:$0xff] %v27082_v29  ;;  %v27084_v40 = vand.u32 4294901760, %v12325_v13 }
 0x37d   : > { %11556 = vmatpush1.msra.mxu0 %v26439_v43  ;;  %11783 = vmatprep.subr.mxu1 %v26393_v33  ;;  %v12795_v50 = vcombine.high %v12316_v61, %v12316_v61  ;;  %v29234_v43 = vld [vmem:[#allocation91_spill] sm:$0xff]  ;;  %v28932_v33 = vand.u32 4294901760, %v27076_v56 }
 0x37e   : > { %11707 = vmatprep.subr.mxu0 %v26436_v35  ;;  %11664 = vmatprep.mubr.f32.mxu1 %v29117_v46  ;;  %v1024_v35 = vadd.f32 %v29234_v43, %v948_v5  ;;  %29235 = vst [vmem:[#allocation91_spill] sm:$0xff] %v27097_v19  ;;  %v27103_v45 = vsub.f32 %v12325_v13, %v27084_v40  ;;  %v27109_v43 = vand.u32 4294901760, %v11960_v31  ;;  %v27117_v13 = vpop.f32.mrf.mxu1  ;;  %s24119_s7 = sshll.u32 %s29471_s0, 4  ;;  %s29473_s0 = smov %s29472_s23 }
 0x37f   : > { %11589 = vmatprep.mubr.f32.mxu0 %v29117_v46  ;;  %11668 = vmatmul.mubr.f32.vlgmr.msra.gmra.mxu1 %v29232_v44  ;;  %v27105_v44 = vpop.f32.mrf.mxu0  ;;  %v12798_v5 = vsel %vm708_vm4, %v12795_v50, 0  ;;  %v12440_v31 = vsub.f32 %v27076_v56, %v28932_v33  ;;  %v29243_v33 = vld [vmem:[#allocation93_spill] sm:$0xff] }
 0x380   : > { %11592 = vmatmul.mubr.f32.vlgmr.msra.gmra.mxu0 %v29233_v30  ;;  %11785 = vmatpush1.msra.mxu1 %v26420_v9  ;;  %29236 = vst [vmem:[#allocation147_spill] sm:$0xff] %v27105_v44  ;;  %29237 = vst [vmem:[#allocation148_spill] sm:$0xff] %v27109_v43  ;;  %v29238_v30 = vld [vmem:[#allocation92_spill] sm:$0xff]  ;;  %v13273_v9 = vpop.permute.xlu0 %13272 }
 0x381   : > { %11711 = vmatpush1.msra.mxu0 %v26465_v63  ;;  %11956 = vmatprep.subr.mxu1 %v27082_v29  ;;  %v1102_v63 = vadd.f32 %v29238_v30, %v1024_v35  ;;  %29239 = vst [vmem:[#allocation92_spill] sm:$0xff] %v27117_v13  ;;  %v27126_v35 = vpop.f32.mrf.mxu0  ;;  %v27130_v30 = vand.u32 4294901760, %v12798_v5  ;;  %v12441_v19 = vand.u32 4294901760, %v12440_v31  ;;  %v29247_v31 = vld [vmem:[#allocation94_spill] sm:$0xff] }
 0x382   : > { %11874 = vmatprep.subr.mxu0 %v26997_v51  ;;  %11818 = vmatprep.mubr.f32.mxu1 %v29117_v46  ;;  %29240 = vst [vmem:[#allocation149_spill] sm:$0xff] %v27126_v35 }
 0x383   : > { %11744 = vmatprep.mubr.f32.mxu0 %v29117_v46  ;;  %11820 = vmatmul.mubr.f32.vlgmr.msra.gmra.mxu1 %v29226_v8  ;;  %v1176_v13 = vadd.f32 %v29243_v33, %v1102_v63  ;;  %v29244_v33 = vand.u32 4294901760, %v27103_v45  ;;  %v27155_v44 = vsub.f32 %v12798_v5, %v27130_v30 }
 0x384   : > { %11746 = vmatmul.mubr.f32.vlgmr.msra.gmra.mxu0 %v29226_v8  ;;  %11962 = vmatpush1.msra.mxu1 %v27109_v43  ;;  %v12796_v8 = vsel %vm708_vm4, %v12316_v61, 0  ;;  %v29241_v43 = vld [vmem:[#allocation114_spill] sm:$0xff]  ;;  %v13271_v24 = vpop.permute.xlu0 %13270 }
 0x385   : > { %11876 = vmatpush1.msra.mxu0 %v27019_v36  ;;  %12111 = vmatprep.subr.mxu1 %v26997_v51  ;;  %v27141_v50 = vand.u32 4294901760, %v12796_v8  ;;  %v12446_v63 = vsub.f32 %v27103_v45, %v29244_v33  ;;  %v1262_v0 = vadd.f32 %v29247_v31, %v1176_v13 }
 0x386   : > { %12035 = vmatprep.subr.mxu0 %v27013_v1  ;;  %11995 = vmatprep.mubr.f32.mxu1 %v29117_v46  ;;  %v29242_v1 = vld [vmem:[#allocation121_spill] sm:$0xff] }
 0x387   : > { %11909 = vmatprep.mubr.f32.mxu0 %v29117_v46  ;;  %11997 = vmatmul.mubr.f32.vlgmr.msra.gmra.mxu1 %v29241_v43  ;;  %v27163_v58 = vsub.f32 %v12796_v8, %v27141_v50  ;;  %v12447_v13 = vand.u32 4294901760, %v12446_v63 }
 0x388   : > { %11915 = vmatmul.mubr.f32.vlgmr.msra.gmra.mxu0 %v29242_v1  ;;  %v27134_v29 = vpop.f32.mrf.mxu1  ;;  %12113 = vmatpush1.msra.mxu1 %v27019_v36  ;;  %v13275_v1 = vpop.permute.xlu1 %13274 }
 0x389   : > { %12038 = vmatpush1.msra.mxu0 %v27038_v17  ;;  %12265 = vmatprep.subr.mxu1 %v26997_v51  ;;  %v29245_v51 = vld [vmem:[#allocation119_spill] sm:$0xff]  ;;  %v13277_v33 = vsel %vm1692_vm7, %v13273_v9, %v13275_v1 }
 0x38a   : > { %v27139_v61 = vpop.f32.mrf.mxu0  ;;  %12189 = vmatprep.subr.mxu0 %v27035_v18  ;;  %v27145_v35 = vpop.f32.mrf.mxu1  ;;  %12146 = vmatprep.mubr.f32.mxu1 %v29117_v46  ;;  %v29246_v18 = vld [vmem:[#allocation117_spill] sm:$0xff] }
 0x38b   : > { %12071 = vmatprep.mubr.f32.mxu0 %v29117_v46  ;;  %12150 = vmatmul.mubr.f32.vlgmr.msra.gmra.mxu1 %v29245_v51 }
 0x38c   : > { %v27152_v17 = vpop.f32.mrf.mxu0  ;;  %12074 = vmatmul.mubr.f32.vlgmr.msra.gmra.mxu0 %v29246_v18  ;;  %12267 = vmatpush1.msra.mxu1 %v27019_v36  ;;  %v13276_v18 = vsel %vm1692_vm7, %v13271_v24, %v13273_v9  ;;  %v13280_v36 = vsel %vm708_vm4, %v13277_v33, 0  ;;  %v1859_v9 = vadd.f32 %v26593_v11, %v26600_v34  ;;  %v13757_v24 = vpop.permute.xlu1 %13756  ;;  %v29253_v33 = vand.u32 4294901760, %v27155_v44  ;;  %v29254_v34 = vld [vmem:[#allocation60_spill] sm:$0xff] }
 0x38d   : > { %12193 = vmatpush1.msra.mxu0 %v27065_v37  ;;  %12442 = vmatprep.subr.mxu1 %v12441_v19  ;;  %v29251_v19 = vld [vmem:[#allocation95_spill] sm:$0xff]  ;;  %v13278_v31 = vsel %vm708_vm4, %v13276_v18, 0  ;;  %v29256_v18 = vld [vmem:[#allocation96_spill] sm:$0xff] }
 0x38e   : > { %12360 = vmatprep.subr.mxu0 %v27052_v20  ;;  %v27167_v5 = vpop.f32.mrf.mxu1  ;;  %12300 = vmatprep.mubr.f32.mxu1 %v29117_v46  ;;  %v1344_v37 = vadd.f32 %v29251_v19, %v1262_v0  ;;  %v27197_v19 = vand.u32 4294901760, %v13280_v36  ;;  %v1936_v11 = vadd.f32 %v26622_v62, %v1859_v9  ;;  %v2355_v62 = vadd.f32 %v26668_v28, %v26660_v48  ;;  %v29262_v48 = vld [vmem:[#allocation59_spill] sm:$0xff]  ;;  %v29263_v28 = vld [vmem:[#allocation58_spill] sm:$0xff] }
 0x38f   : > { %29248 = vst [vmem:[#allocation93_spill] sm:$0xff] %v27167_v5  ;;  %v27169_v51 = vpop.f32.mrf.mxu0  ;;  %12226 = vmatprep.mubr.f32.mxu0 %v29117_v46  ;;  %12302 = vmatmul.mubr.f32.vlgmr.msra.gmra.mxu1 %v29241_v43  ;;  %v27212_v5 = vand.u32 4294901760, %v13278_v31  ;;  %v29259_v9 = vand.u32 4294901760, %v27076_v56 }
 0x390   : > { %12228 = vmatmul.mubr.f32.vlgmr.msra.gmra.mxu0 %v29241_v43  ;;  %v27177_v1 = vpop.f32.mrf.mxu1  ;;  %12448 = vmatpush1.msra.mxu1 %v12447_v13  ;;  %v12911_v13 = vsub.f32 %v27155_v44, %v29253_v33  ;;  %v1421_v43 = vadd.f32 %v29256_v18, %v1344_v37  ;;  %v29258_v33 = vand.u32 4294901760, %v27163_v58 }
 0x391   : > { %29249 = vst [vmem:[#allocation94_spill] sm:$0xff] %v27177_v1  ;;  %v27179_v8 = vpop.f32.mrf.mxu0  ;;  %12362 = vmatpush1.msra.mxu0 %v27084_v40  ;;  %12597 = vmatprep.subr.mxu1 %v27052_v20 }
 0x392   : > { %29250 = vst [vmem:[#allocation150_spill] sm:$0xff] %v27179_v8  ;;  %12521 = vmatprep.subr.mxu0 %v27076_v56  ;;  %12481 = vmatprep.mubr.f32.mxu1 %v29117_v46  ;;  %v12917_v1 = vsub.f32 %v27163_v58, %v29258_v33  ;;  %v12912_v18 = vand.u32 4294901760, %v12911_v13  ;;  %v13759_v33 = vpop.permute.xlu0 %13758  ;;  %v29264_v56 = vld [vmem:[#allocation97_spill] sm:$0xff]  ;;  %v29265_v13 = vand.u32 4294901760, %v27103_v45 }
 0x393   : > { %12395 = vmatprep.mubr.f32.mxu0 %v29117_v46  ;;  %v27192_v0 = vpop.f32.mrf.mxu1  ;;  %12483 = vmatmul.mubr.f32.vlgmr.msra.gmra.mxu1 %v25615_v41 }
 0x394   : > { %29252 = vst [vmem:[#allocation95_spill] sm:$0xff] %v27192_v0  ;;  %12401 = vmatmul.mubr.f32.vlgmr.msra.gmra.mxu0 %v29254_v34  ;;  %v27202_v63 = vpop.f32.mrf.mxu0  ;;  %12599 = vmatpush1.msra.mxu1 %v27084_v40  ;;  %v27224_v34 = vsub.f32 %v13280_v36, %v27197_v19  ;;  %v12918_v36 = vand.u32 4294901760, %v12917_v1 }
 0x395   : > { %29255 = vst [vmem:[#allocation151_spill] sm:$0xff] %v27202_v63  ;;  %12524 = vmatpush1.msra.mxu0 %v27103_v45  ;;  %v27207_v0 = vpop.f32.mrf.mxu1  ;;  %12751 = vmatprep.subr.mxu1 %v27052_v20  ;;  %v29261_v63 = vld [vmem:[#allocation124_spill] sm:$0xff]  ;;  %v1497_v20 = vadd.f32 %v29264_v56, %v1421_v43  ;;  %v2432_v43 = vadd.f32 %v26676_v6, %v2355_v62  ;;  %v29266_v6 = vld [vmem:[#allocation125_spill] sm:$0xff] }
 0x396   : > { %29257 = vst [vmem:[#allocation96_spill] sm:$0xff] %v27207_v0  ;;  %12675 = vmatprep.subr.mxu0 %v29259_v9  ;;  %v27219_v37 = vpop.f32.mrf.mxu0  ;;  %12632 = vmatprep.mubr.f32.mxu1 %v29117_v46  ;;  %v13755_v0 = vpop.permute.xlu1 %13754  ;;  %v2012_v8 = vadd.f32 %v29261_v63, %v1936_v11  ;;  %v2839_v9 = vadd.f32 %v26720_v12, %v26711_v22 }
 0x397   : > { %29260 = vst [vmem:[#allocation152_spill] sm:$0xff] %v27219_v37  ;;  %12557 = vmatprep.mubr.f32.mxu0 %v29117_v46  ;;  %12636 = vmatmul.mubr.f32.vlgmr.msra.gmra.mxu1 %v29262_v48  ;;  %v27240_v63 = vsub.f32 %v13278_v31, %v27212_v5  ;;  %v13761_v11 = vsel %vm2188_vm9, %v13757_v24, %v13759_v33 }
 0x398   : > { %12560 = vmatmul.mubr.f32.vlgmr.msra.gmra.mxu0 %v29263_v28  ;;  %12753 = vmatpush1.msra.mxu1 %v27084_v40  ;;  %v3333_v22 = vadd.f32 %v26835_v57, %v26845_v47  ;;  %v3335_v12 = vadd.f32 %v26854_v49, %v26862_v21  ;;  %v13760_v31 = vsel %vm2188_vm9, %v13755_v0, %v13757_v24  ;;  %v13392_v57 = vand.u32 4294901760, %v27224_v34  ;;  %v29267_v21 = vld [vmem:[#allocation123_spill] sm:$0xff] }
 0x399   : > { %12679 = vmatpush1.msra.mxu0 %v29265_v13  ;;  %v27235_v37 = vpop.f32.mrf.mxu1  ;;  %12786 = vmatprep.mubr.f32.mxu1 %v29117_v46  ;;  %v2090_v1 = vadd.f32 %v29266_v6, %v2012_v8  ;;  %v13764_v47 = vsel %vm708_vm4, %v13761_v11, 0  ;;  %v2916_v49 = vadd.f32 %v26731_v26, %v2839_v9  ;;  %v1575_v62 = vadd.f32 %v29267_v21, %v1497_v20  ;;  %v29268_v9 = vld [vmem:[#allocation126_spill] sm:$0xff]  ;;  %v27289_v11 = vpop.permute.xlu0 %14707  ;;  %v29272_v21 = vld [vmem:[#allocation127_spill] sm:$0xff] }
 0x39a   : > { %v27237_v23 = vpop.f32.mrf.mxu0  ;;  %12712 = vmatprep.mubr.f32.mxu0 %v29117_v46  ;;  %12831 = vmatprep.subr.mxu0 %v27130_v30  ;;  %v2508_v24 = vadd.f32 %v26688_v14, %v2432_v43  ;;  %v13762_v33 = vsel %vm708_vm4, %v13760_v31, 0  ;;  %v3410_v26 = vadd.f32 %v26879_v27, %v3333_v22  ;;  %v3412_v56 = vadd.f32 %v26896_v55, %v3335_v12  ;;  %v29271_v31 = vld [vmem:[#allocation122_spill] sm:$0xff] }
 0x39b   : > { %12913 = vmatprep.subr.mxu1 %v12912_v18  ;;  %v27251_v45 = vpop.f32.mrf.mxu1  ;;  %12788 = vmatmul.mubr.f32.vlgmr.msra.gmra.mxu1 %v25615_v41  ;;  %v28944_v18 = vand.u32 4294901760, %v27240_v63  ;;  %v3829_v20 = vadd.f32 %v26937_v2, %v26942_v10  ;;  %v27279_v14 = vand.u32 4294901760, %v13764_v47  ;;  %v2164_v13 = vadd.f32 %v29268_v9, %v2090_v1  ;;  %v29270_v2 = vld [vmem:[#allocation129_spill] sm:$0xff] }
 0x39c   : > { %v27253_v40 = vpop.f32.mrf.mxu0  ;;  %12714 = vmatmul.mubr.f32.vlgmr.msra.gmra.mxu0 %v25615_v41  ;;  %12919 = vmatpush1.msra.mxu1 %v12918_v36  ;;  %v29269_v36 = vld [vmem:[#allocation63_spill] sm:$0xff]  ;;  %v13393_v27 = vsub.f32 %v27224_v34, %v13392_v57  ;;  %v2992_v10 = vadd.f32 %v29270_v2, %v2916_v49  ;;  %v3831_v43 = vadd.f32 %v26950_v38, %v26953_v7  ;;  %v27301_v1 = vand.u32 4294901760, %v13762_v33  ;;  %v29273_v38 = vld [vmem:[#allocation133_spill] sm:$0xff] }
 0x39d   : > { %12833 = vmatpush1.msra.mxu0 %v27141_v50  ;;  %12952 = vmatprep.mubr.f32.mxu1 %v29117_v46  ;;  %v4313_v22 = vadd.f32 %v27015_v39, %v27021_v15  ;;  %v1649_v6 = vadd.f32 %v29271_v31, %v1575_v62  ;;  %v2586_v9 = vadd.f32 %v29272_v21, %v2508_v24  ;;  %v29274_v39 = vld [vmem:[#allocation134_spill] sm:$0xff]  ;;  %v29275_v62 = vand.u32 4294901760, %v27155_v44 }
 0x39e   : > { %12866 = vmatprep.mubr.f32.mxu0 %v29117_v46  ;;  %v27268_v8 = vpop.f32.mrf.mxu1  ;;  %12992 = vmatprep.subr.mxu0 %v27155_v44  ;;  %v13399_v15 = vsub.f32 %v27240_v63, %v28944_v18  ;;  %v3486_v7 = vadd.f32 %v29273_v38, %v3410_v26  ;;  %v3488_v49 = vadd.f32 %v29274_v39, %v3412_v56  ;;  %v29276_v18 = vld [vmem:[#allocation62_spill] sm:$0xff]  ;;  %v29277_v26 = vld [vmem:[#allocation61_spill] sm:$0xff]  ;;  %v13394_v56 = vand.u32 4294901760, %v13393_v27 }
 0x39f   : > { %v27270_v0 = vpop.f32.mrf.mxu0  ;;  %13068 = vmatprep.subr.mxu1 %v27130_v30  ;;  %12954 = vmatmul.mubr.f32.vlgmr.msra.gmra.mxu1 %v25648_v59  ;;  %v3906_v2 = vadd.f32 %v26964_v3, %v3829_v20  ;;  %v27318_v31 = vsub.f32 %v13764_v47, %v27279_v14  ;;  %v4315_v21 = vadd.f32 %v27030_v60, %v27041_v32  ;;  %v29278_v3 = vld [vmem:[#allocation132_spill] sm:$0xff]  ;;  %v29279_v47 = vand.u32 4294901760, %v27163_v58 }
 0x3a0   : > { %12872 = vmatmul.mubr.f32.vlgmr.msra.gmra.mxu0 %v29269_v36  ;;  %v27287_v55 = vpop.f32.mrf.mxu1  ;;  %13070 = vmatpush1.msra.mxu1 %v27141_v50  ;;  %v3070_v20 = vadd.f32 %v29278_v3, %v2992_v10  ;;  %v3908_v38 = vadd.f32 %v26975_v4, %v3831_v43  ;;  %v4390_v44 = vadd.f32 %v27060_v42, %v4313_v22  ;;  %v29280_v60 = vld [vmem:[#allocation128_spill] sm:$0xff]  ;;  %v14706_v42 = vpop.permute.xlu0 %14705 }
 0x3a1   : > { %12995 = vmatpush1.msra.mxu0 %v27163_v58  ;;  %v27298_v12 = vpop.f32.mrf.mxu0  ;;  %13103 = vmatprep.mubr.f32.mxu1 %v29117_v46  ;;  %v27335_v32 = vsub.f32 %v13762_v33, %v27301_v1  ;;  %v2660_v27 = vadd.f32 %v29280_v60, %v2586_v9  ;;  %v4809_v10 = vadd.f32 %v27134_v29, %v27139_v61  ;;  %v13400_v33 = vand.u32 4294901760, %v13399_v15  ;;  %v29282_v15 = vld [vmem:[#allocation88_spill] sm:$0xff]  ;;  %v29287_v60 = vld [vmem:[#allocation89_spill] sm:$0xff] }
 0x3a2   : > { %13222 = vmatprep.subr.mxu1 %v27130_v30  ;;  %13028 = vmatprep.mubr.f32.mxu0 %v29117_v46  ;;  %v2167_v30 = vadd.f32 %v2164_v13, %v1649_v6  ;;  %v3564_v4 = vadd.f32 %v26915_v52, %v3486_v7  ;;  %v3566_v58 = vadd.f32 %v26928_v16, %v3488_v49  ;;  %v13876_v52 = vand.u32 4294901760, %v27318_v31  ;;  %v29281_v16 = vld [vmem:[#allocation131_spill] sm:$0xff] }
 0x3a3   : > { %13146 = vmatprep.subr.mxu0 %v29275_v62  ;;  %v27315_v24 = vpop.f32.mrf.mxu1  ;;  %13107 = vmatmul.mubr.f32.vlgmr.msra.gmra.mxu1 %v29276_v18  ;;  %v4392_v22 = vadd.f32 %v27086_v25, %v4315_v21  ;;  %v4811_v29 = vadd.f32 %v27145_v35, %v27152_v17  ;;  %v4886_v61 = vadd.f32 %v27169_v51, %v4809_v10  ;;  %v13882_v17 = vand.u32 4294901760, %v27335_v32  ;;  %v14710_v35 = vpop.permute.xlu1 %14709 }
 0x3a4   : > { %13031 = vmatmul.mubr.f32.vlgmr.msra.gmra.mxu0 %v29277_v26  ;;  %13224 = vmatpush1.msra.mxu1 %v27141_v50  ;;  %v3982_v50 = vadd.f32 %v26960_v53, %v3906_v2  ;;  %v3144_v53 = vadd.f32 %v29281_v16, %v3070_v20  ;;  %v3984_v9 = vadd.f32 %v26972_v54, %v3908_v38  ;;  %v29283_v2 = vld [vmem:[#allocation150_spill] sm:$0xff]  ;;  %v29284_v54 = vld [vmem:[#allocation135_spill] sm:$0xff] }
 0x3a5   : > { %13150 = vmatpush1.msra.mxu0 %v29279_v47  ;;  %v27330_v13 = vpop.f32.mrf.mxu0  ;;  %v27332_v6 = vpop.f32.mrf.mxu1  ;;  %13395 = vmatprep.subr.mxu1 %v13394_v56  ;;  %v4466_v7 = vadd.f32 %v29282_v15, %v4390_v44  ;;  %v27362_v51 = vsel %vm3168_vm11, %v14706_v42, %v27289_v11  ;;  %v2663_v49 = vadd.f32 %v2660_v27, %v2167_v30  ;;  %v29285_v56 = vld [vmem:[#allocation136_spill] sm:$0xff]  ;;  %v29286_v20 = vld [vmem:[#allocation138_spill] sm:$0xff]  ;;  %v29288_v27 = vld [vmem:[#allocation93_spill] sm:$0xff] }
 0x3a6   : > { %13313 = vmatprep.subr.mxu0 %v27197_v19  ;;  %13257 = vmatprep.mubr.f32.mxu1 %v29117_v46  ;;  %v4888_v62 = vadd.f32 %v29283_v2, %v4811_v29  ;;  %v3638_v21 = vadd.f32 %v29284_v54, %v3564_v4  ;;  %v3640_v3 = vadd.f32 %v29285_v56, %v3566_v58  ;;  %v29289_v42 = vld [vmem:[#allocation64_spill] sm:$0xff]  ;;  %v29292_v16 = vld [vmem:[#allocation147_spill] sm:$0xff] }
 0x3a7   : > { %13183 = vmatprep.mubr.f32.mxu0 %v29117_v46  ;;  %v27346_v43 = vpop.f32.mrf.mxu0  ;;  %13259 = vmatmul.mubr.f32.vlgmr.msra.gmra.mxu1 %v25648_v59  ;;  %v4060_v38 = vadd.f32 %v29286_v20, %v3982_v50  ;;  %v4468_v30 = vadd.f32 %v29287_v60, %v4392_v22  ;;  %v4962_v10 = vadd.f32 %v29288_v27, %v4886_v61  ;;  %v29291_v50 = vld [vmem:[#allocation141_spill] sm:$0xff]  ;;  %v29293_v61 = vld [vmem:[#allocation94_spill] sm:$0xff] }
 0x3a8   : > { %13185 = vmatmul.mubr.f32.vlgmr.msra.gmra.mxu0 %v25648_v59  ;;  %13401 = vmatpush1.msra.mxu1 %v13400_v33  ;;  %v29290_v33 = vld [vmem:[#allocation69_spill] sm:$0xff]  ;;  %v13877_v4 = vsub.f32 %v27318_v31, %v13876_v52  ;;  %v3147_v58 = vadd.f32 %v3144_v53, %v2663_v49  ;;  %v4062_v29 = vadd.f32 %v29291_v50, %v3984_v9 }
 0x3a9   : > { %13315 = vmatpush1.msra.mxu0 %v27212_v5  ;;  %v5770_v25 = vpop.f32.mrf.mxu1  ;;  %13550 = vmatprep.subr.mxu1 %v27197_v19  ;;  %v4544_v15 = vadd.f32 %v29292_v16, %v4466_v7  ;;  %v14712_v22 = vsel %vm3168_vm11, %v27289_v11, %v14710_v35  ;;  %v4964_v2 = vadd.f32 %v29293_v61, %v4888_v62  ;;  %v29294_v7 = vld [vmem:[#allocation130_spill] sm:$0xff]  ;;  %v29295_v20 = vld [vmem:[#allocation137_spill] sm:$0xff]  ;;  %v29297_v35 = vld [vmem:[#allocation151_spill] sm:$0xff] }
 0x3aa   : > { %v5688_v39 = vpop.f32.mrf.mxu0  ;;  %13474 = vmatprep.subr.mxu0 %v27224_v34  ;;  %13434 = vmatprep.mubr.f32.mxu1 %v29117_v46  ;;  %v13883_v9 = vsub.f32 %v27335_v32, %v13882_v17  ;;  %v3642_v49 = vadd.f32 %v3638_v21, %v29294_v7  ;;  %v3643_v56 = vadd.f32 %v3640_v3, %v3147_v58  ;;  %v29296_v11 = vld [vmem:[#allocation149_spill] sm:$0xff]  ;;  %v29298_v62 = vld [vmem:[#allocation66_spill] sm:$0xff]  ;;  %v13878_v50 = vand.u32 4294901760, %v13877_v4  ;;  %v29300_v58 = vld [vmem:[#allocation140_spill] sm:$0xff] }
 0x3ab   : > { %13348 = vmatprep.mubr.f32.mxu0 %v29117_v46  ;;  %v5772_v44 = vpop.f32.mrf.mxu1  ;;  %13436 = vmatmul.mubr.f32.vlgmr.msra.gmra.mxu1 %v29289_v42  ;;  %v4134_v60 = vadd.f32 %v29295_v20, %v4060_v38  ;;  %v5040_v34 = vadd.f32 %v29297_v35, %v4962_v10  ;;  %v29299_v27 = vld [vmem:[#allocation65_spill] sm:$0xff]  ;;  %v4136_v38 = vadd.f32 %v29300_v58, %v4062_v29  ;;  %v29301_v16 = vld [vmem:[#allocation91_spill] sm:$0xff]  ;;  %v14713_v35 = vsel %vm708_vm4, %v27362_v51, 0 }
 0x3ac   : > { %v5690_v47 = vpop.f32.mrf.mxu0  ;;  %13354 = vmatmul.mubr.f32.vlgmr.msra.gmra.mxu0 %v29290_v33  ;;  %13552 = vmatpush1.msra.mxu1 %v27212_v5  ;;  %v4618_v61 = vadd.f32 %v29301_v16, %v4544_v15  ;;  %v5302_v7 = vadd.f32 %v27251_v45, %v27253_v40  ;;  %v5771_v20 = vadd.f32 %v5770_v25, %v5688_v39  ;;  %v29305_v40 = vld [vmem:[#allocation95_spill] sm:$0xff]  ;;  %v29308_v16 = vld [vmem:[#allocation72_spill] sm:$0xff]  ;;  %v27440_v51 = vand.u32 4294901760, %v14713_v35 }
 0x3ad   : > { %13477 = vmatpush1.msra.mxu0 %v27240_v63  ;;  %13704 = vmatprep.subr.mxu1 %v27197_v19  ;;  %v4546_v19 = vadd.f32 %v29296_v11, %v4468_v30  ;;  %v29302_v30 = vand.u32 4294901760, %v27240_v63  ;;  %v4138_v29 = vadd.f32 %v4134_v60, %v3642_v49  ;;  %v5773_v11 = vadd.f32 %v5772_v44, %v5690_v47  ;;  %v29304_v63 = vld [vmem:[#allocation92_spill] sm:$0xff]  ;;  %v29307_v58 = vld [vmem:[#allocation67_spill] sm:$0xff] }
 0x3ae   : > { %13628 = vmatprep.subr.mxu0 %v13392_v57  ;;  %v5923_v54 = vpop.f32.mrf.mxu1  ;;  %13585 = vmatprep.mubr.f32.mxu1 %v29117_v46  ;;  %v5300_v57 = vadd.f32 %v27235_v37, %v27237_v23  ;;  %v29303_v23 = vld [vmem:[#allocation152_spill] sm:$0xff]  ;;  %v5379_v15 = vadd.f32 %v27298_v12, %v5302_v7  ;;  %v14715_v12 = vsel %vm708_vm4, %v14712_v22, 0  ;;  %v4139_v44 = vadd.f32 %v4136_v38, %v3643_v56 }
 0x3af   : > { %v5847_v53 = vpop.f32.mrf.mxu0  ;;  %13510 = vmatprep.mubr.f32.mxu0 %v29117_v46  ;;  %13589 = vmatmul.mubr.f32.vlgmr.msra.gmra.mxu1 %v29298_v62  ;;  %v5042_v37 = vadd.f32 %v29303_v23, %v4964_v2  ;;  %v4620_v45 = vadd.f32 %v29304_v63, %v4546_v19  ;;  %v5114_v2 = vadd.f32 %v29305_v40, %v5040_v34  ;;  %v29306_v49 = vld [vmem:[#allocation96_spill] sm:$0xff]  ;;  %v15192_v34 = vpop.permute.xlu1 %15191 }
 0x3b0   : > { %13513 = vmatmul.mubr.f32.vlgmr.msra.gmra.mxu0 %v29299_v27  ;;  %v5925_v21 = vpop.f32.mrf.mxu1  ;;  %13706 = vmatpush1.msra.mxu1 %v27212_v5  ;;  %v5377_v10 = vadd.f32 %v27270_v0, %v5300_v57  ;;  %v13884_v5 = vand.u32 4294901760, %v13883_v9  ;;  %v5848_v0 = vadd.f32 %v5847_v53, %v5771_v20  ;;  %v4622_v9 = vadd.f32 %v4618_v61, %v4138_v29  ;;  %v15194_v20 = vpop.permute.xlu0 %15193  ;;  %v29376_v27 = vld [vmem:[#allocation117_spill] sm:$0xff]  ;;  %v665_v62 = vld [vmem:[%s579_s3 + $0x8] sm:$0xf] }
 0x3b1   : > { %v5849_v3 = vpop.f32.mrf.mxu0  ;;  %13632 = vmatpush1.msra.mxu0 %v29302_v30  ;;  %13879 = vmatprep.subr.mxu1 %v13878_v50  ;;  %v5116_v60 = vadd.f32 %v29306_v49, %v5042_v37  ;;  %v5455_v22 = vadd.f32 %v27287_v55, %v5379_v15  ;;  %v27434_v57 = vand.u32 4294901760, %v14715_v12  ;;  %v4623_v50 = vadd.f32 %v4620_v45, %v4139_v44  ;;  %v29309_v15 = vld [vmem:[#allocation70_spill] sm:$0xff] }
 0x3b2   : > { %13797 = vmatprep.subr.mxu0 %v27279_v14  ;;  %13739 = vmatprep.mubr.f32.mxu1 %v29117_v46  ;;  %v5850_v47 = vadd.f32 %v5849_v3, %v5773_v11  ;;  %v5453_v19 = vadd.f32 %v27268_v8, %v5377_v10  ;;  %v5118_v8 = vadd.f32 %v5114_v2, %v4622_v9 }
 0x3b3   : > { %v27412_v4 = vpop.f32.mrf.mxu1  ;;  %13665 = vmatprep.mubr.f32.mxu0 %v29117_v46  ;;  %13741 = vmatmul.mubr.f32.vlgmr.msra.gmra.mxu1 %v29289_v42  ;;  %v6001_v25 = vpop.f32.mrf.mxu0  ;;  %v5924_v3 = vadd.f32 %v5923_v54, %v5848_v0  ;;  %v5119_v7 = vadd.f32 %v5116_v60, %v4623_v50  ;;  %v5533_v23 = vadd.f32 %v27346_v43, %v5455_v22 }
 0x3b4   : > { %13667 = vmatmul.mubr.f32.vlgmr.msra.gmra.mxu0 %v29289_v42  ;;  %13885 = vmatpush1.msra.mxu1 %v13884_v5  ;;  %v5926_v61 = vadd.f32 %v5925_v21, %v5850_v47  ;;  %v5531_v30 = vadd.f32 %v27330_v13, %v5453_v19  ;;  %v27450_v10 = vsub.f32 %v14715_v12, %v27434_v57  ;;  %v5122_v29 = vmul.f32 0.01, %v5118_v8  ;;  %v29312_v12 = vld [vmem:[#allocation139_spill] sm:$0xff] }
 0x3b5   : > { %v27421_v39 = vpop.f32.mrf.mxu1  ;;  %13799 = vmatpush1.msra.mxu0 %v27301_v1  ;;  %14034 = vmatprep.subr.mxu1 %v27279_v14  ;;  %v6003_v53 = vpop.f32.mrf.mxu0  ;;  %v6002_v13 = vadd.f32 %v6001_v25, %v5924_v3  ;;  %vm5120_vm15 = vcmp.gt.f32.partialorder %v5118_v8, 0.0  ;;  %v27458_v45 = vsub.f32 %v14713_v35, %v27440_v51  ;;  %v15196_v40 = vsel %vm3664_vm12, %v15192_v34, %v15194_v20  ;;  %v29311_v25 = vld [vmem:[#allocation146_spill] sm:$0xff]  ;;  %v29313_v35 = vld [vmem:[#allocation148_spill] sm:$0xff] }
 0x3b6   : > { %13958 = vmatprep.subr.mxu0 %v27318_v31  ;;  %13918 = vmatprep.mubr.f32.mxu1 %v29117_v46  ;;  %v29310_v31 = vld [vmem:[#allocation68_spill] sm:$0xff]  ;;  %v6004_v43 = vadd.f32 %v6003_v53, %v5926_v61  ;;  %v5123_v2 = vmul.f32 0.01, %v5119_v7  ;;  %v5605_v0 = vadd.f32 %v27315_v24, %v5531_v30  ;;  %vm5121_vm0 = vcmp.gt.f32.partialorder %v5119_v7, 0.0 }
 0x3b7   : > { %v6256_v56 = vpop.f32.mrf.mxu1  ;;  %13832 = vmatprep.mubr.f32.mxu0 %v29117_v46  ;;  %13920 = vmatmul.mubr.f32.vlgmr.msra.gmra.mxu1 %v29307_v58  ;;  %v5124_v49 = vsel %vm5120_vm15, %v5118_v8, %v5122_v29  ;;  %v6076_v24 = vadd.f32 %v27412_v4, %v6002_v13  ;;  %v15199_v19 = vsel %vm708_vm4, %v15196_v40, 0  ;;  %v14833_v4 = vand.u32 4294901760, %v27458_v45  ;;  %v29317_v29 = vld [vmem:[#allocation76_spill] sm:$0xff] }
 0x3b8   : > { %v6174_v38 = vpop.f32.mrf.mxu0  ;;  %13838 = vmatmul.mubr.f32.vlgmr.msra.gmra.mxu0 %v29308_v16  ;;  %14036 = vmatpush1.msra.mxu1 %v27301_v1  ;;  %v6078_v53 = vadd.f32 %v27421_v39, %v6004_v43  ;;  %v5609_v8 = vadd.f32 %v5605_v0, %v5124_v49  ;;  %v5125_v3 = vsel %vm5121_vm0, %v5119_v7, %v5123_v2  ;;  %v29319_v40 = vld [vmem:[#allocation144_spill] sm:$0xff] }
 0x3b9   : > { %13961 = vmatpush1.msra.mxu0 %v27335_v32  ;;  %v6258_v55 = vpop.f32.mrf.mxu1  ;;  %14188 = vmatprep.subr.mxu1 %v27279_v14  ;;  %v6257_v37 = vadd.f32 %v6256_v56, %v6174_v38  ;;  %v29315_v38 = vld [vmem:[#allocation142_spill] sm:$0xff]  ;;  %v14834_v0 = vsub.f32 %v27458_v45, %v14833_v4 }
 0x3ba   : > { %14112 = vmatprep.subr.mxu0 %v13876_v52  ;;  %v6176_v54 = vpop.f32.mrf.mxu0  ;;  %14069 = vmatprep.mubr.f32.mxu1 %v29117_v46  ;;  %v15190_v52 = vpop.permute.xlu1 %15189  ;;  %v6080_v7 = vadd.f32 %v6076_v24, %v5609_v8 }
 0x3bb   : > { %v6409_v21 = vpop.f32.mrf.mxu1  ;;  %13994 = vmatprep.mubr.f32.mxu0 %v29117_v46  ;;  %14073 = vmatmul.mubr.f32.vlgmr.msra.gmra.mxu1 %v29309_v15  ;;  %v6259_v11 = vadd.f32 %v6258_v55, %v6176_v54  ;;  %v15195_v9 = vsel %vm3664_vm12, %v15190_v52, %v15192_v34  ;;  %v29314_v34 = vld [vmem:[#allocation143_spill] sm:$0xff] }
 0x3bc   : > { %v6333_v14 = vpop.f32.mrf.mxu0  ;;  %13997 = vmatmul.mubr.f32.vlgmr.msra.gmra.mxu0 %v29310_v31  ;;  %14190 = vmatpush1.msra.mxu1 %v27301_v1  ;;  %v5607_v1 = vadd.f32 %v27332_v6, %v5533_v23  ;;  %v14827_v6 = vand.u32 4294901760, %v27450_v10  ;;  %v27484_v23 = vand.u32 4294901760, %v15199_v19  ;;  %v29373_v31 = vld [vmem:[#allocation121_spill] sm:$0xff] }
 0x3bd   : > { %v6334_v5 = vadd.f32 %v6333_v14, %v6257_v37  ;;  %14116 = vmatpush1.msra.mxu0 %v13882_v17  ;;  %v6411_v63 = vpop.f32.mrf.mxu1  ;;  %14346 = vmatprep.subr.mxu1 %v29311_v25  ;;  %v15197_v37 = vsel %vm708_vm4, %v15195_v9, 0 }
 0x3be   : > { %14264 = vmatprep.subr.mxu0 %v29312_v12  ;;  %v6335_v44 = vpop.f32.mrf.mxu0  ;;  %14223 = vmatprep.mubr.f32.mxu1 %v29117_v46  ;;  %v5610_v39 = vadd.f32 %v5607_v1, %v5125_v3  ;;  %v14828_v13 = vsub.f32 %v27450_v10, %v14827_v6  ;;  %v15673_v1 = vpop.permute.xlu1 %15672  ;;  %v27508_v49 = vsub.f32 %v15199_v19, %v27484_v23  ;;  %v29322_v3 = vld [vmem:[#allocation90_spill] sm:$0xff] }
 0x3bf   : > { %v6336_v47 = vadd.f32 %v6335_v44, %v6259_v11  ;;  %v6561_v32 = vpop.f32.mrf.mxu1  ;;  %14149 = vmatprep.mubr.f32.mxu0 %v29117_v46  ;;  %v6410_v17 = vadd.f32 %v6409_v21, %v6334_v5  ;;  %14225 = vmatmul.mubr.f32.vlgmr.msra.gmra.mxu1 %v29307_v58  ;;  %v29316_v21 = vld [vmem:[#allocation71_spill] sm:$0xff]  ;;  %v29318_v11 = vld [vmem:[#allocation145_spill] sm:$0xff]  ;;  %v27503_v44 = vand.u32 4294901760, %v15197_v37 }
 0x3c0   : > { %v6487_v60 = vpop.f32.mrf.mxu0  ;;  %14151 = vmatmul.mubr.f32.vlgmr.msra.gmra.mxu0 %v29307_v58  ;;  %14352 = vmatpush1.msra.mxu1 %v29313_v35  ;;  %v6081_v14 = vadd.f32 %v6078_v53, %v5610_v39  ;;  %v14835_v39 = vand.u32 4294901760, %v14834_v0 }
 0x3c1   : > { %v6488_v22 = vadd.f32 %v6487_v60, %v6410_v17  ;;  %14266 = vmatpush1.msra.mxu0 %v29314_v34  ;;  %v6563_v56 = vpop.f32.mrf.mxu1  ;;  %v6412_v50 = vadd.f32 %v6411_v63, %v6336_v47  ;;  %14501 = vmatprep.subr.mxu1 %v29312_v12  ;;  %v15671_v63 = vpop.permute.xlu0 %15670  ;;  %v29320_v60 = vld [vmem:[#allocation74_spill] sm:$0xff] }
 0x3c2   : > { %14425 = vmatprep.subr.mxu0 %v29315_v38  ;;  %v6489_v61 = vpop.f32.mrf.mxu0  ;;  %14385 = vmatprep.mubr.f32.mxu1 %v29117_v46  ;;  %v15675_v24 = vsel %vm4148_vm13, %v15671_v63, %v15673_v1 }
 0x3c3   : > { %v6562_v55 = vadd.f32 %v6561_v32, %v6488_v22  ;;  %v6490_v30 = vadd.f32 %v6489_v61, %v6412_v50  ;;  %v6741_v54 = vpop.f32.mrf.mxu1  ;;  %14299 = vmatprep.mubr.f32.mxu0 %v29117_v46  ;;  %14387 = vmatmul.mubr.f32.vlgmr.msra.gmra.mxu1 %v29316_v21  ;;  %v29321_v22 = vld [vmem:[#allocation73_spill] sm:$0xff] }
 0x3c4   : > { %v6659_v20 = vpop.f32.mrf.mxu0  ;;  %14305 = vmatmul.mubr.f32.vlgmr.msra.gmra.mxu0 %v29317_v29  ;;  %14503 = vmatpush1.msra.mxu1 %v29314_v34 }
 0x3c5   : > { %v6564_v52 = vadd.f32 %v6563_v56, %v6490_v30  ;;  %v6742_v43 = vadd.f32 %v6741_v54, %v6659_v20  ;;  %14428 = vmatpush1.msra.mxu0 %v29318_v11  ;;  %v6743_v5 = vpop.f32.mrf.mxu1  ;;  %14655 = vmatprep.subr.mxu1 %v29312_v12  ;;  %v6566_v47 = vadd.f32 %v6562_v55, %v6080_v7  ;;  %v14829_v56 = vand.u32 4294901760, %v14828_v13  ;;  %v15669_v13 = vpop.permute.xlu0 %15668 }
 0x3c6   : > { %14579 = vmatprep.subr.mxu0 %v29319_v40  ;;  %v6661_v2 = vpop.f32.mrf.mxu0  ;;  %14536 = vmatprep.mubr.f32.mxu1 %v29117_v46  ;;  %v27517_v55 = vsub.f32 %v15197_v37, %v27503_v44  ;;  %v15678_v30 = vsel %vm708_vm4, %v15675_v24, 0  ;;  %v15311_v37 = vand.u32 4294901760, %v27508_v49  ;;  %v16155_v24 = vpop.permute.xlu1 %16154 }
 0x3c7   : > { %v6567_v32 = vadd.f32 %v6564_v52, %v6081_v14  ;;  %v6744_v17 = vadd.f32 %v6743_v5, %v6661_v2  ;;  %v6894_v9 = vpop.f32.mrf.mxu1  ;;  %14461 = vmatprep.mubr.f32.mxu0 %v29117_v46  ;;  %14540 = vmatmul.mubr.f32.vlgmr.msra.gmra.mxu1 %v29320_v60  ;;  %v15674_v52 = vsel %vm4148_vm13, %v15669_v13, %v15671_v63  ;;  %v27531_v0 = vand.u32 4294901760, %v15678_v30 }
 0x3c8   : > { %v6818_v53 = vpop.f32.mrf.mxu0  ;;  %14464 = vmatmul.mubr.f32.vlgmr.msra.gmra.mxu0 %v29321_v22  ;;  %14657 = vmatpush1.msra.mxu1 %v29314_v34 }
 0x3c9   : > { %v6570_v50 = vcombine.low %v6566_v47, %v6567_v32  ;;  %v6819_v8 = vadd.f32 %v6818_v53, %v6742_v43  ;;  %14583 = vmatpush1.msra.mxu0 %v29322_v3  ;;  %v6896_v61 = vpop.f32.mrf.mxu1  ;;  %14830 = vmatprep.subr.mxu1 %v14829_v56  ;;  %v15317_v47 = vand.u32 4294901760, %v27517_v55  ;;  %v29323_v53 = vld [vmem:[#allocation75_spill] sm:$0xff] }
 0x3ca   : > { %14748 = vmatprep.subr.mxu0 %v27434_v57  ;;  %v6820_v19 = vpop.f32.mrf.mxu0  ;;  %14690 = vmatprep.mubr.f32.mxu1 %v29117_v46 }
 0x3cb   : > { %6572 = vst [vmem:[%s27521_s15] sm:$0xff] %v6570_v50  ;;  %v6821_v54 = vadd.f32 %v6820_v19, %v6744_v17  ;;  %v7046_v7 = vpop.f32.mrf.mxu1  ;;  %14616 = vmatprep.mubr.f32.mxu0 %v29117_v46  ;;  %v6895_v20 = vadd.f32 %v6894_v9, %v6819_v8  ;;  %14692 = vmatmul.mubr.f32.vlgmr.msra.gmra.mxu1 %v29316_v21  ;;  %v15676_v9 = vsel %vm708_vm4, %v15674_v52, 0  ;;  %v29324_v50 = vld [vmem:[#allocation80_spill] sm:$0xff] }
 0x3cc   : > { %v6972_v14 = vpop.f32.mrf.mxu0  ;;  %14618 = vmatmul.mubr.f32.vlgmr.msra.gmra.mxu0 %v29316_v21  ;;  %14836 = vmatpush1.msra.mxu1 %v14835_v39  ;;  %v15312_v8 = vsub.f32 %v27508_v49, %v15311_v37 }
 0x3cd   : > { %v6973_v43 = vadd.f32 %v6972_v14, %v6895_v20  ;;  %14750 = vmatpush1.msra.mxu0 %v27440_v51  ;;  %v7048_v5 = vpop.f32.mrf.mxu1  ;;  %v6897_v2 = vadd.f32 %v6896_v61, %v6821_v54  ;;  %14985 = vmatprep.subr.mxu1 %v27434_v57  ;;  %v27547_v54 = vsub.f32 %v15678_v30, %v27531_v0  ;;  %v27552_v20 = vand.u32 4294901760, %v15676_v9 }
 0x3ce   : > { %14909 = vmatprep.subr.mxu0 %v27450_v10  ;;  %v6974_v1 = vpop.f32.mrf.mxu0  ;;  %14869 = vmatprep.mubr.f32.mxu1 %v29117_v46  ;;  %v15318_v30 = vsub.f32 %v27517_v55, %v15317_v47  ;;  %v15313_v10 = vand.u32 4294901760, %v15312_v8 }
 0x3cf   : > { %v6975_v32 = vadd.f32 %v6974_v1, %v6897_v2  ;;  %v7212_v17 = vpop.f32.mrf.mxu1  ;;  %14783 = vmatprep.mubr.f32.mxu0 %v29117_v46  ;;  %v7047_v63 = vadd.f32 %v7046_v7, %v6973_v43  ;;  %14871 = vmatmul.mubr.f32.vlgmr.msra.gmra.mxu1 %v29323_v53  ;;  %v29325_v43 = vld [vmem:[#allocation78_spill] sm:$0xff]  ;;  %v27568_v8 = vsub.f32 %v15676_v9, %v27552_v20 }
 0x3d0   : > { %v7130_v56 = vpop.f32.mrf.mxu0  ;;  %14789 = vmatmul.mubr.f32.vlgmr.msra.gmra.mxu0 %v29324_v50  ;;  %14987 = vmatpush1.msra.mxu1 %v27440_v51 }
 0x3d1   : > { %v7131_v61 = vadd.f32 %v7130_v56, %v7047_v63  ;;  %14912 = vmatpush1.msra.mxu0 %v27458_v45  ;;  %v7214_v19 = vpop.f32.mrf.mxu1  ;;  %v7049_v39 = vadd.f32 %v7048_v5, %v6975_v32  ;;  %15139 = vmatprep.subr.mxu1 %v27434_v57  ;;  %v29326_v5 = vld [vmem:[#allocation77_spill] sm:$0xff]  ;;  %v16153_v63 = vpop.permute.xlu1 %16152  ;;  %v15319_v45 = vand.u32 4294901760, %v15318_v30 }
 0x3d2   : > { %15063 = vmatprep.subr.mxu0 %v14827_v6  ;;  %v7132_v7 = vpop.f32.mrf.mxu0  ;;  %15020 = vmatprep.mubr.f32.mxu1 %v29117_v46  ;;  %v16157_v6 = vpop.permute.xlu0 %16156 }
 0x3d3   : > { %v7133_v13 = vadd.f32 %v7132_v7, %v7049_v39  ;;  %v7365_v14 = vpop.f32.mrf.mxu1  ;;  %14945 = vmatprep.mubr.f32.mxu0 %v29117_v46  ;;  %v7213_v52 = vadd.f32 %v7212_v17, %v7131_v61  ;;  %15024 = vmatmul.mubr.f32.vlgmr.msra.gmra.mxu1 %v29325_v43  ;;  %v16159_v17 = vsel %vm4644_vm14, %v16155_v24, %v16157_v6  ;;  %v15790_v61 = vand.u32 4294901760, %v27547_v54 }
 0x3d4   : > { %v7289_v57 = vpop.f32.mrf.mxu0  ;;  %14948 = vmatmul.mubr.f32.vlgmr.msra.gmra.mxu0 %v29326_v5  ;;  %15141 = vmatpush1.msra.mxu1 %v27440_v51  ;;  %v16162_v7 = vsel %vm708_vm4, %v16159_v17, 0  ;;  %v29327_v17 = vld [vmem:[#allocation79_spill] sm:$0xff] }
 0x3d5   : > { %v7290_v2 = vadd.f32 %v7289_v57, %v7213_v52  ;;  %15067 = vmatpush1.msra.mxu0 %v14833_v4  ;;  %v7367_v1 = vpop.f32.mrf.mxu1  ;;  %v7215_v32 = vadd.f32 %v7214_v19, %v7133_v13  ;;  %15314 = vmatprep.subr.mxu1 %v15313_v10  ;;  %v16158_v13 = vsel %vm4644_vm14, %v16153_v63, %v16155_v24  ;;  %v28945_v10 = vand.u32 4294901760, %v27568_v8  ;;  %v664_v5 = vld [vmem:[%s579_s3] sm:$0xff] }
 0x3d6   : > { %15232 = vmatprep.subr.mxu0 %v27484_v23  ;;  %v7291_v56 = vpop.f32.mrf.mxu0  ;;  %15174 = vmatprep.mubr.f32.mxu1 %v29117_v46  ;;  %v15791_v30 = vsub.f32 %v27547_v54, %v15790_v61  ;;  %v23316_v60 = vcombine.high %v664_v5, %v664_v5 }
 0x3d7   : > { %v7292_v39 = vadd.f32 %v7291_v56, %v7215_v32  ;;  %v7517_v51 = vpop.f32.mrf.mxu1  ;;  %15100 = vmatprep.mubr.f32.mxu0 %v29117_v46  ;;  %v7366_v4 = vadd.f32 %v7365_v14, %v7290_v2  ;;  %15176 = vmatmul.mubr.f32.vlgmr.msra.gmra.mxu1 %v29323_v53  ;;  %v16160_v32 = vsel %vm708_vm4, %v16158_v13, 0  ;;  %v29328_v56 = vld [vmem:[#allocation84_spill] sm:$0xff] }
 0x3d8   : > { %v7443_v19 = vpop.f32.mrf.mxu0  ;;  %15102 = vmatmul.mubr.f32.vlgmr.msra.gmra.mxu0 %v29323_v53  ;;  %15320 = vmatpush1.msra.mxu1 %v15319_v45  ;;  %v27599_v13 = vand.u32 4294901760, %v16160_v32 }
 0x3d9   : > { %v7444_v9 = vadd.f32 %v7443_v19, %v7366_v4  ;;  %15234 = vmatpush1.msra.mxu0 %v27503_v44  ;;  %v7519_v52 = vpop.f32.mrf.mxu1  ;;  %v7368_v57 = vadd.f32 %v7367_v1, %v7292_v39  ;;  %15469 = vmatprep.subr.mxu1 %v27484_v23  ;;  %v27587_v1 = vand.u32 4294901760, %v16162_v7  ;;  %v15792_v19 = vand.u32 4294901760, %v15791_v30 }
 0x3da   : > { %15393 = vmatprep.subr.mxu0 %v27508_v49  ;;  %v7445_v14 = vpop.f32.mrf.mxu0  ;;  %15353 = vmatprep.mubr.f32.mxu1 %v29117_v46 }
 0x3db   : > { %v27583_v6 = vadd.f32 %v7517_v51, %v7444_v9  ;;  %v7446_v24 = vadd.f32 %v7445_v14, %v7368_v57  ;;  %v7694_v2 = vpop.f32.mrf.mxu1  ;;  %15267 = vmatprep.mubr.f32.mxu0 %v29117_v46  ;;  %15355 = vmatmul.mubr.f32.vlgmr.msra.gmra.mxu1 %v29327_v17  ;;  %v15797_v57 = vsub.f32 %v27568_v8, %v28945_v10 }
 0x3dc   : > { %v7612_v63 = vpop.f32.mrf.mxu0  ;;  %15273 = vmatmul.mubr.f32.vlgmr.msra.gmra.mxu0 %v29328_v56  ;;  %15471 = vmatpush1.msra.mxu1 %v27503_v44  ;;  %v27607_v14 = vsub.f32 %v16162_v7, %v27587_v1  ;;  %v29364_v56 = vld [vmem:[#allocation57_spill] sm:$0xff] }
 0x3dd   : > { %v27592_v39 = vadd.f32 %v7519_v52, %v7446_v24  ;;  %v7695_v51 = vadd.f32 %v7694_v2, %v7612_v63  ;;  %15396 = vmatpush1.msra.mxu0 %v27517_v55  ;;  %v7696_v45 = vpop.f32.mrf.mxu1  ;;  %15623 = vmatprep.subr.mxu1 %v27484_v23  ;;  %v29329_v23 = vld [vmem:[#allocation82_spill] sm:$0xff]  ;;  %v27616_v63 = vsub.f32 %v16160_v32, %v27599_v13 }
 0x3de   : > { %15547 = vmatprep.subr.mxu0 %v15311_v37  ;;  %v7614_v4 = vpop.f32.mrf.mxu0  ;;  %15504 = vmatprep.mubr.f32.mxu1 %v29117_v46  ;;  %v29330_v37 = vld [vmem:[#allocation81_spill] sm:$0xff] }
 0x3df   : > { %v7697_v9 = vadd.f32 %v7696_v45, %v7614_v4  ;;  %v7847_v52 = vpop.f32.mrf.mxu1  ;;  %15429 = vmatprep.mubr.f32.mxu0 %v29117_v46  ;;  %15508 = vmatmul.mubr.f32.vlgmr.msra.gmra.mxu1 %v29329_v23  ;;  %v15798_v4 = vand.u32 4294901760, %v15797_v57 }
 0x3e0   : > { %v7771_v49 = vpop.f32.mrf.mxu0  ;;  %15432 = vmatmul.mubr.f32.vlgmr.msra.gmra.mxu0 %v29330_v37  ;;  %15625 = vmatpush1.msra.mxu1 %v27503_v44 }
 0x3e1   : > { %v7772_v30 = vadd.f32 %v7771_v49, %v7695_v51  ;;  %15551 = vmatpush1.msra.mxu0 %v15317_v47  ;;  %v7849_v24 = vpop.f32.mrf.mxu1  ;;  %15793 = vmatprep.subr.mxu1 %v15792_v19  ;;  %v28946_v47 = vand.u32 4294901760, %v27607_v14 }
 0x3e2   : > { %15711 = vmatprep.subr.mxu0 %v27531_v0  ;;  %v7773_v2 = vpop.f32.mrf.mxu0  ;;  %15658 = vmatprep.mubr.f32.mxu1 %v29117_v46 }
 0x3e3   : > { %v7774_v7 = vadd.f32 %v7773_v2, %v7697_v9  ;;  %v7999_v45 = vpop.f32.mrf.mxu1  ;;  %15584 = vmatprep.mubr.f32.mxu0 %v29117_v46  ;;  %v7848_v44 = vadd.f32 %v7847_v52, %v7772_v30  ;;  %15660 = vmatmul.mubr.f32.vlgmr.msra.gmra.mxu1 %v29327_v17  ;;  %v16280_v52 = vand.u32 4294901760, %v27616_v63  ;;  %v29331_v2 = vld [vmem:[#allocation83_spill] sm:$0xff] }
 0x3e4   : > { %v7925_v55 = vpop.f32.mrf.mxu0  ;;  %15586 = vmatmul.mubr.f32.vlgmr.msra.gmra.mxu0 %v29327_v17  ;;  %15799 = vmatpush1.msra.mxu1 %v15798_v4 }
 0x3e5   : > { %v7926_v51 = vadd.f32 %v7925_v55, %v7848_v44  ;;  %15713 = vmatpush1.msra.mxu0 %v27552_v20  ;;  %v8001_v32 = vpop.f32.mrf.mxu1  ;;  %v7850_v19 = vadd.f32 %v7849_v24, %v7774_v7  ;;  %15948 = vmatprep.subr.mxu1 %v27531_v0  ;;  %v29332_v44 = vld [vmem:[#allocation87_spill] sm:$0xff]  ;;  %v16275_v24 = vsub.f32 %v27607_v14, %v28946_v47 }
 0x3e6   : > { %15872 = vmatprep.subr.mxu0 %v27547_v54  ;;  %v7927_v9 = vpop.f32.mrf.mxu0  ;;  %15832 = vmatprep.mubr.f32.mxu1 %v29117_v46 }
 0x3e7   : > { %v8000_v57 = vadd.f32 %v7999_v45, %v7926_v51  ;;  %v7928_v49 = vadd.f32 %v7927_v9, %v7850_v19  ;;  %v8178_v30 = vpop.f32.mrf.mxu1  ;;  %15746 = vmatprep.mubr.f32.mxu0 %v29117_v46  ;;  %15834 = vmatmul.mubr.f32.vlgmr.msra.gmra.mxu1 %v29331_v2  ;;  %v16276_v54 = vand.u32 4294901760, %v16275_v24 }
 0x3e8   : > { %v8096_v4 = vpop.f32.mrf.mxu0  ;;  %15752 = vmatmul.mubr.f32.vlgmr.msra.gmra.mxu0 %v29332_v44  ;;  %15950 = vmatpush1.msra.mxu1 %v27552_v20 }
 0x3e9   : > { %v8004_v7 = vadd.f32 %v8000_v57, %v27583_v6  ;;  %v8002_v55 = vadd.f32 %v8001_v32, %v7928_v49  ;;  %v8179_v45 = vadd.f32 %v8178_v30, %v8096_v4  ;;  %15875 = vmatpush1.msra.mxu0 %v27568_v8  ;;  %v8180_v51 = vpop.f32.mrf.mxu1  ;;  %16102 = vmatprep.subr.mxu1 %v27531_v0  ;;  %v29333_v32 = vld [vmem:[#allocation86_spill] sm:$0xff]  ;;  %v29334_v0 = vld [vmem:[#allocation85_spill] sm:$0xff] }
 0x3ea   : > { %16026 = vmatprep.subr.mxu0 %v15790_v61  ;;  %v8098_v19 = vpop.f32.mrf.mxu0  ;;  %15983 = vmatprep.mubr.f32.mxu1 %v29117_v46  ;;  %v16281_v6 = vsub.f32 %v27616_v63, %v16280_v52 }
 0x3eb   : > { %v8005_v9 = vadd.f32 %v8002_v55, %v27592_v39  ;;  %v8181_v10 = vadd.f32 %v8180_v51, %v8098_v19  ;;  %v8331_v47 = vpop.f32.mrf.mxu1  ;;  %15908 = vmatprep.mubr.f32.mxu0 %v29117_v46  ;;  %15987 = vmatmul.mubr.f32.vlgmr.msra.gmra.mxu1 %v29333_v32  ;;  %v29335_v39 = vand.u32 4294901760, %v27568_v8 }
 0x3ec   : > { %v8255_v57 = vpop.f32.mrf.mxu0  ;;  %15911 = vmatmul.mubr.f32.vlgmr.msra.gmra.mxu0 %v29334_v0  ;;  %16104 = vmatpush1.msra.mxu1 %v27552_v20  ;;  %v16282_v51 = vand.u32 4294901760, %v16281_v6  ;;  %v29336_v6 = vld [vmem:[#allocation98_spill] sm:$0xff] }
 0x3ed   : > { %v8256_v61 = vadd.f32 %v8255_v57, %v8179_v45  ;;  %16030 = vmatpush1.msra.mxu0 %v29335_v39  ;;  %v8333_v49 = vpop.f32.mrf.mxu1  ;;  %16277 = vmatprep.subr.mxu1 %v16276_v54  ;;  %v29337_v39 = vld [vmem:[#allocation102_spill] sm:$0xff] }
 0x3ee   : > { %16195 = vmatprep.subr.mxu0 %v27587_v1  ;;  %v8257_v30 = vpop.f32.mrf.mxu0  ;;  %16137 = vmatprep.mubr.f32.mxu1 %v29117_v46 }
 0x3ef   : > { %v8258_v4 = vadd.f32 %v8257_v30, %v8181_v10  ;;  %v8483_v55 = vpop.f32.mrf.mxu1  ;;  %16063 = vmatprep.mubr.f32.mxu0 %v29117_v46  ;;  %v8332_v19 = vadd.f32 %v8331_v47, %v8256_v61  ;;  %16139 = vmatmul.mubr.f32.vlgmr.msra.gmra.mxu1 %v29331_v2 }
 0x3f0   : > { %v8409_v20 = vpop.f32.mrf.mxu0  ;;  %16065 = vmatmul.mubr.f32.vlgmr.msra.gmra.mxu0 %v29331_v2  ;;  %16283 = vmatpush1.msra.mxu1 %v16282_v51 }
 0x3f1   : > { %v8410_v8 = vadd.f32 %v8409_v20, %v8332_v19  ;;  %16197 = vmatpush1.msra.mxu0 %v27599_v13  ;;  %v8485_v24 = vpop.f32.mrf.mxu1  ;;  %v8334_v45 = vadd.f32 %v8333_v49, %v8258_v4  ;;  %16432 = vmatprep.subr.mxu1 %v27587_v1  ;;  %v29338_v19 = vand.u32 4294901760, %v27607_v14 }
 0x3f2   : > { %16356 = vmatprep.subr.mxu0 %v27607_v14  ;;  %v8411_v10 = vpop.f32.mrf.mxu0  ;;  %16316 = vmatprep.mubr.f32.mxu1 %v29117_v46 }
 0x3f3   : > { %v8484_v57 = vadd.f32 %v8483_v55, %v8410_v8  ;;  %v8412_v54 = vadd.f32 %v8411_v10, %v8334_v45  ;;  %v8645_v47 = vpop.f32.mrf.mxu1  ;;  %16230 = vmatprep.mubr.f32.mxu0 %v29117_v46  ;;  %16318 = vmatmul.mubr.f32.vlgmr.msra.gmra.mxu1 %v29336_v6  ;;  %v17577_v55 = vpop.permute.xlu0 %17576 }
 0x3f4   : > { %v8563_v61 = vpop.f32.mrf.mxu0  ;;  %16236 = vmatmul.mubr.f32.vlgmr.msra.gmra.mxu0 %v29337_v39  ;;  %16434 = vmatpush1.msra.mxu1 %v27599_v13  ;;  %v17579_v8 = vpop.permute.xlu1 %17578 }
 0x3f5   : > { %v8488_v30 = vadd.f32 %v8484_v57, %v8004_v7  ;;  %v8486_v51 = vadd.f32 %v8485_v24, %v8412_v54  ;;  %v8646_v49 = vadd.f32 %v8645_v47, %v8563_v61  ;;  %16359 = vmatpush1.msra.mxu0 %v27616_v63  ;;  %v8647_v4 = vpop.f32.mrf.mxu1  ;;  %16586 = vmatprep.subr.mxu1 %v27587_v1  ;;  %v29339_v57 = vld [vmem:[#allocation100_spill] sm:$0xff]  ;;  %v29340_v47 = vld [vmem:[#allocation99_spill] sm:$0xff] }
 0x3f6   : > { %16510 = vmatprep.subr.mxu0 %v29338_v19  ;;  %v8565_v20 = vpop.f32.mrf.mxu0  ;;  %16467 = vmatprep.mubr.f32.mxu1 %v29117_v46  ;;  %v17581_v24 = vsel %vm2672_vm10, %v17577_v55, %v17579_v8  ;;  %v29342_v61 = vld [vmem:[#allocation108_spill] sm:$0xff] }
 0x3f7   : > { %v8489_v45 = vadd.f32 %v8486_v51, %v8005_v9  ;;  %v8648_v10 = vadd.f32 %v8647_v4, %v8565_v20  ;;  %v8798_v7 = vpop.f32.mrf.mxu1  ;;  %16392 = vmatprep.mubr.f32.mxu0 %v29117_v46  ;;  %16471 = vmatmul.mubr.f32.vlgmr.msra.gmra.mxu1 %v29339_v57  ;;  %v29341_v9 = vld [vmem:[#allocation118_spill] sm:$0xff]  ;;  %v17584_v4 = vsel %vm708_vm4, %v17581_v24, 0 }
 0x3f8   : > { %v8722_v54 = vpop.f32.mrf.mxu0  ;;  %16395 = vmatmul.mubr.f32.vlgmr.msra.gmra.mxu0 %v29340_v47  ;;  %16588 = vmatpush1.msra.mxu1 %v27599_v13  ;;  %v17575_v13 = vpop.permute.xlu0 %17574 }
 0x3f9   : > { %v8723_v1 = vadd.f32 %v8722_v54, %v8646_v49  ;;  %16514 = vmatpush1.msra.mxu0 %v16280_v52  ;;  %v8800_v14 = vpop.f32.mrf.mxu1  ;;  %16750 = vmatprep.subr.mxu1 %v29341_v9  ;;  %v17580_v52 = vsel %vm2672_vm10, %v17575_v13, %v17577_v55  ;;  %v29343_v49 = vld [vmem:[#allocation120_spill] sm:$0xff]  ;;  %v29344_v9 = vld [vmem:[#allocation111_spill] sm:$0xff] }
 0x3fa   : > { %16668 = vmatprep.subr.mxu0 %v29342_v61  ;;  %v8724_v51 = vpop.f32.mrf.mxu0  ;;  %16621 = vmatprep.mubr.f32.mxu1 %v29117_v46  ;;  %v17582_v55 = vsel %vm708_vm4, %v17580_v52, 0  ;;  %v29352_v52 = vld [vmem:[#allocation112_spill] sm:$0xff] }
 0x3fb   : > { %v8725_v19 = vadd.f32 %v8724_v51, %v8648_v10  ;;  %v8950_v20 = vpop.f32.mrf.mxu1  ;;  %16547 = vmatprep.mubr.f32.mxu0 %v29117_v46  ;;  %v8799_v8 = vadd.f32 %v8798_v7, %v8723_v1  ;;  %16623 = vmatmul.mubr.f32.vlgmr.msra.gmra.mxu1 %v29336_v6  ;;  %v27686_v51 = vand.u32 4294901760, %v17584_v4  ;;  %v29346_v7 = vld [vmem:[#allocation110_spill] sm:$0xff] }
 0x3fc   : > { %v8876_v63 = vpop.f32.mrf.mxu0  ;;  %16549 = vmatmul.mubr.f32.vlgmr.msra.gmra.mxu0 %v29336_v6  ;;  %16756 = vmatpush1.msra.mxu1 %v29343_v49 }
 0x3fd   : > { %v8877_v54 = vadd.f32 %v8876_v63, %v8799_v8  ;;  %16670 = vmatpush1.msra.mxu0 %v29344_v9  ;;  %v8952_v10 = vpop.f32.mrf.mxu1  ;;  %v8801_v24 = vadd.f32 %v8800_v14, %v8725_v19  ;;  %29345 = vst [vmem:[#allocation124_spill] sm:$0xff] %v27686_v51  ;;  %16905 = vmatprep.subr.mxu1 %v29342_v61  ;;  %v29347_v8 = vld [vmem:[#allocation101_spill] sm:$0xff] }
 0x3fe   : > { %16829 = vmatprep.subr.mxu0 %v29346_v7  ;;  %v8878_v1 = vpop.f32.mrf.mxu0  ;;  %16789 = vmatprep.mubr.f32.mxu1 %v29117_v46  ;;  %v29348_v19 = vld [vmem:[#allocation105_spill] sm:$0xff] }
 0x3ff   : > { %v8951_v47 = vadd.f32 %v8950_v20, %v8877_v54  ;;  %v8879_v57 = vadd.f32 %v8878_v1, %v8801_v24  ;;  %v27691_v39 = vpop.f32.mrf.mxu1  ;;  %16703 = vmatprep.mubr.f32.mxu0 %v29117_v46  ;;  %16791 = vmatmul.mubr.f32.vlgmr.msra.gmra.mxu1 %v29347_v8  ;;  %v29350_v20 = vld [vmem:[#allocation113_spill] sm:$0xff]  ;;  %v27706_v54 = vsub.f32 %v17584_v4, %v27686_v51  ;;  %v18065_v24 = vpop.permute.xlu0 %18064  ;;  %v27712_v1 = vand.u32 4294901760, %v17582_v55 }
 0x400   : > { %v27696_v14 = vpop.f32.mrf.mxu0  ;;  %16709 = vmatmul.mubr.f32.vlgmr.msra.gmra.mxu0 %v29348_v19  ;;  %16907 = vmatpush1.msra.mxu1 %v29344_v9 }
 0x401   : > { %v27699_v13 = vadd.f32 %v8951_v47, %v8488_v30  ;;  %v8953_v63 = vadd.f32 %v8952_v10, %v8879_v57  ;;  %16832 = vmatpush1.msra.mxu0 %v29350_v20  ;;  %v27703_v49 = vpop.f32.mrf.mxu1  ;;  %29351 = vst [vmem:[#allocation58_spill] sm:$0xff] %v27706_v54  ;;  %17059 = vmatprep.subr.mxu1 %v29342_v61  ;;  %29353 = vst [vmem:[#allocation97_spill] sm:$0xff] %v27712_v1  ;;  %v18063_v30 = vpop.permute.xlu1 %18062  ;;  %v29355_v10 = vld [vmem:[#allocation104_spill] sm:$0xff]  ;;  %v29356_v20 = vld [vmem:[#allocation103_spill] sm:$0xff] }
 0x402   : > { %16983 = vmatprep.subr.mxu0 %v29352_v52  ;;  %v27710_v7 = vpop.f32.mrf.mxu0  ;;  %16940 = vmatprep.mubr.f32.mxu1 %v29117_v46  ;;  %v18067_v4 = vsel %vm702_vm3, %v18063_v30, %v18065_v24  ;;  %v29357_v52 = vld [vmem:[#allocation116_spill] sm:$0xff]  ;;  %v27734_v24 = vand.u32 4294901760, %v27706_v54 }
 0x403   : > { %29349 = vst [vmem:[#allocation59_spill] sm:$0xff] %v27699_v13  ;;  %v27714_v57 = vadd.f32 %v8953_v63, %v8489_v45  ;;  %v27717_v47 = vpop.f32.mrf.mxu1  ;;  %16865 = vmatprep.mubr.f32.mxu0 %v29117_v46  ;;  %16944 = vmatmul.mubr.f32.vlgmr.msra.gmra.mxu1 %v29355_v10  ;;  %v27737_v10 = vsub.f32 %v17582_v55, %v27712_v1  ;;  %v19016_v22 = vpop.permute.xlu0 %19015 }
 0x404   : > { %v27722_v61 = vpop.f32.mrf.mxu0  ;;  %16868 = vmatmul.mubr.f32.vlgmr.msra.gmra.mxu0 %v29356_v20  ;;  %17061 = vmatpush1.msra.mxu1 %v29344_v9  ;;  %29358 = vst [vmem:[#allocation123_spill] sm:$0xff] %v27734_v24  ;;  %v18070_v20 = vsel %vm708_vm4, %v18067_v4, 0 }
 0x405   : > { %29354 = vst [vmem:[#allocation125_spill] sm:$0xff] %v27714_v57  ;;  %16987 = vmatpush1.msra.mxu0 %v29357_v52  ;;  %v27727_v45 = vpop.f32.mrf.mxu1  ;;  %17217 = vmatprep.subr.mxu1 %v29311_v25  ;;  %29359 = vst [vmem:[#allocation126_spill] sm:$0xff] %v27737_v10  ;;  %v18061_v19 = vpop.permute.xlu1 %18060  ;;  %v27752_v4 = vand.u32 4294901760, %v18070_v20  ;;  %v27766_v0 = vand.u32 4294901760, %v27737_v10 }
 0x406   : > { %17135 = vmatprep.subr.mxu0 %v29312_v12  ;;  %v27731_v63 = vpop.f32.mrf.mxu0  ;;  %17094 = vmatprep.mubr.f32.mxu1 %v29117_v46  ;;  %v18066_v25 = vsel %vm702_vm3, %v18061_v19, %v18063_v30  ;;  %v29361_v19 = vld [vmem:[#allocation106_spill] sm:$0xff] }
 0x407   : > { %v27741_v9 = vpop.f32.mrf.mxu1  ;;  %17020 = vmatprep.mubr.f32.mxu0 %v29117_v46  ;;  %17096 = vmatmul.mubr.f32.vlgmr.msra.gmra.mxu1 %v29347_v8  ;;  %29360 = vst [vmem:[#allocation63_spill] sm:$0xff] %v27766_v0  ;;  %v18068_v32 = vsel %vm708_vm4, %v18066_v25, 0  ;;  %v27778_v2 = vsub.f32 %v18070_v20, %v27752_v4 }
 0x408   : > { %v27745_v52 = vpop.f32.mrf.mxu0  ;;  %17022 = vmatmul.mubr.f32.vlgmr.msra.gmra.mxu0 %v29347_v8  ;;  %17223 = vmatpush1.msra.mxu1 %v29313_v35  ;;  %v17697_v8 = vsub.f32 %v27706_v54, %v27734_v24  ;;  %v27792_v20 = vand.u32 4294901760, %v18068_v32 }
 0x409   : > { %17137 = vmatpush1.msra.mxu0 %v29314_v34  ;;  %v27750_v55 = vpop.f32.mrf.mxu1  ;;  %17372 = vmatprep.subr.mxu1 %v29312_v12  ;;  %v29371_v50 = vand.u32 4294901760, %v27778_v2  ;;  %v19018_v16 = vpop.permute.xlu1 %19017 }
 0x40a   : > { %17296 = vmatprep.subr.mxu0 %v29315_v38  ;;  %v27757_v6 = vpop.f32.mrf.mxu0  ;;  %17256 = vmatprep.mubr.f32.mxu1 %v29117_v46  ;;  %v29362_v38 = vld [vmem:[#allocation115_spill] sm:$0xff]  ;;  %v27784_v23 = vand.u32 4294901760, %v17697_v8 }
 0x40b   : > { %v27762_v35 = vpop.f32.mrf.mxu1  ;;  %17170 = vmatprep.mubr.f32.mxu0 %v29117_v46  ;;  %17258 = vmatmul.mubr.f32.vlgmr.msra.gmra.mxu1 %v29361_v19  ;;  %v29366_v8 = vld [vmem:[#allocation107_spill] sm:$0xff]  ;;  %v18183_v53 = vsub.f32 %v27778_v2, %v29371_v50 }
 0x40c   : > { %v27769_v30 = vpop.f32.mrf.mxu0  ;;  %17176 = vmatmul.mubr.f32.vlgmr.msra.gmra.mxu0 %v29362_v38  ;;  %17374 = vmatpush1.msra.mxu1 %v29314_v34  ;;  %29363 = vst [vmem:[#allocation129_spill] sm:$0xff] %v27784_v23  ;;  %v24445_v38 = vld [vmem:[%s25542_s30] sm:$0xff]  ;;  %s24123_s30 = sshll.u32 %s29470_s6, 3 }
 0x40d   : > { %17299 = vmatpush1.msra.mxu0 %v29318_v11  ;;  %v27775_v44 = vpop.f32.mrf.mxu1  ;;  %17526 = vmatprep.subr.mxu1 %v29312_v12  ;;  %v18059_v25 = vmul.f32 %v24445_v38, %v29364_v56  ;;  %v17703_v11 = vsub.f32 %v27737_v10, %v27766_v0  ;;  %v29365_v12 = vld [vmem:[#allocation109_spill] sm:$0xff]  ;;  %v18184_v21 = vand.u32 4294901760, %v18183_v53  ;;  %v19014_v53 = vpop.permute.xlu0 %19013  ;;  %s23816_s3 = sadd.s32 %s24123_s30, %s24119_s7 }
 0x40e   : > { %17450 = vmatprep.subr.mxu0 %v29319_v40  ;;  %v27782_v37 = vpop.f32.mrf.mxu0  ;;  %17407 = vmatprep.mubr.f32.mxu1 %v29117_v46  ;;  %s24120_s25 = sshll.u32 %s23816_s3, 6 }
 0x40f   : > { %17332 = vmatprep.mubr.f32.mxu0 %v29117_v46  ;;  %v27794_v17 = vpop.f32.mrf.mxu1  ;;  %17411 = vmatmul.mubr.f32.vlgmr.msra.gmra.mxu1 %v29365_v12  ;;  %v18538_v12 = vcombine.high %v18059_v25, %v18059_v25  ;;  %v18539_v29 = vsel %vm708_vm4, %v18059_v25, 0  ;;  %s28647_s26 = scalar_lea.hbm %s29472_s23, %s24120_s25 }
 0x410   : > { %v27797_v40 = vpop.f32.mrf.mxu0  ;;  %17335 = vmatmul.mubr.f32.vlgmr.msra.gmra.mxu0 %v29366_v8  ;;  %17528 = vmatpush1.msra.mxu1 %v29314_v34  ;;  %v27811_v8 = vand.u32 4294901760, %v17703_v11  ;;  %v27814_v34 = vsub.f32 %v18068_v32, %v27792_v20  ;;  %v27856_v15 = vand.u32 4294901760, %v18539_v29 }
 0x411   : > { %17454 = vmatpush1.msra.mxu0 %v29322_v3  ;;  %17699 = vmatprep.subr.mxu1 %v27784_v23  ;;  %v27803_v38 = vpop.f32.mrf.mxu1  ;;  %v19502_v42 = vpop.permute.xlu0 %19501 }
 0x412   : > { %17617 = vmatprep.subr.mxu0 %v27686_v51  ;;  %v27806_v56 = vpop.f32.mrf.mxu0  ;;  %17561 = vmatprep.mubr.f32.mxu1 %v29117_v46  ;;  %29367 = vst [vmem:[#allocation122_spill] sm:$0xff] %v27811_v8 }
 0x413   : > { %17487 = vmatprep.mubr.f32.mxu0 %v29117_v46  ;;  %v27816_v3 = vpop.f32.mrf.mxu1  ;;  %17563 = vmatmul.mubr.f32.vlgmr.msra.gmra.mxu1 %v29361_v19 }
 0x414   : > { %29368 = vst [vmem:[#allocation127_spill] sm:$0xff] %v27816_v3  ;;  %v27819_v43 = vpop.f32.mrf.mxu0  ;;  %17489 = vmatmul.mubr.f32.vlgmr.msra.gmra.mxu0 %v29361_v19  ;;  %17705 = vmatpush1.msra.mxu1 %v27811_v8  ;;  %v18541_v19 = vsel %vm708_vm4, %v18538_v12, 0  ;;  %v27882_v3 = vsub.f32 %v18539_v29, %v27856_v15 }
 0x415   : > { %17619 = vmatpush1.msra.mxu0 %v27712_v1  ;;  %17854 = vmatprep.subr.mxu1 %v27686_v51  ;;  %v27827_v11 = vpop.f32.mrf.mxu1  ;;  %v27848_v12 = vand.u32 4294901760, %v18541_v19 }
 0x416   : > { %29369 = vst [vmem:[#allocation133_spill] sm:$0xff] %v27827_v11  ;;  %17778 = vmatprep.subr.mxu0 %v27706_v54  ;;  %v27830_v32 = vpop.f32.mrf.mxu0  ;;  %17738 = vmatprep.mubr.f32.mxu1 %v29117_v46  ;;  %v29372_v54 = vld [vmem:[#allocation114_spill] sm:$0xff] }
 0x417   : > { %29370 = vst [vmem:[#allocation134_spill] sm:$0xff] %v27830_v32  ;;  %17652 = vmatprep.mubr.f32.mxu0 %v29117_v46  ;;  %v27840_v8 = vpop.f32.mrf.mxu1  ;;  %17740 = vmatmul.mubr.f32.vlgmr.msra.gmra.mxu1 %v29372_v54 }
 0x418   : > { %v27843_v23 = vpop.f32.mrf.mxu0  ;;  %17658 = vmatmul.mubr.f32.vlgmr.msra.gmra.mxu0 %v29373_v31  ;;  %17856 = vmatpush1.msra.mxu1 %v27712_v1 }
 0x419   : > { %17781 = vmatpush1.msra.mxu0 %v27737_v10  ;;  %18008 = vmatprep.subr.mxu1 %v27686_v51  ;;  %v27851_v50 = vpop.f32.mrf.mxu1  ;;  %v29374_v10 = vld [vmem:[#allocation119_spill] sm:$0xff] }
 0x41a   : > { %17932 = vmatprep.subr.mxu0 %v27734_v24  ;;  %v27854_v25 = vpop.f32.mrf.mxu0  ;;  %17889 = vmatprep.mubr.f32.mxu1 %v29117_v46  ;;  %v29375_v24 = vand.u32 4294901760, %v27814_v34 }
 0x41b   : > { %23319 = vrot.lane.b32.xlu0 %v23316_v60, %s24988_s21  ;;  %v27860_v31 = vpop.f32.mrf.mxu1  ;;  %17814 = vmatprep.mubr.f32.mxu0 %v29117_v46  ;;  %v27874_v60 = vsub.f32 %v18541_v19, %v27848_v12 }
 0x41c   : > { %17893 = vmatmul.mubr.f32.vlgmr.msra.gmra.mxu1 %v29374_v10  ;;  %v27864_v51 = vpop.f32.mrf.mxu0  ;;  %v18189_v58 = vsub.f32 %v27814_v34, %v29375_v24  ;;  %17817 = vmatmul.mubr.f32.vlgmr.msra.gmra.mxu0 %v29376_v27  ;;  %v19020_v24 = vsel %vm1692_vm7, %v19016_v22, %v19018_v16 }
 0x41d   : > { %18010 = vmatpush1.msra.mxu1 %v27712_v1  ;;  %17936 = vmatpush1.msra.mxu0 %v27766_v0  ;;  %v27877_v10 = vpop.f32.mrf.mxu1  ;;  %v19019_v0 = vsel %vm1692_vm7, %v19014_v53, %v19016_v22  ;;  %v28980_v16 = vand.u32 4294901760, %v27874_v60  ;;  %v19023_v29 = vsel %vm708_vm4, %v19020_v24, 0  ;;  %v19500_v1 = vpop.permute.xlu1 %19499 }
 0x41e   : > { %18185 = vmatprep.subr.mxu1 %v18184_v21  ;;  %v27879_v11 = vpop.f32.mrf.mxu0  ;;  %18103 = vmatprep.subr.mxu0 %v27752_v4  ;;  %v18190_v21 = vand.u32 4294901760, %v18189_v58  ;;  %v19021_v22 = vsel %vm708_vm4, %v19019_v0, 0  ;;  %v29381_v0 = vld [vmem:[#allocation60_spill] sm:$0xff] }
 0x41f   : > { %18043 = vmatprep.mubr.f32.mxu1 %v29117_v46  ;;  %23317 = vrot.lane.b32.xlu0 %v664_v5, %s24988_s21  ;;  %v27889_v19 = vpop.f32.mrf.mxu1  ;;  %v18654_v58 = vsub.f32 %v27874_v60, %v28980_v16  ;;  %v27929_v57 = vand.u32 4294901760, %v19021_v22  ;;  %v29383_v16 = vand.u32 4294901760, %v27778_v2 }
 0x420   : > { %23321 = vrot.lane.b32.xlu1 %v665_v62, %s24988_s21  ;;  %29377 = vst [vmem:[#allocation62_spill] sm:$0xff] %v27889_v19  ;;  %v27891_v27 = vpop.f32.mrf.mxu0  ;;  %17969 = vmatprep.mubr.f32.mxu0 %v29117_v46  ;;  %v29382_v19 = vand.u32 4294901760, %v27882_v3  ;;  %s24996_s21 = smov [#allocation17]  }
 0x421   : > { %29378 = vst [vmem:[#allocation61_spill] sm:$0xff] %v27891_v27  ;;  %18045 = vmatmul.mubr.f32.vlgmr.msra.gmra.mxu1 %v29372_v54  ;;  %17971 = vmatmul.mubr.f32.vlgmr.msra.gmra.mxu0 %v29372_v54  ;;  %v27899_v5 = vpop.f32.mrf.mxu1  ;;  %v18655_v27 = vand.u32 4294901760, %v18654_v58  ;;  %v27952_v32 = vsub.f32 %v19021_v22, %v27929_v57  ;;  %s24701_s13 = sshll.u32 %s24996_s21, 4  ;;  %s24702_s13 = int_to_ptr.vmem [resolvable:$false] %s24701_s13 }
 0x422   : > { %18191 = vmatpush1.msra.mxu1 %v18190_v21  ;;  %29379 = vst [vmem:[#allocation132_spill] sm:$0xff] %v27899_v5  ;;  %v27901_v62 = vpop.f32.mrf.mxu0  ;;  %18105 = vmatpush1.msra.mxu0 %v27792_v20  ;;  %v27913_v21 = vand.u32 4294901760, %v19023_v29  ;;  %s24703_s12 = scalar_lea.vmem %s24702_s13, 1024  ;;  %p24704_p0 = scmp.lt.s32.totalorder %s28649_s14, %s24702_s13 }
 0x423   : > { %29380 = vst [vmem:[#allocation128_spill] sm:$0xff] %v27901_v62  ;;  %18340 = vmatprep.subr.mxu1 %v27752_v4  ;;  %18264 = vmatprep.subr.mxu0 %v27778_v2  ;;  %v27909_v53 = vpop.f32.mrf.mxu1  ;;  %v18660_v62 = vsub.f32 %v27882_v3, %v29382_v19  ;;  %v19498_v19 = vpop.permute.xlu1 %19497  ;;  %p24705_p2 = scmp.lt.s32.totalorder %s24703_s12, %s24697_s11 }
 0x424   : > { %18224 = vmatprep.mubr.f32.mxu1 %v29117_v46  ;;  %v27911_v24 = vpop.f32.mrf.mxu0  ;;  %18138 = vmatprep.mubr.f32.mxu0 %v29117_v46  ;;  %v27941_v33 = vsub.f32 %v19023_v29, %v27913_v21  ;;  %v19504_v29 = vsel %vm2188_vm9, %v19500_v1, %v19502_v42 }
 0x425   : > { %18226 = vmatmul.mubr.f32.vlgmr.msra.gmra.mxu1 %v25615_v41  ;;  %18144 = vmatmul.mubr.f32.vlgmr.msra.gmra.mxu0 %v29381_v0  ;;  %v27922_v54 = vpop.f32.mrf.mxu1  ;;  %p24706_p5 = por %p24705_p2, %p24704_p0 }
 0x426   : > { %18342 = vmatpush1.msra.mxu1 %v27792_v20  ;;  %v27924_v5 = vpop.f32.mrf.mxu0  ;;  %18267 = vmatpush1.msra.mxu0 %v27814_v34 }
 0x427   : > { %18494 = vmatprep.subr.mxu1 %v27752_v4  ;;  %18418 = vmatprep.subr.mxu0 %v29383_v16  ;;  %v27936_v0 = vpop.f32.mrf.mxu1  ;;  %v18661_v16 = vand.u32 4294901760, %v18660_v62  ;;  %p24707_p12 = pnand %p24706_p5, %p24700_p8 }
 0x428   : > { %18375 = vmatprep.mubr.f32.mxu1 %v29117_v46  ;;  %29384 = vst [vmem:[#allocation131_spill] sm:$0xff] %v27936_v0  ;;  %v27938_v13 = vpop.f32.mrf.mxu0  ;;  %18300 = vmatprep.mubr.f32.mxu0 %v29117_v46  ;;  %v29385_v0 = vand.u32 4294901760, %v27814_v34  ;;  %v19135_v34 = vand.u32 4294901760, %v27941_v33 }
 0x429   : > { %18379 = vmatmul.mubr.f32.vlgmr.msra.gmra.mxu1 %v29262_v48  ;;  %18303 = vmatmul.mubr.f32.vlgmr.msra.gmra.mxu0 %v29263_v28  ;;  %v27947_v2 = vpop.f32.mrf.mxu1  ;;  %v19503_v48 = vsel %vm2188_vm9, %v19498_v19, %v19500_v1  ;;  %v9130_v28 = vadd.f32 %v27691_v39, %v27696_v14  ;;  %v19507_v1 = vsel %vm708_vm4, %v19504_v29, 0 }
 0x42a   : > { %18496 = vmatpush1.msra.mxu1 %v27792_v20  ;;  %v27949_v4 = vpop.f32.mrf.mxu0  ;;  %18422 = vmatpush1.msra.mxu0 %v29385_v0  ;;  %v9132_v20 = vadd.f32 %v27703_v49, %v27710_v7  ;;  %v19505_v62 = vsel %vm708_vm4, %v19503_v48, 0  ;;  %v19136_v0 = vsub.f32 %v27941_v33, %v19135_v34 }
 0x42b   : > { %18529 = vmatprep.mubr.f32.mxu1 %v29117_v46  ;;  %v27963_v58 = vpop.f32.mrf.mxu1  ;;  %18455 = vmatprep.mubr.f32.mxu0 %v29117_v46  ;;  %v9207_v39 = vadd.f32 %v27722_v61, %v9130_v28  ;;  %v27989_v61 = vand.u32 4294901760, %v19507_v1  ;;  %v27998_v19 = vand.u32 4294901760, %v19505_v62 }
 0x42c   : > { %18574 = vmatprep.subr.mxu0 %v27848_v12  ;;  %v27967_v42 = vpop.f32.mrf.mxu0  ;;  %18656 = vmatprep.subr.mxu1 %v18655_v27  ;;  %v9209_v14 = vadd.f32 %v27731_v63, %v9132_v20  ;;  %v19141_v27 = vand.u32 4294901760, %v27952_v32  ;;  %v9614_v63 = vadd.f32 %v27762_v35, %v27769_v30  ;;  %v9616_v30 = vadd.f32 %v27775_v44, %v27782_v37 }
 0x42d   : > { %18531 = vmatmul.mubr.f32.vlgmr.msra.gmra.mxu1 %v25615_v41  ;;  %18457 = vmatmul.mubr.f32.vlgmr.msra.gmra.mxu0 %v25615_v41  ;;  %v27975_v49 = vpop.f32.mrf.mxu1  ;;  %v10093_v20 = vadd.f32 %v27840_v8, %v27843_v23  ;;  %v19137_v8 = vand.u32 4294901760, %v19136_v0 }
 0x42e   : > { %v27977_v7 = vpop.f32.mrf.mxu0  ;;  %18662 = vmatpush1.msra.mxu1 %v18661_v16  ;;  %18576 = vmatpush1.msra.mxu0 %v27856_v15  ;;  %v9283_v16 = vadd.f32 %v27717_v47, %v9207_v39  ;;  %v9285_v29 = vadd.f32 %v27727_v45, %v9209_v14  ;;  %v9691_v28 = vadd.f32 %v27797_v40, %v9614_v63  ;;  %v29386_v45 = vand.u32 4294901760, %v27874_v60 }
 0x42f   : > { %18695 = vmatprep.mubr.f32.mxu1 %v29117_v46  ;;  %v27983_v22 = vpop.f32.mrf.mxu1  ;;  %18609 = vmatprep.mubr.f32.mxu0 %v29117_v46  ;;  %v19142_v37 = vsub.f32 %v27952_v32, %v19141_v27  ;;  %v28025_v40 = vsub.f32 %v19507_v1, %v27989_v61  ;;  %v9693_v23 = vadd.f32 %v27806_v56, %v9616_v30 }
 0x430   : > { %18735 = vmatprep.subr.mxu0 %v27874_v60  ;;  %v27987_v41 = vpop.f32.mrf.mxu0  ;;  %18811 = vmatprep.subr.mxu1 %v27848_v12  ;;  %v10170_v44 = vadd.f32 %v27864_v51, %v10093_v20  ;;  %v10095_v39 = vadd.f32 %v27851_v50, %v27854_v25  ;;  %v10577_v1 = vadd.f32 %v27909_v53, %v27911_v24  ;;  %v29390_v20 = vld [vmem:[#allocation61_spill] sm:$0xff] }
 0x431   : > { %18697 = vmatmul.mubr.f32.vlgmr.msra.gmra.mxu1 %v25648_v59  ;;  %18615 = vmatmul.mubr.f32.vlgmr.msra.gmra.mxu0 %v29269_v36  ;;  %v28003_v48 = vpop.f32.mrf.mxu1  ;;  %v9361_v56 = vadd.f32 %v27745_v52, %v9283_v16  ;;  %v9363_v60 = vadd.f32 %v27757_v6, %v9285_v29  ;;  %v9767_v14 = vadd.f32 %v27794_v17, %v9691_v28  ;;  %v19143_v6 = vand.u32 4294901760, %v19142_v37  ;;  %v29389_v28 = vld [vmem:[#allocation134_spill] sm:$0xff] }
 0x432   : > { %18813 = vmatpush1.msra.mxu1 %v27856_v15  ;;  %v28006_v35 = vpop.f32.mrf.mxu0  ;;  %18738 = vmatpush1.msra.mxu0 %v27882_v3  ;;  %v10172_v50 = vadd.f32 %v27879_v11, %v10095_v39  ;;  %v10246_v17 = vadd.f32 %v27860_v31, %v10170_v44  ;;  %v20453_v31 = vpop.permute.xlu1 %20452  ;;  %v29392_v44 = vld [vmem:[#allocation69_spill] sm:$0xff] }
 0x433   : > { %18846 = vmatprep.mubr.f32.mxu1 %v29117_v46  ;;  %18965 = vmatprep.subr.mxu1 %v27848_v12  ;;  %v28016_v36 = vpop.f32.mrf.mxu1  ;;  %v28033_v12 = vsub.f32 %v19505_v62, %v27998_v19  ;;  %v29387_v62 = vand.u32 4294901760, %v27882_v3  ;;  %v9769_v3 = vadd.f32 %v27803_v38, %v9693_v23  ;;  %v28072_v38 = vpop.permute.xlu0 %20450  ;;  %v9435_v24 = vadd.f32 %v27741_v9, %v9361_v56 }
 0x434   : > { %18771 = vmatprep.mubr.f32.mxu0 %v29117_v46  ;;  %v28019_v47 = vpop.f32.mrf.mxu0  ;;  %18889 = vmatprep.subr.mxu0 %v29386_v45  ;;  %v9437_v63 = vadd.f32 %v27750_v55, %v9363_v60  ;;  %v9845_v0 = vadd.f32 %v27819_v43, %v9767_v14  ;;  %v10324_v55 = vadd.f32 %v29390_v20, %v10246_v17  ;;  %v29391_v43 = vld [vmem:[#allocation64_spill] sm:$0xff]  ;;  %v29394_v60 = vld [vmem:[#allocation125_spill] sm:$0xff] }
 0x435   : > { %18850 = vmatmul.mubr.f32.vlgmr.msra.gmra.mxu1 %v29276_v18  ;;  %18774 = vmatmul.mubr.f32.vlgmr.msra.gmra.mxu0 %v29277_v26  ;;  %v28041_v51 = vpop.f32.mrf.mxu1  ;;  %v10654_v26 = vadd.f32 %v27938_v13, %v10577_v1  ;;  %v19625_v13 = vand.u32 4294901760, %v28033_v12  ;;  %v9847_v9 = vadd.f32 %v29389_v28, %v9769_v3  ;;  %v20455_v37 = vsel %vm3168_vm11, %v28072_v38, %v20453_v31  ;;  %v29393_v1 = vld [vmem:[#allocation59_spill] sm:$0xff]  ;;  %v29397_v31 = vld [vmem:[#allocation133_spill] sm:$0xff] }
 0x436   : > { %18967 = vmatpush1.msra.mxu1 %v27856_v15  ;;  %v28043_v18 = vpop.f32.mrf.mxu0  ;;  %18893 = vmatpush1.msra.mxu0 %v29387_v62  ;;  %v10579_v15 = vadd.f32 %v27922_v54, %v27924_v5  ;;  %v19619_v54 = vand.u32 4294901760, %v28025_v40  ;;  %v9439_v56 = vadd.f32 %v9435_v24, %v29393_v1  ;;  %v9440_v14 = vadd.f32 %v9437_v63, %v29394_v60  ;;  %v29395_v62 = vld [vmem:[#allocation127_spill] sm:$0xff]  ;;  %v29398_v63 = vld [vmem:[#allocation62_spill] sm:$0xff] }
 0x437   : > { %19138 = vmatprep.subr.mxu1 %v19137_v8  ;;  %19056 = vmatprep.subr.mxu0 %v27913_v21  ;;  %v28056_v52 = vpop.f32.mrf.mxu1  ;;  %v19626_v39 = vsub.f32 %v28033_v12, %v19625_v13  ;;  %v9921_v24 = vadd.f32 %v29397_v31, %v9847_v9 }
 0x438   : > { %19000 = vmatprep.mubr.f32.mxu1 %v29117_v46  ;;  %v28058_v25 = vpop.f32.mrf.mxu0  ;;  %18926 = vmatprep.mubr.f32.mxu0 %v29117_v46  ;;  %v10656_v11 = vadd.f32 %v27949_v4, %v10579_v15  ;;  %v10248_v4 = vadd.f32 %v27877_v10, %v10172_v50  ;;  %v19620_v10 = vsub.f32 %v28025_v40, %v19619_v54 }
 0x439   : > { %19002 = vmatmul.mubr.f32.vlgmr.msra.gmra.mxu1 %v25648_v59  ;;  %18928 = vmatmul.mubr.f32.vlgmr.msra.gmra.mxu0 %v25648_v59  ;;  %v28068_v5 = vpop.f32.mrf.mxu1  ;;  %v29388_v59 = vld [vmem:[#allocation131_spill] sm:$0xff]  ;;  %v9919_v50 = vadd.f32 %v29395_v62, %v9845_v0  ;;  %v10398_v0 = vadd.f32 %v29398_v63, %v10324_v55 }
 0x43a   : > { %19144 = vmatpush1.msra.mxu1 %v19143_v6  ;;  %v28070_v53 = vpop.f32.mrf.mxu0  ;;  %19058 = vmatpush1.msra.mxu0 %v27929_v57  ;;  %v10730_v16 = vadd.f32 %v29388_v59, %v10654_v26  ;;  %v10732_v23 = vadd.f32 %v27947_v2, %v10656_v11  ;;  %v29396_v2 = vld [vmem:[#allocation128_spill] sm:$0xff]  ;;  %v11050_v6 = vadd.f32 %v27983_v22, %v27987_v41  ;;  %v20449_v11 = vpop.permute.xlu0 %20448  ;;  %v19621_v22 = vand.u32 4294901760, %v19620_v10 }
 0x43b   : > { %19293 = vmatprep.subr.mxu1 %v27913_v21  ;;  %19217 = vmatprep.subr.mxu0 %v27941_v33  ;;  %v11516_v29 = vpop.f32.mrf.mxu1  ;;  %v10326_v15 = vadd.f32 %v29396_v2, %v10248_v4  ;;  %v29400_v4 = vld [vmem:[#allocation65_spill] sm:$0xff]  ;;  %v9923_v28 = vadd.f32 %v9919_v50, %v9439_v56  ;;  %v20935_v56 = vpop.permute.xlu1 %20934  ;;  %v29403_v50 = vld [vmem:[#allocation72_spill] sm:$0xff] }
 0x43c   : > { %19177 = vmatprep.mubr.f32.mxu1 %v29117_v46  ;;  %v11434_v30 = vpop.f32.mrf.mxu0  ;;  %19091 = vmatprep.mubr.f32.mxu0 %v29117_v46  ;;  %v10808_v26 = vadd.f32 %v27967_v42, %v10730_v16  ;;  %v29399_v42 = vld [vmem:[#allocation66_spill] sm:$0xff]  ;;  %v10810_v33 = vadd.f32 %v27977_v7, %v10732_v23 }
 0x43d   : > { %19179 = vmatmul.mubr.f32.vlgmr.msra.gmra.mxu1 %v29391_v43  ;;  %19097 = vmatmul.mubr.f32.vlgmr.msra.gmra.mxu0 %v29392_v44  ;;  %v11518_v45 = vpop.f32.mrf.mxu1  ;;  %v11517_v41 = vadd.f32 %v11516_v29, %v11434_v30  ;;  %v19627_v29 = vand.u32 4294901760, %v19626_v39 }
 0x43e   : > { %19295 = vmatpush1.msra.mxu1 %v27929_v57  ;;  %v11436_v8 = vpop.f32.mrf.mxu0  ;;  %19220 = vmatpush1.msra.mxu0 %v27952_v32  ;;  %v10882_v7 = vadd.f32 %v27963_v58, %v10808_v26  ;;  %v20458_v32 = vsel %vm708_vm4, %v20455_v37, 0  ;;  %v10402_v58 = vadd.f32 %v10398_v0, %v9923_v28  ;;  %v10884_v10 = vadd.f32 %v27975_v49, %v10810_v33 }
 0x43f   : > { %19447 = vmatprep.subr.mxu1 %v27913_v21  ;;  %19371 = vmatprep.subr.mxu0 %v19135_v34  ;;  %v11669_v3 = vpop.f32.mrf.mxu1  ;;  %v11052_v21 = vadd.f32 %v28003_v48, %v28006_v35  ;;  %v11127_v34 = vadd.f32 %v28019_v47, %v11050_v6  ;;  %v11519_v48 = vadd.f32 %v11518_v45, %v11436_v8  ;;  %v29401_v35 = vld [vmem:[#allocation132_spill] sm:$0xff]  ;;  %v28142_v37 = vand.u32 4294901760, %v20458_v32 }
 0x440   : > { %19328 = vmatprep.mubr.f32.mxu1 %v29117_v46  ;;  %v11593_v17 = vpop.f32.mrf.mxu0  ;;  %19253 = vmatprep.mubr.f32.mxu0 %v29117_v46  ;;  %v10400_v20 = vadd.f32 %v29401_v35, %v10326_v15  ;;  %v10886_v39 = vadd.f32 %v10882_v7, %v10402_v58 }
 0x441   : > { %19332 = vmatmul.mubr.f32.vlgmr.msra.gmra.mxu1 %v29399_v42  ;;  %19256 = vmatmul.mubr.f32.vlgmr.msra.gmra.mxu0 %v29400_v4  ;;  %v11671_v59 = vpop.f32.mrf.mxu1  ;;  %v11129_v9 = vadd.f32 %v28043_v18, %v11052_v21  ;;  %v11594_v47 = vadd.f32 %v11593_v17, %v11517_v41  ;;  %v20454_v18 = vsel %vm3168_vm11, %v20449_v11, %v28072_v38  ;;  %v20933_v41 = vpop.permute.xlu1 %20932 }
 0x442   : > { %19449 = vmatpush1.msra.mxu1 %v27929_v57  ;;  %v11595_v16 = vpop.f32.mrf.mxu0  ;;  %19375 = vmatpush1.msra.mxu0 %v19141_v27  ;;  %v9924_v27 = vadd.f32 %v9921_v24, %v9440_v14  ;;  %v11203_v23 = vadd.f32 %v28016_v36, %v11127_v34  ;;  %v28158_v17 = vsub.f32 %v20458_v32, %v28142_v37  ;;  %v10890_v11 = vmul.f32 0.01, %v10886_v39 }
 0x443   : > { %19622 = vmatprep.subr.mxu1 %v19621_v22  ;;  %19540 = vmatprep.subr.mxu0 %v27989_v61  ;;  %v28127_v57 = vpop.f32.mrf.mxu1  ;;  %v11596_v55 = vadd.f32 %v11595_v16, %v11519_v48  ;;  %v11205_v38 = vadd.f32 %v28041_v51, %v11129_v9  ;;  %v11670_v1 = vadd.f32 %v11669_v3, %v11594_v47  ;;  %v29402_v51 = vld [vmem:[#allocation67_spill] sm:$0xff]  ;;  %vm10888_vm1 = vcmp.gt.f32.partialorder %v10886_v39, 0.0  ;;  %v29407_v48 = vld [vmem:[#allocation124_spill] sm:$0xff] }
 0x444   : > { %19482 = vmatprep.mubr.f32.mxu1 %v29117_v46  ;;  %v11747_v30 = vpop.f32.mrf.mxu0  ;;  %19408 = vmatprep.mubr.f32.mxu0 %v29117_v46  ;;  %v10403_v8 = vadd.f32 %v10400_v20, %v9924_v27  ;;  %v11281_v62 = vadd.f32 %v28058_v25, %v11203_v23 }
 0x445   : > { %19484 = vmatmul.mubr.f32.vlgmr.msra.gmra.mxu1 %v29391_v43  ;;  %19410 = vmatmul.mubr.f32.vlgmr.msra.gmra.mxu0 %v29391_v43  ;;  %v28137_v44 = vpop.f32.mrf.mxu1  ;;  %v20456_v43 = vsel %vm708_vm4, %v20454_v18, 0  ;;  %v11672_v60 = vadd.f32 %v11671_v59, %v11596_v55  ;;  %v11283_v26 = vadd.f32 %v28070_v53, %v11205_v38  ;;  %v11748_v25 = vadd.f32 %v11747_v30, %v11670_v1  ;;  %v20937_v53 = vpop.permute.xlu0 %20936  ;;  %v29406_v59 = vld [vmem:[#allocation129_spill] sm:$0xff]  ;;  %v29408_v18 = vld [vmem:[#allocation122_spill] sm:$0xff] }
 0x446   : > { %19628 = vmatpush1.msra.mxu1 %v19627_v29  ;;  %v11749_v45 = vpop.f32.mrf.mxu0  ;;  %19542 = vmatpush1.msra.mxu0 %v27998_v19  ;;  %v10887_v14 = vadd.f32 %v10884_v10, %v10403_v8  ;;  %v28155_v3 = vand.u32 4294901760, %v20456_v43  ;;  %v20939_v42 = vsel %vm3664_vm12, %v20935_v56, %v20937_v53  ;;  %v11355_v33 = vadd.f32 %v28056_v52, %v11281_v62  ;;  %v29409_v10 = vld [vmem:[#allocation97_spill] sm:$0xff]  ;;  %v29410_v8 = vld [vmem:[#allocation58_spill] sm:$0xff]  ;;  %v29414_v53 = vld [vmem:[#allocation123_spill] sm:$0xff] }
 0x447   : > { %19777 = vmatprep.subr.mxu1 %v27989_v61  ;;  %19701 = vmatprep.subr.mxu0 %v28025_v40  ;;  %v11998_v49 = vpop.f32.mrf.mxu1  ;;  %v11750_v63 = vadd.f32 %v11749_v45, %v11672_v60  ;;  %v29405_v40 = vld [vmem:[#allocation68_spill] sm:$0xff]  ;;  %v11357_v4 = vadd.f32 %v28068_v5, %v11283_v26  ;;  %v11822_v52 = vadd.f32 %v28127_v57, %v11748_v25  ;;  %v29411_v60 = vld [vmem:[#allocation71_spill] sm:$0xff] }
 0x448   : > { %19661 = vmatprep.mubr.f32.mxu1 %v29117_v46  ;;  %v11916_v36 = vpop.f32.mrf.mxu0  ;;  %19575 = vmatprep.mubr.f32.mxu0 %v29117_v46  ;;  %v10891_v22 = vmul.f32 0.01, %v10887_v14  ;;  %vm10889_vm2 = vcmp.gt.f32.partialorder %v10887_v14, 0.0  ;;  %v28174_v9 = vsub.f32 %v20456_v43, %v28155_v3  ;;  %v20938_v57 = vsel %vm3664_vm12, %v20933_v41, %v20935_v56 }
 0x449   : > { %19663 = vmatmul.mubr.f32.vlgmr.msra.gmra.mxu1 %v29402_v51  ;;  %19581 = vmatmul.mubr.f32.vlgmr.msra.gmra.mxu0 %v29403_v50  ;;  %v12000_v2 = vpop.f32.mrf.mxu1  ;;  %v11999_v6 = vadd.f32 %v11998_v49, %v11916_v36  ;;  %v11824_v20 = vadd.f32 %v28137_v44, %v11750_v63  ;;  %v20940_v36 = vsel %vm708_vm4, %v20938_v57, 0 }
 0x44a   : > { %19779 = vmatpush1.msra.mxu1 %v27998_v19  ;;  %v11918_v15 = vpop.f32.mrf.mxu0  ;;  %19704 = vmatpush1.msra.mxu0 %v28033_v12  ;;  %v20570_v12 = vand.u32 4294901760, %v28158_v17  ;;  %v10893_v30 = vsel %vm10889_vm2, %v10887_v14, %v10891_v22  ;;  %v20576_v44 = vand.u32 4294901760, %v28174_v9  ;;  %v29412_v14 = vld [vmem:[#allocation76_spill] sm:$0xff]  ;;  %v29415_v22 = vld [vmem:[#allocation74_spill] sm:$0xff] }
 0x44b   : > { %19931 = vmatprep.subr.mxu1 %v27989_v61  ;;  %19855 = vmatprep.subr.mxu0 %v19619_v54  ;;  %v12151_v31 = vpop.f32.mrf.mxu1  ;;  %v12001_v0 = vadd.f32 %v12000_v2, %v11918_v15  ;;  %v29404_v61 = vld [vmem:[#allocation70_spill] sm:$0xff]  ;;  %v11360_v55 = vadd.f32 %v11357_v4, %v10893_v30  ;;  %v21414_v2 = vpop.permute.xlu0 %21413  ;;  %v29417_v4 = vld [vmem:[#allocation63_spill] sm:$0xff] }
 0x44c   : > { %19812 = vmatprep.mubr.f32.mxu1 %v29117_v46  ;;  %v12075_v24 = vpop.f32.mrf.mxu0  ;;  %19737 = vmatprep.mubr.f32.mxu0 %v29117_v46  ;;  %v20571_v49 = vsub.f32 %v28158_v17, %v20570_v12  ;;  %v21416_v15 = vpop.permute.xlu1 %21415 }
 0x44d   : > { %19816 = vmatmul.mubr.f32.vlgmr.msra.gmra.mxu1 %v29404_v61  ;;  %v12076_v21 = vadd.f32 %v12075_v24, %v11999_v6  ;;  %19740 = vmatmul.mubr.f32.vlgmr.msra.gmra.mxu0 %v29405_v40  ;;  %v12153_v54 = vpop.f32.mrf.mxu1  ;;  %v11827_v43 = vadd.f32 %v11824_v20, %v11360_v55  ;;  %v28209_v24 = vand.u32 4294901760, %v20940_v36  ;;  %v20577_v61 = vsub.f32 %v28174_v9, %v20576_v44 }
 0x44e   : > { %19933 = vmatpush1.msra.mxu1 %v27998_v19  ;;  %v12077_v34 = vpop.f32.mrf.mxu0  ;;  %19859 = vmatpush1.msra.mxu0 %v19625_v13  ;;  %v10892_v19 = vsel %vm10888_vm1, %v10886_v39, %v10890_v11  ;;  %v20942_v13 = vsel %vm708_vm4, %v20939_v42, 0  ;;  %v29413_v11 = vld [vmem:[#allocation126_spill] sm:$0xff]  ;;  %v20572_v40 = vand.u32 4294901760, %v20571_v49 }
 0x44f   : > { %20089 = vmatprep.subr.mxu1 %v29406_v59  ;;  %v12078_v16 = vadd.f32 %v12077_v34, %v12001_v0  ;;  %v12152_v28 = vadd.f32 %v12151_v31, %v12076_v21  ;;  %20007 = vmatprep.subr.mxu0 %v29407_v48  ;;  %v12303_v35 = vpop.f32.mrf.mxu1  ;;  %v11359_v29 = vadd.f32 %v11355_v33, %v10892_v19  ;;  %v28192_v45 = vand.u32 4294901760, %v20942_v13  ;;  %v21412_v20 = vpop.permute.xlu0 %21411 }
 0x450   : > { %19966 = vmatprep.mubr.f32.mxu1 %v29117_v46  ;;  %v12229_v5 = vpop.f32.mrf.mxu0  ;;  %19892 = vmatprep.mubr.f32.mxu0 %v29117_v46  ;;  %v21418_v21 = vsel %vm4148_vm13, %v21414_v2, %v21416_v15  ;;  %v28224_v19 = vsub.f32 %v20940_v36, %v28209_v24  ;;  %v21898_v49 = vpop.permute.xlu1 %21897  ;;  %v29418_v36 = vld [vmem:[#allocation75_spill] sm:$0xff] }
 0x451   : > { %19968 = vmatmul.mubr.f32.vlgmr.msra.gmra.mxu1 %v29402_v51  ;;  %v12230_v7 = vadd.f32 %v12229_v5, %v12152_v28  ;;  %v12154_v47 = vadd.f32 %v12153_v54, %v12078_v16  ;;  %19894 = vmatmul.mubr.f32.vlgmr.msra.gmra.mxu0 %v29402_v51  ;;  %v12305_v32 = vpop.f32.mrf.mxu1  ;;  %v11826_v38 = vadd.f32 %v11822_v52, %v11359_v29  ;;  %v29416_v54 = vld [vmem:[#allocation73_spill] sm:$0xff]  ;;  %v21421_v52 = vsel %vm708_vm4, %v21418_v21, 0 }
 0x452   : > { %20095 = vmatpush1.msra.mxu1 %v29408_v18  ;;  %v12231_v27 = vpop.f32.mrf.mxu0  ;;  %20009 = vmatpush1.msra.mxu0 %v29409_v10  ;;  %v28207_v31 = vsub.f32 %v20942_v13, %v28192_v45  ;;  %v20578_v5 = vand.u32 4294901760, %v20577_v61  ;;  %v21417_v29 = vsel %vm4148_vm13, %v21412_v20, %v21414_v2  ;;  %v29420_v61 = vld [vmem:[#allocation78_spill] sm:$0xff] }
 0x453   : > { %v12304_v58 = vadd.f32 %v12303_v35, %v12230_v7  ;;  %20244 = vmatprep.subr.mxu1 %v29407_v48  ;;  %v12232_v23 = vadd.f32 %v12231_v27, %v12154_v47  ;;  %20168 = vmatprep.subr.mxu0 %v29410_v8  ;;  %v12484_v39 = vpop.f32.mrf.mxu1  ;;  %v28234_v27 = vand.u32 4294901760, %v21421_v52 }
 0x454   : > { %20128 = vmatprep.mubr.f32.mxu1 %v29117_v46  ;;  %v12402_v1 = vpop.f32.mrf.mxu0  ;;  %20042 = vmatprep.mubr.f32.mxu0 %v29117_v46  ;;  %v21054_v57 = vand.u32 4294901760, %v28207_v31 }
 0x455   : > { %v12306_v56 = vadd.f32 %v12305_v32, %v12232_v23  ;;  %20130 = vmatmul.mubr.f32.vlgmr.msra.gmra.mxu1 %v29411_v60  ;;  %v12485_v51 = vadd.f32 %v12484_v39, %v12402_v1  ;;  %20048 = vmatmul.mubr.f32.vlgmr.msra.gmra.mxu0 %v29412_v14  ;;  %v12486_v62 = vpop.f32.mrf.mxu1  ;;  %v12308_v26 = vadd.f32 %v12304_v58, %v11826_v38  ;;  %v21060_v23 = vand.u32 4294901760, %v28224_v19 }
 0x456   : > { %20246 = vmatpush1.msra.mxu1 %v29409_v10  ;;  %v12404_v50 = vpop.f32.mrf.mxu0  ;;  %20171 = vmatpush1.msra.mxu0 %v29413_v11  ;;  %v21419_v1 = vsel %vm708_vm4, %v21417_v29, 0 }
 0x457   : > { %v12309_v6 = vadd.f32 %v12306_v56, %v11827_v43  ;;  %20398 = vmatprep.subr.mxu1 %v29407_v48  ;;  %v12487_v25 = vadd.f32 %v12486_v62, %v12404_v50  ;;  %20322 = vmatprep.subr.mxu0 %v29414_v53  ;;  %v12637_v63 = vpop.f32.mrf.mxu1  ;;  %v28250_v50 = vsub.f32 %v21421_v52, %v28234_v27 }
 0x458   : > { %20279 = vmatprep.mubr.f32.mxu1 %v29117_v46  ;;  %v12561_v0 = vpop.f32.mrf.mxu0  ;;  %20204 = vmatprep.mubr.f32.mxu0 %v29117_v46 }
 0x459   : > { %v12312_v42 = vcombine.low %v12308_v26, %v12309_v6  ;;  %20283 = vmatmul.mubr.f32.vlgmr.msra.gmra.mxu1 %v29415_v22  ;;  %v12562_v33 = vadd.f32 %v12561_v0, %v12485_v51  ;;  %20207 = vmatmul.mubr.f32.vlgmr.msra.gmra.mxu0 %v29416_v54  ;;  %v12639_v34 = vpop.f32.mrf.mxu1  ;;  %v29419_v51 = vld [vmem:[#allocation80_spill] sm:$0xff]  ;;  %v28254_v26 = vand.u32 4294901760, %v21419_v1  ;;  %v21900_v0 = vpop.permute.xlu0 %21899 }
 0x45a   : > { %20400 = vmatpush1.msra.mxu1 %v29409_v10  ;;  %v12563_v41 = vpop.f32.mrf.mxu0  ;;  %20326 = vmatpush1.msra.mxu0 %v29417_v4  ;;  %v21902_v22 = vsel %vm4644_vm14, %v21898_v49, %v21900_v0 }
 0x45b   : > { %24113 = vst [vmem:[%s27521_s15 + $0x8] sm:$0xff] %v12312_v42  ;;  %20573 = vmatprep.subr.mxu1 %v20572_v40  ;;  %v12564_v16 = vadd.f32 %v12563_v41, %v12487_v25  ;;  %v12638_v28 = vadd.f32 %v12637_v63, %v12562_v33  ;;  %20491 = vmatprep.subr.mxu0 %v28142_v37  ;;  %v12789_v35 = vpop.f32.mrf.mxu1  ;;  %v21896_v40 = vpop.permute.xlu1 %21895  ;;  %v21533_v41 = vand.u32 4294901760, %v28250_v50 }
 0x45c   : > { %20433 = vmatprep.mubr.f32.mxu1 %v29117_v46  ;;  %v12715_v13 = vpop.f32.mrf.mxu0  ;;  %20359 = vmatprep.mubr.f32.mxu0 %v29117_v46  ;;  %v21061_v63 = vsub.f32 %v28224_v19, %v21060_v23 }
 0x45d   : > { %20435 = vmatmul.mubr.f32.vlgmr.msra.gmra.mxu1 %v29411_v60  ;;  %v12716_v7 = vadd.f32 %v12715_v13, %v12638_v28  ;;  %v12640_v47 = vadd.f32 %v12639_v34, %v12564_v16  ;;  %20361 = vmatmul.mubr.f32.vlgmr.msra.gmra.mxu0 %v29411_v60  ;;  %v12791_v30 = vpop.f32.mrf.mxu1  ;;  %v21055_v60 = vsub.f32 %v28207_v31, %v21054_v57 }
 0x45e   : > { %20579 = vmatpush1.msra.mxu1 %v20578_v5  ;;  %v12717_v32 = vpop.f32.mrf.mxu0  ;;  %20493 = vmatpush1.msra.mxu0 %v28155_v3  ;;  %v28271_v16 = vsub.f32 %v21419_v1, %v28254_v26  ;;  %v21062_v28 = vand.u32 4294901760, %v21061_v63  ;;  %v21901_v5 = vsel %vm4644_vm14, %v21896_v40, %v21898_v49  ;;  %v21534_v29 = vsub.f32 %v28250_v50, %v21533_v41  ;;  %v29422_v1 = vld [vmem:[#allocation79_spill] sm:$0xff]  ;;  %v29425_v63 = vld [vmem:[#allocation81_spill] sm:$0xff] }
 0x45f   : > { %20728 = vmatprep.subr.mxu1 %v28142_v37  ;;  %v12718_v55 = vadd.f32 %v12717_v32, %v12640_v47  ;;  %v12790_v58 = vadd.f32 %v12789_v35, %v12716_v7  ;;  %20652 = vmatprep.subr.mxu0 %v28158_v17  ;;  %v12955_v38 = vpop.f32.mrf.mxu1  ;;  %v21056_v21 = vand.u32 4294901760, %v21055_v60  ;;  %v29421_v17 = vld [vmem:[#allocation77_spill] sm:$0xff]  ;;  %v21905_v35 = vsel %vm708_vm4, %v21902_v22, 0 }
 0x460   : > { %20612 = vmatprep.mubr.f32.mxu1 %v29117_v46  ;;  %v12873_v39 = vpop.f32.mrf.mxu0  ;;  %20526 = vmatprep.mubr.f32.mxu0 %v29117_v46  ;;  %v28288_v32 = vand.u32 4294901760, %v21905_v35 }
 0x461   : > { %20614 = vmatmul.mubr.f32.vlgmr.msra.gmra.mxu1 %v29418_v36  ;;  %v12874_v43 = vadd.f32 %v12873_v39, %v12790_v58  ;;  %v12792_v56 = vadd.f32 %v12791_v30, %v12718_v55  ;;  %20532 = vmatmul.mubr.f32.vlgmr.msra.gmra.mxu0 %v29419_v51  ;;  %v12957_v14 = vpop.f32.mrf.mxu1  ;;  %v21539_v30 = vand.u32 4294901760, %v28271_v16  ;;  %v21535_v51 = vand.u32 4294901760, %v21534_v29 }
 0x462   : > { %20730 = vmatpush1.msra.mxu1 %v28155_v3  ;;  %v12875_v62 = vpop.f32.mrf.mxu0  ;;  %20655 = vmatpush1.msra.mxu0 %v28174_v9 }
 0x463   : > { %20882 = vmatprep.subr.mxu1 %v28142_v37  ;;  %v12876_v2 = vadd.f32 %v12875_v62, %v12792_v56  ;;  %v12956_v15 = vadd.f32 %v12955_v38, %v12874_v43  ;;  %20806 = vmatprep.subr.mxu0 %v20570_v12  ;;  %v13108_v6 = vpop.f32.mrf.mxu1  ;;  %v21903_v38 = vsel %vm708_vm4, %v21901_v5, 0  ;;  %v29427_v5 = vld [vmem:[#allocation87_spill] sm:$0xff] }
 0x464   : > { %20763 = vmatprep.mubr.f32.mxu1 %v29117_v46  ;;  %v13032_v25 = vpop.f32.mrf.mxu0  ;;  %20688 = vmatprep.mubr.f32.mxu0 %v29117_v46  ;;  %v28304_v62 = vand.u32 4294901760, %v21903_v38 }
 0x465   : > { %20767 = vmatmul.mubr.f32.vlgmr.msra.gmra.mxu1 %v29420_v61  ;;  %v13033_v37 = vadd.f32 %v13032_v25, %v12956_v15  ;;  %v12958_v42 = vadd.f32 %v12957_v14, %v12876_v2  ;;  %20691 = vmatmul.mubr.f32.vlgmr.msra.gmra.mxu0 %v29421_v17  ;;  %v13110_v12 = vpop.f32.mrf.mxu1  ;;  %v28302_v14 = vsub.f32 %v21905_v35, %v28288_v32 }
 0x466   : > { %20884 = vmatpush1.msra.mxu1 %v28155_v3  ;;  %v13034_v33 = vpop.f32.mrf.mxu0  ;;  %20810 = vmatpush1.msra.mxu0 %v20576_v44 }
 0x467   : > { %21057 = vmatprep.subr.mxu1 %v21056_v21  ;;  %v13035_v54 = vadd.f32 %v13034_v33, %v12958_v42  ;;  %v13109_v34 = vadd.f32 %v13108_v6, %v13033_v37  ;;  %20975 = vmatprep.subr.mxu0 %v28192_v45  ;;  %v13260_v3 = vpop.f32.mrf.mxu1  ;;  %v21540_v6 = vsub.f32 %v28271_v16, %v21539_v30  ;;  %v22017_v22 = vand.u32 4294901760, %v28302_v14 }
 0x468   : > { %20917 = vmatprep.mubr.f32.mxu1 %v29117_v46  ;;  %v13186_v52 = vpop.f32.mrf.mxu0  ;;  %20843 = vmatprep.mubr.f32.mxu0 %v29117_v46  ;;  %v28319_v37 = vsub.f32 %v21903_v38, %v28304_v62  ;;  %v29428_v38 = vld [vmem:[#allocation86_spill] sm:$0xff] }
 0x469   : > { %20919 = vmatmul.mubr.f32.vlgmr.msra.gmra.mxu1 %v29418_v36  ;;  %v13187_v9 = vadd.f32 %v13186_v52, %v13109_v34  ;;  %v13111_v44 = vadd.f32 %v13110_v12, %v13035_v54  ;;  %20845 = vmatmul.mubr.f32.vlgmr.msra.gmra.mxu0 %v29418_v36  ;;  %v13262_v13 = vpop.f32.mrf.mxu1  ;;  %v29423_v36 = vld [vmem:[#allocation84_spill] sm:$0xff]  ;;  %v21541_v42 = vand.u32 4294901760, %v21540_v6 }
 0x46a   : > { %21063 = vmatpush1.msra.mxu1 %v21062_v28  ;;  %v13188_v20 = vpop.f32.mrf.mxu0  ;;  %20977 = vmatpush1.msra.mxu0 %v28209_v24  ;;  %v22023_v54 = vand.u32 4294901760, %v28319_v37  ;;  %v22018_v28 = vsub.f32 %v28302_v14, %v22017_v22 }
 0x46b   : > { %v28280_v7 = vadd.f32 %v13260_v3, %v13187_v9  ;;  %21212 = vmatprep.subr.mxu1 %v28192_v45  ;;  %v13189_v47 = vadd.f32 %v13188_v20, %v13111_v44  ;;  %21136 = vmatprep.subr.mxu0 %v28207_v31  ;;  %v13437_v55 = vpop.f32.mrf.mxu1  ;;  %v29426_v9 = vld [vmem:[#allocation83_spill] sm:$0xff] }
 0x46c   : > { %21096 = vmatprep.mubr.f32.mxu1 %v29117_v46  ;;  %v13355_v58 = vpop.f32.mrf.mxu0  ;;  %21010 = vmatprep.mubr.f32.mxu0 %v29117_v46 }
 0x46d   : > { %v28293_v39 = vadd.f32 %v13262_v13, %v13189_v47  ;;  %21098 = vmatmul.mubr.f32.vlgmr.msra.gmra.mxu1 %v29422_v1  ;;  %v13438_v49 = vadd.f32 %v13437_v55, %v13355_v58  ;;  %21016 = vmatmul.mubr.f32.vlgmr.msra.gmra.mxu0 %v29423_v36  ;;  %v13439_v43 = vpop.f32.mrf.mxu1  ;;  %v22024_v58 = vsub.f32 %v28319_v37, %v22023_v54 }
 0x46e   : > { %21214 = vmatpush1.msra.mxu1 %v28209_v24  ;;  %v13357_v56 = vpop.f32.mrf.mxu0  ;;  %21139 = vmatpush1.msra.mxu0 %v28224_v19 }
 0x46f   : > { %21366 = vmatprep.subr.mxu1 %v28192_v45  ;;  %v13440_v60 = vadd.f32 %v13439_v43, %v13357_v56  ;;  %21290 = vmatprep.subr.mxu0 %v21054_v57  ;;  %v13590_v2 = vpop.f32.mrf.mxu1  ;;  %v29424_v45 = vld [vmem:[#allocation82_spill] sm:$0xff]  ;;  %v22025_v56 = vand.u32 4294901760, %v22024_v58 }
 0x470   : > { %21247 = vmatprep.mubr.f32.mxu1 %v29117_v46  ;;  %v13514_v15 = vpop.f32.mrf.mxu0  ;;  %21172 = vmatprep.mubr.f32.mxu0 %v29117_v46 }
 0x471   : > { %21251 = vmatmul.mubr.f32.vlgmr.msra.gmra.mxu1 %v29424_v45  ;;  %v13515_v25 = vadd.f32 %v13514_v15, %v13438_v49  ;;  %21175 = vmatmul.mubr.f32.vlgmr.msra.gmra.mxu0 %v29425_v63  ;;  %v13592_v0 = vpop.f32.mrf.mxu1 }
 0x472   : > { %21368 = vmatpush1.msra.mxu1 %v28209_v24  ;;  %v13516_v31 = vpop.f32.mrf.mxu0  ;;  %21294 = vmatpush1.msra.mxu0 %v21060_v23 }
 0x473   : > { %21536 = vmatprep.subr.mxu1 %v21535_v51  ;;  %v13517_v57 = vadd.f32 %v13516_v31, %v13440_v60  ;;  %v13591_v61 = vadd.f32 %v13590_v2, %v13515_v25  ;;  %21454 = vmatprep.subr.mxu0 %v28234_v27  ;;  %v13742_v21 = vpop.f32.mrf.mxu1 }
 0x474   : > { %21401 = vmatprep.mubr.f32.mxu1 %v29117_v46  ;;  %v13668_v24 = vpop.f32.mrf.mxu0  ;;  %21327 = vmatprep.mubr.f32.mxu0 %v29117_v46 }
 0x475   : > { %21403 = vmatmul.mubr.f32.vlgmr.msra.gmra.mxu1 %v29422_v1  ;;  %v13669_v19 = vadd.f32 %v13668_v24, %v13591_v61  ;;  %v13593_v23 = vadd.f32 %v13592_v0, %v13517_v57  ;;  %21329 = vmatmul.mubr.f32.vlgmr.msra.gmra.mxu0 %v29422_v1  ;;  %v13744_v17 = vpop.f32.mrf.mxu1  ;;  %v22019_v1 = vand.u32 4294901760, %v22018_v28  ;;  %v29430_v0 = vld [vmem:[#allocation98_spill] sm:$0xff] }
 0x476   : > { %21542 = vmatpush1.msra.mxu1 %v21541_v42  ;;  %v13670_v12 = vpop.f32.mrf.mxu0  ;;  %21456 = vmatpush1.msra.mxu0 %v28254_v26  ;;  %v29431_v57 = vld [vmem:[#allocation102_spill] sm:$0xff] }
 0x477   : > { %v13743_v33 = vadd.f32 %v13742_v21, %v13669_v19  ;;  %21691 = vmatprep.subr.mxu1 %v28234_v27  ;;  %v13671_v40 = vadd.f32 %v13670_v12, %v13593_v23  ;;  %21615 = vmatprep.subr.mxu0 %v28250_v50  ;;  %v13921_v34 = vpop.f32.mrf.mxu1 }
 0x478   : > { %21575 = vmatprep.mubr.f32.mxu1 %v29117_v46  ;;  %v13839_v3 = vpop.f32.mrf.mxu0  ;;  %21489 = vmatprep.mubr.f32.mxu0 %v29117_v46 }
 0x479   : > { %v13747_v52 = vadd.f32 %v13743_v33, %v28280_v7  ;;  %v13745_v35 = vadd.f32 %v13744_v17, %v13671_v40  ;;  %21577 = vmatmul.mubr.f32.vlgmr.msra.gmra.mxu1 %v29426_v9  ;;  %v13922_v44 = vadd.f32 %v13921_v34, %v13839_v3  ;;  %21495 = vmatmul.mubr.f32.vlgmr.msra.gmra.mxu0 %v29427_v5  ;;  %v13923_v13 = vpop.f32.mrf.mxu1  ;;  %v29432_v17 = vld [vmem:[#allocation100_spill] sm:$0xff]  ;;  %v29433_v33 = vld [vmem:[#allocation99_spill] sm:$0xff] }
 0x47a   : > { %21693 = vmatpush1.msra.mxu1 %v28254_v26  ;;  %v13841_v20 = vpop.f32.mrf.mxu0  ;;  %21618 = vmatpush1.msra.mxu0 %v28271_v16  ;;  %v29435_v3 = vld [vmem:[#allocation139_spill] sm:$0xff] }
 0x47b   : > { %v13748_v47 = vadd.f32 %v13745_v35, %v28293_v39  ;;  %21845 = vmatprep.subr.mxu1 %v28234_v27  ;;  %v13924_v29 = vadd.f32 %v13923_v13, %v13841_v20  ;;  %21769 = vmatprep.subr.mxu0 %v21533_v41  ;;  %v14074_v7 = vpop.f32.mrf.mxu1  ;;  %v29429_v27 = vld [vmem:[#allocation85_spill] sm:$0xff]  ;;  %v29437_v13 = vld [vmem:[#allocation143_spill] sm:$0xff] }
 0x47c   : > { %21726 = vmatprep.mubr.f32.mxu1 %v29117_v46  ;;  %v13998_v55 = vpop.f32.mrf.mxu0  ;;  %21651 = vmatprep.mubr.f32.mxu0 %v29117_v46 }
 0x47d   : > { %21730 = vmatmul.mubr.f32.vlgmr.msra.gmra.mxu1 %v29428_v38  ;;  %v13999_v39 = vadd.f32 %v13998_v55, %v13922_v44  ;;  %21654 = vmatmul.mubr.f32.vlgmr.msra.gmra.mxu0 %v29429_v27  ;;  %v14076_v50 = vpop.f32.mrf.mxu1  ;;  %v29436_v44 = vld [vmem:[#allocation148_spill] sm:$0xff]  ;;  %v29439_v38 = vld [vmem:[#allocation101_spill] sm:$0xff] }
 0x47e   : > { %21847 = vmatpush1.msra.mxu1 %v28254_v26  ;;  %v14000_v41 = vpop.f32.mrf.mxu0  ;;  %21773 = vmatpush1.msra.mxu0 %v21539_v30 }
 0x47f   : > { %22020 = vmatprep.subr.mxu1 %v22019_v1  ;;  %v14001_v49 = vadd.f32 %v14000_v41, %v13924_v29  ;;  %v14075_v36 = vadd.f32 %v14074_v7, %v13999_v39  ;;  %21938 = vmatprep.subr.mxu0 %v28288_v32  ;;  %v14226_v43 = vpop.f32.mrf.mxu1  ;;  %v29440_v39 = vld [vmem:[#allocation105_spill] sm:$0xff] }
 0x480   : > { %21880 = vmatprep.mubr.f32.mxu1 %v29117_v46  ;;  %v14152_v60 = vpop.f32.mrf.mxu0  ;;  %21806 = vmatprep.mubr.f32.mxu0 %v29117_v46  ;;  %v29441_v41 = vld [vmem:[#allocation145_spill] sm:$0xff] }
 0x481   : > { %21882 = vmatmul.mubr.f32.vlgmr.msra.gmra.mxu1 %v29426_v9  ;;  %v14153_v26 = vadd.f32 %v14152_v60, %v14075_v36  ;;  %v14077_v51 = vadd.f32 %v14076_v50, %v14001_v49  ;;  %21808 = vmatmul.mubr.f32.vlgmr.msra.gmra.mxu0 %v29426_v9  ;;  %v14228_v16 = vpop.f32.mrf.mxu1 }
 0x482   : > { %22026 = vmatpush1.msra.mxu1 %v22025_v56  ;;  %v14154_v30 = vpop.f32.mrf.mxu0  ;;  %21940 = vmatpush1.msra.mxu0 %v28304_v62 }
 0x483   : > { %v14227_v2 = vadd.f32 %v14226_v43, %v14153_v26  ;;  %22175 = vmatprep.subr.mxu1 %v28288_v32  ;;  %v14155_v15 = vadd.f32 %v14154_v30, %v14077_v51  ;;  %22099 = vmatprep.subr.mxu0 %v28302_v14  ;;  %v14388_v6 = vpop.f32.mrf.mxu1  ;;  %v29442_v51 = vld [vmem:[#allocation144_spill] sm:$0xff] }
 0x484   : > { %22059 = vmatprep.mubr.f32.mxu1 %v29117_v46  ;;  %v14306_v45 = vpop.f32.mrf.mxu0  ;;  %21973 = vmatprep.mubr.f32.mxu0 %v29117_v46 }
 0x485   : > { %v14231_v25 = vadd.f32 %v14227_v2, %v13747_v52  ;;  %v14229_v63 = vadd.f32 %v14228_v16, %v14155_v15  ;;  %22061 = vmatmul.mubr.f32.vlgmr.msra.gmra.mxu1 %v29430_v0  ;;  %v14389_v31 = vadd.f32 %v14388_v6, %v14306_v45  ;;  %21979 = vmatmul.mubr.f32.vlgmr.msra.gmra.mxu0 %v29431_v57  ;;  %v14390_v61 = vpop.f32.mrf.mxu1  ;;  %v29443_v15 = vld [vmem:[#allocation104_spill] sm:$0xff]  ;;  %v29444_v45 = vld [vmem:[#allocation103_spill] sm:$0xff] }
 0x486   : > { %22177 = vmatpush1.msra.mxu1 %v28304_v62  ;;  %v14308_v21 = vpop.f32.mrf.mxu0  ;;  %22102 = vmatpush1.msra.mxu0 %v28319_v37 }
 0x487   : > { %v14232_v42 = vadd.f32 %v14229_v63, %v13748_v47  ;;  %22329 = vmatprep.subr.mxu1 %v28288_v32  ;;  %v14391_v24 = vadd.f32 %v14390_v61, %v14308_v21  ;;  %22253 = vmatprep.subr.mxu0 %v22017_v22  ;;  %v14541_v19 = vpop.f32.mrf.mxu1  ;;  %v29434_v32 = vld [vmem:[#allocation146_spill] sm:$0xff] }
 0x488   : > { %22210 = vmatprep.mubr.f32.mxu1 %v29117_v46  ;;  %v14465_v23 = vpop.f32.mrf.mxu0  ;;  %22135 = vmatprep.mubr.f32.mxu0 %v29117_v46  ;;  %v29438_v47 = vld [vmem:[#allocation142_spill] sm:$0xff] }
 0x489   : > { %22214 = vmatmul.mubr.f32.vlgmr.msra.gmra.mxu1 %v29432_v17  ;;  %v14466_v12 = vadd.f32 %v14465_v23, %v14389_v31  ;;  %22138 = vmatmul.mubr.f32.vlgmr.msra.gmra.mxu0 %v29433_v33  ;;  %v14543_v40 = vpop.f32.mrf.mxu1  ;;  %v29445_v63 = vld [vmem:[#allocation90_spill] sm:$0xff]  ;;  %v29447_v33 = vld [vmem:[#allocation115_spill] sm:$0xff] }
 0x48a   : > { %22331 = vmatpush1.msra.mxu1 %v28304_v62  ;;  %v14467_v34 = vpop.f32.mrf.mxu0  ;;  %22257 = vmatpush1.msra.mxu0 %v22023_v54 }
 0x48b   : > { %22493 = vmatprep.subr.mxu1 %v29434_v32  ;;  %v14468_v14 = vadd.f32 %v14467_v34, %v14391_v24  ;;  %v14542_v22 = vadd.f32 %v14541_v19, %v14466_v12  ;;  %22411 = vmatprep.subr.mxu0 %v29435_v3  ;;  %v14693_v28 = vpop.f32.mrf.mxu1 }
 0x48c   : > { %22364 = vmatprep.mubr.f32.mxu1 %v29117_v46  ;;  %v14619_v52 = vpop.f32.mrf.mxu0  ;;  %22290 = vmatprep.mubr.f32.mxu0 %v29117_v46 }
 0x48d   : > { %22366 = vmatmul.mubr.f32.vlgmr.msra.gmra.mxu1 %v29430_v0  ;;  %v14620_v62 = vadd.f32 %v14619_v52, %v14542_v22  ;;  %v23320_v35 = vpop.permute.xlu0 %23319  ;;  %v14544_v9 = vadd.f32 %v14543_v40, %v14468_v14  ;;  %22292 = vmatmul.mubr.f32.vlgmr.msra.gmra.mxu0 %v29430_v0  ;;  %v14695_v37 = vpop.f32.mrf.mxu1  ;;  %v29448_v22 = vld [vmem:[#allocation109_spill] sm:$0xff] }
 0x48e   : > { %22499 = vmatpush1.msra.mxu1 %v29436_v44  ;;  %v14621_v54 = vpop.f32.mrf.mxu0  ;;  %22413 = vmatpush1.msra.mxu0 %v29437_v13 }
 0x48f   : > { %v14694_v5 = vadd.f32 %v14693_v28, %v14620_v62  ;;  %22648 = vmatprep.subr.mxu1 %v29435_v3  ;;  %v14622_v20 = vadd.f32 %v14621_v54, %v14544_v9  ;;  %22572 = vmatprep.subr.mxu0 %v29438_v47  ;;  %v28390_v29 = vpop.f32.mrf.mxu1  ;;  %v29450_v9 = vld [vmem:[#allocation114_spill] sm:$0xff] }
 0x490   : > { %22532 = vmatprep.mubr.f32.mxu1 %v29117_v46  ;;  %v28392_v7 = vpop.f32.mrf.mxu0  ;;  %22446 = vmatprep.mubr.f32.mxu0 %v29117_v46 }
 0x491   : > { %v28394_v55 = vadd.f32 %v14694_v5, %v14231_v25  ;;  %v14696_v58 = vadd.f32 %v14695_v37, %v14622_v20  ;;  %22534 = vmatmul.mubr.f32.vlgmr.msra.gmra.mxu1 %v29439_v38  ;;  %22452 = vmatmul.mubr.f32.vlgmr.msra.gmra.mxu0 %v29440_v39  ;;  %v23318_v1 = vpop.permute.xlu0 %23317  ;;  %v28406_v43 = vpop.f32.mrf.mxu1  ;;  %v29451_v37 = vld [vmem:[#allocation121_spill] sm:$0xff]  ;;  %v29452_v20 = vld [vmem:[#allocation119_spill] sm:$0xff] }
 0x492   : > { %22650 = vmatpush1.msra.mxu1 %v29437_v13  ;;  %v23322_v27 = vpop.permute.xlu1 %23321  ;;  %22575 = vmatpush1.msra.mxu0 %v29441_v41  ;;  %v23323_v49 = vsel %vm2672_vm10, %v23318_v1, %v23320_v35  ;;  %v28408_v56 = vpop.f32.mrf.mxu0 }
 0x493   : > { %v28400_v50 = vadd.f32 %v14696_v58, %v14232_v42  ;;  %22802 = vmatprep.subr.mxu1 %v29435_v3  ;;  %v23324_v36 = vsel %vm2672_vm10, %v23320_v35, %v23322_v27  ;;  %v23325_v60 = vsel %vm708_vm4, %v23323_v49, 0  ;;  %22726 = vmatprep.subr.mxu0 %v29442_v51  ;;  %v28418_v2 = vpop.f32.mrf.mxu1  ;;  %v29453_v58 = vld [vmem:[#allocation117_spill] sm:$0xff] }
 0x494   : > { %v23327_v26 = vsel %vm708_vm4, %v23324_v36, 0  ;;  %22683 = vmatprep.mubr.f32.mxu1 %v29117_v46  ;;  %v28414_v16 = vand.u32 4294901760, %v23325_v60  ;;  %22608 = vmatprep.mubr.f32.mxu0 %v29117_v46  ;;  %v28422_v6 = vpop.f32.mrf.mxu0 }
 0x495   : > { %v28416_v30 = vand.u32 4294901760, %v23327_v26  ;;  %22687 = vmatmul.mubr.f32.vlgmr.msra.gmra.mxu1 %v29443_v15  ;;  %22611 = vmatmul.mubr.f32.vlgmr.msra.gmra.mxu0 %v29444_v45  ;;  %v28431_v0 = vpop.f32.mrf.mxu1 }
 0x496   : > { %22804 = vmatpush1.msra.mxu1 %v29437_v13  ;;  %22730 = vmatpush1.msra.mxu0 %v29445_v63  ;;  %v28433_v31 = vpop.f32.mrf.mxu0  ;;  %v28436_v57 = vsub.f32 %v23325_v60, %v28414_v16 }
 0x497   : > { %v28427_v25 = vsub.f32 %v23327_v26, %v28416_v30  ;;  %22960 = vmatprep.subr.mxu1 %v29406_v59  ;;  %22878 = vmatprep.subr.mxu0 %v29407_v48  ;;  %v28440_v61 = vpop.f32.mrf.mxu1 }
 0x498   : > { %22837 = vmatprep.mubr.f32.mxu1 %v29117_v46  ;;  %22763 = vmatprep.mubr.f32.mxu0 %v29117_v46  ;;  %v28444_v21 = vpop.f32.mrf.mxu0  ;;  %v23445_v23 = vand.u32 4294901760, %v28436_v57 }
 0x499   : > { %22839 = vmatmul.mubr.f32.vlgmr.msra.gmra.mxu1 %v29439_v38  ;;  %v23439_v59 = vand.u32 4294901760, %v28427_v25  ;;  %22765 = vmatmul.mubr.f32.vlgmr.msra.gmra.mxu0 %v29439_v38  ;;  %v28451_v42 = vpop.f32.mrf.mxu1 }
 0x49a   : > { %22966 = vmatpush1.msra.mxu1 %v29408_v18  ;;  %22880 = vmatpush1.msra.mxu0 %v29409_v10  ;;  %v28453_v24 = vpop.f32.mrf.mxu0  ;;  %v29446_v18 = vld [vmem:[#allocation106_spill] sm:$0xff]  ;;  %v23446_v32 = vsub.f32 %v28436_v57, %v23445_v23 }
 0x49b   : > { %23115 = vmatprep.subr.mxu1 %v29407_v48  ;;  %v23440_v19 = vsub.f32 %v28427_v25, %v23439_v59  ;;  %23039 = vmatprep.subr.mxu0 %v29410_v8  ;;  %v28459_v17 = vpop.f32.mrf.mxu1 }
 0x49c   : > { %22999 = vmatprep.mubr.f32.mxu1 %v29117_v46  ;;  %22913 = vmatprep.mubr.f32.mxu0 %v29117_v46  ;;  %v28463_v12 = vpop.f32.mrf.mxu0  ;;  %v23447_v28 = vand.u32 4294901760, %v23446_v32 }
 0x49d   : > { %23001 = vmatmul.mubr.f32.vlgmr.msra.gmra.mxu1 %v29446_v18  ;;  %22919 = vmatmul.mubr.f32.vlgmr.msra.gmra.mxu0 %v29447_v33  ;;  %v28469_v40 = vpop.f32.mrf.mxu1  ;;  %v23441_v34 = vand.u32 4294901760, %v23440_v19 }
 0x49e   : > { %23117 = vmatpush1.msra.mxu1 %v29409_v10  ;;  %23042 = vmatpush1.msra.mxu0 %v29413_v11  ;;  %v28471_v8 = vpop.f32.mrf.mxu0 }
 0x49f   : > { %23269 = vmatprep.subr.mxu1 %v29407_v48  ;;  %23193 = vmatprep.subr.mxu0 %v29414_v53  ;;  %v28476_v14 = vpop.f32.mrf.mxu1  ;;  %v29449_v48 = vld [vmem:[#allocation107_spill] sm:$0xff] }
 0x4a0   : > { %23150 = vmatprep.mubr.f32.mxu1 %v29117_v46  ;;  %23075 = vmatprep.mubr.f32.mxu0 %v29117_v46  ;;  %v28480_v11 = vpop.f32.mrf.mxu0 }
 0x4a1   : > { %23154 = vmatmul.mubr.f32.vlgmr.msra.gmra.mxu1 %v29448_v22  ;;  %23078 = vmatmul.mubr.f32.vlgmr.msra.gmra.mxu0 %v29449_v48  ;;  %v28485_v53 = vpop.f32.mrf.mxu1 }
 0x4a2   : > { %23271 = vmatpush1.msra.mxu1 %v29409_v10  ;;  %23197 = vmatpush1.msra.mxu0 %v29417_v4  ;;  %v28487_v3 = vpop.f32.mrf.mxu0 }
 0x4a3   : > { %23442 = vmatprep.subr.mxu1 %v23441_v34  ;;  %23360 = vmatprep.subr.mxu0 %v28416_v30  ;;  %v28491_v52 = vpop.f32.mrf.mxu1 }
 0x4a4   : > { %23304 = vmatprep.mubr.f32.mxu1 %v29117_v46  ;;  %23230 = vmatprep.mubr.f32.mxu0 %v29117_v46  ;;  %v28495_v10 = vpop.f32.mrf.mxu0 }
 0x4a5   : > { %23306 = vmatmul.mubr.f32.vlgmr.msra.gmra.mxu1 %v29446_v18  ;;  %23232 = vmatmul.mubr.f32.vlgmr.msra.gmra.mxu0 %v29446_v18  ;;  %v28500_v4 = vpop.f32.mrf.mxu1  ;;  %v14875_v18 = vadd.f32 %v28406_v43, %v28408_v56 }
 0x4a6   : > { %23448 = vmatpush1.msra.mxu1 %v23447_v28  ;;  %23362 = vmatpush1.msra.mxu0 %v28414_v16  ;;  %v28502_v62 = vpop.f32.mrf.mxu0 }
 0x4a7   : > { %23597 = vmatprep.subr.mxu1 %v28416_v30  ;;  %23521 = vmatprep.subr.mxu0 %v28427_v25  ;;  %v15835_v35 = vpop.f32.mrf.mxu1  ;;  %v14952_v22 = vadd.f32 %v28433_v31, %v14875_v18 }
 0x4a8   : > { %23481 = vmatprep.mubr.f32.mxu1 %v29117_v46  ;;  %23395 = vmatprep.mubr.f32.mxu0 %v29117_v46  ;;  %v15753_v44 = vpop.f32.mrf.mxu0 }
 0x4a9   : > { %23483 = vmatmul.mubr.f32.vlgmr.msra.gmra.mxu1 %v29450_v9  ;;  %23401 = vmatmul.mubr.f32.vlgmr.msra.gmra.mxu0 %v29451_v37  ;;  %v15837_v54 = vpop.f32.mrf.mxu1  ;;  %v15359_v37 = vadd.f32 %v28469_v40, %v28471_v8  ;;  %v15836_v56 = vadd.f32 %v15835_v35, %v15753_v44 }
 0x4aa   : > { %23599 = vmatpush1.msra.mxu1 %v28414_v16  ;;  %23524 = vmatpush1.msra.mxu0 %v28436_v57  ;;  %v15755_v5 = vpop.f32.mrf.mxu0 }
 0x4ab   : > { %23751 = vmatprep.subr.mxu1 %v28416_v30  ;;  %23675 = vmatprep.subr.mxu0 %v23439_v59  ;;  %v28513_v13 = vpop.f32.mrf.mxu1  ;;  %v15436_v43 = vadd.f32 %v28487_v3, %v15359_v37 }
 0x4ac   : > { %23632 = vmatprep.mubr.f32.mxu1 %v29117_v46  ;;  %23557 = vmatprep.mubr.f32.mxu0 %v29117_v46  ;;  %v15912_v47 = vpop.f32.mrf.mxu0 }
 0x4ad   : > { %23636 = vmatmul.mubr.f32.vlgmr.msra.gmra.mxu1 %v29452_v20  ;;  %23560 = vmatmul.mubr.f32.vlgmr.msra.gmra.mxu0 %v29453_v58  ;;  %v15990_v38 = vpop.f32.mrf.mxu1  ;;  %v15028_v58 = vadd.f32 %v28431_v0, %v14952_v22  ;;  %v15512_v3 = vadd.f32 %v28485_v53, %v15436_v43 }
 0x4ae   : > { %23753 = vmatpush1.msra.mxu1 %v28414_v16  ;;  %23679 = vmatpush1.msra.mxu0 %v23445_v23  ;;  %v15914_v39 = vpop.f32.mrf.mxu0  ;;  %v14873_v23 = vadd.f32 %v28390_v29, %v28392_v7 }
 0x4af   : > { %23786 = vmatprep.mubr.f32.mxu1 %v29117_v46  ;;  %23712 = vmatprep.mubr.f32.mxu0 %v29117_v46  ;;  %v28521_v1 = vpop.f32.mrf.mxu1 }
 0x4b0   : > { %v28524_v27 = vpop.f32.mrf.mxu0  ;;  %v14950_v32 = vadd.f32 %v28422_v6, %v14873_v23  ;;  %v15838_v6 = vadd.f32 %v15837_v54, %v15755_v5  ;;  %v15106_v5 = vadd.f32 %v28453_v24, %v15028_v58 }
 0x4b1   : > { %23788 = vmatmul.mubr.f32.vlgmr.msra.gmra.mxu1 %v29450_v9  ;;  %23714 = vmatmul.mubr.f32.vlgmr.msra.gmra.mxu0 %v29450_v9  ;;  %v28527_v41 = vpop.f32.mrf.mxu1  ;;  %v15357_v9 = vadd.f32 %v28459_v17, %v28463_v12  ;;  %v15913_v17 = vadd.f32 %v15912_v47, %v15836_v56 }
 0x4b2   : > { %v16068_v49 = vpop.f32.mrf.mxu0  ;;  %v15026_v31 = vadd.f32 %v28418_v2, %v14950_v32  ;;  %v15915_v12 = vadd.f32 %v15914_v39, %v15838_v6  ;;  %v15180_v22 = vadd.f32 %v28451_v42, %v15106_v5 }
 0x4b3   : > { %v16319_v36 = vpop.f32.mrf.mxu1  ;;  %v15434_v7 = vadd.f32 %v28480_v11, %v15357_v9  ;;  %v15989_v47 = vadd.f32 %v28513_v13, %v15913_v17 }
 0x4b4   : > { %v16237_v60 = vpop.f32.mrf.mxu0  ;;  %v15104_v54 = vadd.f32 %v28444_v21, %v15026_v31  ;;  %v15991_v39 = vadd.f32 %v15990_v38, %v15915_v12 }
 0x4b5   : > { %v16321_v26 = vpop.f32.mrf.mxu1  ;;  %v16320_v40 = vadd.f32 %v16319_v36, %v16237_v60  ;;  %v15510_v11 = vadd.f32 %v28476_v14, %v15434_v7  ;;  %v16067_v21 = vadd.f32 %v28524_v27, %v15989_v47  ;;  %v15183_v27 = vadd.f32 %v15180_v22, %v28400_v50 }
 0x4b6   : > { %v16239_v51 = vpop.f32.mrf.mxu0  ;;  %v16069_v24 = vadd.f32 %v16068_v49, %v15991_v39 }
 0x4b7   : > { %v16472_v16 = vpop.f32.mrf.mxu1  ;;  %v16322_v8 = vadd.f32 %v16321_v26, %v16239_v51  ;;  %v15588_v26 = vadd.f32 %v28495_v10, %v15510_v11  ;;  %v15590_v51 = vadd.f32 %v28502_v62, %v15512_v3  ;;  %v16141_v49 = vadd.f32 %v28521_v1, %v16067_v21 }
 0x4b8   : > { %v16396_v30 = vpop.f32.mrf.mxu0 }
 0x4b9   : > { %v16474_v15 = vpop.f32.mrf.mxu1  ;;  %v16397_v35 = vadd.f32 %v16396_v30, %v16320_v40  ;;  %v15662_v7 = vadd.f32 %v28491_v52, %v15588_v26  ;;  %v15664_v10 = vadd.f32 %v28500_v4, %v15590_v51 }
 0x4ba   : > { %v16398_v45 = vpop.f32.mrf.mxu0 }
 0x4bb   : > { %v28529_v46 = vpop.f32.mrf.mxu1  ;;  %v16399_v2 = vadd.f32 %v16398_v45, %v16322_v8  ;;  %v16473_v14 = vadd.f32 %v16472_v16, %v16397_v35  ;;  %v15178_v45 = vadd.f32 %v28440_v61, %v15104_v54 }
 0x4bc   : > { %v16550_v25 = vpop.f32.mrf.mxu0 }
 0x4bd   : > { %v28531_v63 = vpop.f32.mrf.mxu1  ;;  %v16475_v32 = vadd.f32 %v16474_v15, %v16399_v2  ;;  %v16551_v62 = vadd.f32 %v16550_v25, %v16473_v14  ;;  %v15182_v42 = vadd.f32 %v15178_v45, %v28394_v55 }
 0x4be   : > { %v16552_v57 = vpop.f32.mrf.mxu0 }
 0x4bf   : > { %v16792_v59 = vpop.f32.mrf.mxu1  ;;  %v16553_v16 = vadd.f32 %v16552_v57, %v16475_v32  ;;  %v15666_v25 = vadd.f32 %v15662_v7, %v15182_v42  ;;  %v15667_v57 = vadd.f32 %v15664_v10, %v15183_v27 }
 0x4c0   : > { %v16710_v19 = vpop.f32.mrf.mxu0 }
 0x4c1   : > { %v16794_v33 = vpop.f32.mrf.mxu1  ;;  %v16793_v9 = vadd.f32 %v16792_v59, %v16710_v19  ;;  %v16143_v59 = vadd.f32 %v28527_v41, %v16069_v24  ;;  %v16145_v40 = vadd.f32 %v16141_v49, %v15666_v25 }
 0x4c2   : > { %v16712_v34 = vpop.f32.mrf.mxu0 }
 0x4c3   : > { %v28539_v48 = vpop.f32.mrf.mxu1  ;;  %v16795_v13 = vadd.f32 %v16794_v33, %v16712_v34  ;;  %v16625_v34 = vadd.f32 %v28529_v46, %v16551_v62  ;;  %v16146_v1 = vadd.f32 %v16143_v59, %v15667_v57 }
 0x4c4   : > { %29454 = vst [vmem:[#allocation88_spill] sm:$0xff] %v28539_v48  ;;  %v16869_v28 = vpop.f32.mrf.mxu0 }
 0x4c5   : > { %v28545_v20 = vpop.f32.mrf.mxu1  ;;  %v16870_v15 = vadd.f32 %v16869_v28, %v16793_v9  ;;  %v16627_v28 = vadd.f32 %v28531_v63, %v16553_v16  ;;  %v16629_v35 = vadd.f32 %v16625_v34, %v16145_v40 }
 0x4c6   : > { %29455 = vst [vmem:[#allocation150_spill] sm:$0xff] %v28545_v20  ;;  %v16871_v29 = vpop.f32.mrf.mxu0 }
 0x4c7   : > { %v28551_v23 = vpop.f32.mrf.mxu1  ;;  %v16872_v43 = vadd.f32 %v16871_v29, %v16795_v13  ;;  %v16630_v2 = vadd.f32 %v16627_v28, %v16146_v1  ;;  %v16633_v51 = vmul.f32 0.01, %v16629_v35  ;;  %vm16631_vm3 = vcmp.gt.f32.partialorder %v16629_v35, 0.0 }
 0x4c8   : > { %v28553_v18 = vpop.f32.mrf.mxu0 }
 0x4c9   : > { %v28555_v20 = vpop.f32.mrf.mxu1  ;;  %v16634_v14 = vmul.f32 0.01, %v16630_v2  ;;  %vm16632_vm4 = vcmp.gt.f32.partialorder %v16630_v2, 0.0 }
 0x4ca   : > { %v28557_v48 = vpop.f32.mrf.mxu0 }
 0x4cb   : > { %v17259_v44 = vpop.f32.mrf.mxu1  ;;  %v29456_v29 = vld [vmem:[#allocation88_spill] sm:$0xff] }
 0x4cc   : > { %v17177_v0 = vpop.f32.mrf.mxu0  ;;  %v16946_v58 = vadd.f32 %v29456_v29, %v16870_v15 }
 0x4cd   : > { %v17261_v36 = vpop.f32.mrf.mxu1  ;;  %v17260_v56 = vadd.f32 %v17259_v44, %v17177_v0  ;;  %v29457_v17 = vld [vmem:[#allocation150_spill] sm:$0xff] }
 0x4ce   : > { %v17179_v60 = vpop.f32.mrf.mxu0  ;;  %v16948_v55 = vadd.f32 %v29457_v17, %v16872_v43  ;;  %v17024_v0 = vadd.f32 %v28553_v18, %v16946_v58 }
 0x4cf   : > { %v17412_v53 = vpop.f32.mrf.mxu1  ;;  %v17262_v6 = vadd.f32 %v17261_v36, %v17179_v60 }
 0x4d0   : > { %v17336_v30 = vpop.f32.mrf.mxu0  ;;  %v17026_v46 = vadd.f32 %v28557_v48, %v16948_v55 }
 0x4d1   : > { %v17414_v38 = vpop.f32.mrf.mxu1  ;;  %v17337_v19 = vadd.f32 %v17336_v30, %v17260_v56  ;;  %v17098_v30 = vadd.f32 %v28551_v23, %v17024_v0 }
 0x4d2   : > { %v17338_v37 = vpop.f32.mrf.mxu0  ;;  %v17100_v18 = vadd.f32 %v28555_v20, %v17026_v46 }
 0x4d3   : > { %v17564_v61 = vpop.f32.mrf.mxu1  ;;  %v17339_v52 = vadd.f32 %v17338_v37, %v17262_v6  ;;  %v17413_v8 = vadd.f32 %v17412_v53, %v17337_v19  ;;  %v16636_v37 = vsel %vm16632_vm4, %v16630_v2, %v16634_v14 }
 0x4d4   : > { %v17490_v31 = vpop.f32.mrf.mxu0  ;;  %v17103_v62 = vadd.f32 %v17100_v18, %v16636_v37 }
 0x4d5   : > { %v17566_v33 = vpop.f32.mrf.mxu1  ;;  %v17415_v41 = vadd.f32 %v17414_v38, %v17339_v52  ;;  %v17491_v39 = vadd.f32 %v17490_v31, %v17413_v8  ;;  %v16635_v38 = vsel %vm16631_vm3, %v16629_v35, %v16633_v51 }
 0x4d6   : > { %v17492_v4 = vpop.f32.mrf.mxu0  ;;  %v17102_v10 = vadd.f32 %v17098_v30, %v16635_v38 }
 0x4d7   : > { %v17741_v12 = vpop.f32.mrf.mxu1  ;;  %v17493_v36 = vadd.f32 %v17492_v4, %v17415_v41  ;;  %v17565_v21 = vadd.f32 %v17564_v61, %v17491_v39 }
 0x4d8   : > { %v17659_v50 = vpop.f32.mrf.mxu0 }
 0x4d9   : > { %v17743_v11 = vpop.f32.mrf.mxu1  ;;  %v17742_v44 = vadd.f32 %v17741_v12, %v17659_v50  ;;  %v17567_v24 = vadd.f32 %v17566_v33, %v17493_v36  ;;  %v17569_v23 = vadd.f32 %v17565_v21, %v17102_v10 }
 0x4da   : > { %v17661_v3 = vpop.f32.mrf.mxu0 }
 0x4db   : > { %v17744_v5 = vadd.f32 %v17743_v11, %v17661_v3  ;;  %v17570_v6 = vadd.f32 %v17567_v24, %v17103_v62 }
 0x4dc   : > { %v17894_v63 = vpop.f32.mrf.mxu1  ;;  %v17818_v54 = vpop.f32.mrf.mxu0 }
 0x4dd   : > { %v17819_v47 = vadd.f32 %v17818_v54, %v17742_v44 }
 0x4de   : > { %v17896_v60 = vpop.f32.mrf.mxu1  ;;  %v17820_v26 = vpop.f32.mrf.mxu0 }
 0x4df   : > { %v17821_v32 = vadd.f32 %v17820_v26, %v17744_v5  ;;  %v17895_v53 = vadd.f32 %v17894_v63, %v17819_v47 }
 0x4e1   : > { %v18046_v45 = vpop.f32.mrf.mxu1  ;;  %v17972_v48 = vpop.f32.mrf.mxu0  ;;  %v17897_v22 = vadd.f32 %v17896_v60, %v17821_v32 }
 0x4e2   : > { %v17973_v9 = vadd.f32 %v17972_v48, %v17895_v53 }
 0x4e3   : > { %v18048_v13 = vpop.f32.mrf.mxu1  ;;  %v17974_v7 = vpop.f32.mrf.mxu0 }
 0x4e4   : > { %v18047_v16 = vadd.f32 %v18046_v45, %v17973_v9  ;;  %v17975_v15 = vadd.f32 %v17974_v7, %v17897_v22 }
 0x4e5   : > { %v18227_v43 = vpop.f32.mrf.mxu1  ;;  %v18145_v56 = vpop.f32.mrf.mxu0 }
 0x4e6   : > { %v18049_v20 = vadd.f32 %v18048_v13, %v17975_v15  ;;  %v18228_v31 = vadd.f32 %v18227_v43, %v18145_v56  ;;  %v18051_v61 = vadd.f32 %v18047_v16, %v17569_v23 }
 0x4e7   : > { %v18229_v42 = vpop.f32.mrf.mxu1  ;;  %v18147_v27 = vpop.f32.mrf.mxu0 }
 0x4e8   : > { %v18052_v49 = vadd.f32 %v18049_v20, %v17570_v6  ;;  %v18230_v59 = vadd.f32 %v18229_v42, %v18147_v27 }
 0x4e9   : > { %v18380_v19 = vpop.f32.mrf.mxu1  ;;  %v18304_v52 = vpop.f32.mrf.mxu0 }
 0x4ea   : > { %v18055_v33 = vcombine.low %v18051_v61, %v18052_v49  ;;  %v18305_v4 = vadd.f32 %v18304_v52, %v18228_v31 }
 0x4eb   : > { %v18382_v25 = vpop.f32.mrf.mxu1  ;;  %v18306_v57 = vpop.f32.mrf.mxu0 }
 0x4ec   : > { %24114 = vst [vmem:[%s27521_s15 + $0x10] sm:$0xff] %v18055_v33  ;;  %v18307_v34 = vadd.f32 %v18306_v57, %v18230_v59  ;;  %v18381_v29 = vadd.f32 %v18380_v19, %v18305_v4 }
 0x4ed   : > { %v18532_v28 = vpop.f32.mrf.mxu1  ;;  %v18458_v58 = vpop.f32.mrf.mxu0 }
 0x4ee   : > { %v18459_v17 = vadd.f32 %v18458_v58, %v18381_v29  ;;  %v18383_v12 = vadd.f32 %v18382_v25, %v18307_v34 }
 0x4ef   : > { %v18534_v55 = vpop.f32.mrf.mxu1  ;;  %v18460_v50 = vpop.f32.mrf.mxu0 }
 0x4f0   : > { %v18461_v40 = vadd.f32 %v18460_v50, %v18383_v12  ;;  %v18533_v8 = vadd.f32 %v18532_v28, %v18459_v17 }
 0x4f1   : > { %v18698_v1 = vpop.f32.mrf.mxu1  ;;  %v18616_v41 = vpop.f32.mrf.mxu0 }
 0x4f2   : > { %v18617_v11 = vadd.f32 %v18616_v41, %v18533_v8  ;;  %v18535_v35 = vadd.f32 %v18534_v55, %v18461_v40 }
 0x4f3   : > { %v18700_v3 = vpop.f32.mrf.mxu1  ;;  %v18618_v2 = vpop.f32.mrf.mxu0 }
 0x4f4   : > { %v18619_v44 = vadd.f32 %v18618_v2, %v18535_v35  ;;  %v18699_v46 = vadd.f32 %v18698_v1, %v18617_v11 }
 0x4f5   : > { %v18851_v0 = vpop.f32.mrf.mxu1  ;;  %v18775_v63 = vpop.f32.mrf.mxu0 }
 0x4f6   : > { %v18776_v54 = vadd.f32 %v18775_v63, %v18699_v46  ;;  %v18701_v47 = vadd.f32 %v18700_v3, %v18619_v44 }
 0x4f7   : > { %v18853_v5 = vpop.f32.mrf.mxu1  ;;  %v18777_v39 = vpop.f32.mrf.mxu0 }
 0x4f8   : > { %v18778_v36 = vadd.f32 %v18777_v39, %v18701_v47  ;;  %v18852_v26 = vadd.f32 %v18851_v0, %v18776_v54 }
 0x4f9   : > { %v19003_v60 = vpop.f32.mrf.mxu1  ;;  %v18929_v51 = vpop.f32.mrf.mxu0 }
 0x4fa   : > { %v18930_v14 = vadd.f32 %v18929_v51, %v18852_v26  ;;  %v18854_v53 = vadd.f32 %v18853_v5, %v18778_v36 }
 0x4fb   : > { %v19005_v32 = vpop.f32.mrf.mxu1  ;;  %v18931_v30 = vpop.f32.mrf.mxu0 }
 0x4fc   : > { %v19004_v18 = vadd.f32 %v19003_v60, %v18930_v14  ;;  %v18932_v45 = vadd.f32 %v18931_v30, %v18854_v53 }
 0x4fd   : > { %v19180_v48 = vpop.f32.mrf.mxu1  ;;  %v19098_v22 = vpop.f32.mrf.mxu0 }
 0x4fe   : > { %v19006_v21 = vadd.f32 %v19005_v32, %v18932_v45  ;;  %v19181_v24 = vadd.f32 %v19180_v48, %v19098_v22 }
 0x4ff   : > { %v19182_v9 = vpop.f32.mrf.mxu1  ;;  %v19100_v13 = vpop.f32.mrf.mxu0 }
 0x500   : > { %v19183_v38 = vadd.f32 %v19182_v9, %v19100_v13 }
 0x501   : > { %v19333_v37 = vpop.f32.mrf.mxu1  ;;  %v19257_v7 = vpop.f32.mrf.mxu0 }
 0x502   : > { %v19258_v10 = vadd.f32 %v19257_v7, %v19181_v24 }
 0x503   : > { %v19335_v62 = vpop.f32.mrf.mxu1  ;;  %v19259_v16 = vpop.f32.mrf.mxu0 }
 0x504   : > { %v19260_v15 = vadd.f32 %v19259_v16, %v19183_v38  ;;  %v19334_v56 = vadd.f32 %v19333_v37, %v19258_v10 }
 0x505   : > { %v19485_v43 = vpop.f32.mrf.mxu1  ;;  %v19411_v23 = vpop.f32.mrf.mxu0 }
 0x506   : > { %v19412_v6 = vadd.f32 %v19411_v23, %v19334_v56  ;;  %v19336_v31 = vadd.f32 %v19335_v62, %v19260_v15 }
 0x507   : > { %v19487_v20 = vpop.f32.mrf.mxu1  ;;  %v19413_v42 = vpop.f32.mrf.mxu0 }
 0x508   : > { %v19486_v27 = vadd.f32 %v19485_v43, %v19412_v6  ;;  %v19414_v61 = vadd.f32 %v19413_v42, %v19336_v31 }
 0x509   : > { %v19664_v49 = vpop.f32.mrf.mxu1  ;;  %v19582_v59 = vpop.f32.mrf.mxu0 }
 0x50a   : > { %v19490_v19 = vadd.f32 %v19486_v27, %v19004_v18  ;;  %v19488_v52 = vadd.f32 %v19487_v20, %v19414_v61  ;;  %v19665_v33 = vadd.f32 %v19664_v49, %v19582_v59 }
 0x50b   : > { %v19666_v4 = vpop.f32.mrf.mxu1  ;;  %v19584_v25 = vpop.f32.mrf.mxu0 }
 0x50c   : > { %v19491_v57 = vadd.f32 %v19488_v52, %v19006_v21  ;;  %v19667_v34 = vadd.f32 %v19666_v4, %v19584_v25 }
 0x50d   : > { %v19817_v28 = vpop.f32.mrf.mxu1  ;;  %v19741_v29 = vpop.f32.mrf.mxu0 }
 0x50e   : > { %v19742_v58 = vadd.f32 %v19741_v29, %v19665_v33 }
 0x50f   : > { %v19819_v17 = vpop.f32.mrf.mxu1  ;;  %v19743_v55 = vpop.f32.mrf.mxu0 }
 0x510   : > { %v19744_v12 = vadd.f32 %v19743_v55, %v19667_v34  ;;  %v19818_v40 = vadd.f32 %v19817_v28, %v19742_v58 }
 0x511   : > { %v19969_v50 = vpop.f32.mrf.mxu1  ;;  %v19895_v1 = vpop.f32.mrf.mxu0 }
 0x512   : > { %v19896_v8 = vadd.f32 %v19895_v1, %v19818_v40  ;;  %v19820_v11 = vadd.f32 %v19819_v17, %v19744_v12 }
 0x513   : > { %v19971_v41 = vpop.f32.mrf.mxu1  ;;  %v19897_v3 = vpop.f32.mrf.mxu0 }
 0x514   : > { %v19970_v35 = vadd.f32 %v19969_v50, %v19896_v8  ;;  %v19898_v2 = vadd.f32 %v19897_v3, %v19820_v11 }
 0x515   : > { %v20131_v44 = vpop.f32.mrf.mxu1  ;;  %v20049_v0 = vpop.f32.mrf.mxu0 }
 0x516   : > { %v19974_v46 = vadd.f32 %v19970_v35, %v19490_v19  ;;  %v19972_v63 = vadd.f32 %v19971_v41, %v19898_v2  ;;  %v20132_v54 = vadd.f32 %v20131_v44, %v20049_v0 }
 0x517   : > { %v20133_v5 = vpop.f32.mrf.mxu1  ;;  %v20051_v47 = vpop.f32.mrf.mxu0 }
 0x518   : > { %v19975_v39 = vadd.f32 %v19972_v63, %v19491_v57  ;;  %v20134_v36 = vadd.f32 %v20133_v5, %v20051_v47 }
 0x519   : > { %v20284_v60 = vpop.f32.mrf.mxu1  ;;  %v20208_v26 = vpop.f32.mrf.mxu0 }
 0x51a   : > { %v20209_v51 = vadd.f32 %v20208_v26, %v20132_v54 }
 0x51b   : > { %v20286_v14 = vpop.f32.mrf.mxu1  ;;  %v20210_v32 = vpop.f32.mrf.mxu0 }
 0x51c   : > { %v20211_v53 = vadd.f32 %v20210_v32, %v20134_v36  ;;  %v20285_v18 = vadd.f32 %v20284_v60, %v20209_v51 }
 0x51d   : > { %v20436_v30 = vpop.f32.mrf.mxu1  ;;  %v20362_v45 = vpop.f32.mrf.mxu0 }
 0x51e   : > { %v20363_v48 = vadd.f32 %v20362_v45, %v20285_v18  ;;  %v20287_v21 = vadd.f32 %v20286_v14, %v20211_v53 }
 0x51f   : > { %v20438_v22 = vpop.f32.mrf.mxu1  ;;  %v20364_v24 = vpop.f32.mrf.mxu0 }
 0x520   : > { %v20437_v9 = vadd.f32 %v20436_v30, %v20363_v48  ;;  %v20365_v13 = vadd.f32 %v20364_v24, %v20287_v21 }
 0x521   : > { %v20615_v38 = vpop.f32.mrf.mxu1  ;;  %v20533_v37 = vpop.f32.mrf.mxu0 }
 0x522   : > { %v28584_v7 = vadd.f32 %v20437_v9, %v19974_v46  ;;  %v20439_v10 = vadd.f32 %v20438_v22, %v20365_v13  ;;  %v20616_v32 = vadd.f32 %v20615_v38, %v20533_v37 }
 0x523   : > { %v20617_v62 = vpop.f32.mrf.mxu1  ;;  %v20535_v16 = vpop.f32.mrf.mxu0 }
 0x524   : > { %29458 = vst [vmem:[#allocation135_spill] sm:$0xff] %v28584_v7  ;;  %v28586_v15 = vadd.f32 %v20439_v10, %v19975_v39  ;;  %v20618_v53 = vadd.f32 %v20617_v62, %v20535_v16 }
 0x525   : > { %v20768_v43 = vpop.f32.mrf.mxu1  ;;  %v20692_v56 = vpop.f32.mrf.mxu0 }
 0x526   : > { %29459 = vst [vmem:[#allocation136_spill] sm:$0xff] %v28586_v15  ;;  %v20693_v45 = vadd.f32 %v20692_v56, %v20616_v32 }
 0x527   : > { %v20770_v23 = vpop.f32.mrf.mxu1  ;;  %v20694_v6 = vpop.f32.mrf.mxu0 }
 0x528   : > { %v20695_v48 = vadd.f32 %v20694_v6, %v20618_v53  ;;  %v20769_v15 = vadd.f32 %v20768_v43, %v20693_v45 }
 0x529   : > { %v28588_v20 = vpop.f32.mrf.mxu1  ;;  %v28590_v31 = vpop.f32.mrf.mxu0 }
 0x52a   : > { %v20771_v7 = vadd.f32 %v20770_v23, %v20695_v48 }
 0x52b   : > { %v28592_v42 = vpop.f32.mrf.mxu1  ;;  %v28594_v27 = vpop.f32.mrf.mxu0  ;;  %v29464_v53 = vld [vmem:[#allocation135_spill] sm:$0xff] }
 0x52c   : > { %v20849_v43 = vadd.f32 %v28594_v27, %v20771_v7 }
 0x52d   : > { %v21099_v61 = vpop.f32.mrf.mxu1  ;;  %v21017_v49 = vpop.f32.mrf.mxu0 }
 0x52e   : > { %v21100_v21 = vadd.f32 %v21099_v61, %v21017_v49 }
 0x52f   : > { %v21101_v59 = vpop.f32.mrf.mxu1  ;;  %v21019_v19 = vpop.f32.mrf.mxu0 }
 0x530   : > { %v21102_v24 = vadd.f32 %v21101_v59, %v21019_v19 }
 0x531   : > { %v21252_v52 = vpop.f32.mrf.mxu1  ;;  %v21176_v33 = vpop.f32.mrf.mxu0 }
 0x532   : > { %v21177_v10 = vadd.f32 %v21176_v33, %v21100_v21 }
 0x533   : > { %v21254_v4 = vpop.f32.mrf.mxu1  ;;  %v21178_v25 = vpop.f32.mrf.mxu0 }
 0x534   : > { %v21253_v49 = vadd.f32 %v21252_v52, %v21177_v10 }
 0x535   : > { %v28596_v57 = vpop.f32.mrf.mxu1  ;;  %v28598_v34 = vpop.f32.mrf.mxu0 }
 0x537   : > { %v28600_v28 = vpop.f32.mrf.mxu1  ;;  %v28602_v29 = vpop.f32.mrf.mxu0 }
 0x539   : > { %v21578_v58 = vpop.f32.mrf.mxu1  ;;  %v21496_v17 = vpop.f32.mrf.mxu0 }
 0x53b   : > { %v21580_v55 = vpop.f32.mrf.mxu1  ;;  %v21498_v12 = vpop.f32.mrf.mxu0 }
 0x53d   : > { %v21731_v50 = vpop.f32.mrf.mxu1  ;;  %v21655_v40 = vpop.f32.mrf.mxu0 }
 0x53f   : > { %v21733_v1 = vpop.f32.mrf.mxu1  ;;  %v21657_v8 = vpop.f32.mrf.mxu0 }
 0x541   : > { %v28604_v41 = vpop.f32.mrf.mxu1  ;;  %v21809_v11 = vpop.f32.mrf.mxu0 }
 0x542   : > { %29460 = vst [vmem:[#allocation138_spill] sm:$0xff] %v28604_v41 }
 0x543   : > { %v28606_v3 = vpop.f32.mrf.mxu1  ;;  %v21811_v35 = vpop.f32.mrf.mxu0 }
 0x544   : > { %29461 = vst [vmem:[#allocation89_spill] sm:$0xff] %v28606_v3  ;;  %v21579_v3 = vadd.f32 %v21578_v58, %v21496_v17  ;;  %v20847_v17 = vadd.f32 %v28590_v31, %v20769_v15 }
 0x545   : > { %v22062_v2 = vpop.f32.mrf.mxu1  ;;  %v21980_v44 = vpop.f32.mrf.mxu0 }
 0x546   : > { %v21656_v37 = vadd.f32 %v21655_v40, %v21579_v3  ;;  %v22063_v16 = vadd.f32 %v22062_v2, %v21980_v44 }
 0x547   : > { %v22064_v0 = vpop.f32.mrf.mxu1  ;;  %v21982_v46 = vpop.f32.mrf.mxu0 }
 0x548   : > { %v22065_v56 = vadd.f32 %v22064_v0, %v21982_v46  ;;  %v21732_v23 = vadd.f32 %v21731_v50, %v21656_v37  ;;  %v20921_v0 = vadd.f32 %v28588_v20, %v20847_v17  ;;  %v20923_v46 = vadd.f32 %v28592_v42, %v20849_v43 }
 0x549   : > { %v22215_v63 = vpop.f32.mrf.mxu1  ;;  %v22139_v54 = vpop.f32.mrf.mxu0  ;;  %v29466_v45 = vld [vmem:[#allocation138_spill] sm:$0xff] }
 0x54a   : > { %v22140_v19 = vadd.f32 %v22139_v54, %v22063_v16  ;;  %v21810_v54 = vadd.f32 %v21809_v11, %v21732_v23  ;;  %v20925_v42 = vadd.f32 %v20921_v0, %v29464_v53  ;;  %v29465_v11 = vld [vmem:[#allocation136_spill] sm:$0xff] }
 0x54b   : > { %v22217_v5 = vpop.f32.mrf.mxu1  ;;  %v22141_v47 = vpop.f32.mrf.mxu0 }
 0x54c   : > { %v22142_v33 = vadd.f32 %v22141_v47, %v22065_v56  ;;  %v22216_v2 = vadd.f32 %v22215_v63, %v22140_v19 }
 0x54d   : > { %v28608_v39 = vpop.f32.mrf.mxu1  ;;  %v22293_v36 = vpop.f32.mrf.mxu0 }
 0x54e   : > { %29462 = vst [vmem:[#allocation93_spill] sm:$0xff] %v28608_v39  ;;  %v21179_v39 = vadd.f32 %v21178_v25, %v21102_v24  ;;  %v22218_v44 = vadd.f32 %v22217_v5, %v22142_v33  ;;  %v22294_v47 = vadd.f32 %v22293_v36, %v22216_v2 }
 0x54f   : > { %v28610_v60 = vpop.f32.mrf.mxu1  ;;  %v22295_v26 = vpop.f32.mrf.mxu0 }
 0x550   : > { %29463 = vst [vmem:[#allocation141_spill] sm:$0xff] %v28610_v60  ;;  %v21581_v60 = vadd.f32 %v21580_v55, %v21498_v12  ;;  %v21255_v59 = vadd.f32 %v21254_v4, %v21179_v39 }
 0x551   : > { %v22535_v51 = vpop.f32.mrf.mxu1  ;;  %v22453_v14 = vpop.f32.mrf.mxu0 }
 0x552   : > { %v21658_v62 = vadd.f32 %v21657_v8, %v21581_v60  ;;  %v21331_v8 = vadd.f32 %v28598_v34, %v21253_v49  ;;  %v21333_v3 = vadd.f32 %v28602_v29, %v21255_v59  ;;  %v22536_v7 = vadd.f32 %v22535_v51, %v22453_v14  ;;  %v29467_v14 = vld [vmem:[#allocation89_spill] sm:$0xff] }
 0x553   : > { %v22537_v30 = vpop.f32.mrf.mxu1  ;;  %v22455_v18 = vpop.f32.mrf.mxu0  ;;  %v22296_v29 = vadd.f32 %v22295_v26, %v22218_v44  ;;  %v21884_v51 = vadd.f32 %v29466_v45, %v21810_v54 }
 0x554   : > { %v21734_v55 = vadd.f32 %v21733_v1, %v21658_v62  ;;  %v22538_v27 = vadd.f32 %v22537_v30, %v22455_v18  ;;  %v21405_v1 = vadd.f32 %v28596_v57, %v21331_v8  ;;  %v21407_v34 = vadd.f32 %v28600_v28, %v21333_v3 }
 0x555   : > { %v28612_v22 = vpop.f32.mrf.mxu1  ;;  %v22612_v9 = vpop.f32.mrf.mxu0  ;;  %v29468_v21 = vld [vmem:[#allocation93_spill] sm:$0xff] }
 0x556   : > { %v21812_v15 = vadd.f32 %v21811_v35, %v21734_v55  ;;  %v22613_v5 = vadd.f32 %v22612_v9, %v22536_v7  ;;  %v20926_v35 = vadd.f32 %v20923_v46, %v29465_v11  ;;  %v21409_v36 = vadd.f32 %v21405_v1, %v20925_v42 }
 0x557   : > { %v28614_v13 = vpop.f32.mrf.mxu1  ;;  %v22614_v41 = vpop.f32.mrf.mxu0  ;;  %v22368_v24 = vadd.f32 %v29468_v21, %v22294_v47 }
 0x558   : > { %v22615_v39 = vadd.f32 %v22614_v41, %v22538_v27  ;;  %v21886_v30 = vadd.f32 %v29467_v14, %v21812_v15  ;;  %v21410_v26 = vadd.f32 %v21407_v34, %v20926_v35  ;;  %v29469_v41 = vld [vmem:[#allocation141_spill] sm:$0xff]  ;;  %v22689_v37 = vadd.f32 %v28612_v22, %v22613_v5 }
 0x559   : > { %v28616_v38 = vpop.f32.mrf.mxu1  ;;  %v28618_v6 = vpop.f32.mrf.mxu0  ;;  %v22370_v9 = vadd.f32 %v29469_v41, %v22296_v29  ;;  %v21888_v56 = vadd.f32 %v21884_v51, %v21409_v36 }
 0x55a   : > { %v22691_v62 = vadd.f32 %v28614_v13, %v22615_v39  ;;  %v21889_v49 = vadd.f32 %v21886_v30, %v21410_v26  ;;  %v22767_v55 = vadd.f32 %v28618_v6, %v22689_v37 }
 0x55b   : > { %v28620_v61 = vpop.f32.mrf.mxu1  ;;  %v22768_v25 = vpop.f32.mrf.mxu0  ;;  %v22372_v17 = vadd.f32 %v22368_v24, %v21888_v56 }
 0x55c   : > { %v22373_v43 = vadd.f32 %v22370_v9, %v21889_v49  ;;  %v22841_v54 = vadd.f32 %v28616_v38, %v22767_v55 }
 0x55d   : > { %v23002_v58 = vpop.f32.mrf.mxu1  ;;  %v22920_v12 = vpop.f32.mrf.mxu0  ;;  %v22376_v0 = vmul.f32 0.01, %v22372_v17  ;;  %vm22374_vm5 = vcmp.gt.f32.partialorder %v22372_v17, 0.0 }
 0x55e   : > { %v23003_v60 = vadd.f32 %v23002_v58, %v22920_v12  ;;  %v22769_v12 = vadd.f32 %v22768_v25, %v22691_v62  ;;  %vm22375_vm6 = vcmp.gt.f32.partialorder %v22373_v43, 0.0 }
 0x55f   : > { %v23004_v40 = vpop.f32.mrf.mxu1  ;;  %v22922_v52 = vpop.f32.mrf.mxu0  ;;  %v22378_v47 = vsel %vm22374_vm5, %v22372_v17, %v22376_v0 }
 0x560   : > { %v23005_v32 = vadd.f32 %v23004_v40, %v22922_v52  ;;  %v22843_v6 = vadd.f32 %v28620_v61, %v22769_v12  ;;  %v22845_v5 = vadd.f32 %v22841_v54, %v22378_v47 }
 0x561   : > { %v23155_v4 = vpop.f32.mrf.mxu1  ;;  %v23079_v31 = vpop.f32.mrf.mxu0 }
 0x562   : > { %v23080_v57 = vadd.f32 %v23079_v31, %v23003_v60 }
 0x563   : > { %v23157_v50 = vpop.f32.mrf.mxu1  ;;  %v23081_v63 = vpop.f32.mrf.mxu0 }
 0x564   : > { %v23082_v48 = vadd.f32 %v23081_v63, %v23005_v32  ;;  %v23156_v19 = vadd.f32 %v23155_v4, %v23080_v57  ;;  %v22377_v4 = vmul.f32 0.01, %v22373_v43 }
 0x565   : > { %v23307_v20 = vpop.f32.mrf.mxu1  ;;  %v23233_v18 = vpop.f32.mrf.mxu0 }
 0x566   : > { %v23158_v33 = vadd.f32 %v23157_v50, %v23082_v48  ;;  %v23234_v22 = vadd.f32 %v23233_v18, %v23156_v19  ;;  %v22379_v29 = vsel %vm22375_vm6, %v22373_v43, %v22377_v4 }
 0x567   : > { %v23309_v28 = vpop.f32.mrf.mxu1  ;;  %v23235_v10 = vpop.f32.mrf.mxu0  ;;  %v22846_v38 = vadd.f32 %v22843_v6, %v22379_v29 }
 0x568   : > { %v23236_v13 = vadd.f32 %v23235_v10, %v23158_v33  ;;  %v23308_v27 = vadd.f32 %v23307_v20, %v23234_v22 }
 0x569   : > { %v23484_v16 = vpop.f32.mrf.mxu1  ;;  %v23402_v59 = vpop.f32.mrf.mxu0 }
 0x56a   : > { %v23485_v40 = vadd.f32 %v23484_v16, %v23402_v59  ;;  %v23310_v50 = vadd.f32 %v23309_v28, %v23236_v13  ;;  %v23312_v32 = vadd.f32 %v23308_v27, %v22845_v5 }
 0x56b   : > { %v23486_v58 = vpop.f32.mrf.mxu1  ;;  %v23404_v23 = vpop.f32.mrf.mxu0 }
 0x56c   : > { %v23487_v2 = vadd.f32 %v23486_v58, %v23404_v23  ;;  %v23313_v53 = vadd.f32 %v23310_v50, %v22846_v38 }
 0x56d   : > { %v23637_v8 = vpop.f32.mrf.mxu1  ;;  %v23561_v3 = vpop.f32.mrf.mxu0 }
 0x56e   : > { %v23562_v44 = vadd.f32 %v23561_v3, %v23485_v40 }
 0x56f   : > { %v23639_v52 = vpop.f32.mrf.mxu1  ;;  %v23563_v46 = vpop.f32.mrf.mxu0 }
 0x570   : > { %v23564_v25 = vadd.f32 %v23563_v46, %v23487_v2  ;;  %v23638_v15 = vadd.f32 %v23637_v8, %v23562_v44 }
 0x571   : > { %v23789_v31 = vpop.f32.mrf.mxu1  ;;  %v23715_v7 = vpop.f32.mrf.mxu0 }
 0x572   : > { %v23716_v1 = vadd.f32 %v23715_v7, %v23638_v15  ;;  %v23640_v34 = vadd.f32 %v23639_v52, %v23564_v25 }
 0x573   : > { %v23717_v63 = vpop.f32.mrf.mxu0  ;;  %v23791_v60 = vpop.f32.mrf.mxu1 }
 0x574   : > { %v23790_v61 = vadd.f32 %v23789_v31, %v23716_v1  ;;  %v23718_v39 = vadd.f32 %v23717_v63, %v23640_v34 }
 0x576   : > { %v23792_v42 = vadd.f32 %v23791_v60, %v23718_v39  ;;  %v23794_v20 = vadd.f32 %v23790_v61, %v23312_v32 }
 0x578   : > { %v23795_v11 = vadd.f32 %v23792_v42, %v23313_v53 }
 0x57a   : > { %v23798_v35 = vcombine.low %v23794_v20, %v23795_v11 }
 0x57c   : > { %24115 = vst [vmem:[%s27521_s15 + $0x18] sm:$0xff] %v23798_v35 }
 0x57d   : > { %24710 = shalt.err (!%p24707_p12)
}
 0x57e   : > { %s24711_s29 = scalar_lea.hbm %s28647_s26, 512  ;;  %s24715_s4 = scalar_lea.hbm %s29473_s0, 2048 }
 0x57f   : > { %p24712_p1 = scmp.ne.s32.totalorder %s28647_s26, %s24711_s29  ;;  %p24716_p4 = scmp.lt.s32.totalorder %s28647_s26, %s29473_s0 }
 0x580   : > { %p24717_p6 = scmp.lt.s32.totalorder %s24715_s4, %s24711_s29 }
 0x581   : > { %p24713_p7 = pnand %p24712_p1, %p29474_p11 }
 0x582   : > { %p24718_p13 = por %p24717_p6, %p24716_p4 }
 0x583   : > { %p24714_p9 = pneg %p24713_p7 }
 0x585   : > { %p24719_p3 = pnand %p24718_p13, %p24714_p9 }
 0x587   : > { %24722 = shalt.err (!%p24719_p3)
}
 0x588   : > { %s24997_s24 = smov 128   ;;  %s24998_s15 = smov 8  }
 0x589   : > { %24162 = dma.vmem_to_hbm [thread:$0]  (%p29474_p11), %s28649_s14, 512, %s28647_s26, %s28654_s28, %s24997_s24, %s24997_s24, %s24998_s15  }
 0x58a PF: > { %s29475_s6 = sld [smem:[#allocation27_spill]]  ;;  %p24204_p10 = scmp.ge.s32.totalorder %s24965_s2, 2 }
 0x58b   : > { %s29476_s30 = sld [smem:[#allocation52_spill]] }
 0x590   : > { %s23834_s7 = sand.u32 1, %s29475_s6  }
 0x591   : > { %p29477_p8 = scmp.ne.s32.totalorder %s29476_s30, 0  ;;  %s23835_s3 = scalar_lea.sflag [#allocation4], %s23834_s7 }
 0x593   : > { %p24194_p0 = pnand %p24204_p10, %p29477_p8 }
 0x595   : > { %p24195_p2 = pneg %p24194_p0 }
 0x597   : > { %24860 = dma.done.wait (%p24195_p2), %s23835_s3, 512  }
 0x598   : > { %24862 = vsyncadd (%p24195_p2), %s23835_s3, 4294966784  ;;  %s33_s2 = sadd.s32 1, %s24965_s2   ;;  %s29479_s8 = sld [smem:[#allocation28_spill]] }
 0x599   : > { %p28682_p5 = scmp.ge.s32.totalorder %s33_s2, 6   ;;  %s29480_s11 = sld [smem:[#allocation51_spill]] }
 0x59a   : > { %s29481_s12 = sld [smem:[#allocation30_spill]]  ;;  %s29490_s30 = smov %s24869_s10 }
 0x59b   : > { %s29482_s13 = sld [smem:[#allocation31_spill]]  ;;  %s29497_s14 = smov %s29528_s20 }
 0x59c   : > { %s29483_s1 = sld [smem:[#allocation54_spill]]  ;;  %s29499_s15 = smov %s24893_s16 }
 0x59d   : > { %s29484_s18 = sld [smem:[#allocation34_spill]]  ;;  %s29501_s16 = smov %s24897_s17 }
 0x59e   : > { %s29485_s19 = sld [smem:[#allocation35_spill]]  ;;  %s29492_s10 = smov %s29479_s8 }
 0x59f   : > { %s29486_s9 = sld [smem:[#allocation56_spill]]  ;;  %s29507_s21 = smov %s24917_s22 }
 0x5a0   : > { %s29487_s23 = sld [smem:[#allocation36_spill]] }
 0x5a1   : > { %s29488_s26 = sld [smem:[#allocation53_spill]] }
 0x5a2   : > { %s29489_s24 = sld [smem:[#allocation38_spill]]  ;;  %s29503_s17 = smov %s29483_s1 }
 0x5a3   : > { %s29491_s28 = sld [smem:[#allocation39_spill]] }
 0x5a4   : > { %s29493_s29 = sld [smem:[#allocation55_spill]] }
 0x5a5   : > { %s29494_s27 = sld [smem:[#allocation40_spill]]  ;;  %s29506_s20 = smov %s29486_s9 }
 0x5a6   : > { %s29495_s4 = sld [smem:[#allocation41_spill]]  ;;  %s29508_s22 = smov %s29487_s23 }
 0x5a7   : > { %s29496_s5 = sld [smem:[#allocation50_spill]]  ;;  %s29509_s23 = smov %s29488_s26 }
 0x5a8   : > { %s29498_s6 = sld [smem:[#allocation44_spill]] }
 0x5a9   : > { %s29500_s8 = sld [smem:[#allocation45_spill]]  ;;  %s29510_s25 = smov %s29491_s28 }
 0x5aa   : > { %s29502_s7 = sld [smem:[#allocation48_spill]]  ;;  %s29511_s26 = smov %s29493_s29 }
 0x5ab   : > { %s29504_s3 = sld [smem:[#allocation49_spill]] }
 0x5ac   : > { %s29512_s28 = smov %s29495_s4 }
 0x5ad   : > { %s29513_s29 = smov %s29496_s5  ;;  %32 = sbr.rel (!%p28682_p5) target bundleno = 33 (0x21), region = 176 }
 0x5ae   : > { %s29514_s9 = smov %s29498_s6 }
 0x5b0   : > { %s29515_s6 = smov %s29502_s7 }
 0x5b1   : > { %s29516_s4 = smov %s29504_s3 }
 0x5b2   :  { %23840 = vsyncpa [#allocation3], 1 }
 0x5b3   :  { %23842 = vsyncpa [#allocation3 + $0x1], 1 }
 0x5b4   :  { %23843 = vsyncpa [#allocation6], 1 }
 0x5b5   :  { %23844 = vsyncpa [#allocation9], 1 }
 0x5b6   :  { %23846 = vsyncpa [#allocation9 + $0x1], 1 }
 0x5b7   :  { %23847 = vsyncpa [#allocation12], 1 }
 0x5b8   :  { %23849 = vsyncpa [#allocation12 + $0x1], 1 }
 0x5b9   :  { %23850 = vsyncpa [#allocation15], 1 }
 0x5ba   :  { %23852 = vsyncpa [#allocation15 + $0x1], 1 }
 0x5bb   :  { %23853 = vsyncpa [#allocation4], 1 }
 0x5bc   :  { %23855 = vsyncpa [#allocation4 + $0x1], 1 }

</bundles_post_ra>
